<compile_context>
chip_gen: v5e
topology: v5e:2x2
jax: 0.10.0
libtpu: 0.0.40
codegen_flags: <defaults>
</compile_context>

<pallas_src>
import jax
import jax.numpy as jnp
from jax.experimental import pallas as pl
from jax.experimental.pallas import tpu as pltpu

# Logical dims
D_IN, H1, H2, H3, H4, D_FEAT = 2559, 1750, 1000, 100, 20, 21
# Padded (lane/sublane friendly) dims
D_IN_P, H1_P, H2_P, H3_P, H4_P = 2560, 1792, 1024, 128, 128


def _round_up(v, m):
    return (v + m - 1) // m * m


def _pad2(a, rows, cols):
    return jnp.pad(a, ((0, rows - a.shape[0]), (0, cols - a.shape[1])))


def prepare_params(params):
    """Zero-pad weights/biases to TPU-friendly shapes; cast matmul weights to bf16.
    Call once (outside the per-step forward) so the cast/pad is not paid per call."""
    (w1, b1, w2, b2, w3, b3, w4, b4, wc, bc) = params
    w1p = _pad2(w1, D_IN_P, H1_P).astype(jnp.bfloat16)
    w2p = _pad2(w2, H1_P, H2_P).astype(jnp.bfloat16)
    w3p = _pad2(w3, H2_P, H3_P).astype(jnp.bfloat16)
    w4p = _pad2(w4, H3_P, H4_P).astype(jnp.bfloat16)
    b1p = _pad2(b1.reshape(1, -1), 1, H1_P).astype(jnp.float32)
    b2p = _pad2(b2.reshape(1, -1), 1, H2_P).astype(jnp.float32)
    b3p = _pad2(b3.reshape(1, -1), 1, H3_P).astype(jnp.float32)
    b4p = _pad2(b4.reshape(1, -1), 1, H4_P).astype(jnp.float32)
    # common layer (21 -> 1), kept f32, laid out as one 128-lane row:
    # lanes 0..19 multiply h, lane 20 multiplies x_gboost, lanes 21..127 are zero.
    wc_row = _pad2(wc.reshape(-1, 1).T, 1, H4_P).astype(jnp.float32)   # (1, 128)
    bcp = bc.reshape(1, 1).astype(jnp.float32)
    return (w1p, b1p, w2p, b2p, w3p, b3p, w4p, b4p, wc_row, bcp)


def _net_kernel(x_ref, xg_ref,
                w1_ref, b1_ref, w2_ref, b2_ref, w3_ref, b3_ref,
                w4_ref, b4_ref, wc_row_ref, bc_ref,
                out2_ref, feat_ref, acc1_ref):
    k = pl.program_id(1)

    @pl.when(k == 0)
    def _init():
        acc1_ref[...] = jnp.zeros_like(acc1_ref)

    # Layer 1 (K-tiled): stream a (tk, 1792) slice of W1, accumulate in f32.
    acc1_ref[...] += jnp.dot(x_ref[...].astype(jnp.bfloat16), w1_ref[...],
                             preferred_element_type=jnp.float32)

    @pl.when(k == pl.num_programs(1) - 1)
    def _finalize():
        # bias + ReLU in f32; cast to bf16 only right before each MXU matmul.
        h = jnp.maximum(acc1_ref[...] + b1_ref[...], 0.0)
        h = jnp.maximum(
            jnp.dot(h.astype(jnp.bfloat16), w2_ref[...],
                    preferred_element_type=jnp.float32) + b2_ref[...], 0.0)
        h = jnp.maximum(
            jnp.dot(h.astype(jnp.bfloat16), w3_ref[...],
                    preferred_element_type=jnp.float32) + b3_ref[...], 0.0)
        h = jnp.maximum(
            jnp.dot(h.astype(jnp.bfloat16), w4_ref[...],
                    preferred_element_type=jnp.float32) + b4_ref[...], 0.0)
        # h: (tm, 128); lanes 20..127 are exactly zero (zero-padded weights/biases).
        xg = xg_ref[...]                                              # (tm, 1)
        lane = jax.lax.broadcasted_iota(jnp.int32, h.shape, dimension=1)
        feat = jnp.where(lane == H4, xg, h)        # place x_gboost at lane 20
        feat_ref[...] = feat                                          # lane-dense store
        # common layer 21 -> 1 as VPU mul + lane reduction (skip an N=1 MXU pass).
        out2_ref[...] = (jnp.sum(feat * wc_row_ref[...], axis=-1, keepdims=True)
                         + bc_ref[...])


def net_forward(x, x_gboost, prepped_params, *, tm_max=256, tk=512):
    (w1p, b1p, w2p, b2p, w3p, b3p, w4p, b4p, wc_row, bcp) = prepped_params

    x = x.astype(jnp.float32)
    x = x.reshape(-1, x.shape[1])        # row-major reshape == torch .view([-1, x.shape[1]])
    xg = x_gboost.astype(jnp.float32).reshape(-1, 1)
    B = x.shape[0]

    # Batch tiling: tm <= 256 keeps the per-tile VMEM footprint ~15 MB, safe on
    # every generation (incl. v7x's 64 MiB physical VMEM).
    tm = min(tm_max, _round_up(B, 8))
    b_pad = _round_up(B, tm)
    xp = jnp.pad(x, ((0, b_pad - B), (0, D_IN_P - D_IN)))
    xgp = jnp.pad(xg, ((0, b_pad - B), (0, 0)))

    nb = b_pad // tm
    nk = D_IN_P // tk

    flops = 2 * b_pad * (D_IN_P * H1_P + H1_P * H2_P + H2_P * H3_P + H3_P * H4_P + H4_P)
    bytes_accessed = (2 * (D_IN_P * H1_P + H1_P * H2_P + H2_P * H3_P + H3_P * H4_P)
                      + 4 * (H1_P + H2_P + 2 * H3_P + H4_P + 1)
                      + 4 * b_pad * (D_IN_P + 1 + H4_P + 1))

    grid_spec = pltpu.PrefetchScalarGridSpec(
        num_scalar_prefetch=0,
        grid=(nb, nk),
        in_specs=[
            pl.BlockSpec((tm, tk), lambda i, k: (i, k)),          # x tile
            pl.BlockSpec((tm, 1), lambda i, k: (i, 0)),           # x_gboost
            pl.BlockSpec((tk, H1_P), lambda i, k: (k, 0)),        # W1 tile (streamed)
            pl.BlockSpec((1, H1_P), lambda i, k: (0, 0)),         # b1
            pl.BlockSpec((H1_P, H2_P), lambda i, k: (0, 0)),      # W2 (VMEM-resident)
            pl.BlockSpec((1, H2_P), lambda i, k: (0, 0)),         # b2
            pl.BlockSpec((H2_P, H3_P), lambda i, k: (0, 0)),      # W3
            pl.BlockSpec((1, H3_P), lambda i, k: (0, 0)),         # b3
            pl.BlockSpec((H3_P, H4_P), lambda i, k: (0, 0)),      # W4
            pl.BlockSpec((1, H4_P), lambda i, k: (0, 0)),         # b4
            pl.BlockSpec((1, H4_P), lambda i, k: (0, 0)),         # wc row
            pl.BlockSpec((1, 1), lambda i, k: (0, 0)),            # bc
        ],
        out_specs=(
            pl.BlockSpec((tm, 1), lambda i, k: (i, 0)),           # x2
            pl.BlockSpec((tm, H4_P), lambda i, k: (i, 0)),        # feat (128 lanes, padded)
        ),
        scratch_shapes=[pltpu.VMEM((tm, H1_P), jnp.float32)],     # layer-1 accumulator
    )

    out2_p, feat_p = pl.pallas_call(
        _net_kernel,
        grid_spec=grid_spec,
        out_shape=(jax.ShapeDtypeStruct((b_pad, 1), jnp.float32),
                   jax.ShapeDtypeStruct((b_pad, H4_P), jnp.float32)),
        compiler_params=pltpu.CompilerParams(
            dimension_semantics=("parallel", "arbitrary"),
            vmem_limit_bytes=40 * 1024 * 1024),
        cost_estimate=pl.CostEstimate(flops=flops, transcendentals=0,
                                      bytes_accessed=bytes_accessed),
    )(xp, xgp, w1p, b1p, w2p, b2p, w3p, b3p, w4p, b4p, wc_row, bcp)

    return out2_p[:B], feat_p[:B, :D_FEAT]


def init_params(key):
    """Deterministic parameter init (PyTorch-Linear-like uniform bounds).
    Weights are stored (in_features, out_features), i.e. y = x @ W + b."""
    dims = [(D_IN, H1), (H1, H2), (H2, H3), (H3, H4), (D_FEAT, 1)]
    params = []
    for (fin, fout) in dims:
        key, kw, kb = jax.random.split(key, 3)
        bound = 1.0 / (fin ** 0.5)
        w = jax.random.uniform(kw, (fin, fout), jnp.float32, -bound, bound)
        b = jax.random.uniform(kb, (1, fout), jnp.float32, -bound, bound)
        params += [w, b]
    return tuple(params)


def _reference(x, xg, params, matmul_dtype=jnp.float32):
    """Pure-JAX reference. matmul_dtype=bf16 reproduces the kernel's numerics
    (bf16 matmul inputs, f32 accumulation)."""
    (w1, b1, w2, b2, w3, b3, w4, b4, wc, bc) = params
    h = x.astype(jnp.float32).reshape(-1, x.shape[1])
    xg = xg.astype(jnp.float32).reshape(-1, 1)
    for w, b in ((w1, b1), (w2, b2), (w3, b3), (w4, b4)):
        hm = h.astype(matmul_dtype).astype(jnp.float32)
        wm = w.astype(matmul_dtype).astype(jnp.float32)
        h = jnp.maximum(hm @ wm + b, 0.0)
    feat = jnp.concatenate([h, xg], axis=1)
    return feat @ wc + bc, feat


if __name__ == "__main__":
    key = jax.random.PRNGKey(0)
    kp, kx, kg = jax.random.split(key, 3)

    params = init_params(kp)
    prepped = prepare_params(params)

    B = 2
    x = jax.random.normal(kx, (B, D_IN), jnp.float32)
    x_gboost = jax.random.normal(kg, (B, 1), jnp.float32)

    x2, feat = net_forward(x, x_gboost, prepped)
    jax.block_until_ready((x2, feat))
    assert x2.shape == (B, 1) and feat.shape == (B, D_FEAT)

    # Matched-precision reference (bf16 matmul inputs, f32 accumulation) — tight check.
    x2_m, feat_m = _reference(x, x_gboost, params, matmul_dtype=jnp.bfloat16)
    assert jnp.allclose(x2, x2_m, atol=1e-3, rtol=1e-3)
    assert jnp.allclose(feat, feat_m, atol=1e-3, rtol=1e-3)

    # Full-f32 reference — sanity check that bf16 weights keep overall fidelity.
    x2_f, feat_f = _reference(x, x_gboost, params, matmul_dtype=jnp.float32)
    assert jnp.allclose(x2, x2_f, atol=3e-2, rtol=3e-2)
    assert jnp.allclose(feat, feat_f, atol=3e-2, rtol=3e-2)

    print("KERNEL_OK")
</pallas_src>

<mosaic_0001>
module attributes {stable_mosaic.version = 11 : i64} {
  func.func @_net_kernel(%arg0: i32, %arg1: i32, %arg2: memref<8x512xf32, #tpu.memory_space<vmem>>, %arg3: memref<8x1xf32, #tpu.memory_space<vmem>>, %arg4: memref<512x1792xbf16, #tpu.memory_space<vmem>>, %arg5: memref<1x1792xf32, #tpu.memory_space<vmem>>, %arg6: memref<1792x1024xbf16, #tpu.memory_space<vmem>>, %arg7: memref<1x1024xf32, #tpu.memory_space<vmem>>, %arg8: memref<1024x128xbf16, #tpu.memory_space<vmem>>, %arg9: memref<1x128xf32, #tpu.memory_space<vmem>>, %arg10: memref<128x128xbf16, #tpu.memory_space<vmem>>, %arg11: memref<1x128xf32, #tpu.memory_space<vmem>>, %arg12: memref<1x128xf32, #tpu.memory_space<vmem>>, %arg13: memref<1x1xf32, #tpu.memory_space<vmem>>, %arg14: memref<8x1xf32, #tpu.memory_space<vmem>>, %arg15: memref<8x128xf32, #tpu.memory_space<vmem>>, %arg16: memref<8x1792xf32, #tpu.memory_space<vmem>>) attributes {dimension_semantics = [#tpu.dimension_semantics<parallel>, #tpu.dimension_semantics<arbitrary>], iteration_bounds = array<i64: 1, 5>, scalar_prefetch = 0 : i64, scratch_operands = 1 : i64, tpu.core_type = #tpu.core_type<tc>, window_params = [{transform_indices = @transform_0, window_bounds = array<i64: 8, 512>}, {transform_indices = @transform_1, window_bounds = array<i64: 8, 1>}, {transform_indices = @transform_2, window_bounds = array<i64: 512, 1792>}, {pipeline_mode = #tpu.pipeline_mode<synchronous>, transform_indices = @transform_3, window_bounds = array<i64: 1, 1792>}, {pipeline_mode = #tpu.pipeline_mode<synchronous>, transform_indices = @transform_4, window_bounds = array<i64: 1792, 1024>}, {pipeline_mode = #tpu.pipeline_mode<synchronous>, transform_indices = @transform_5, window_bounds = array<i64: 1, 1024>}, {pipeline_mode = #tpu.pipeline_mode<synchronous>, transform_indices = @transform_6, window_bounds = array<i64: 1024, 128>}, {pipeline_mode = #tpu.pipeline_mode<synchronous>, transform_indices = @transform_7, window_bounds = array<i64: 1, 128>}, {pipeline_mode = #tpu.pipeline_mode<synchronous>, transform_indices = @transform_8, window_bounds = array<i64: 128, 128>}, {pipeline_mode = #tpu.pipeline_mode<synchronous>, transform_indices = @transform_9, window_bounds = array<i64: 1, 128>}, {pipeline_mode = #tpu.pipeline_mode<synchronous>, transform_indices = @transform_10, window_bounds = array<i64: 1, 128>}, {pipeline_mode = #tpu.pipeline_mode<synchronous>, transform_indices = @transform_11, window_bounds = array<i64: 1, 1>}, {transform_indices = @transform_12, window_bounds = array<i64: 8, 1>}, {transform_indices = @transform_13, window_bounds = array<i64: 8, 128>}]} {
    %c0_i32 = arith.constant 0 : i32
    %0 = arith.cmpi eq, %arg1, %c0_i32 : i32
    %1 = arith.extui %0 : i1 to i32
    %c0_i32_0 = arith.constant 0 : i32
    %2 = arith.cmpi ne, %1, %c0_i32_0 : i32
    scf.if %2 {
      %cst_9 = arith.constant 0.000000e+00 : f32
      %13 = vector.broadcast %cst_9 : f32 to vector<8x1792xf32>
      %c0_10 = arith.constant 0 : index
      %c0_11 = arith.constant 0 : index
      %14 = vector.load %arg16[%c0_10, %c0_11] : memref<8x1792xf32, #tpu.memory_space<vmem>>, vector<8x1792xf32>
      tpu.vector_store %arg16[%c0_10, %c0_11], %13 {strides = array<i32>} : memref<8x1792xf32, #tpu.memory_space<vmem>>, vector<8x1792xf32>,
    } else {
    }
    %c0 = arith.constant 0 : index
    %c0_1 = arith.constant 0 : index
    %3 = vector.load %arg16[%c0, %c0_1] : memref<8x1792xf32, #tpu.memory_space<vmem>>, vector<8x1792xf32>
    %c0_2 = arith.constant 0 : index
    %c0_3 = arith.constant 0 : index
    %4 = vector.load %arg2[%c0_2, %c0_3] : memref<8x512xf32, #tpu.memory_space<vmem>>, vector<8x512xf32>
    %5 = arith.truncf %4 : vector<8x512xf32> to vector<8x512xbf16>
    %c0_4 = arith.constant 0 : index
    %c0_5 = arith.constant 0 : index
    %6 = vector.load %arg4[%c0_4, %c0_5] : memref<512x1792xbf16, #tpu.memory_space<vmem>>, vector<512x1792xbf16>
    %cst = arith.constant dense<0.000000e+00> : vector<8x1792xf32>
    %7 = tpu.matmul %5, %6, %cst {dimension_numbers = #tpu.dot_dimension_numbers<[1], [0], [0], [1], [0, 0, 1, 1], [], []>} : vector<8x512xbf16>, vector<512x1792xbf16>, vector<8x1792xf32> -> vector<8x1792xf32>
    %8 = arith.addf %3, %7 : vector<8x1792xf32>
    %c0_6 = arith.constant 0 : index
    %c0_7 = arith.constant 0 : index
    %9 = vector.load %arg16[%c0_6, %c0_7] : memref<8x1792xf32, #tpu.memory_space<vmem>>, vector<8x1792xf32>
    tpu.vector_store %arg16[%c0_6, %c0_7], %8 {strides = array<i32>} : memref<8x1792xf32, #tpu.memory_space<vmem>>, vector<8x1792xf32>,
    %c4_i32 = arith.constant 4 : i32
    %10 = arith.cmpi eq, %arg1, %c4_i32 : i32
    %11 = arith.extui %10 : i1 to i32
    %c0_i32_8 = arith.constant 0 : i32
    %12 = arith.cmpi ne, %11, %c0_i32_8 : i32
    scf.if %12 {
      %c0_9 = arith.constant 0 : index
      %c0_10 = arith.constant 0 : index
      %13 = vector.load %arg16[%c0_9, %c0_10] : memref<8x1792xf32, #tpu.memory_space<vmem>>, vector<8x1792xf32>
      %c0_11 = arith.constant 0 : index
      %c0_12 = arith.constant 0 : index
      %14 = vector.load %arg5[%c0_11, %c0_12] : memref<1x1792xf32, #tpu.memory_space<vmem>>, vector<1x1792xf32>
      %15 = vector.broadcast %14 : vector<1x1792xf32> to vector<8x1792xf32>
      %16 = arith.addf %13, %15 : vector<8x1792xf32>
      %cst_13 = arith.constant 0.000000e+00 : f32
      %17 = vector.broadcast %cst_13 : f32 to vector<8x1792xf32>
      %18 = arith.maximumf %16, %17 : vector<8x1792xf32>
      %19 = arith.truncf %18 : vector<8x1792xf32> to vector<8x1792xbf16>
      %c0_14 = arith.constant 0 : index
      %c0_15 = arith.constant 0 : index
      %20 = vector.load %arg6[%c0_14, %c0_15] : memref<1792x1024xbf16, #tpu.memory_space<vmem>>, vector<1792x1024xbf16>
      %cst_16 = arith.constant dense<0.000000e+00> : vector<8x1024xf32>
      %21 = tpu.matmul %19, %20, %cst_16 {dimension_numbers = #tpu.dot_dimension_numbers<[1], [0], [0], [1], [0, 0, 1, 1], [], []>} : vector<8x1792xbf16>, vector<1792x1024xbf16>, vector<8x1024xf32> -> vector<8x1024xf32>
      %c0_17 = arith.constant 0 : index
      %c0_18 = arith.constant 0 : index
      %22 = vector.load %arg7[%c0_17, %c0_18] : memref<1x1024xf32, #tpu.memory_space<vmem>>, vector<1x1024xf32>
      %23 = vector.broadcast %22 : vector<1x1024xf32> to vector<8x1024xf32>
      %24 = arith.addf %21, %23 : vector<8x1024xf32>
      %cst_19 = arith.constant 0.000000e+00 : f32
      %25 = vector.broadcast %cst_19 : f32 to vector<8x1024xf32>
      %26 = arith.maximumf %24, %25 : vector<8x1024xf32>
      %27 = arith.truncf %26 : vector<8x1024xf32> to vector<8x1024xbf16>
      %c0_20 = arith.constant 0 : index
      %c0_21 = arith.constant 0 : index
      %28 = vector.load %arg8[%c0_20, %c0_21] : memref<1024x128xbf16, #tpu.memory_space<vmem>>, vector<1024x128xbf16>
      %cst_22 = arith.constant dense<0.000000e+00> : vector<8x128xf32>
      %29 = tpu.matmul %27, %28, %cst_22 {dimension_numbers = #tpu.dot_dimension_numbers<[1], [0], [0], [1], [0, 0, 1, 1], [], []>} : vector<8x1024xbf16>, vector<1024x128xbf16>, vector<8x128xf32> -> vector<8x128xf32>
      %c0_23 = arith.constant 0 : index
      %c0_24 = arith.constant 0 : index
      %30 = vector.load %arg9[%c0_23, %c0_24] : memref<1x128xf32, #tpu.memory_space<vmem>>, vector<1x128xf32>
      %31 = vector.broadcast %30 : vector<1x128xf32> to vector<8x128xf32>
      %32 = arith.addf %29, %31 : vector<8x128xf32>
      %cst_25 = arith.constant 0.000000e+00 : f32
      %33 = vector.broadcast %cst_25 : f32 to vector<8x128xf32>
      %34 = arith.maximumf %32, %33 : vector<8x128xf32>
      %35 = arith.truncf %34 : vector<8x128xf32> to vector<8x128xbf16>
      %c0_26 = arith.constant 0 : index
      %c0_27 = arith.constant 0 : index
      %36 = vector.load %arg10[%c0_26, %c0_27] : memref<128x128xbf16, #tpu.memory_space<vmem>>, vector<128x128xbf16>
      %cst_28 = arith.constant dense<0.000000e+00> : vector<8x128xf32>
      %37 = tpu.matmul %35, %36, %cst_28 {dimension_numbers = #tpu.dot_dimension_numbers<[1], [0], [0], [1], [0, 0, 1, 1], [], []>} : vector<8x128xbf16>, vector<128x128xbf16>, vector<8x128xf32> -> vector<8x128xf32>
      %c0_29 = arith.constant 0 : index
      %c0_30 = arith.constant 0 : index
      %38 = vector.load %arg11[%c0_29, %c0_30] : memref<1x128xf32, #tpu.memory_space<vmem>>, vector<1x128xf32>
      %39 = vector.broadcast %38 : vector<1x128xf32> to vector<8x128xf32>
      %40 = arith.addf %37, %39 : vector<8x128xf32>
      %cst_31 = arith.constant 0.000000e+00 : f32
      %41 = vector.broadcast %cst_31 : f32 to vector<8x128xf32>
      %42 = arith.maximumf %40, %41 : vector<8x128xf32>
      %c0_32 = arith.constant 0 : index
      %c0_33 = arith.constant 0 : index
      %43 = vector.load %arg3[%c0_32, %c0_33] : memref<8x1xf32, #tpu.memory_space<vmem>>, vector<8x1xf32>
      %44 = tpu.iota {dimensions = array<i32: 1>} : vector<8x128xi32>
      %c20_i32 = arith.constant 20 : i32
      %45 = vector.broadcast %c20_i32 : i32 to vector<8x128xi32>
      %46 = arith.cmpi eq, %44, %45 : vector<8x128xi32>
      %47 = vector.shape_cast %43 : vector<8x1xf32> to vector<8x1xf32>
      %48 = vector.broadcast %47 : vector<8x1xf32> to vector<8x128xf32>
      %49 = arith.select %46, %48, %42 : vector<8x128xi1>, vector<8x128xf32>
      %c0_34 = arith.constant 0 : index
      %c0_35 = arith.constant 0 : index
      %50 = vector.load %arg15[%c0_34, %c0_35] : memref<8x128xf32, #tpu.memory_space<vmem>>, vector<8x128xf32>
      tpu.vector_store %arg15[%c0_34, %c0_35], %49 {strides = array<i32>} : memref<8x128xf32, #tpu.memory_space<vmem>>, vector<8x128xf32>,
      %c0_36 = arith.constant 0 : index
      %c0_37 = arith.constant 0 : index
      %51 = vector.load %arg12[%c0_36, %c0_37] : memref<1x128xf32, #tpu.memory_space<vmem>>, vector<1x128xf32>
      %52 = vector.broadcast %51 : vector<1x128xf32> to vector<8x128xf32>
      %53 = arith.mulf %49, %52 : vector<8x128xf32>
      %cst_38 = arith.constant dense<0.000000e+00> : vector<8xf32>
      %54 = vector.multi_reduction <add>, %53, %cst_38 [1] : vector<8x128xf32> to vector<8xf32>
      %55 = vector.shape_cast %54 : vector<8xf32> to vector<8x1xf32>
      %c0_39 = arith.constant 0 : index
      %c0_40 = arith.constant 0 : index
      %56 = vector.load %arg13[%c0_39, %c0_40] : memref<1x1xf32, #tpu.memory_space<vmem>>, vector<1x1xf32>
      %57 = vector.broadcast %56 : vector<1x1xf32> to vector<8x1xf32>
      %58 = arith.addf %55, %57 : vector<8x1xf32>
      %c0_41 = arith.constant 0 : index
      %c0_42 = arith.constant 0 : index
      %59 = vector.load %arg14[%c0_41, %c0_42] : memref<8x1xf32, #tpu.memory_space<vmem>>, vector<8x1xf32>
      tpu.vector_store %arg14[%c0_41, %c0_42], %58 {strides = array<i32>} : memref<8x1xf32, #tpu.memory_space<vmem>>, vector<8x1xf32>,
    } else {
    }
    return
  }
  func.func @transform_0(%arg0: i32, %arg1: i32) -> (i32, i32) {
    %c0_i32 = arith.constant 0 : i32
    return %arg0, %arg1 : i32, i32
  }
  func.func @transform_1(%arg0: i32, %arg1: i32) -> (i32, i32) {
    %c0_i32 = arith.constant 0 : i32
    %c0_i32_0 = arith.constant 0 : i32
    return %arg0, %c0_i32 : i32, i32
  }
  func.func @transform_2(%arg0: i32, %arg1: i32) -> (i32, i32) {
    %c0_i32 = arith.constant 0 : i32
    %c0_i32_0 = arith.constant 0 : i32
    return %arg1, %c0_i32 : i32, i32
  }
  func.func @transform_3(%arg0: i32, %arg1: i32) -> (i32, i32) {
    %c0_i32 = arith.constant 0 : i32
    %c0_i32_0 = arith.constant 0 : i32
    %c0_i32_1 = arith.constant 0 : i32
    return %c0_i32, %c0_i32_0 : i32, i32
  }
  func.func @transform_4(%arg0: i32, %arg1: i32) -> (i32, i32) {
    %c0_i32 = arith.constant 0 : i32
    %c0_i32_0 = arith.constant 0 : i32
    %c0_i32_1 = arith.constant 0 : i32
    return %c0_i32, %c0_i32_0 : i32, i32
  }
  func.func @transform_5(%arg0: i32, %arg1: i32) -> (i32, i32) {
    %c0_i32 = arith.constant 0 : i32
    %c0_i32_0 = arith.constant 0 : i32
    %c0_i32_1 = arith.constant 0 : i32
    return %c0_i32, %c0_i32_0 : i32, i32
  }
  func.func @transform_6(%arg0: i32, %arg1: i32) -> (i32, i32) {
    %c0_i32 = arith.constant 0 : i32
    %c0_i32_0 = arith.constant 0 : i32
    %c0_i32_1 = arith.constant 0 : i32
    return %c0_i32, %c0_i32_0 : i32, i32
  }
  func.func @transform_7(%arg0: i32, %arg1: i32) -> (i32, i32) {
    %c0_i32 = arith.constant 0 : i32
    %c0_i32_0 = arith.constant 0 : i32
    %c0_i32_1 = arith.constant 0 : i32
    return %c0_i32, %c0_i32_0 : i32, i32
  }
  func.func @transform_8(%arg0: i32, %arg1: i32) -> (i32, i32) {
    %c0_i32 = arith.constant 0 : i32
    %c0_i32_0 = arith.constant 0 : i32
    %c0_i32_1 = arith.constant 0 : i32
    return %c0_i32, %c0_i32_0 : i32, i32
  }
  func.func @transform_9(%arg0: i32, %arg1: i32) -> (i32, i32) {
    %c0_i32 = arith.constant 0 : i32
    %c0_i32_0 = arith.constant 0 : i32
    %c0_i32_1 = arith.constant 0 : i32
    return %c0_i32, %c0_i32_0 : i32, i32
  }
  func.func @transform_10(%arg0: i32, %arg1: i32) -> (i32, i32) {
    %c0_i32 = arith.constant 0 : i32
    %c0_i32_0 = arith.constant 0 : i32
    %c0_i32_1 = arith.constant 0 : i32
    return %c0_i32, %c0_i32_0 : i32, i32
  }
  func.func @transform_11(%arg0: i32, %arg1: i32) -> (i32, i32) {
    %c0_i32 = arith.constant 0 : i32
    %c0_i32_0 = arith.constant 0 : i32
    %c0_i32_1 = arith.constant 0 : i32
    return %c0_i32, %c0_i32_0 : i32, i32
  }
  func.func @transform_12(%arg0: i32, %arg1: i32) -> (i32, i32) {
    %c0_i32 = arith.constant 0 : i32
    %c0_i32_0 = arith.constant 0 : i32
    return %arg0, %c0_i32 : i32, i32
  }
  func.func @transform_13(%arg0: i32, %arg1: i32) -> (i32, i32) {
    %c0_i32 = arith.constant 0 : i32
    %c0_i32_0 = arith.constant 0 : i32
    return %arg0, %c0_i32 : i32, i32
  }
}

</mosaic_0001>

<bundles_post_ra>
// kernel: tpu_custom_call.1
= control target key start
LH: loop header
LB: loop body
LE: loop exit
PB: predicated region body
PF: predicated region fallthrough
CT: control target
= control target key end

     0   :  { %s21267_s0 = inlined_call_operand.hbm [shape: f32[8,2560], index: 0, kind: input, shape index: {}]   ;;  %s21268_s1 = inlined_call_operand.vmem [shape: f32[8,1], index: 1, kind: input, shape index: {}]   ;;  %s21269_s2 = inlined_call_operand.hbm [shape: bf16[2560,1792], index: 2, kind: input, shape index: {}]   ;;  %s21270_s3 = inlined_call_operand.hbm [shape: f32[1,1792], index: 3, kind: input, shape index: {}]   ;;  %s21271_s4 = inlined_call_operand.hbm [shape: bf16[1792,1024], index: 4, kind: input, shape index: {}]   ;;  %s21272_s5 = inlined_call_operand.hbm [shape: f32[1,1024], index: 5, kind: input, shape index: {}]   ;;  %s21273_s6 = inlined_call_operand.hbm [shape: bf16[1024,128], index: 6, kind: input, shape index: {}]   ;;  %s21274_s7 = inlined_call_operand.hbm [shape: f32[1,128], index: 7, kind: input, shape index: {}]   ;;  %s21275_s8 = inlined_call_operand.hbm [shape: bf16[128,128], index: 8, kind: input, shape index: {}]   ;;  %s21276_s9 = inlined_call_operand.hbm [shape: f32[1,128], index: 9, kind: input, shape index: {}]   ;;  %s21277_s10 = inlined_call_operand.hbm [shape: f32[1,128], index: 10, kind: input, shape index: {}]   ;;  %s21278_s11 = inlined_call_operand.<no memory space> [shape: f32[1,1], index: 11, kind: input, shape index: {}]   ;;  %s21279_s12 = inlined_call_operand.vmem [shape: f32[8,1], index: 12, kind: output, shape index: {0}]   ;;  %s21280_s13 = inlined_call_operand.hbm [shape: f32[8,128], index: 13, kind: output, shape index: {1}]  }
   0x1   :  { %21281 = sst [smem:[#allocation30_spill]] %s21267_s0  ;;  %v19_v0 = vstv %s21278_s11 }
   0x2   :  { %21282 = sst [smem:[#allocation31_spill]] %s21268_s1  ;;  %20 = vst [vmem:[#allocation3] sm:$0x1] %v19_v0 }
   0x3   :  { %21283 = sst [smem:[#allocation32_spill]] %s21270_s3 }
   0x4   :  { %21284 = sst [smem:[#allocation33_spill]] %s21271_s4 }
   0x5   :  { %21285 = sst [smem:[#allocation34_spill]] %s21272_s5 }
   0x6   :  { %21286 = sst [smem:[#allocation35_spill]] %s21273_s6 }
   0x7   :  { %21287 = sst [smem:[#allocation36_spill]] %s21274_s7 }
   0x8   :  { %21288 = sst [smem:[#allocation37_spill]] %s21279_s12 }
   0x9   :  { %21289 = sst [smem:[#allocation38_spill]] %s21280_s13 }
   0xa   :  { %21 = vsyncpa [#allocation5], 0 }
   0xb   :  { %23 = vsyncpa [#allocation5 + $0x1], 0 }
   0xc   :  { %24 = vsyncpa [#allocation8], 0 }
   0xd   :  { %26 = vsyncpa [#allocation8 + $0x1], 0 }
   0xe   :  { %27 = vsyncpa [#allocation11], 0 }
   0xf   :  { %28 = vsyncpa [#allocation14], 0 }
  0x10   :  { %29 = vsyncpa [#allocation17], 0 }
  0x11   :  { %30 = vsyncpa [#allocation20], 0 }
  0x12   :  { %31 = vsyncpa [#allocation6], 0  ;;  %s19834_s27 = smov 0   ;;  %s19836_s28 = smov 0  }
  0x13   :  { %s19838_s29 = smov 0   ;;  %s19840_s30 = smov 0  }
  0x14   :  { %s19842_s14 = smov 0   ;;  %s19844_s11 = smov 0  }
  0x15 LB: > { %s19865_s15 = sadd.s32 4294967295, %s19742_s11   ;;  %p12054_p0 = scmp.ge.s32.totalorder %s19742_s11, 1  ;;  %s19742_s11 = sphi %s19844_s11, %s37_s11   ;;  %s19738_s14 = sphi %s19842_s14, %s21308_s14   ;;  %s19734_s30 = sphi %s19840_s30, %s21307_s30   ;;  %s19730_s29 = sphi %s19838_s29, %s21306_s29   ;;  %s19726_s28 = sphi %s19836_s28, %s21305_s28   ;;  %s19722_s27 = sphi %s19834_s27, %s21304_s27  }
  0x16   : > { %p72_p1 = scmp.eq.s32.totalorder %s19865_s15, 0  ;;  %p375_p2 = scmp.lt.s32.totalorder %s19742_s11, 6 }
  0x17   : > { %s21290_s3 = sld [smem:[#allocation32_spill]]  ;;  %s19744_s20 = smov [#allocation9]  }
  0x18   : > { %p19873_p3 = pnand %p12054_p0, %p375_p2  ;;  %s396_s21 = sshll.u32 %s19744_s20, 4  ;;  %s397_s21 = int_to_ptr.vmem [resolvable:$true] %s396_s21 }
  0x19   : > { %s21292_s4 = sld [smem:[#allocation33_spill]]  ;;  %s19745_s26 = smov [#allocation10]  }
  0x1a   : > { %p19212_p4 = pneg %p19873_p3  ;;  %s407_s16 = sshll.u32 %s19745_s26, 4  ;;  %s408_s16 = int_to_ptr.vmem [resolvable:$true] %s407_s16 }
  0x1b   : > { %s19746_s17 = smov 512   ;;  %s19747_s20 = smov 32  }
  0x1c   : > { %p19884_p5 = pnand %p19212_p4, %p72_p1  ;;  %s21294_s6 = sld [smem:[#allocation35_spill]] }
  0x1d   : > { %s394_s18 = sshll.u32 %s21290_s3, 4  ;;  %s457_s26 = sshll.u32 %s21275_s8, 4  ;;  %s395_s18 = int_to_ptr.hbm [resolvable:$true] %s394_s18  ;;  %s458_s26 = int_to_ptr.hbm [resolvable:$true] %s457_s26 }
  0x1e   : > { %19215 = dma.hbm_to_vmem [thread:$0]  (!%p19884_p5), %s395_s18, 224, %s397_s21, [#allocation8]  }
  0x1f   : > { %s405_s24 = sshll.u32 %s21292_s4, 4  ;;  %s19748_s4 = smov [#allocation13]   ;;  %s406_s24 = int_to_ptr.hbm [resolvable:$true] %s405_s24 }
  0x20   : > { %19218 = dma.hbm_to_vmem [thread:$0]  (!%p19884_p5), %s406_s24, 114688, %s408_s16, [#allocation11], %s19746_s17, %s19746_s17, %s19747_s20  }
  0x21   : > { %s433_s13 = sshll.u32 %s19748_s4, 4  ;;  %s19749_s18 = smov 64   ;;  %s434_s13 = int_to_ptr.vmem [resolvable:$true] %s433_s13 }
  0x22   : > { %s431_s3 = sshll.u32 %s21294_s6, 4  ;;  %s19750_s21 = smov 4   ;;  %s432_s3 = int_to_ptr.hbm [resolvable:$true] %s431_s3 }
  0x23   : > { %19224 = dma.hbm_to_vmem [thread:$0]  (!%p19884_p5), %s432_s3, 8192, %s434_s13, [#allocation14], %s19749_s18, %s19749_s18, %s19750_s21  }
  0x24   : > { %s19751_s24 = smov [#allocation16]   ;;  %s21295_s5 = sld [smem:[#allocation34_spill]] }
  0x25   : > { %s459_s16 = sshll.u32 %s19751_s24, 4  ;;  %s21296_s7 = sld [smem:[#allocation36_spill]]  ;;  %s460_s16 = int_to_ptr.vmem [resolvable:$true] %s459_s16 }
  0x26   : > { %19230 = dma.hbm_to_vmem [thread:$0]  (!%p19884_p5), %s458_s26, 1024, %s460_s16, [#allocation17], %s19749_s18, %s19749_s18, %s19750_s21  }
  0x27   : > { %s19752_s23 = smov [#allocation12]   ;;  %s19753_s3 = smov [#allocation15]  }
  0x28   : > { %s422_s6 = sshll.u32 %s19752_s23, 4  ;;  %s448_s13 = sshll.u32 %s19753_s3, 4  ;;  %s423_s6 = int_to_ptr.vmem [resolvable:$true] %s422_s6  ;;  %s449_s13 = int_to_ptr.vmem [resolvable:$true] %s448_s13 }
  0x29   : > { %s472_s26 = sshll.u32 %s21276_s9, 4  ;;  %s19754_s16 = smov [#allocation18]   ;;  %s473_s26 = int_to_ptr.hbm [resolvable:$true] %s472_s26 }
  0x2a   : > { %s420_s22 = sshll.u32 %s21295_s5, 4  ;;  %s474_s20 = sshll.u32 %s19754_s16, 4  ;;  %s421_s22 = int_to_ptr.hbm [resolvable:$true] %s420_s22  ;;  %s475_s20 = int_to_ptr.vmem [resolvable:$true] %s474_s20 }
  0x2b   : > { %s446_s12 = sshll.u32 %s21296_s7, 4  ;;  %s46_s1 = sadd.s32 1, %s19738_s14  ;;  %s447_s12 = int_to_ptr.hbm [resolvable:$true] %s446_s12 }
  0x2c   : > { %19221 = dma.hbm_to_vmem [thread:$0]  (!%p19884_p5), %s421_s22, 128, %s423_s6, [#allocation11]  }
  0x2d   : > { %19227 = dma.hbm_to_vmem [thread:$0]  (!%p19884_p5), %s447_s12, 16, %s449_s13, [#allocation14]  }
  0x2e   : > { %s484_s6 = sshll.u32 %s21277_s10, 4  ;;  %s19755_s22 = smov [#allocation19]   ;;  %s485_s6 = int_to_ptr.hbm [resolvable:$true] %s484_s6 }
  0x2f   : > { %19233 = dma.hbm_to_vmem [thread:$0]  (!%p19884_p5), %s473_s26, 16, %s475_s20, [#allocation17]  }
  0x30   : > { %s486_s4 = sshll.u32 %s19755_s22, 4  ;;  %s58_s12 = sadd.s32 1, %s19730_s29  ;;  %s487_s4 = int_to_ptr.vmem [resolvable:$true] %s486_s4 }
  0x31   : > { %19236 = dma.hbm_to_vmem [thread:$0]  (!%p19884_p5), %s485_s6, 16, %s487_s4, [#allocation20]  }
  0x32   : > { %p47_p6 = scmp.ge.s32.totalorder %s46_s1, 5  ;;  %p65_p7 = scmp.ne.s32.totalorder %s19730_s29, %s19726_s28 }
  0x33   : > { %p66_p8 = scmp.eq.s32.totalorder %s19742_s11, 0  ;;  %p71_p9 = scmp.ne.s32.totalorder %s19726_s28, %s19722_s27 }
  0x34   : > { %s21310_s1 = smov (%p47_p6, %s46_s1), 0  ;;  %p19252_p12 = scmp.lt.s32.totalorder %s19742_s11, 5 }
  0x35   : > { %p19931_p10 = por %p66_p8, %p65_p7  ;;  %p19937_p11 = por %p72_p1, %p71_p9 }
  0x36   : > { %s54_s3 = ssub.s32 %s19738_s14, %s21310_s1  ;;  %s500_s13 = sand.u32 1, %s19730_s29  }
  0x37   : > { %p56_p13 = scmp.eq.s32.totalorder %s54_s3, 0  ;;  %s12065_s27 = sshll.u32 %s500_s13, 5 }
  0x38   : > { %s17752_s17 = sshll.u32 %s19738_s14, 5  ;;  %s21299_s0 = sld [smem:[#allocation30_spill]] }
  0x39   : > { %s19946_s24 = scalar_select %p56_p13, %s19730_s29, %s58_s12  }
  0x3a   : > { %s504_s6 = scalar_lea.vmem [#allocation4], %s12065_s27  ;;  %p19954_p0 = pnand %p19252_p12, %p19931_p10 }
  0x3b   : > { %s515_s16 = sshll.u32 %s504_s6, 4  ;;  %s19169_s4 = smul.u32 3584, %s500_s13  ;;  %s516_s16 = int_to_ptr.vmem [resolvable:$true] %s515_s16 }
  0x3c   : > { %s522_s12 = sand.u32 1, %s19742_s11   ;;  %s19170_s3 = smul.u32 3584, %s19738_s14 }
  0x3d   : > { %s501_s5 = scalar_lea.sflag [#allocation5], %s500_s13  ;;  %s526_s26 = scalar_lea.vmem [#allocation7], %s19169_s4 }
  0x3e   : > { %s511_s21 = scalar_lea.hbm %s21299_s0, %s17752_s17  ;;  %s535_s17 = sshll.u32 %s526_s26, 4  ;;  %s536_s17 = int_to_ptr.vmem [resolvable:$true] %s535_s17 }
  0x3f   : > { %s513_s20 = sshll.u32 %s511_s21, 4  ;;  %s532_s21 = scalar_lea.hbm %s21269_s2, %s19170_s3  ;;  %s514_s20 = int_to_ptr.hbm [resolvable:$true] %s513_s20 }
  0x40   : > { %19240 = dma.hbm_to_vmem [thread:$0]  (!%p19954_p0), %s514_s20, 512, %s516_s16, %s501_s5  }
  0x41   : > { %s533_s23 = sshll.u32 %s532_s21, 4  ;;  %s523_s6 = scalar_lea.sflag [#allocation8], %s522_s12  ;;  %s534_s23 = int_to_ptr.hbm [resolvable:$true] %s533_s23 }
  0x42   : > { %s19756_s0 = smov 896   ;;  %s19757_s7 = smov 56  }
  0x43   : > { %19243 = dma.hbm_to_vmem [thread:$0]  (!%p19954_p0), %s534_s23, 57344, %s536_s17, %s523_s6, %s19756_s0, %s19756_s0, %s19757_s7  }
  0x44   : > { %547 = sbr.rel (%p19873_p3) target bundleno = 2763 (0xacb), region = 68  ;;  %s549_s5 = sand.u32 (!%p19873_p3), 1, %s19726_s28  }
  0x45   : > { %s12072_s13 = sshll.u32 (!%p19873_p3), %s549_s5, 5  ;;  %s550_s16 = scalar_lea.sflag (!%p19873_p3), [#allocation5], %s549_s5 }
  0x46   : > { %s19970_s20 = scalar_lea.vmem (!%p19873_p3), [#allocation4], %s12072_s13 }
  0x49   : > { %19689 = dma.done.wait (%p19937_p11), %s550_s16, 512  }
  0x4a   : > { %19691 = vsyncadd (%p19937_p11), %s550_s16, 4294966784  ;;  %s559_s4 = sand.u32 1, %s19865_s15   ;;  %s19171_s22 = smul.u32 3584, %s549_s5 }
  0x4b   : > { %s560_s0 = scalar_lea.sflag [#allocation8], %s559_s4 }
  0x4c   : > { %s19977_s7 = scalar_lea.vmem [#allocation7], %s19171_s22 }
  0x4d   : > { %19693 = dma.done.wait (%p19937_p11), %s560_s0, 57344  }
  0x4e   : > { %19695 = vsyncadd (%p19937_p11), %s560_s0, 4294909952 }
  0x4f   : > { %19697 = dma.done.wait (%p72_p1), [#allocation8], 224  }
  0x50   : > { %19699 = vsyncadd (%p72_p1), [#allocation8], 4294967072 }
  0x51   : > { %19701 = dma.done.wait (%p72_p1), [#allocation11], 114816  }
  0x52   : > { %19703 = vsyncadd (%p72_p1), [#allocation11], 4294852480 }
  0x53   : > { %19705 = dma.done.wait (%p72_p1), [#allocation14], 8208  }
  0x54   : > { %19707 = vsyncadd (%p72_p1), [#allocation14], 4294959088 }
  0x55   : > { %19709 = dma.done.wait (%p72_p1), [#allocation17], 1040  }
  0x56   : > { %19711 = vsyncadd (%p72_p1), [#allocation17], 4294966256 }
  0x57   : > { %19713 = dma.done.wait (%p72_p1), [#allocation20], 16  }
  0x58   : > { %19715 = vsyncadd (%p72_p1), [#allocation20], 4294967280  ;;  %p12081_p2 = scmp.ne.s32.totalorder %s19734_s30, 0 }
  0x5a   : > { %668 = sbr.rel (%p12081_p2) target bundleno = 110 (0x6e), region = 112 }
  0x5f   : > { %v19758_v1 = vmov 0.0  }
  0x60   : > { %669 = vst [vmem:[#allocation2 + $0x30] sm:$0xff] %v19758_v1 }
  0x61   : > { %670 = vst [vmem:[#allocation2] sm:$0xff] %v19758_v1 }
  0x62   : > { %671 = vst [vmem:[#allocation2 + $0x58] sm:$0xff] %v19758_v1 }
  0x63   : > { %672 = vst [vmem:[#allocation2 + $0x18] sm:$0xff] %v19758_v1 }
  0x64   : > { %673 = vst [vmem:[#allocation2 + $0x50] sm:$0xff] %v19758_v1 }
  0x65   : > { %674 = vst [vmem:[#allocation2 + $0x68] sm:$0xff] %v19758_v1 }
  0x66   : > { %675 = vst [vmem:[#allocation2 + $0x8] sm:$0xff] %v19758_v1 }
  0x67   : > { %676 = vst [vmem:[#allocation2 + $0x48] sm:$0xff] %v19758_v1 }
  0x68   : > { %677 = vst [vmem:[#allocation2 + $0x40] sm:$0xff] %v19758_v1 }
  0x69   : > { %678 = vst [vmem:[#allocation2 + $0x20] sm:$0xff] %v19758_v1 }
  0x6a   : > { %679 = vst [vmem:[#allocation2 + $0x10] sm:$0xff] %v19758_v1 }
  0x6b   : > { %680 = vst [vmem:[#allocation2 + $0x38] sm:$0xff] %v19758_v1 }
  0x6c   : > { %681 = vst [vmem:[#allocation2 + $0x60] sm:$0xff] %v19758_v1 }
  0x6d   : > { %682 = vst [vmem:[#allocation2 + $0x28] sm:$0xff] %v19758_v1 }
  0x6e PF: > { %v12476_v2 = vld [vmem:[%s19977_s7 + $0x310] sm:$0xf]  ;;  %v17858_v3 = vld [vmem:[%s19977_s7 + $0x344] sm:$0xf0]  ;;  %v12420_v13 = vld [vmem:[%s19977_s7 + $0x2a0] sm:$0xf] }
  0x6f   : > { %v12924_v4 = vld [vmem:[%s19977_s7 + $0x690] sm:$0xf]  ;;  %v12477_v5 = vor.u32 %v17858_v3, %v12476_v2  ;;  %v17970_v6 = vld [vmem:[%s19977_s7 + $0x6c4] sm:$0xf0]  ;;  %v17844_v15 = vld [vmem:[%s19977_s7 + $0x2d4] sm:$0xf0] }
  0x70   : > { %v13372_v7 = vld [vmem:[%s19977_s7 + $0xa10] sm:$0xf]  ;;  %v18082_v8 = vld [vmem:[%s19977_s7 + $0xa44] sm:$0xf0]  ;;  %v12925_v9 = vor.u32 %v17970_v6, %v12924_v4  ;;  %v12868_v16 = vld [vmem:[%s19977_s7 + $0x620] sm:$0xf]  ;;  %v12421_v18 = vor.u32 %v17844_v15, %v12420_v13 }
  0x71   : > { %v13373_v10 = vor.u32 %v18082_v8, %v13372_v7  ;;  %v13820_v11 = vld [vmem:[%s19977_s7 + $0xd90] sm:$0xf]  ;;  %v18194_v12 = vld [vmem:[%s19977_s7 + $0xdc4] sm:$0xf0]  ;;  %3393 = vmatpush.bf16.msra.mxu0 %v12477_v5  ;;  %v17956_v17 = vld [vmem:[%s19977_s7 + $0x654] sm:$0xf0] }
  0x72   : > { %v13821_v14 = vor.u32 %v18194_v12, %v13820_v11  ;;  %3406 = vmatpush.bf16.msra.mxu1 %v12925_v9  ;;  %v12869_v19 = vor.u32 %v17956_v17, %v12868_v16  ;;  %v13316_v20 = vld [vmem:[%s19977_s7 + $0x9a0] sm:$0xf]  ;;  %v18068_v21 = vld [vmem:[%s19977_s7 + $0x9d4] sm:$0xf0]  ;;  %v12364_v25 = vld [vmem:[%s19977_s7 + $0x230] sm:$0xf] }
  0x73   : > { %3419 = vmatpush.bf16.msra.mxu2 %v13373_v10  ;;  %v13764_v22 = vld [vmem:[%s19977_s7 + $0xd20] sm:$0xf]  ;;  %v13317_v23 = vor.u32 %v18068_v21, %v13316_v20  ;;  %v18180_v24 = vld [vmem:[%s19977_s7 + $0xd54] sm:$0xf0]  ;;  %v17830_v26 = vld [vmem:[%s19977_s7 + $0x264] sm:$0xf0] }
  0x74   : > { %3432 = vmatpush.bf16.msra.mxu3 %v13821_v14  ;;  %v13765_v27 = vor.u32 %v18180_v24, %v13764_v22  ;;  %v12812_v28 = vld [vmem:[%s19977_s7 + $0x5b0] sm:$0xf]  ;;  %v17942_v29 = vld [vmem:[%s19977_s7 + $0x5e4] sm:$0xf0]  ;;  %v12365_v31 = vor.u32 %v17830_v26, %v12364_v25  ;;  %v12308_v37 = vld [vmem:[%s19977_s7 + $0x1c0] sm:$0xf] }
  0x75   : > { %v13260_v30 = vld [vmem:[%s19977_s7 + $0x930] sm:$0xf]  ;;  %3394 = vmatpush.bf16.msra.mxu0 %v12421_v18  ;;  %v18054_v32 = vld [vmem:[%s19977_s7 + $0x964] sm:$0xf0]  ;;  %v12813_v35 = vor.u32 %v17942_v29, %v12812_v28  ;;  %v17816_v38 = vld [vmem:[%s19977_s7 + $0x1f4] sm:$0xf0] }
  0x76   : > { %v13708_v33 = vld [vmem:[%s19977_s7 + $0xcb0] sm:$0xf]  ;;  %v18166_v34 = vld [vmem:[%s19977_s7 + $0xce4] sm:$0xf0]  ;;  %3407 = vmatpush.bf16.msra.mxu1 %v12869_v19  ;;  %v13261_v36 = vor.u32 %v18054_v32, %v13260_v30  ;;  %v12756_v39 = vld [vmem:[%s19977_s7 + $0x540] sm:$0xf]  ;;  %v12309_v46 = vor.u32 %v17816_v38, %v12308_v37 }
  0x77   : > { %3420 = vmatpush.bf16.msra.mxu2 %v13317_v23  ;;  %v13709_v40 = vor.u32 %v18166_v34, %v13708_v33  ;;  %v17928_v41 = vld [vmem:[%s19977_s7 + $0x574] sm:$0xf0]  ;;  %v13204_v42 = vld [vmem:[%s19977_s7 + $0x8c0] sm:$0xf]  ;;  %v12252_v49 = vld [vmem:[%s19977_s7 + $0x150] sm:$0xf] }
  0x78   : > { %3433 = vmatpush.bf16.msra.mxu3 %v13765_v27  ;;  %v18040_v43 = vld [vmem:[%s19977_s7 + $0x8f4] sm:$0xf0]  ;;  %v13652_v44 = vld [vmem:[%s19977_s7 + $0xc40] sm:$0xf]  ;;  %v12757_v47 = vor.u32 %v17928_v41, %v12756_v39  ;;  %v17802_v50 = vld [vmem:[%s19977_s7 + $0x184] sm:$0xf0] }
  0x79   : > { %v18152_v45 = vld [vmem:[%s19977_s7 + $0xc74] sm:$0xf0]  ;;  %3395 = vmatpush.bf16.msra.mxu0 %v12365_v31  ;;  %v13205_v48 = vor.u32 %v18040_v43, %v13204_v42  ;;  %v12700_v51 = vld [vmem:[%s19977_s7 + $0x4d0] sm:$0xf]  ;;  %v17914_v53 = vld [vmem:[%s19977_s7 + $0x504] sm:$0xf0]  ;;  %v12253_v58 = vor.u32 %v17802_v50, %v12252_v49 }
  0x7a   : > { %3408 = vmatpush.bf16.msra.mxu1 %v12813_v35  ;;  %v13653_v52 = vor.u32 %v18152_v45, %v13652_v44  ;;  %v13148_v54 = vld [vmem:[%s19977_s7 + $0x850] sm:$0xf]  ;;  %v18026_v55 = vld [vmem:[%s19977_s7 + $0x884] sm:$0xf0]  ;;  %v12701_v59 = vor.u32 %v17914_v53, %v12700_v51  ;;  %v12196_v61 = vld [vmem:[%s19977_s7 + $0xe0] sm:$0xf] }
  0x7b   : > { %3421 = vmatpush.bf16.msra.mxu2 %v13261_v36  ;;  %v13596_v56 = vld [vmem:[%s19977_s7 + $0xbd0] sm:$0xf]  ;;  %v18138_v57 = vld [vmem:[%s19977_s7 + $0xc04] sm:$0xf0]  ;;  %v13149_v60 = vor.u32 %v18026_v55, %v13148_v54  ;;  %v17788_v62 = vld [vmem:[%s19977_s7 + $0x114] sm:$0xf0] }
  0x7c   : > { %3434 = vmatpush.bf16.msra.mxu3 %v13709_v40  ;;  %v12644_v63 = vld [vmem:[%s19977_s7 + $0x460] sm:$0xf]  ;;  %v13597_v0 = vor.u32 %v18138_v57, %v13596_v56  ;;  %v17900_v1 = vld [vmem:[%s19977_s7 + $0x494] sm:$0xf0]  ;;  %v12197_v6 = vor.u32 %v17788_v62, %v12196_v61  ;;  %v12140_v9 = vld [vmem:[%s19977_s7 + $0x70] sm:$0xf] }
  0x7d   : > { %3396 = vmatpush.bf16.msra.mxu0 %v12309_v46  ;;  %v13092_v2 = vld [vmem:[%s19977_s7 + $0x7e0] sm:$0xf]  ;;  %v18012_v3 = vld [vmem:[%s19977_s7 + $0x814] sm:$0xf0]  ;;  %v12645_v7 = vor.u32 %v17900_v1, %v12644_v63  ;;  %v17774_v10 = vld [vmem:[%s19977_s7 + $0xa4] sm:$0xf0] }
  0x7e   : > { %3409 = vmatpush.bf16.msra.mxu1 %v12757_v47  ;;  %v13540_v4 = vld [vmem:[%s19977_s7 + $0xb60] sm:$0xf]  ;;  %v18124_v5 = vld [vmem:[%s19977_s7 + $0xb94] sm:$0xf0]  ;;  %v13093_v8 = vor.u32 %v18012_v3, %v13092_v2  ;;  %v12588_v11 = vld [vmem:[%s19977_s7 + $0x3f0] sm:$0xf]  ;;  %v12141_v18 = vor.u32 %v17774_v10, %v12140_v9 }
  0x7f   : > { %3422 = vmatpush.bf16.msra.mxu2 %v13205_v48  ;;  %v13541_v12 = vor.u32 %v18124_v5, %v13540_v4  ;;  %v17886_v13 = vld [vmem:[%s19977_s7 + $0x424] sm:$0xf0]  ;;  %v13036_v14 = vld [vmem:[%s19977_s7 + $0x770] sm:$0xf]  ;;  %v12084_v19 = vld [vmem:[%s19977_s7] sm:$0xf] }
  0x80   : > { %3435 = vmatpush.bf16.msra.mxu3 %v13653_v52  ;;  %v17998_v15 = vld [vmem:[%s19977_s7 + $0x7a4] sm:$0xf0]  ;;  %v13484_v16 = vld [vmem:[%s19977_s7 + $0xaf0] sm:$0xf]  ;;  %v17760_v20 = vld [vmem:[%s19977_s7 + $0x34] sm:$0xf0]  ;;  %v12589_v21 = vor.u32 %v17886_v13, %v12588_v11 }
  0x81   : > { %3397 = vmatpush.bf16.msra.mxu0 %v12253_v58  ;;  %v18110_v17 = vld [vmem:[%s19977_s7 + $0xb24] sm:$0xf0]  ;;  %v13037_v22 = vor.u32 %v17998_v15, %v13036_v14  ;;  %v12532_v23 = vld [vmem:[%s19977_s7 + $0x380] sm:$0xf]  ;;  %v17872_v24 = vld [vmem:[%s19977_s7 + $0x3b4] sm:$0xf0]  ;;  %v12085_v33 = vor.u32 %v17760_v20, %v12084_v19 }
  0x82   : > { %3410 = vmatpush.bf16.msra.mxu1 %v12701_v59  ;;  %v12980_v25 = vld [vmem:[%s19977_s7 + $0x700] sm:$0xf]  ;;  %v13485_v26 = vor.u32 %v18110_v17, %v13484_v16  ;;  %v17984_v27 = vld [vmem:[%s19977_s7 + $0x734] sm:$0xf0]  ;;  %v17851_v30 = vld [vmem:[%s19977_s7 + $0x314] sm:$0xf]  ;;  %v12533_v37 = vor.u32 %v17872_v24, %v12532_v23 }
  0x83   : > { %3423 = vmatpush.bf16.msra.mxu2 %v13149_v60  ;;  %v13428_v28 = vld [vmem:[%s19977_s7 + $0xa80] sm:$0xf]  ;;  %v18096_v29 = vld [vmem:[%s19977_s7 + $0xab4] sm:$0xf0]  ;;  %v12478_v31 = vld [vmem:[%s19977_s7 + $0x348] sm:$0xf0]  ;;  %v12981_v38 = vor.u32 %v17984_v27, %v12980_v25 }
  0x84   : > { %3436 = vmatpush.bf16.msra.mxu3 %v13597_v0  ;;  %v17963_v32 = vld [vmem:[%s19977_s7 + $0x694] sm:$0xf]  ;;  %v12926_v34 = vld [vmem:[%s19977_s7 + $0x6c8] sm:$0xf0]  ;;  %v13429_v41 = vor.u32 %v18096_v29, %v13428_v28  ;;  %v12481_v42 = vor.u32 %v17851_v30, %v12478_v31  ;;  %v17837_v45 = vld [vmem:[%s19977_s7 + $0x2a4] sm:$0xf] }
  0x85   : > { %3398 = vmatpush.bf16.msra.mxu0 %v12197_v6  ;;  %v18075_v35 = vld [vmem:[%s19977_s7 + $0xa14] sm:$0xf]  ;;  %v13374_v36 = vld [vmem:[%s19977_s7 + $0xa48] sm:$0xf0]  ;;  %v12929_v43 = vor.u32 %v17963_v32, %v12926_v34  ;;  %v12422_v46 = vld [vmem:[%s19977_s7 + $0x2d8] sm:$0xf0] }
  0x86   : > { %3411 = vmatpush.bf16.msra.mxu1 %v12645_v7  ;;  %v18187_v39 = vld [vmem:[%s19977_s7 + $0xd94] sm:$0xf]  ;;  %v13822_v40 = vld [vmem:[%s19977_s7 + $0xdc8] sm:$0xf0]  ;;  %v13377_v44 = vor.u32 %v18075_v35, %v13374_v36  ;;  %v17949_v47 = vld [vmem:[%s19977_s7 + $0x624] sm:$0xf]  ;;  %v12425_v54 = vor.u32 %v17837_v45, %v12422_v46 }
  0x87   : > { %3424 = vmatpush.bf16.msra.mxu2 %v13093_v8  ;;  %v13825_v48 = vor.u32 %v18187_v39, %v13822_v40  ;;  %v12870_v49 = vld [vmem:[%s19977_s7 + $0x658] sm:$0xf0]  ;;  %v18061_v50 = vld [vmem:[%s19977_s7 + $0x9a4] sm:$0xf]  ;;  %v17823_v55 = vld [vmem:[%s19977_s7 + $0x234] sm:$0xf] }
  0x88   : > { %3437 = vmatpush.bf16.msra.mxu3 %v13541_v12  ;;  %v13318_v51 = vld [vmem:[%s19977_s7 + $0x9d8] sm:$0xf0]  ;;  %v18173_v52 = vld [vmem:[%s19977_s7 + $0xd24] sm:$0xf]  ;;  %v12873_v56 = vor.u32 %v17949_v47, %v12870_v49  ;;  %v12366_v58 = vld [vmem:[%s19977_s7 + $0x268] sm:$0xf0] }
  0x89   : > { %3399 = vmatpush.bf16.msra.mxu0 %v12141_v18  ;;  %v13766_v53 = vld [vmem:[%s19977_s7 + $0xd58] sm:$0xf0]  ;;  %v13321_v57 = vor.u32 %v18061_v50, %v13318_v51  ;;  %v17935_v59 = vld [vmem:[%s19977_s7 + $0x5b4] sm:$0xf]  ;;  %v12814_v60 = vld [vmem:[%s19977_s7 + $0x5e8] sm:$0xf0]  ;;  %v12369_v2 = vor.u32 %v17823_v55, %v12366_v58 }
  0x8a   : > { %3412 = vmatpush.bf16.msra.mxu1 %v12589_v21  ;;  %v13769_v61 = vor.u32 %v18173_v52, %v13766_v53  ;;  %v18047_v62 = vld [vmem:[%s19977_s7 + $0x934] sm:$0xf]  ;;  %v13262_v63 = vld [vmem:[%s19977_s7 + $0x968] sm:$0xf0]  ;;  %v12817_v3 = vor.u32 %v17935_v59, %v12814_v60  ;;  %v700_v5 = vld [vmem:[%s19970_s20 + $0x18] sm:$0xff]  ;;  %p13874_p1 = scmp.ne.s32.totalorder %s19734_s30, 4 }
  0x8b   : > { %3425 = vmatpush.bf16.msra.mxu2 %v13037_v22  ;;  %v18159_v0 = vld [vmem:[%s19977_s7 + $0xcb4] sm:$0xf]  ;;  %v13710_v1 = vld [vmem:[%s19977_s7 + $0xce8] sm:$0xf0]  ;;  %v13265_v6 = vor.u32 %v18047_v62, %v13262_v63  ;;  %v17809_v7 = vld [vmem:[%s19977_s7 + $0x1c4] sm:$0xf]  ;;  %v20099_v11 = vpack.c.bf16 %v700_v5, %v700_v5 }
  0x8c   : > { %3438 = vmatpush.bf16.msra.mxu3 %v13485_v26  ;;  %v699_v4 = vld [vmem:[%s19970_s20 + $0x10] sm:$0xff]  ;;  %v12310_v8 = vld [vmem:[%s19977_s7 + $0x1f8] sm:$0xf0]  ;;  %v17921_v9 = vld [vmem:[%s19977_s7 + $0x544] sm:$0xf]  ;;  %v13713_v12 = vor.u32 %v18159_v0, %v13710_v1  ;;  %s21301_s25 = sld [smem:[#allocation31_spill]] (!%p13874_p1) }
  0x8d   : > { %3400 = vmatpush.bf16.msra.mxu0 %v12085_v33  ;;  %v20097_v10 = vpack.c.bf16 %v699_v4, %v699_v4  ;;  %v12758_v13 = vld [vmem:[%s19977_s7 + $0x578] sm:$0xf0]  ;;  %v18033_v14 = vld [vmem:[%s19977_s7 + $0x8c4] sm:$0xf]  ;;  %v12313_v19 = vor.u32 %v17809_v7, %v12310_v8  ;;  %v698_v21 = vld [vmem:[%s19970_s20 + $0x8] sm:$0xff]  ;;  %s21302_s26 = sld [smem:[#allocation37_spill]] (!%p13874_p1) }
  0x8e   : > { %3413 = vmatpush.bf16.msra.mxu1 %v12533_v37  ;;  %v13206_v15 = vld [vmem:[%s19977_s7 + $0x8f8] sm:$0xf0]  ;;  %v18145_v16 = vld [vmem:[%s19977_s7 + $0xc44] sm:$0xf]  ;;  %v12761_v22 = vor.u32 %v17921_v9, %v12758_v13  ;;  %v17795_v24 = vld [vmem:[%s19977_s7 + $0x154] sm:$0xf]  ;;  %v20115_v27 = vpack.c.bf16 %v698_v21, %v698_v21 }
  0x8f   : > { %3426 = vmatpush.bf16.msra.mxu2 %v12981_v38  ;;  %v13654_v17 = vld [vmem:[%s19977_s7 + $0xc78] sm:$0xf0]  ;;  %v697_v18 = vld [vmem:[%s19970_s20] sm:$0xff]  ;;  %v13209_v23 = vor.u32 %v18033_v14, %v13206_v15  ;;  %v12254_v25 = vld [vmem:[%s19977_s7 + $0x188] sm:$0xf0] }
  0x90   : > { %3439 = vmatpush.bf16.msra.mxu3 %v13429_v41  ;;  %v20109_v20 = vpack.c.bf16 %v697_v18, %v697_v18  ;;  %v17907_v26 = vld [vmem:[%s19977_s7 + $0x4d4] sm:$0xf]  ;;  %v13657_v28 = vor.u32 %v18145_v16, %v13654_v17  ;;  %v12702_v29 = vld [vmem:[%s19977_s7 + $0x508] sm:$0xf0]  ;;  %v12257_v34 = vor.u32 %v17795_v24, %v12254_v25  ;;  %v17781_v37 = vld [vmem:[%s19977_s7 + $0xe4] sm:$0xf] }
  0x91   : > { %3445 = vmatpush.bf16.msrb.mxu0 %v12481_v42  ;;  %v18019_v30 = vld [vmem:[%s19977_s7 + $0x854] sm:$0xf]  ;;  %v13150_v31 = vld [vmem:[%s19977_s7 + $0x888] sm:$0xf0]  ;;  %3414 = vmatmul.bf16.vlgmr.msra.gmra.mxu1 %v20115_v27  ;;  %v12705_v35 = vor.u32 %v17907_v26, %v12702_v29  ;;  %v12198_v38 = vld [vmem:[%s19977_s7 + $0x118] sm:$0xf0] }
  0x92   : > { %3458 = vmatpush.bf16.msrb.mxu1 %v12929_v43  ;;  %3427 = vmatmul.bf16.vlgmr.msra.gmra.mxu2 %v20097_v10  ;;  %v18131_v32 = vld [vmem:[%s19977_s7 + $0xbd4] sm:$0xf]  ;;  %v13598_v33 = vld [vmem:[%s19977_s7 + $0xc08] sm:$0xf0]  ;;  %v13153_v36 = vor.u32 %v18019_v30, %v13150_v31  ;;  %v17893_v39 = vld [vmem:[%s19977_s7 + $0x464] sm:$0xf]  ;;  %v12201_v46 = vor.u32 %v17781_v37, %v12198_v38 }
  0x93   : > { %3471 = vmatpush.bf16.msrb.mxu2 %v13377_v44  ;;  %3440 = vmatmul.bf16.vlgmr.msra.gmra.mxu3 %v20099_v11  ;;  %v13601_v40 = vor.u32 %v18131_v32, %v13598_v33  ;;  %v12646_v41 = vld [vmem:[%s19977_s7 + $0x498] sm:$0xf0]  ;;  %v18005_v42 = vld [vmem:[%s19977_s7 + $0x7e4] sm:$0xf]  ;;  %v17767_v49 = vld [vmem:[%s19977_s7 + $0x74] sm:$0xf] }
  0x94   : > { %3484 = vmatpush.bf16.msrb.mxu3 %v13825_v48  ;;  %3401 = vmatmul.bf16.vlgmr.msra.gmra.mxu0 %v20109_v20  ;;  %v13094_v43 = vld [vmem:[%s19977_s7 + $0x818] sm:$0xf0]  ;;  %v18117_v44 = vld [vmem:[%s19977_s7 + $0xb64] sm:$0xf]  ;;  %v12649_v47 = vor.u32 %v17893_v39, %v12646_v41  ;;  %v12142_v50 = vld [vmem:[%s19977_s7 + $0xa8] sm:$0xf0] }
  0x95   : > { %3446 = vmatpush.bf16.msrb.mxu0 %v12425_v54  ;;  %v13542_v45 = vld [vmem:[%s19977_s7 + $0xb98] sm:$0xf0]  ;;  %v13097_v48 = vor.u32 %v18005_v42, %v13094_v43  ;;  %v17879_v51 = vld [vmem:[%s19977_s7 + $0x3f4] sm:$0xf]  ;;  %v12590_v53 = vld [vmem:[%s19977_s7 + $0x428] sm:$0xf0]  ;;  %v12145_v58 = vor.u32 %v17767_v49, %v12142_v50 }
  0x96   : > { %3459 = vmatpush.bf16.msrb.mxu1 %v12873_v56  ;;  %v13545_v52 = vor.u32 %v18117_v44, %v13542_v45  ;;  %v17991_v54 = vld [vmem:[%s19977_s7 + $0x774] sm:$0xf]  ;;  %v13038_v55 = vld [vmem:[%s19977_s7 + $0x7a8] sm:$0xf0]  ;;  %v17753_v59 = vld [vmem:[%s19977_s7 + $0x4] sm:$0xf] }
  0x97   : > { %3472 = vmatpush.bf16.msrb.mxu2 %v13321_v57  ;;  %v18103_v56 = vld [vmem:[%s19977_s7 + $0xaf4] sm:$0xf]  ;;  %v13486_v57 = vld [vmem:[%s19977_s7 + $0xb28] sm:$0xf0]  ;;  %v12086_v60 = vld [vmem:[%s19977_s7 + $0x38] sm:$0xf0]  ;;  %v13041_v62 = vor.u32 %v17991_v54, %v13038_v55 }
  0x98   : > { %3485 = vmatpush.bf16.msrb.mxu3 %v13769_v61  ;;  %v12593_v61 = vor.u32 %v17879_v51, %v12590_v53  ;;  %v17865_v63 = vld [vmem:[%s19977_s7 + $0x384] sm:$0xf]  ;;  %v12534_v0 = vld [vmem:[%s19977_s7 + $0x3b8] sm:$0xf0]  ;;  %v17859_v7 = vld [vmem:[%s19977_s7 + $0x34c] sm:$0xf0]  ;;  %v12089_v9 = vor.u32 %v17753_v59, %v12086_v60 }
  0x99   : > { %3447 = vmatpush.bf16.msrb.mxu0 %v12369_v2  ;;  %v17977_v1 = vld [vmem:[%s19977_s7 + $0x704] sm:$0xf]  ;;  %v13489_v2 = vor.u32 %v18103_v56, %v13486_v57  ;;  %v13430_v5 = vld [vmem:[%s19977_s7 + $0xab8] sm:$0xf0]  ;;  %v12932_v8 = vld [vmem:[%s19977_s7 + $0x698] sm:$0xf]  ;;  %v12537_v15 = vor.u32 %v17865_v63, %v12534_v0 }
  0x9a   : > { %3460 = vmatpush.bf16.msrb.mxu1 %v12817_v3  ;;  %v12982_v3 = vld [vmem:[%s19977_s7 + $0x738] sm:$0xf0]  ;;  %v18089_v4 = vld [vmem:[%s19977_s7 + $0xa84] sm:$0xf]  ;;  %v13380_v13 = vld [vmem:[%s19977_s7 + $0xa18] sm:$0xf] }
  0x9b   : > { %3473 = vmatpush.bf16.msrb.mxu2 %v13265_v6  ;;  %v12484_v6 = vld [vmem:[%s19977_s7 + $0x318] sm:$0xf]  ;;  %v18083_v14 = vld [vmem:[%s19977_s7 + $0xa4c] sm:$0xf0]  ;;  %v12985_v16 = vor.u32 %v17977_v1, %v12982_v3  ;;  %v12428_v24 = vld [vmem:[%s19977_s7 + $0x2a8] sm:$0xf] }
  0x9c   : > { %3486 = vmatpush.bf16.msrb.mxu3 %v13713_v12  ;;  %v17971_v12 = vld [vmem:[%s19977_s7 + $0x6cc] sm:$0xf0]  ;;  %v13828_v17 = vld [vmem:[%s19977_s7 + $0xd98] sm:$0xf]  ;;  %v12485_v21 = vor.u32 %v17859_v7, %v12484_v6  ;;  %v17845_v25 = vld [vmem:[%s19977_s7 + $0x2dc] sm:$0xf0] }
  0x9d   : > { %3448 = vmatpush.bf16.msrb.mxu0 %v12313_v19  ;;  %v18195_v18 = vld [vmem:[%s19977_s7 + $0xdcc] sm:$0xf0]  ;;  %v13433_v19 = vor.u32 %v18089_v4, %v13430_v5  ;;  %v12876_v26 = vld [vmem:[%s19977_s7 + $0x628] sm:$0xf]  ;;  %v17957_v29 = vld [vmem:[%s19977_s7 + $0x65c] sm:$0xf0] }
  0x9e   : > { %3461 = vmatpush.bf16.msrb.mxu1 %v12761_v22  ;;  %v12933_v22 = vor.u32 %v17971_v12, %v12932_v8  ;;  %v13324_v30 = vld [vmem:[%s19977_s7 + $0x9a8] sm:$0xf]  ;;  %v18069_v31 = vld [vmem:[%s19977_s7 + $0x9dc] sm:$0xf0]  ;;  %v12372_v37 = vld [vmem:[%s19977_s7 + $0x238] sm:$0xf] }
  0x9f   : > { %3474 = vmatpush.bf16.msrb.mxu2 %v13209_v23  ;;  %v13381_v23 = vor.u32 %v18083_v14, %v13380_v13  ;;  %v13772_v32 = vld [vmem:[%s19977_s7 + $0xd28] sm:$0xf]  ;;  %v18181_v33 = vld [vmem:[%s19977_s7 + $0xd5c] sm:$0xf0]  ;;  %v17831_v38 = vld [vmem:[%s19977_s7 + $0x26c] sm:$0xf0] }
  0xa0   : > { %3487 = vmatpush.bf16.msrb.mxu3 %v13657_v28  ;;  %v13829_v28 = vor.u32 %v18195_v18, %v13828_v17  ;;  %v12820_v39 = vld [vmem:[%s19977_s7 + $0x5b8] sm:$0xf]  ;;  %v17943_v41 = vld [vmem:[%s19977_s7 + $0x5ec] sm:$0xf0]  ;;  %v12316_v49 = vld [vmem:[%s19977_s7 + $0x1c8] sm:$0xf] }
  0xa1   : > { %3449 = vmatpush.bf16.msrb.mxu0 %v12257_v34  ;;  %v12429_v34 = vor.u32 %v17845_v25, %v12428_v24  ;;  %v13268_v42 = vld [vmem:[%s19977_s7 + $0x938] sm:$0xf]  ;;  %v18055_v43 = vld [vmem:[%s19977_s7 + $0x96c] sm:$0xf0]  ;;  %v17817_v50 = vld [vmem:[%s19977_s7 + $0x1fc] sm:$0xf0] }
  0xa2   : > { %3462 = vmatpush.bf16.msrb.mxu1 %v12705_v35  ;;  %v12877_v35 = vor.u32 %v17957_v29, %v12876_v26  ;;  %v13716_v44 = vld [vmem:[%s19977_s7 + $0xcb8] sm:$0xf]  ;;  %v18167_v45 = vld [vmem:[%s19977_s7 + $0xcec] sm:$0xf0]  ;;  %v12764_v51 = vld [vmem:[%s19977_s7 + $0x548] sm:$0xf] }
  0xa3   : > { %3475 = vmatpush.bf16.msrb.mxu2 %v13153_v36  ;;  %v13325_v36 = vor.u32 %v18069_v31, %v13324_v30  ;;  %v17929_v53 = vld [vmem:[%s19977_s7 + $0x57c] sm:$0xf0]  ;;  %v13212_v54 = vld [vmem:[%s19977_s7 + $0x8c8] sm:$0xf]  ;;  %v12708_v63 = vld [vmem:[%s19977_s7 + $0x4d8] sm:$0xf] }
  0xa4   : > { %3488 = vmatpush.bf16.msrb.mxu3 %v13601_v40  ;;  %v13773_v40 = vor.u32 %v18181_v33, %v13772_v32  ;;  %v18041_v55 = vld [vmem:[%s19977_s7 + $0x8fc] sm:$0xf0]  ;;  %v13660_v56 = vld [vmem:[%s19977_s7 + $0xc48] sm:$0xf]  ;;  %v12765_v59 = vor.u32 %v17929_v53, %v12764_v51  ;;  %v17915_v1 = vld [vmem:[%s19977_s7 + $0x50c] sm:$0xf0] }
  0xa5   : > { %3450 = vmatpush.bf16.msrb.mxu0 %v12201_v46  ;;  %v12373_v46 = vor.u32 %v17831_v38, %v12372_v37  ;;  %v18153_v57 = vld [vmem:[%s19977_s7 + $0xc7c] sm:$0xf0]  ;;  %v13213_v60 = vor.u32 %v18041_v55, %v13212_v54  ;;  %v18027_v3 = vld [vmem:[%s19977_s7 + $0x88c] sm:$0xf0]  ;;  %v13604_v4 = vld [vmem:[%s19977_s7 + $0xbd8] sm:$0xf]  ;;  %v12709_v7 = vor.u32 %v17915_v1, %v12708_v63 }
  0xa6   : > { %3463 = vmatpush.bf16.msrb.mxu1 %v12649_v47  ;;  %v12821_v47 = vor.u32 %v17943_v41, %v12820_v39  ;;  %v13661_v0 = vor.u32 %v18153_v57, %v13660_v56  ;;  %v18139_v5 = vld [vmem:[%s19977_s7 + $0xc0c] sm:$0xf0]  ;;  %v17789_v12 = vld [vmem:[%s19977_s7 + $0x11c] sm:$0xf0]  ;;  %v12652_v13 = vld [vmem:[%s19977_s7 + $0x468] sm:$0xf] }
  0xa7   : > { %3476 = vmatpush.bf16.msrb.mxu2 %v13097_v48  ;;  %v13269_v48 = vor.u32 %v18055_v43, %v13268_v42  ;;  %v13605_v14 = vor.u32 %v18139_v5, %v13604_v4  ;;  %v18013_v17 = vld [vmem:[%s19977_s7 + $0x81c] sm:$0xf0]  ;;  %v13548_v18 = vld [vmem:[%s19977_s7 + $0xb68] sm:$0xf]  ;;  %v12148_v24 = vld [vmem:[%s19977_s7 + $0x78] sm:$0xf] }
  0xa8   : > { %3489 = vmatpush.bf16.msrb.mxu3 %v13545_v52  ;;  %v13717_v52 = vor.u32 %v18167_v45, %v13716_v44  ;;  %v17775_v25 = vld [vmem:[%s19977_s7 + $0xac] sm:$0xf0]  ;;  %v12596_v26 = vld [vmem:[%s19977_s7 + $0x3f8] sm:$0xf]  ;;  %v12540_v39 = vld [vmem:[%s19977_s7 + $0x388] sm:$0xf] }
  0xa9   : > { %3451 = vmatpush.bf16.msrb.mxu0 %v12145_v58  ;;  %v12317_v58 = vor.u32 %v17817_v50, %v12316_v49  ;;  %v17887_v29 = vld [vmem:[%s19977_s7 + $0x42c] sm:$0xf0]  ;;  %v13044_v30 = vld [vmem:[%s19977_s7 + $0x778] sm:$0xf]  ;;  %v12988_v41 = vld [vmem:[%s19977_s7 + $0x708] sm:$0xf] }
  0xaa   : > { %3464 = vmatpush.bf16.msrb.mxu1 %v12593_v61  ;;  %v12260_v61 = vld [vmem:[%s19977_s7 + $0x158] sm:$0xf]  ;;  %v17999_v31 = vld [vmem:[%s19977_s7 + $0x7ac] sm:$0xf0]  ;;  %v12597_v37 = vor.u32 %v17887_v29, %v12596_v26  ;;  %v17985_v43 = vld [vmem:[%s19977_s7 + $0x73c] sm:$0xf0] }
  0xab   : > { %3477 = vmatpush.bf16.msrb.mxu2 %v13041_v62  ;;  %v17803_v62 = vld [vmem:[%s19977_s7 + $0x18c] sm:$0xf0]  ;;  %v13492_v32 = vld [vmem:[%s19977_s7 + $0xaf8] sm:$0xf]  ;;  %v13045_v38 = vor.u32 %v17999_v31, %v13044_v30  ;;  %v13436_v44 = vld [vmem:[%s19977_s7 + $0xa88] sm:$0xf]  ;;  %v12989_v54 = vor.u32 %v17985_v43, %v12988_v41 }
  0xac   : > { %3490 = vmatpush.bf16.msrb.mxu3 %v13489_v2  ;;  %v13156_v2 = vld [vmem:[%s19977_s7 + $0x858] sm:$0xf]  ;;  %v12261_v6 = vor.u32 %v17803_v62, %v12260_v61  ;;  %v18111_v33 = vld [vmem:[%s19977_s7 + $0xb2c] sm:$0xf0]  ;;  %v18097_v45 = vld [vmem:[%s19977_s7 + $0xabc] sm:$0xf0] }
  0xad   : > { %3452 = vmatpush.bf16.msrb.mxu0 %v12089_v9  ;;  %v13157_v8 = vor.u32 %v18027_v3, %v13156_v2  ;;  %v12204_v9 = vld [vmem:[%s19977_s7 + $0xe8] sm:$0xf]  ;;  %v13493_v42 = vor.u32 %v18111_v33, %v13492_v32  ;;  %v12934_v50 = vld [vmem:[%s19977_s7 + $0x6d0] sm:$0xf0]  ;;  %v18076_v51 = vld [vmem:[%s19977_s7 + $0xa1c] sm:$0xf]  ;;  %v13437_v57 = vor.u32 %v18097_v45, %v13436_v44 }
  0xae   : > { %3465 = vmatpush.bf16.msrb.mxu1 %v12537_v15  ;;  %v17901_v15 = vld [vmem:[%s19977_s7 + $0x49c] sm:$0xf0]  ;;  %v18188_v55 = vld [vmem:[%s19977_s7 + $0xd9c] sm:$0xf]  ;;  %v13830_v56 = vld [vmem:[%s19977_s7 + $0xdd0] sm:$0xf0] }
  0xaf   : > { %3478 = vmatpush.bf16.msrb.mxu2 %v12985_v16  ;;  %v13100_v16 = vld [vmem:[%s19977_s7 + $0x7e8] sm:$0xf]  ;;  %v17838_v61 = vld [vmem:[%s19977_s7 + $0x2ac] sm:$0xf]  ;;  %v12430_v62 = vld [vmem:[%s19977_s7 + $0x2e0] sm:$0xf0] }
  0xb0   : > { %3491 = vmatpush.bf16.msrb.mxu3 %v13433_v19  ;;  %3453 = vmatmul.bf16.vlgmr.msrb.gmra.mxu0 %v20109_v20  ;;  %v18125_v19 = vld [vmem:[%s19977_s7 + $0xb9c] sm:$0xf0]  ;;  %v17950_v63 = vld [vmem:[%s19977_s7 + $0x62c] sm:$0xf]  ;;  %v12878_v1 = vld [vmem:[%s19977_s7 + $0x660] sm:$0xf0] }
  0xb1   : > { %3497 = vmatpush.bf16.msra.mxu0 %v12485_v21  ;;  %3466 = vmatmul.bf16.vlgmr.msrb.gmra.mxu1 %v20115_v27  ;;  %v12205_v21 = vor.u32 %v17789_v12, %v12204_v9  ;;  %v18062_v2 = vld [vmem:[%s19977_s7 + $0x9ac] sm:$0xf]  ;;  %v13326_v3 = vld [vmem:[%s19977_s7 + $0x9e0] sm:$0xf0]  ;;  %v17824_v9 = vld [vmem:[%s19977_s7 + $0x23c] sm:$0xf] }
  0xb2   : > { %3510 = vmatpush.bf16.msra.mxu1 %v12933_v22  ;;  %3479 = vmatmul.bf16.vlgmr.msrb.gmra.mxu2 %v20097_v10  ;;  %v12653_v22 = vor.u32 %v17901_v15, %v12652_v13  ;;  %v18174_v4 = vld [vmem:[%s19977_s7 + $0xd2c] sm:$0xf]  ;;  %v13774_v5 = vld [vmem:[%s19977_s7 + $0xd60] sm:$0xf0]  ;;  %v12374_v12 = vld [vmem:[%s19977_s7 + $0x270] sm:$0xf0] }
  0xb3   : > { %3523 = vmatpush.bf16.msra.mxu2 %v13381_v23  ;;  %3492 = vmatmul.bf16.vlgmr.msrb.gmra.mxu3 %v20099_v11  ;;  %v13101_v23 = vor.u32 %v18013_v17, %v13100_v16  ;;  %v17936_v13 = vld [vmem:[%s19977_s7 + $0x5bc] sm:$0xf]  ;;  %v12822_v15 = vld [vmem:[%s19977_s7 + $0x5f0] sm:$0xf0]  ;;  %v17922_v26 = vld [vmem:[%s19977_s7 + $0x54c] sm:$0xf] }
  0xb4   : > { %3536 = vmatpush.bf16.msra.mxu3 %v13829_v28  ;;  %v13549_v28 = vor.u32 %v18125_v19, %v13548_v18  ;;  %v18048_v16 = vld [vmem:[%s19977_s7 + $0x93c] sm:$0xf]  ;;  %v13270_v17 = vld [vmem:[%s19977_s7 + $0x970] sm:$0xf0]  ;;  %v12766_v29 = vld [vmem:[%s19977_s7 + $0x580] sm:$0xf0] }
  0xb5   : > { %3498 = vmatpush.bf16.msra.mxu0 %v12429_v34  ;;  %v12149_v34 = vor.u32 %v17775_v25, %v12148_v24  ;;  %v18160_v18 = vld [vmem:[%s19977_s7 + $0xcbc] sm:$0xf]  ;;  %v13718_v19 = vld [vmem:[%s19977_s7 + $0xcf0] sm:$0xf0]  ;;  %v17810_v24 = vld [vmem:[%s19977_s7 + $0x1cc] sm:$0xf] }
  0xb6   : > { %3511 = vmatpush.bf16.msra.mxu1 %v12877_v35  ;;  %v12092_v35 = vld [vmem:[%s19977_s7 + $0x8] sm:$0xf]  ;;  %v12318_v25 = vld [vmem:[%s19977_s7 + $0x200] sm:$0xf0]  ;;  %v18034_v30 = vld [vmem:[%s19977_s7 + $0x8cc] sm:$0xf] }
  0xb7   : > { %3524 = vmatpush.bf16.msra.mxu2 %v13325_v36  ;;  %v17761_v36 = vld [vmem:[%s19977_s7 + $0x3c] sm:$0xf0]  ;;  %v13214_v31 = vld [vmem:[%s19977_s7 + $0x900] sm:$0xf0]  ;;  %v18146_v32 = vld [vmem:[%s19977_s7 + $0xc4c] sm:$0xf] }
  0xb8   : > { %3537 = vmatpush.bf16.msra.mxu3 %v13773_v40  ;;  %v17873_v40 = vld [vmem:[%s19977_s7 + $0x3bc] sm:$0xf0]  ;;  %v12093_v49 = vor.u32 %v17761_v36, %v12092_v35  ;;  %v13662_v33 = vld [vmem:[%s19977_s7 + $0xc80] sm:$0xf0]  ;;  %v12769_v35 = vor.u32 %v17922_v26, %v12766_v29  ;;  %v13217_v36 = vor.u32 %v18034_v30, %v13214_v31  ;;  %v12710_v41 = vld [vmem:[%s19977_s7 + $0x510] sm:$0xf0] }
  0xb9   : > { %3499 = vmatpush.bf16.msra.mxu0 %v12373_v46  ;;  %v17852_v46 = vld [vmem:[%s19977_s7 + $0x31c] sm:$0xf]  ;;  %v12541_v53 = vor.u32 %v17873_v40, %v12540_v39  ;;  %v13665_v40 = vor.u32 %v18146_v32, %v13662_v33  ;;  %v13158_v43 = vld [vmem:[%s19977_s7 + $0x890] sm:$0xf0]  ;;  %v13388_v26 = vld [vmem:[%s19977_s7 + $0xa20] sm:$0xf] }
  0xba   : > { %3512 = vmatpush.bf16.msra.mxu1 %v12821_v47  ;;  %v12486_v47 = vld [vmem:[%s19977_s7 + $0x350] sm:$0xf0]  ;;  %v17908_v39 = vld [vmem:[%s19977_s7 + $0x4dc] sm:$0xf]  ;;  %v13836_v31 = vld [vmem:[%s19977_s7 + $0xda0] sm:$0xf] }
  0xbb   : > { %3525 = vmatpush.bf16.msra.mxu2 %v13269_v48  ;;  %v17964_v48 = vld [vmem:[%s19977_s7 + $0x69c] sm:$0xf]  ;;  %v13606_v45 = vld [vmem:[%s19977_s7 + $0xc10] sm:$0xf0]  ;;  %v18196_v32 = vld [vmem:[%s19977_s7 + $0xdd4] sm:$0xf0] }
  0xbc   : > { %3538 = vmatpush.bf16.msra.mxu3 %v13717_v52  ;;  %v13382_v52 = vld [vmem:[%s19977_s7 + $0xa50] sm:$0xf0]  ;;  %v18132_v44 = vld [vmem:[%s19977_s7 + $0xbdc] sm:$0xf] }
  0xbd   : > { %3500 = vmatpush.bf16.msra.mxu0 %v12317_v58  ;;  %v12489_v58 = vor.u32 %v17852_v46, %v12486_v47  ;;  %v12713_v47 = vor.u32 %v17908_v39, %v12710_v41  ;;  %v12884_v39 = vld [vmem:[%s19977_s7 + $0x630] sm:$0xf]  ;;  %v17958_v41 = vld [vmem:[%s19977_s7 + $0x664] sm:$0xf0] }
  0xbe   : > { %3513 = vmatpush.bf16.msra.mxu1 %v12765_v59  ;;  %v12937_v59 = vor.u32 %v17964_v48, %v12934_v50  ;;  %v12206_v50 = vld [vmem:[%s19977_s7 + $0x120] sm:$0xf0] }
  0xbf   : > { %3526 = vmatpush.bf16.msra.mxu2 %v13213_v60  ;;  %v13385_v60 = vor.u32 %v18076_v51, %v13382_v52  ;;  %v17894_v51 = vld [vmem:[%s19977_s7 + $0x46c] sm:$0xf]  ;;  %v13609_v52 = vor.u32 %v18132_v44, %v13606_v45  ;;  %v13780_v44 = vld [vmem:[%s19977_s7 + $0xd30] sm:$0xf]  ;;  %v18182_v45 = vld [vmem:[%s19977_s7 + $0xd64] sm:$0xf0] }
  0xc0   : > { %3539 = vmatpush.bf16.msra.mxu3 %v13661_v0  ;;  %v13833_v0 = vor.u32 %v18188_v55, %v13830_v56  ;;  %v13102_v55 = vld [vmem:[%s19977_s7 + $0x820] sm:$0xf0]  ;;  %v18118_v56 = vld [vmem:[%s19977_s7 + $0xb6c] sm:$0xf] }
  0xc1   : > { %3501 = vmatpush.bf16.msra.mxu0 %v12261_v6  ;;  %v12433_v6 = vor.u32 %v17838_v61, %v12430_v62  ;;  %v17768_v61 = vld [vmem:[%s19977_s7 + $0x7c] sm:$0xf]  ;;  %v12150_v62 = vld [vmem:[%s19977_s7 + $0xb0] sm:$0xf0] }
  0xc2   : > { %3514 = vmatpush.bf16.msra.mxu1 %v12709_v7  ;;  %v12881_v7 = vor.u32 %v17950_v63, %v12878_v1  ;;  %v17880_v63 = vld [vmem:[%s19977_s7 + $0x3fc] sm:$0xf]  ;;  %v12598_v1 = vld [vmem:[%s19977_s7 + $0x430] sm:$0xf0] }
  0xc3   : > { %3527 = vmatpush.bf16.msra.mxu2 %v13157_v8  ;;  %v13329_v8 = vor.u32 %v18062_v2, %v13326_v3  ;;  %v17992_v2 = vld [vmem:[%s19977_s7 + $0x77c] sm:$0xf]  ;;  %v13046_v3 = vld [vmem:[%s19977_s7 + $0x7b0] sm:$0xf0] }
  0xc4   : > { %3540 = vmatpush.bf16.msra.mxu3 %v13605_v14  ;;  %v13777_v14 = vor.u32 %v18174_v4, %v13774_v5  ;;  %v18104_v4 = vld [vmem:[%s19977_s7 + $0xafc] sm:$0xf]  ;;  %v13494_v5 = vld [vmem:[%s19977_s7 + $0xb30] sm:$0xf0] }
  0xc5   : > { %3502 = vmatpush.bf16.msra.mxu0 %v12205_v21  ;;  %v12377_v21 = vor.u32 %v17824_v9, %v12374_v12  ;;  %v12601_v9 = vor.u32 %v17880_v63, %v12598_v1  ;;  %v13049_v12 = vor.u32 %v17992_v2, %v13046_v3  ;;  %v12772_v63 = vld [vmem:[%s19977_s7 + $0x550] sm:$0xf]  ;;  %v17930_v1 = vld [vmem:[%s19977_s7 + $0x584] sm:$0xf0] }
  0xc6   : > { %3515 = vmatpush.bf16.msra.mxu1 %v12653_v22  ;;  %v12825_v22 = vor.u32 %v17936_v13, %v12822_v15  ;;  %v17866_v13 = vld [vmem:[%s19977_s7 + $0x38c] sm:$0xf]  ;;  %v13220_v2 = vld [vmem:[%s19977_s7 + $0x8d0] sm:$0xf]  ;;  %v18042_v3 = vld [vmem:[%s19977_s7 + $0x904] sm:$0xf0] }
  0xc7   : > { %3528 = vmatpush.bf16.msra.mxu2 %v13101_v23  ;;  %v13273_v23 = vor.u32 %v18048_v16, %v13270_v17  ;;  %v17978_v15 = vld [vmem:[%s19977_s7 + $0x70c] sm:$0xf]  ;;  %v13497_v16 = vor.u32 %v18104_v4, %v13494_v5  ;;  %v12990_v17 = vld [vmem:[%s19977_s7 + $0x740] sm:$0xf0]  ;;  %v13668_v4 = vld [vmem:[%s19977_s7 + $0xc50] sm:$0xf] }
  0xc8   : > { %3541 = vmatpush.bf16.msra.mxu3 %v13549_v28  ;;  %v13721_v28 = vor.u32 %v18160_v18, %v13718_v19  ;;  %v18090_v18 = vld [vmem:[%s19977_s7 + $0xa8c] sm:$0xf]  ;;  %v13438_v19 = vld [vmem:[%s19977_s7 + $0xac0] sm:$0xf0]  ;;  %v12993_v30 = vor.u32 %v17978_v15, %v12990_v17  ;;  %v18154_v5 = vld [vmem:[%s19977_s7 + $0xc84] sm:$0xf0] }
  0xc9   : > { %3503 = vmatpush.bf16.msra.mxu0 %v12149_v34  ;;  %v12321_v34 = vor.u32 %v17810_v24, %v12318_v25  ;;  %v17972_v25 = vld [vmem:[%s19977_s7 + $0x6d4] sm:$0xf0]  ;;  %v13441_v33 = vor.u32 %v18090_v18, %v13438_v19  ;;  %v13612_v18 = vld [vmem:[%s19977_s7 + $0xbe0] sm:$0xf] }
  0xca   : > { %3516 = vmatpush.bf16.msra.mxu1 %v12597_v37  ;;  %v17796_v37 = vld [vmem:[%s19977_s7 + $0x15c] sm:$0xf]  ;;  %v17916_v15 = vld [vmem:[%s19977_s7 + $0x514] sm:$0xf0] }
  0xcb   : > { %3529 = vmatpush.bf16.msra.mxu2 %v13045_v38  ;;  %v12262_v38 = vld [vmem:[%s19977_s7 + $0x190] sm:$0xf0]  ;;  %v18028_v17 = vld [vmem:[%s19977_s7 + $0x894] sm:$0xf0] }
  0xcc   : > { %3542 = vmatpush.bf16.msra.mxu3 %v13493_v42  ;;  %v18020_v42 = vld [vmem:[%s19977_s7 + $0x85c] sm:$0xf]  ;;  %v12265_v46 = vor.u32 %v17796_v37, %v12262_v38  ;;  %v12436_v37 = vld [vmem:[%s19977_s7 + $0x2b0] sm:$0xf]  ;;  %v17846_v38 = vld [vmem:[%s19977_s7 + $0x2e4] sm:$0xf0] }
  0xcd   : > { %3504 = vmatpush.bf16.msra.mxu0 %v12093_v49  ;;  %v13161_v48 = vor.u32 %v18020_v42, %v13158_v43  ;;  %v17782_v49 = vld [vmem:[%s19977_s7 + $0xec] sm:$0xf]  ;;  %v13332_v42 = vld [vmem:[%s19977_s7 + $0x9b0] sm:$0xf]  ;;  %v18070_v43 = vld [vmem:[%s19977_s7 + $0x9e4] sm:$0xf0] }
  0xce   : > { %3517 = vmatpush.bf16.msra.mxu1 %v12541_v53  ;;  %v12654_v53 = vld [vmem:[%s19977_s7 + $0x4a0] sm:$0xf0]  ;;  %v18140_v19 = vld [vmem:[%s19977_s7 + $0xc14] sm:$0xf0] }
  0xcf   : > { %3530 = vmatpush.bf16.msra.mxu2 %v12989_v54  ;;  %v18006_v54 = vld [vmem:[%s19977_s7 + $0x7ec] sm:$0xf] }
  0xd0   : > { %3543 = vmatpush.bf16.msra.mxu3 %v13437_v57  ;;  %3505 = vmatmul.bf16.vlgmr.msra.gmra.mxu0 %v20109_v20  ;;  %v13550_v57 = vld [vmem:[%s19977_s7 + $0xba0] sm:$0xf0] }
  0xd1   : > { %3549 = vmatpush.bf16.msrb.mxu0 %v12489_v58  ;;  %3518 = vmatmul.bf16.vlgmr.msra.gmra.mxu1 %v20115_v27  ;;  %v12209_v58 = vor.u32 %v17782_v49, %v12206_v50  ;;  %v12380_v49 = vld [vmem:[%s19977_s7 + $0x240] sm:$0xf]  ;;  %v17832_v50 = vld [vmem:[%s19977_s7 + $0x274] sm:$0xf0] }
  0xd2   : > { %3562 = vmatpush.bf16.msrb.mxu1 %v12937_v59  ;;  %3531 = vmatmul.bf16.vlgmr.msra.gmra.mxu2 %v20097_v10  ;;  %v12657_v59 = vor.u32 %v17894_v51, %v12654_v53  ;;  %v12828_v51 = vld [vmem:[%s19977_s7 + $0x5c0] sm:$0xf]  ;;  %v17944_v53 = vld [vmem:[%s19977_s7 + $0x5f4] sm:$0xf0] }
  0xd3   : > { %3575 = vmatpush.bf16.msrb.mxu2 %v13385_v60  ;;  %3544 = vmatmul.bf16.vlgmr.msra.gmra.mxu3 %v20099_v11  ;;  %v13105_v60 = vor.u32 %v18006_v54, %v13102_v55  ;;  %v13276_v54 = vld [vmem:[%s19977_s7 + $0x940] sm:$0xf]  ;;  %v18056_v55 = vld [vmem:[%s19977_s7 + $0x974] sm:$0xf0] }
  0xd4   : > { %3588 = vmatpush.bf16.msrb.mxu3 %v13833_v0  ;;  %v13553_v0 = vor.u32 %v18118_v56, %v13550_v57  ;;  %v13724_v56 = vld [vmem:[%s19977_s7 + $0xcc0] sm:$0xf]  ;;  %v18168_v57 = vld [vmem:[%s19977_s7 + $0xcf4] sm:$0xf0] }
  0xd5   : > { %3550 = vmatpush.bf16.msrb.mxu0 %v12433_v6  ;;  %v12153_v6 = vor.u32 %v17768_v61, %v12150_v62  ;;  %v12324_v61 = vld [vmem:[%s19977_s7 + $0x1d0] sm:$0xf]  ;;  %v17818_v62 = vld [vmem:[%s19977_s7 + $0x204] sm:$0xf0] }
  0xd6   : > { %3563 = vmatpush.bf16.msrb.mxu1 %v12881_v7  ;;  %v17754_v7 = vld [vmem:[%s19977_s7 + $0xc] sm:$0xf] }
  0xd7   : > { %3576 = vmatpush.bf16.msrb.mxu2 %v13329_v8  ;;  %v12094_v8 = vld [vmem:[%s19977_s7 + $0x40] sm:$0xf0] }
  0xd8   : > { %3589 = vmatpush.bf16.msrb.mxu3 %v13777_v14  ;;  %v12542_v14 = vld [vmem:[%s19977_s7 + $0x3c0] sm:$0xf0]  ;;  %v12097_v24 = vor.u32 %v17754_v7, %v12094_v8  ;;  %v12773_v7 = vor.u32 %v17930_v1, %v12772_v63  ;;  %v13221_v8 = vor.u32 %v18042_v3, %v13220_v2 }
  0xd9   : > { %3551 = vmatpush.bf16.msrb.mxu0 %v12377_v21  ;;  %v12492_v21 = vld [vmem:[%s19977_s7 + $0x320] sm:$0xf]  ;;  %v12545_v29 = vor.u32 %v17866_v13, %v12542_v14  ;;  %v13669_v14 = vor.u32 %v18154_v5, %v13668_v4  ;;  %v18077_v63 = vld [vmem:[%s19977_s7 + $0xa24] sm:$0xf]  ;;  %v13838_v4 = vld [vmem:[%s19977_s7 + $0xdd8] sm:$0xf0] }
  0xda   : > { %3564 = vmatpush.bf16.msrb.mxu1 %v12825_v22  ;;  %v17860_v22 = vld [vmem:[%s19977_s7 + $0x354] sm:$0xf0]  ;;  %v12716_v13 = vld [vmem:[%s19977_s7 + $0x4e0] sm:$0xf]  ;;  %v18189_v3 = vld [vmem:[%s19977_s7 + $0xda4] sm:$0xf] }
  0xdb   : > { %3577 = vmatpush.bf16.msrb.mxu2 %v13273_v23  ;;  %v12940_v23 = vld [vmem:[%s19977_s7 + $0x6a0] sm:$0xf] }
  0xdc   : > { %3590 = vmatpush.bf16.msrb.mxu3 %v13721_v28  ;;  %v18084_v28 = vld [vmem:[%s19977_s7 + $0xa54] sm:$0xf0] }
  0xdd   : > { %3552 = vmatpush.bf16.msrb.mxu0 %v12321_v34  ;;  %v12493_v34 = vor.u32 %v17860_v22, %v12492_v21  ;;  %v12717_v22 = vor.u32 %v17916_v15, %v12716_v13  ;;  %v17951_v13 = vld [vmem:[%s19977_s7 + $0x634] sm:$0xf]  ;;  %v12886_v15 = vld [vmem:[%s19977_s7 + $0x668] sm:$0xf0] }
  0xde   : > { %3565 = vmatpush.bf16.msrb.mxu1 %v12769_v35  ;;  %v12941_v35 = vor.u32 %v17972_v25, %v12940_v23  ;;  %v17790_v25 = vld [vmem:[%s19977_s7 + $0x124] sm:$0xf0] }
  0xdf   : > { %3578 = vmatpush.bf16.msrb.mxu2 %v13217_v36  ;;  %v13389_v36 = vor.u32 %v18084_v28, %v13388_v26  ;;  %v12660_v26 = vld [vmem:[%s19977_s7 + $0x470] sm:$0xf]  ;;  %v13613_v28 = vor.u32 %v18140_v19, %v13612_v18  ;;  %v18175_v18 = vld [vmem:[%s19977_s7 + $0xd34] sm:$0xf]  ;;  %v13782_v19 = vld [vmem:[%s19977_s7 + $0xd68] sm:$0xf0] }
  0xe0   : > { %3591 = vmatpush.bf16.msrb.mxu3 %v13665_v40  ;;  %v13837_v40 = vor.u32 %v18196_v32, %v13836_v31  ;;  %v18014_v31 = vld [vmem:[%s19977_s7 + $0x824] sm:$0xf0]  ;;  %v13556_v32 = vld [vmem:[%s19977_s7 + $0xb70] sm:$0xf] }
  0xe1   : > { %3553 = vmatpush.bf16.msrb.mxu0 %v12265_v46  ;;  %v12437_v46 = vor.u32 %v17846_v38, %v12436_v37  ;;  %v12156_v37 = vld [vmem:[%s19977_s7 + $0x80] sm:$0xf]  ;;  %v17776_v38 = vld [vmem:[%s19977_s7 + $0xb4] sm:$0xf0] }
  0xe2   : > { %3566 = vmatpush.bf16.msrb.mxu1 %v12713_v47  ;;  %v12885_v47 = vor.u32 %v17958_v41, %v12884_v39  ;;  %v12604_v39 = vld [vmem:[%s19977_s7 + $0x400] sm:$0xf]  ;;  %v17888_v41 = vld [vmem:[%s19977_s7 + $0x434] sm:$0xf0] }
  0xe3   : > { %3579 = vmatpush.bf16.msrb.mxu2 %v13161_v48  ;;  %v13333_v48 = vor.u32 %v18070_v43, %v13332_v42  ;;  %v13052_v42 = vld [vmem:[%s19977_s7 + $0x780] sm:$0xf]  ;;  %v18000_v43 = vld [vmem:[%s19977_s7 + $0x7b4] sm:$0xf0] }
  0xe4   : > { %3592 = vmatpush.bf16.msrb.mxu3 %v13609_v52  ;;  %v13781_v52 = vor.u32 %v18182_v45, %v13780_v44  ;;  %v13500_v44 = vld [vmem:[%s19977_s7 + $0xb00] sm:$0xf]  ;;  %v18112_v45 = vld [vmem:[%s19977_s7 + $0xb34] sm:$0xf0] }
  0xe5   : > { %3554 = vmatpush.bf16.msrb.mxu0 %v12209_v58  ;;  %v12381_v58 = vor.u32 %v17832_v50, %v12380_v49  ;;  %v12605_v49 = vor.u32 %v17888_v41, %v12604_v39  ;;  %v13053_v50 = vor.u32 %v18000_v43, %v13052_v42  ;;  %v17923_v39 = vld [vmem:[%s19977_s7 + $0x554] sm:$0xf]  ;;  %v12774_v41 = vld [vmem:[%s19977_s7 + $0x588] sm:$0xf0] }
  0xe6   : > { %3567 = vmatpush.bf16.msrb.mxu1 %v12657_v59  ;;  %v12829_v59 = vor.u32 %v17944_v53, %v12828_v51  ;;  %v12548_v51 = vld [vmem:[%s19977_s7 + $0x390] sm:$0xf]  ;;  %v18035_v42 = vld [vmem:[%s19977_s7 + $0x8d4] sm:$0xf]  ;;  %v13222_v43 = vld [vmem:[%s19977_s7 + $0x908] sm:$0xf0] }
  0xe7   : > { %3580 = vmatpush.bf16.msrb.mxu2 %v13105_v60  ;;  %v13277_v60 = vor.u32 %v18056_v55, %v13276_v54  ;;  %v12996_v53 = vld [vmem:[%s19977_s7 + $0x710] sm:$0xf]  ;;  %v13501_v54 = vor.u32 %v18112_v45, %v13500_v44  ;;  %v17986_v55 = vld [vmem:[%s19977_s7 + $0x744] sm:$0xf0]  ;;  %v18147_v44 = vld [vmem:[%s19977_s7 + $0xc54] sm:$0xf] }
  0xe8   : > { %3593 = vmatpush.bf16.msrb.mxu3 %v13553_v0  ;;  %v13725_v0 = vor.u32 %v18168_v57, %v13724_v56  ;;  %v13444_v56 = vld [vmem:[%s19977_s7 + $0xa90] sm:$0xf]  ;;  %v18098_v57 = vld [vmem:[%s19977_s7 + $0xac4] sm:$0xf0]  ;;  %v12997_v2 = vor.u32 %v17986_v55, %v12996_v53  ;;  %v13670_v45 = vld [vmem:[%s19977_s7 + $0xc88] sm:$0xf0] }
  0xe9   : > { %3555 = vmatpush.bf16.msrb.mxu0 %v12153_v6  ;;  %v12325_v6 = vor.u32 %v17818_v62, %v12324_v61  ;;  %v12942_v62 = vld [vmem:[%s19977_s7 + $0x6d8] sm:$0xf0]  ;;  %v13445_v5 = vor.u32 %v18098_v57, %v13444_v56  ;;  %v18133_v56 = vld [vmem:[%s19977_s7 + $0xbe4] sm:$0xf] }
  0xea   : > { %3568 = vmatpush.bf16.msrb.mxu1 %v12601_v9  ;;  %v12268_v9 = vld [vmem:[%s19977_s7 + $0x160] sm:$0xf]  ;;  %v12718_v53 = vld [vmem:[%s19977_s7 + $0x518] sm:$0xf0] }
  0xeb   : > { %3581 = vmatpush.bf16.msrb.mxu2 %v13049_v12  ;;  %v17804_v12 = vld [vmem:[%s19977_s7 + $0x194] sm:$0xf0]  ;;  %v13166_v55 = vld [vmem:[%s19977_s7 + $0x898] sm:$0xf0] }
  0xec   : > { %3594 = vmatpush.bf16.msrb.mxu3 %v13497_v16  ;;  %v13164_v16 = vld [vmem:[%s19977_s7 + $0x860] sm:$0xf]  ;;  %v12269_v21 = vor.u32 %v17804_v12, %v12268_v9  ;;  %v17839_v9 = vld [vmem:[%s19977_s7 + $0x2b4] sm:$0xf]  ;;  %v12438_v12 = vld [vmem:[%s19977_s7 + $0x2e8] sm:$0xf0] }
  0xed   : > { %3556 = vmatpush.bf16.msrb.mxu0 %v12097_v24  ;;  %v13165_v23 = vor.u32 %v18028_v17, %v13164_v16  ;;  %v12212_v24 = vld [vmem:[%s19977_s7 + $0xf0] sm:$0xf]  ;;  %v18063_v16 = vld [vmem:[%s19977_s7 + $0x9b4] sm:$0xf]  ;;  %v13334_v17 = vld [vmem:[%s19977_s7 + $0x9e8] sm:$0xf0] }
  0xee   : > { %3569 = vmatpush.bf16.msrb.mxu1 %v12545_v29  ;;  %v17902_v29 = vld [vmem:[%s19977_s7 + $0x4a4] sm:$0xf0]  ;;  %v13614_v57 = vld [vmem:[%s19977_s7 + $0xc18] sm:$0xf0] }
  0xef   : > { %3582 = vmatpush.bf16.msrb.mxu2 %v12993_v30  ;;  %v13108_v30 = vld [vmem:[%s19977_s7 + $0x7f0] sm:$0xf] }
  0xf0   : > { %3595 = vmatpush.bf16.msrb.mxu3 %v13441_v33  ;;  %3557 = vmatmul.bf16.vlgmr.msrb.gmra.mxu0 %v20109_v20  ;;  %v18126_v33 = vld [vmem:[%s19977_s7 + $0xba4] sm:$0xf0] }
  0xf1   : > { %3601 = vmatpush.bf16.msra.mxu0 %v12493_v34  ;;  %3570 = vmatmul.bf16.vlgmr.msrb.gmra.mxu1 %v20115_v27  ;;  %v12213_v34 = vor.u32 %v17790_v25, %v12212_v24  ;;  %v17825_v24 = vld [vmem:[%s19977_s7 + $0x244] sm:$0xf]  ;;  %v12382_v25 = vld [vmem:[%s19977_s7 + $0x278] sm:$0xf0] }
  0xf2   : > { %3614 = vmatpush.bf16.msra.mxu1 %v12941_v35  ;;  %3583 = vmatmul.bf16.vlgmr.msrb.gmra.mxu2 %v20097_v10  ;;  %v12661_v35 = vor.u32 %v17902_v29, %v12660_v26  ;;  %v17937_v26 = vld [vmem:[%s19977_s7 + $0x5c4] sm:$0xf]  ;;  %v12830_v29 = vld [vmem:[%s19977_s7 + $0x5f8] sm:$0xf0] }
  0xf3   : > { %3627 = vmatpush.bf16.msra.mxu2 %v13389_v36  ;;  %3596 = vmatmul.bf16.vlgmr.msrb.gmra.mxu3 %v20099_v11  ;;  %v13109_v36 = vor.u32 %v18014_v31, %v13108_v30  ;;  %v18049_v30 = vld [vmem:[%s19977_s7 + $0x944] sm:$0xf]  ;;  %v13278_v31 = vld [vmem:[%s19977_s7 + $0x978] sm:$0xf0] }
  0xf4   : > { %3640 = vmatpush.bf16.msra.mxu3 %v13837_v40  ;;  %v13557_v40 = vor.u32 %v18126_v33, %v13556_v32  ;;  %v18161_v32 = vld [vmem:[%s19977_s7 + $0xcc4] sm:$0xf]  ;;  %v13726_v33 = vld [vmem:[%s19977_s7 + $0xcf8] sm:$0xf0] }
  0xf5   : > { %3602 = vmatpush.bf16.msra.mxu0 %v12437_v46  ;;  %v12157_v46 = vor.u32 %v17776_v38, %v12156_v37  ;;  %v17811_v37 = vld [vmem:[%s19977_s7 + $0x1d4] sm:$0xf]  ;;  %v12326_v38 = vld [vmem:[%s19977_s7 + $0x208] sm:$0xf0] }
  0xf6   : > { %3615 = vmatpush.bf16.msra.mxu1 %v12885_v47  ;;  %v12100_v47 = vld [vmem:[%s19977_s7 + $0x10] sm:$0xf] }
  0xf7   : > { %3628 = vmatpush.bf16.msra.mxu2 %v13333_v48  ;;  %v17762_v48 = vld [vmem:[%s19977_s7 + $0x44] sm:$0xf0] }
  0xf8   : > { %3641 = vmatpush.bf16.msra.mxu3 %v13781_v52  ;;  %v17874_v52 = vld [vmem:[%s19977_s7 + $0x3c4] sm:$0xf0]  ;;  %v12101_v61 = vor.u32 %v17762_v48, %v12100_v47  ;;  %v12777_v47 = vor.u32 %v17923_v39, %v12774_v41  ;;  %v13225_v48 = vor.u32 %v18035_v42, %v13222_v43  ;;  %v12998_v39 = vld [vmem:[%s19977_s7 + $0x748] sm:$0xf0]  ;;  %v17861_v43 = vld [vmem:[%s19977_s7 + $0x35c] sm:$0xf0] }
  0xf9   : > { %3603 = vmatpush.bf16.msra.mxu0 %v12381_v58  ;;  %v17853_v58 = vld [vmem:[%s19977_s7 + $0x324] sm:$0xf]  ;;  %v12549_v1 = vor.u32 %v17874_v52, %v12548_v51  ;;  %v13673_v52 = vor.u32 %v18147_v44, %v13670_v45  ;;  %v13446_v41 = vld [vmem:[%s19977_s7 + $0xac8] sm:$0xf0]  ;;  %v12500_v42 = vld [vmem:[%s19977_s7 + $0x328] sm:$0xf] }
  0xfa   : > { %3616 = vmatpush.bf16.msra.mxu1 %v12829_v59  ;;  %v12494_v59 = vld [vmem:[%s19977_s7 + $0x358] sm:$0xf0]  ;;  %v17909_v51 = vld [vmem:[%s19977_s7 + $0x4e4] sm:$0xf]  ;;  %v12948_v44 = vld [vmem:[%s19977_s7 + $0x6a8] sm:$0xf] }
  0xfb   : > { %3629 = vmatpush.bf16.msra.mxu2 %v13277_v60  ;;  %v17965_v60 = vld [vmem:[%s19977_s7 + $0x6a4] sm:$0xf] }
  0xfc   : > { %3642 = vmatpush.bf16.msra.mxu3 %v13725_v0  ;;  %v13390_v0 = vld [vmem:[%s19977_s7 + $0xa58] sm:$0xf0] }
  0xfd   : > { %3604 = vmatpush.bf16.msra.mxu0 %v12325_v6  ;;  %v12497_v6 = vor.u32 %v17853_v58, %v12494_v59  ;;  %v12721_v59 = vor.u32 %v17909_v51, %v12718_v53 }
  0xfe   : > { %3617 = vmatpush.bf16.msra.mxu1 %v12773_v7  ;;  %v12945_v7 = vor.u32 %v17965_v60, %v12942_v62  ;;  %v12214_v62 = vld [vmem:[%s19977_s7 + $0x128] sm:$0xf0] }
  0xff   : > { %3630 = vmatpush.bf16.msra.mxu2 %v13221_v8  ;;  %v13393_v8 = vor.u32 %v18077_v63, %v13390_v0  ;;  %v17895_v63 = vld [vmem:[%s19977_s7 + $0x474] sm:$0xf]  ;;  %v13617_v0 = vor.u32 %v18133_v56, %v13614_v57  ;;  %v12501_v57 = vor.u32 %v17861_v43, %v12500_v42 }
 0x100   : > { %3643 = vmatpush.bf16.msra.mxu3 %v13669_v14  ;;  %v13841_v14 = vor.u32 %v18189_v3, %v13838_v4  ;;  %v13110_v3 = vld [vmem:[%s19977_s7 + $0x828] sm:$0xf0]  ;;  %v18119_v4 = vld [vmem:[%s19977_s7 + $0xb74] sm:$0xf] }
 0x101   : > { %3605 = vmatpush.bf16.msra.mxu0 %v12269_v21  ;;  %v12441_v21 = vor.u32 %v17839_v9, %v12438_v12 }
 0x102   : > { %3618 = vmatpush.bf16.msra.mxu1 %v12717_v22  ;;  %v12889_v22 = vor.u32 %v17951_v13, %v12886_v15  ;;  %v17769_v13 = vld [vmem:[%s19977_s7 + $0x84] sm:$0xf] }
 0x103   : > { %3631 = vmatpush.bf16.msra.mxu2 %v13165_v23  ;;  %v13337_v23 = vor.u32 %v18063_v16, %v13334_v17  ;;  %v17881_v15 = vld [vmem:[%s19977_s7 + $0x404] sm:$0xf] }
 0x104   : > { %3644 = vmatpush.bf16.msra.mxu3 %v13613_v28  ;;  %v13785_v28 = vor.u32 %v18175_v18, %v13782_v19  ;;  %v12606_v18 = vld [vmem:[%s19977_s7 + $0x438] sm:$0xf0]  ;;  %v17993_v19 = vld [vmem:[%s19977_s7 + $0x784] sm:$0xf] }
 0x105   : > { %3606 = vmatpush.bf16.msra.mxu0 %v12213_v34  ;;  %v12385_v34 = vor.u32 %v17825_v24, %v12382_v25  ;;  %v18105_v24 = vld [vmem:[%s19977_s7 + $0xb04] sm:$0xf]  ;;  %v13502_v25 = vld [vmem:[%s19977_s7 + $0xb38] sm:$0xf0] }
 0x106   : > { %3619 = vmatpush.bf16.msra.mxu1 %v12661_v35  ;;  %v12833_v35 = vor.u32 %v17937_v26, %v12830_v29  ;;  %v17755_v29 = vld [vmem:[%s19977_s7 + $0x14] sm:$0xf] }
 0x107   : > { %3632 = vmatpush.bf16.msra.mxu2 %v13109_v36  ;;  %v13281_v36 = vor.u32 %v18049_v30, %v13278_v31  ;;  %v12102_v30 = vld [vmem:[%s19977_s7 + $0x48] sm:$0xf0]  ;;  %v683_v31 = vld [vmem:[#allocation2 + $0x30] sm:$0xff] }
 0x108   : > { %3645 = vmatpush.bf16.msra.mxu3 %v13557_v40  ;;  %v13729_v40 = vor.u32 %v18161_v32, %v13726_v33  ;;  %v12609_v32 = vor.u32 %v17881_v15, %v12606_v18  ;;  %v18057_v18 = vld [vmem:[%s19977_s7 + $0x97c] sm:$0xf0] }
 0x109   : > { %3607 = vmatpush.bf16.msra.mxu0 %v12157_v46  ;;  %v12329_v46 = vor.u32 %v17811_v37, %v12326_v38  ;;  %v13505_v38 = vor.u32 %v18105_v24, %v13502_v25  ;;  %v12332_v25 = vld [vmem:[%s19977_s7 + $0x1d8] sm:$0xf] }
 0x10a   : > { %3620 = vmatpush.bf16.msra.mxu1 %v12605_v49  ;;  %v17797_v49 = vld [vmem:[%s19977_s7 + $0x164] sm:$0xf] }
 0x10b   : > { %3633 = vmatpush.bf16.msra.mxu2 %v13053_v50  ;;  %v12270_v50 = vld [vmem:[%s19977_s7 + $0x198] sm:$0xf0] }
 0x10c   : > { %3646 = vmatpush.bf16.msra.mxu3 %v13501_v54  ;;  %v18021_v54 = vld [vmem:[%s19977_s7 + $0x864] sm:$0xf]  ;;  %v12273_v58 = vor.u32 %v17797_v49, %v12270_v50  ;;  %v13396_v49 = vld [vmem:[%s19977_s7 + $0xa28] sm:$0xf]  ;;  %v18085_v50 = vld [vmem:[%s19977_s7 + $0xa5c] sm:$0xf0] }
 0x10d   : > { %3608 = vmatpush.bf16.msra.mxu0 %v12101_v61  ;;  %v13169_v60 = vor.u32 %v18021_v54, %v13166_v55  ;;  %v17783_v61 = vld [vmem:[%s19977_s7 + $0xf4] sm:$0xf]  ;;  %v13844_v54 = vld [vmem:[%s19977_s7 + $0xda8] sm:$0xf]  ;;  %v18197_v55 = vld [vmem:[%s19977_s7 + $0xddc] sm:$0xf0] }
 0x10e   : > { %3621 = vmatpush.bf16.msra.mxu1 %v12549_v1  ;;  %v12662_v1 = vld [vmem:[%s19977_s7 + $0x4a8] sm:$0xf0] }
 0x10f   : > { %3634 = vmatpush.bf16.msra.mxu2 %v12997_v2  ;;  %v18007_v2 = vld [vmem:[%s19977_s7 + $0x7f4] sm:$0xf]  ;;  %v12665_v9 = vor.u32 %v17895_v63, %v12662_v1  ;;  %v17847_v63 = vld [vmem:[%s19977_s7 + $0x2ec] sm:$0xf0]  ;;  %v13845_v1 = vor.u32 %v18197_v55, %v13844_v54  ;;  %v12668_v55 = vld [vmem:[%s19977_s7 + $0x478] sm:$0xf] }
 0x110   : > { %3647 = vmatpush.bf16.msra.mxu3 %v13445_v5  ;;  %3609 = vmatmul.bf16.vlgmr.msra.gmra.mxu0 %v20109_v20  ;;  %v13558_v5 = vld [vmem:[%s19977_s7 + $0xba8] sm:$0xf0]  ;;  %v13113_v12 = vor.u32 %v18007_v2, %v13110_v3  ;;  %v17959_v2 = vld [vmem:[%s19977_s7 + $0x66c] sm:$0xf0]  ;;  %v13340_v3 = vld [vmem:[%s19977_s7 + $0x9b8] sm:$0xf] }
 0x111   : > { %3653 = vmatpush.bf16.msrb.mxu0 %v12497_v6  ;;  %3622 = vmatmul.bf16.vlgmr.msra.gmra.mxu1 %v20115_v27  ;;  %v3402_v6 = vpop.f32.mrf.mxu0  ;;  %v13561_v17 = vor.u32 %v18119_v4, %v13558_v5  ;;  %v18071_v4 = vld [vmem:[%s19977_s7 + $0x9ec] sm:$0xf0]  ;;  %v13788_v5 = vld [vmem:[%s19977_s7 + $0xd38] sm:$0xf] }
 0x112   : > { %3666 = vmatpush.bf16.msrb.mxu1 %v12945_v7  ;;  %3635 = vmatmul.bf16.vlgmr.msra.gmra.mxu2 %v20097_v10  ;;  %v12217_v7 = vor.u32 %v17783_v61, %v12214_v62  ;;  %v13397_v61 = vor.u32 %v18085_v50, %v13396_v49  ;;  %v12444_v62 = vld [vmem:[%s19977_s7 + $0x2b8] sm:$0xf]  ;;  %v18141_v49 = vld [vmem:[%s19977_s7 + $0xc1c] sm:$0xf0]  ;;  %v17791_v54 = vld [vmem:[%s19977_s7 + $0x12c] sm:$0xf0] }
 0x113   : > { %3679 = vmatpush.bf16.msrb.mxu2 %v13393_v8  ;;  %3648 = vmatmul.bf16.vlgmr.msra.gmra.mxu3 %v20099_v11  ;;  %v3415_v8 = vpop.f32.mrf.mxu1 }
 0x114   : > { %3692 = vmatpush.bf16.msrb.mxu3 %v13841_v14  ;;  %v12158_v14 = vld [vmem:[%s19977_s7 + $0xb8] sm:$0xf0]  ;;  %v3416_v16 = vadd.f32 %v3415_v8, %v3402_v6  ;;  %v18183_v6 = vld [vmem:[%s19977_s7 + $0xd6c] sm:$0xf0] }
 0x115   : > { %3654 = vmatpush.bf16.msrb.mxu0 %v12441_v21  ;;  %v13054_v21 = vld [vmem:[%s19977_s7 + $0x7b8] sm:$0xf0]  ;;  %v13789_v15 = vor.u32 %v18183_v6, %v13788_v5 }
 0x116   : > { %3667 = vmatpush.bf16.msrb.mxu1 %v12889_v22  ;;  %v3428_v22 = vpop.f32.mrf.mxu2  ;;  %v13057_v33 = vor.u32 %v17993_v19, %v13054_v21  ;;  %v13732_v19 = vld [vmem:[%s19977_s7 + $0xcc8] sm:$0xf]  ;;  %v18169_v21 = vld [vmem:[%s19977_s7 + $0xcfc] sm:$0xf0] }
 0x117   : > { %3680 = vmatpush.bf16.msrb.mxu2 %v13337_v23  ;;  %v3441_v23 = vpop.f32.mrf.mxu3  ;;  %v3429_v26 = vadd.f32 %v3428_v22, %v3416_v16  ;;  %v17945_v16 = vld [vmem:[%s19977_s7 + $0x5fc] sm:$0xf0] }
 0x118   : > { %3693 = vmatpush.bf16.msrb.mxu3 %v13785_v28  ;;  %v12161_v28 = vor.u32 %v17769_v13, %v12158_v14  ;;  %v17833_v13 = vld [vmem:[%s19977_s7 + $0x27c] sm:$0xf0]  ;;  %v12836_v14 = vld [vmem:[%s19977_s7 + $0x5c8] sm:$0xf] }
 0x119   : > { %3655 = vmatpush.bf16.msrb.mxu0 %v12385_v34  ;;  %v17867_v34 = vld [vmem:[%s19977_s7 + $0x394] sm:$0xf]  ;;  %v3442_v37 = vadd.f32 %v3441_v23, %v3429_v26  ;;  %v12837_v23 = vor.u32 %v17945_v16, %v12836_v14  ;;  %v17819_v26 = vld [vmem:[%s19977_s7 + $0x20c] sm:$0xf0]  ;;  %v17889_v14 = vld [vmem:[%s19977_s7 + $0x43c] sm:$0xf0] }
 0x11a   : > { %3668 = vmatpush.bf16.msrb.mxu1 %v12833_v35  ;;  %v12550_v35 = vld [vmem:[%s19977_s7 + $0x3c8] sm:$0xf0]  ;;  %v18001_v16 = vld [vmem:[%s19977_s7 + $0x7bc] sm:$0xf0] }
 0x11b   : > { %3681 = vmatpush.bf16.msrb.mxu2 %v13281_v36  ;;  %v17979_v36 = vld [vmem:[%s19977_s7 + $0x714] sm:$0xf]  ;;  %v4121_v45 = vadd.f32 %v3442_v37, %v683_v31  ;;  %v3417_v51 = vpop.f32.mrf.mxu1  ;;  %v13228_v31 = vld [vmem:[%s19977_s7 + $0x8d8] sm:$0xf] }
 0x11c   : > { %3694 = vmatpush.bf16.msrb.mxu3 %v13729_v40  ;;  %v18091_v40 = vld [vmem:[%s19977_s7 + $0xa94] sm:$0xf]  ;;  %v13001_v53 = vor.u32 %v17979_v36, %v12998_v39  ;;  %v12276_v39 = vld [vmem:[%s19977_s7 + $0x168] sm:$0xf] }
 0x11d   : > { %3656 = vmatpush.bf16.msrb.mxu0 %v12329_v46  ;;  %v3404_v46 = vpop.f32.mrf.mxu0  ;;  %4135 = vst [vmem:[#allocation2 + $0x30] sm:$0xff] %v4121_v45  ;;  %v13449_v56 = vor.u32 %v18091_v40, %v13446_v41  ;;  %v17805_v40 = vld [vmem:[%s19977_s7 + $0x19c] sm:$0xf0]  ;;  %v12724_v41 = vld [vmem:[%s19977_s7 + $0x4e8] sm:$0xf] }
 0x11e   : > { %3669 = vmatpush.bf16.msrb.mxu1 %v12777_v47  ;;  %v12105_v47 = vor.u32 %v17755_v29, %v12102_v30  ;;  %v13733_v29 = vor.u32 %v18169_v21, %v13732_v19  ;;  %v17931_v30 = vld [vmem:[%s19977_s7 + $0x58c] sm:$0xf0]  ;;  %v13172_v45 = vld [vmem:[%s19977_s7 + $0x868] sm:$0xf]  ;;  %v18029_v46 = vld [vmem:[%s19977_s7 + $0x89c] sm:$0xf0]  ;;  %v12277_v50 = vor.u32 %v17805_v40, %v12276_v39 }
 0x11f   : > { %3682 = vmatpush.bf16.msrb.mxu2 %v13225_v48  ;;  %v17973_v48 = vld [vmem:[%s19977_s7 + $0x6dc] sm:$0xf0]  ;;  %v12950_v40 = vld [vmem:[%s19977_s7 + $0x6e0] sm:$0xf0] }
 0x120   : > { %3695 = vmatpush.bf16.msrb.mxu3 %v13673_v52  ;;  %v12553_v52 = vor.u32 %v17867_v34, %v12550_v35  ;;  %v18155_v34 = vld [vmem:[%s19977_s7 + $0xc8c] sm:$0xf0]  ;;  %v12333_v35 = vor.u32 %v17819_v26, %v12332_v25  ;;  %v18113_v19 = vld [vmem:[%s19977_s7 + $0xb3c] sm:$0xf0]  ;;  %v12556_v26 = vld [vmem:[%s19977_s7 + $0x398] sm:$0xf] }
 0x121   : > { %3657 = vmatpush.bf16.msrb.mxu0 %v12273_v58  ;;  %v3430_v58 = vpop.f32.mrf.mxu2 }
 0x122   : > { %3670 = vmatpush.bf16.msrb.mxu1 %v12721_v59  ;;  %v3443_v59 = vpop.f32.mrf.mxu3  ;;  %v17903_v58 = vld [vmem:[%s19977_s7 + $0x4ac] sm:$0xf0] }
 0x123   : > { %3683 = vmatpush.bf16.msrb.mxu2 %v13169_v60  ;;  %v12949_v60 = vor.u32 %v17973_v48, %v12948_v44  ;;  %v17917_v44 = vld [vmem:[%s19977_s7 + $0x51c] sm:$0xf0]  ;;  %v13620_v48 = vld [vmem:[%s19977_s7 + $0xbe8] sm:$0xf]  ;;  %v13116_v59 = vld [vmem:[%s19977_s7 + $0x7f8] sm:$0xf]  ;;  %v12669_v5 = vor.u32 %v17903_v58, %v12668_v55 }
 0x124   : > { %3696 = vmatpush.bf16.msrb.mxu3 %v13617_v0  ;;  %v12892_v0 = vld [vmem:[%s19977_s7 + $0x638] sm:$0xf]  ;;  %v12725_v51 = vor.u32 %v17917_v44, %v12724_v41  ;;  %v18078_v41 = vld [vmem:[%s19977_s7 + $0xa2c] sm:$0xf]  ;;  %v12894_v55 = vld [vmem:[%s19977_s7 + $0x670] sm:$0xf0] }
 0x125   : > { %3658 = vmatpush.bf16.msrb.mxu0 %v12217_v7  ;;  %v12445_v7 = vor.u32 %v17847_v63, %v12444_v62  ;;  %v12893_v8 = vor.u32 %v17959_v2, %v12892_v0  ;;  %v13564_v63 = vld [vmem:[%s19977_s7 + $0xb78] sm:$0xf]  ;;  %v18127_v0 = vld [vmem:[%s19977_s7 + $0xbac] sm:$0xf0]  ;;  %v18176_v58 = vld [vmem:[%s19977_s7 + $0xd3c] sm:$0xf] }
 0x126   : > { %3671 = vmatpush.bf16.msrb.mxu1 %v12665_v9  ;;  %v13341_v9 = vor.u32 %v18071_v4, %v13340_v3 }
 0x127   : > { %3684 = vmatpush.bf16.msrb.mxu2 %v13113_v12  ;;  %v12388_v12 = vld [vmem:[%s19977_s7 + $0x248] sm:$0xf] }
 0x128   : > { %3697 = vmatpush.bf16.msrb.mxu3 %v13561_v17  ;;  %v13284_v17 = vld [vmem:[%s19977_s7 + $0x948] sm:$0xf]  ;;  %v12389_v22 = vor.u32 %v17833_v13, %v12388_v12  ;;  %v13565_v13 = vor.u32 %v18127_v0, %v13564_v63  ;;  %v17826_v63 = vld [vmem:[%s19977_s7 + $0x24c] sm:$0xf]  ;;  %v12390_v0 = vld [vmem:[%s19977_s7 + $0x280] sm:$0xf0] }
 0x129   : > { %3659 = vmatpush.bf16.msrb.mxu0 %v12161_v28  ;;  %v13285_v24 = vor.u32 %v18057_v18, %v13284_v17  ;;  %v12780_v28 = vld [vmem:[%s19977_s7 + $0x558] sm:$0xf]  ;;  %v13508_v18 = vld [vmem:[%s19977_s7 + $0xb08] sm:$0xf] }
 0x12a   : > { %3672 = vmatpush.bf16.msrb.mxu1 %v12609_v32  ;;  %v18043_v32 = vld [vmem:[%s19977_s7 + $0x90c] sm:$0xf0]  ;;  %v12781_v37 = vor.u32 %v17931_v30, %v12780_v28 }
 0x12b   : > { %3685 = vmatpush.bf16.msrb.mxu2 %v13057_v33  ;;  %v13676_v33 = vld [vmem:[%s19977_s7 + $0xc58] sm:$0xf]  ;;  %v17875_v28 = vld [vmem:[%s19977_s7 + $0x3cc] sm:$0xf0] }
 0x12c   : > { %3698 = vmatpush.bf16.msrb.mxu3 %v13505_v38  ;;  %v13229_v38 = vor.u32 %v18043_v32, %v13228_v31  ;;  %v13677_v43 = vor.u32 %v18155_v34, %v13676_v33  ;;  %v13509_v31 = vor.u32 %v18113_v19, %v13508_v18  ;;  %v17987_v32 = vld [vmem:[%s19977_s7 + $0x74c] sm:$0xf0]  ;;  %v13452_v33 = vld [vmem:[%s19977_s7 + $0xa98] sm:$0xf]  ;;  %v18036_v18 = vld [vmem:[%s19977_s7 + $0x8dc] sm:$0xf] }
 0x12d   : > { %3660 = vmatpush.bf16.msrb.mxu0 %v12105_v47  ;;  %v3454_v36 = vpop.f32.mrf.mxu0  ;;  %v18099_v34 = vld [vmem:[%s19977_s7 + $0xacc] sm:$0xf0]  ;;  %v13230_v19 = vld [vmem:[%s19977_s7 + $0x910] sm:$0xf0] }
 0x12e   : > { %3673 = vmatpush.bf16.msrb.mxu1 %v12553_v52  ;;  %v3467_v42 = vpop.f32.mrf.mxu1  ;;  %v13173_v52 = vor.u32 %v18029_v46, %v13172_v45  ;;  %v18190_v45 = vld [vmem:[%s19977_s7 + $0xdac] sm:$0xf]  ;;  %v13846_v46 = vld [vmem:[%s19977_s7 + $0xde0] sm:$0xf0] }
 0x12f   : > { %3686 = vmatpush.bf16.msrb.mxu2 %v13001_v53  ;;  %v3468_v47 = vadd.f32 %v3467_v42, %v3454_v36  ;;  %v12220_v53 = vld [vmem:[%s19977_s7 + $0xf8] sm:$0xf]  ;;  %v17854_v36 = vld [vmem:[%s19977_s7 + $0x32c] sm:$0xf]  ;;  %v13398_v42 = vld [vmem:[%s19977_s7 + $0xa60] sm:$0xf0] }
 0x130   : > { %3699 = vmatpush.bf16.msrb.mxu3 %v13449_v56  ;;  %3661 = vmatmul.bf16.vlgmr.msrb.gmra.mxu0 %v20109_v20  ;;  %v12221_v2 = vor.u32 %v17791_v54, %v12220_v53  ;;  %v17952_v53 = vld [vmem:[%s19977_s7 + $0x63c] sm:$0xf]  ;;  %v13849_v54 = vor.u32 %v18190_v45, %v13846_v46 }
 0x131   : > { %3705 = vmatpush.bf16.msra.mxu0 %v12501_v57  ;;  %3674 = vmatmul.bf16.vlgmr.msrb.gmra.mxu1 %v20115_v27  ;;  %v13621_v57 = vor.u32 %v18141_v49, %v13620_v48 }
 0x132   : > { %3718 = vmatpush.bf16.msra.mxu1 %v12949_v60  ;;  %3687 = vmatmul.bf16.vlgmr.msrb.gmra.mxu2 %v20097_v10  ;;  %v18015_v60 = vld [vmem:[%s19977_s7 + $0x82c] sm:$0xf0] }
 0x133   : > { %3731 = vmatpush.bf16.msra.mxu2 %v13397_v61  ;;  %3700 = vmatmul.bf16.vlgmr.msrb.gmra.mxu3 %v20099_v11  ;;  %v13117_v6 = vor.u32 %v18015_v60, %v13116_v59  ;;  %v13790_v59 = vld [vmem:[%s19977_s7 + $0xd70] sm:$0xf0] }
 0x134   : > { %3744 = vmatpush.bf16.msra.mxu3 %v13845_v1  ;;  %v684_v1 = vld [vmem:[#allocation2] sm:$0xff] }
 0x135   : > { %3706 = vmatpush.bf16.msra.mxu0 %v12445_v7  ;;  %v3480_v56 = vpop.f32.mrf.mxu2  ;;  %v3456_v4 = vpop.f32.mrf.mxu0  ;;  %v12164_v7 = vld [vmem:[%s19977_s7 + $0x88] sm:$0xf] }
 0x136   : > { %3719 = vmatpush.bf16.msra.mxu1 %v12893_v8  ;;  %v3481_v61 = vadd.f32 %v3480_v56, %v3468_v47  ;;  %v3493_v62 = vpop.f32.mrf.mxu3  ;;  %v17777_v8 = vld [vmem:[%s19977_s7 + $0xbc] sm:$0xf0]  ;;  %v3469_v12 = vpop.f32.mrf.mxu1  ;;  %v13453_v47 = vor.u32 %v18099_v34, %v13452_v33  ;;  %v18064_v56 = vld [vmem:[%s19977_s7 + $0x9bc] sm:$0xf]  ;;  %v18050_v4 = vld [vmem:[%s19977_s7 + $0x94c] sm:$0xf] }
 0x137   : > { %3732 = vmatpush.bf16.msra.mxu2 %v13341_v9  ;;  %v12612_v9 = vld [vmem:[%s19977_s7 + $0x408] sm:$0xf]  ;;  %v12165_v21 = vor.u32 %v17777_v8, %v12164_v7  ;;  %v13734_v7 = vld [vmem:[%s19977_s7 + $0xd00] sm:$0xf0]  ;;  %v12393_v8 = vor.u32 %v17826_v63, %v12390_v0  ;;  %v18022_v34 = vld [vmem:[%s19977_s7 + $0x86c] sm:$0xf] }
 0x138   : > { %3745 = vmatpush.bf16.msra.mxu3 %v13789_v15  ;;  %v3494_v3 = vadd.f32 %v3493_v62, %v3481_v61  ;;  %v13060_v15 = vld [vmem:[%s19977_s7 + $0x788] sm:$0xf]  ;;  %v12897_v61 = vor.u32 %v17952_v53, %v12894_v55  ;;  %v12726_v33 = vld [vmem:[%s19977_s7 + $0x520] sm:$0xf0]  ;;  %v13566_v53 = vld [vmem:[%s19977_s7 + $0xbb0] sm:$0xf0] }
 0x139   : > { %3707 = vmatpush.bf16.msra.mxu0 %v12389_v22  ;;  %v12108_v22 = vld [vmem:[%s19977_s7 + $0x18] sm:$0xf]  ;;  %v13061_v25 = vor.u32 %v18001_v16, %v13060_v15  ;;  %v17924_v15 = vld [vmem:[%s19977_s7 + $0x55c] sm:$0xf] }
 0x13a   : > { %3720 = vmatpush.bf16.msra.mxu1 %v12837_v23  ;;  %v4122_v17 = vadd.f32 %v3494_v3, %v684_v1  ;;  %v17763_v23 = vld [vmem:[%s19977_s7 + $0x4c] sm:$0xf0]  ;;  %v17938_v1 = vld [vmem:[%s19977_s7 + $0x5cc] sm:$0xf]  ;;  %v12838_v3 = vld [vmem:[%s19977_s7 + $0x600] sm:$0xf0] }
 0x13b   : > { %3733 = vmatpush.bf16.msra.mxu2 %v13285_v24  ;;  %v12613_v24 = vor.u32 %v17889_v14, %v12612_v9  ;;  %v12109_v39 = vor.u32 %v17763_v23, %v12108_v22  ;;  %v12841_v9 = vor.u32 %v17938_v1, %v12838_v3  ;;  %v12334_v14 = vld [vmem:[%s19977_s7 + $0x210] sm:$0xf0]  ;;  %v12614_v1 = vld [vmem:[%s19977_s7 + $0x440] sm:$0xf0] }
 0x13c   : > { %3746 = vmatpush.bf16.msra.mxu3 %v13733_v29  ;;  %4136 = vst [vmem:[#allocation2] sm:$0xff] %v4122_v17  ;;  %v13004_v29 = vld [vmem:[%s19977_s7 + $0x718] sm:$0xf]  ;;  %v12782_v17 = vld [vmem:[%s19977_s7 + $0x590] sm:$0xf0] }
 0x13d   : > { %3708 = vmatpush.bf16.msra.mxu0 %v12333_v35  ;;  %v3482_v30 = vpop.f32.mrf.mxu2  ;;  %v13005_v44 = vor.u32 %v17987_v32, %v13004_v29  ;;  %v13678_v22 = vld [vmem:[%s19977_s7 + $0xc90] sm:$0xf0]  ;;  %v12278_v29 = vld [vmem:[%s19977_s7 + $0x1a0] sm:$0xf0] }
 0x13e   : > { %3721 = vmatpush.bf16.msra.mxu1 %v12781_v37  ;;  %v3495_v35 = vpop.f32.mrf.mxu3  ;;  %v12502_v37 = vld [vmem:[%s19977_s7 + $0x360] sm:$0xf0]  ;;  %v17910_v30 = vld [vmem:[%s19977_s7 + $0x4ec] sm:$0xf] }
 0x13f   : > { %3734 = vmatpush.bf16.msra.mxu2 %v13229_v38  ;;  %v17966_v38 = vld [vmem:[%s19977_s7 + $0x6ac] sm:$0xf]  ;;  %v12505_v48 = vor.u32 %v17854_v36, %v12502_v37  ;;  %v13174_v35 = vld [vmem:[%s19977_s7 + $0x8a0] sm:$0xf0] }
 0x140   : > { %3747 = vmatpush.bf16.msra.mxu3 %v13677_v43  ;;  %v12557_v43 = vor.u32 %v17875_v28, %v12556_v26  ;;  %v12953_v49 = vor.u32 %v17966_v38, %v12950_v40  ;;  %v13233_v26 = vor.u32 %v18036_v18, %v13230_v19  ;;  %v17798_v28 = vld [vmem:[%s19977_s7 + $0x16c] sm:$0xf]  ;;  %v13622_v38 = vld [vmem:[%s19977_s7 + $0xc20] sm:$0xf0]  ;;  %v12729_v40 = vor.u32 %v17910_v30, %v12726_v33  ;;  %v13006_v19 = vld [vmem:[%s19977_s7 + $0x750] sm:$0xf0] }
 0x141   : > { %3709 = vmatpush.bf16.msra.mxu0 %v12277_v50  ;;  %v13401_v50 = vor.u32 %v18078_v41, %v13398_v42  ;;  %v18134_v37 = vld [vmem:[%s19977_s7 + $0xbec] sm:$0xf]  ;;  %v13177_v41 = vor.u32 %v18022_v34, %v13174_v35  ;;  %v17784_v42 = vld [vmem:[%s19977_s7 + $0xfc] sm:$0xf]  ;;  %v13062_v3 = vld [vmem:[%s19977_s7 + $0x7c0] sm:$0xf0] }
 0x142   : > { %3722 = vmatpush.bf16.msra.mxu1 %v12725_v51  ;;  %v17840_v51 = vld [vmem:[%s19977_s7 + $0x2bc] sm:$0xf]  ;;  %v13625_v46 = vor.u32 %v18134_v37, %v13622_v38  ;;  %v13404_v30 = vld [vmem:[%s19977_s7 + $0xa30] sm:$0xf]  ;;  %v18198_v35 = vld [vmem:[%s19977_s7 + $0xde4] sm:$0xf0] }
 0x143   : > { %3735 = vmatpush.bf16.msra.mxu2 %v13173_v52  ;;  %v12446_v52 = vld [vmem:[%s19977_s7 + $0x2f0] sm:$0xf0]  ;;  %v13852_v34 = vld [vmem:[%s19977_s7 + $0xdb0] sm:$0xf] }
 0x144   : > { %3748 = vmatpush.bf16.msra.mxu3 %v13621_v57  ;;  %v13342_v57 = vld [vmem:[%s19977_s7 + $0x9f0] sm:$0xf0]  ;;  %v12449_v60 = vor.u32 %v17840_v51, %v12446_v52  ;;  %v18120_v52 = vld [vmem:[%s19977_s7 + $0xb7c] sm:$0xf] }
 0x145   : > { %3710 = vmatpush.bf16.msra.mxu0 %v12221_v2  ;;  %v13345_v62 = vor.u32 %v18064_v56, %v13342_v57  ;;  %v13793_v2 = vor.u32 %v18176_v58, %v13790_v59  ;;  %v13569_v0 = vor.u32 %v18120_v52, %v13566_v53  ;;  %v12396_v52 = vld [vmem:[%s19977_s7 + $0x250] sm:$0xf]  ;;  %v17834_v53 = vld [vmem:[%s19977_s7 + $0x284] sm:$0xf0] }
 0x146   : > { %3723 = vmatpush.bf16.msra.mxu1 %v12669_v5  ;;  %v13286_v5 = vld [vmem:[%s19977_s7 + $0x980] sm:$0xf0] }
 0x147   : > { %3736 = vmatpush.bf16.msra.mxu2 %v13117_v6  ;;  %v18162_v6 = vld [vmem:[%s19977_s7 + $0xccc] sm:$0xf]  ;;  %v13289_v12 = vor.u32 %v18050_v4, %v13286_v5 }
 0x148   : > { %3749 = vmatpush.bf16.msra.mxu3 %v13565_v13  ;;  %v17812_v13 = vld [vmem:[%s19977_s7 + $0x1dc] sm:$0xf]  ;;  %v13737_v16 = vor.u32 %v18162_v6, %v13734_v7  ;;  %v18106_v5 = vld [vmem:[%s19977_s7 + $0xb0c] sm:$0xf]  ;;  %v13510_v6 = vld [vmem:[%s19977_s7 + $0xb40] sm:$0xf0] }
 0x149   : > { %3711 = vmatpush.bf16.msra.mxu0 %v12165_v21  ;;  %v18148_v21 = vld [vmem:[%s19977_s7 + $0xc5c] sm:$0xf]  ;;  %v12337_v23 = vor.u32 %v17812_v13, %v12334_v14  ;;  %v13513_v18 = vor.u32 %v18106_v5, %v13510_v6  ;;  %v13236_v5 = vld [vmem:[%s19977_s7 + $0x8e0] sm:$0xf]  ;;  %v18044_v6 = vld [vmem:[%s19977_s7 + $0x914] sm:$0xf0] }
 0x14a   : > { %3724 = vmatpush.bf16.msra.mxu1 %v12613_v24  ;;  %v13681_v32 = vor.u32 %v18148_v21, %v13678_v22  ;;  %v17868_v14 = vld [vmem:[%s19977_s7 + $0x39c] sm:$0xf]  ;;  %v13454_v22 = vld [vmem:[%s19977_s7 + $0xad0] sm:$0xf0] }
 0x14b   : > { %3737 = vmatpush.bf16.msra.mxu2 %v13061_v25  ;;  %v12785_v25 = vor.u32 %v17924_v15, %v12782_v17  ;;  %v12558_v15 = vld [vmem:[%s19977_s7 + $0x3d0] sm:$0xf0]  ;;  %v18092_v21 = vld [vmem:[%s19977_s7 + $0xa9c] sm:$0xf] }
 0x14c   : > { %3750 = vmatpush.bf16.msra.mxu3 %v13509_v31 }
 0x14d   : > { %3712 = vmatpush.bf16.msra.mxu0 %v12109_v39  ;;  %v3506_v24 = vpop.f32.mrf.mxu0  ;;  %v12281_v39 = vor.u32 %v17798_v28, %v12278_v29  ;;  %v17974_v29 = vld [vmem:[%s19977_s7 + $0x6e4] sm:$0xf0] }
 0x14e   : > { %3725 = vmatpush.bf16.msra.mxu1 %v12557_v43  ;;  %v3519_v31 = vpop.f32.mrf.mxu1  ;;  %v12222_v43 = vld [vmem:[%s19977_s7 + $0x130] sm:$0xf0] }
 0x14f   : > { %3738 = vmatpush.bf16.msra.mxu2 %v13005_v44  ;;  %v3520_v36 = vadd.f32 %v3519_v31, %v3506_v24  ;;  %v17896_v44 = vld [vmem:[%s19977_s7 + $0x47c] sm:$0xf]  ;;  %v12225_v55 = vor.u32 %v17784_v42, %v12222_v43  ;;  %v12508_v24 = vld [vmem:[%s19977_s7 + $0x330] sm:$0xf]  ;;  %v18086_v31 = vld [vmem:[%s19977_s7 + $0xa64] sm:$0xf0]  ;;  %v13853_v43 = vor.u32 %v18198_v35, %v13852_v34 }
 0x150   : > { %3751 = vmatpush.bf16.msra.mxu3 %v13453_v47  ;;  %3713 = vmatmul.bf16.vlgmr.msra.gmra.mxu0 %v20109_v20  ;;  %v12670_v47 = vld [vmem:[%s19977_s7 + $0x4b0] sm:$0xf0]  ;;  %v12900_v42 = vld [vmem:[%s19977_s7 + $0x640] sm:$0xf] }
 0x151   : > { %3757 = vmatpush.bf16.msrb.mxu0 %v12505_v48  ;;  %3726 = vmatmul.bf16.vlgmr.msra.gmra.mxu1 %v20115_v27  ;;  %v18008_v48 = vld [vmem:[%s19977_s7 + $0x7fc] sm:$0xf]  ;;  %v12673_v58 = vor.u32 %v17896_v44, %v12670_v47  ;;  %v17960_v44 = vld [vmem:[%s19977_s7 + $0x674] sm:$0xf0]  ;;  %v13796_v47 = vld [vmem:[%s19977_s7 + $0xd40] sm:$0xf] }
 0x152   : > { %3770 = vmatpush.bf16.msrb.mxu1 %v12953_v49  ;;  %3739 = vmatmul.bf16.vlgmr.msra.gmra.mxu2 %v20097_v10  ;;  %v13118_v49 = vld [vmem:[%s19977_s7 + $0x830] sm:$0xf0] }
 0x153   : > { %3783 = vmatpush.bf16.msrb.mxu2 %v13401_v50  ;;  %3752 = vmatmul.bf16.vlgmr.msra.gmra.mxu3 %v20099_v11  ;;  %v13121_v59 = vor.u32 %v18008_v48, %v13118_v49  ;;  %v18184_v48 = vld [vmem:[%s19977_s7 + $0xd74] sm:$0xf0] }
 0x154   : > { %3796 = vmatpush.bf16.msrb.mxu3 %v13849_v54  ;;  %v685_v54 = vld [vmem:[#allocation2 + $0x58] sm:$0xff] }
 0x155   : > { %3758 = vmatpush.bf16.msrb.mxu0 %v12449_v60  ;;  %v3532_v45 = vpop.f32.mrf.mxu2  ;;  %v3508_v57 = vpop.f32.mrf.mxu0  ;;  %v17770_v60 = vld [vmem:[%s19977_s7 + $0x8c] sm:$0xf] }
 0x156   : > { %3771 = vmatpush.bf16.msrb.mxu1 %v12897_v61  ;;  %v3533_v50 = vadd.f32 %v3532_v45, %v3520_v36  ;;  %v3545_v51 = vpop.f32.mrf.mxu3  ;;  %v12166_v61 = vld [vmem:[%s19977_s7 + $0xc0] sm:$0xf0]  ;;  %v3521_v63 = vpop.f32.mrf.mxu1  ;;  %v13457_v36 = vor.u32 %v18092_v21, %v13454_v22  ;;  %v13348_v45 = vld [vmem:[%s19977_s7 + $0x9c0] sm:$0xf]  ;;  %v13292_v57 = vld [vmem:[%s19977_s7 + $0x950] sm:$0xf] }
 0x157   : > { %3784 = vmatpush.bf16.msrb.mxu2 %v13345_v62  ;;  %v17882_v62 = vld [vmem:[%s19977_s7 + $0x40c] sm:$0xf]  ;;  %v12169_v7 = vor.u32 %v17770_v60, %v12166_v61  ;;  %v18170_v60 = vld [vmem:[%s19977_s7 + $0xd04] sm:$0xf0]  ;;  %v12397_v61 = vor.u32 %v17834_v53, %v12396_v52  ;;  %v13180_v22 = vld [vmem:[%s19977_s7 + $0x870] sm:$0xf] }
 0x158   : > { %3797 = vmatpush.bf16.msrb.mxu3 %v13793_v2  ;;  %v3546_v56 = vadd.f32 %v3545_v51, %v3533_v50  ;;  %v17994_v2 = vld [vmem:[%s19977_s7 + $0x78c] sm:$0xf]  ;;  %v12901_v50 = vor.u32 %v17960_v44, %v12900_v42  ;;  %v17918_v21 = vld [vmem:[%s19977_s7 + $0x524] sm:$0xf0]  ;;  %v18128_v42 = vld [vmem:[%s19977_s7 + $0xbb4] sm:$0xf0] }
 0x159   : > { %3759 = vmatpush.bf16.msrb.mxu0 %v12393_v8  ;;  %v17756_v8 = vld [vmem:[%s19977_s7 + $0x1c] sm:$0xf]  ;;  %v13065_v13 = vor.u32 %v17994_v2, %v13062_v3  ;;  %v12788_v2 = vld [vmem:[%s19977_s7 + $0x560] sm:$0xf] }
 0x15a   : > { %3772 = vmatpush.bf16.msrb.mxu1 %v12841_v9  ;;  %v4123_v4 = vadd.f32 %v3546_v56, %v685_v54  ;;  %v12110_v9 = vld [vmem:[%s19977_s7 + $0x50] sm:$0xf0]  ;;  %v12844_v54 = vld [vmem:[%s19977_s7 + $0x5d0] sm:$0xf]  ;;  %v17946_v56 = vld [vmem:[%s19977_s7 + $0x604] sm:$0xf0] }
 0x15b   : > { %3785 = vmatpush.bf16.msrb.mxu2 %v13289_v12  ;;  %v12617_v12 = vor.u32 %v17882_v62, %v12614_v1  ;;  %v12113_v28 = vor.u32 %v17756_v8, %v12110_v9  ;;  %v12845_v62 = vor.u32 %v17946_v56, %v12844_v54  ;;  %v17820_v1 = vld [vmem:[%s19977_s7 + $0x214] sm:$0xf0]  ;;  %v17890_v54 = vld [vmem:[%s19977_s7 + $0x444] sm:$0xf0] }
 0x15c   : > { %3798 = vmatpush.bf16.msrb.mxu3 %v13737_v16  ;;  %4137 = vst [vmem:[#allocation2 + $0x58] sm:$0xff] %v4123_v4  ;;  %v17980_v16 = vld [vmem:[%s19977_s7 + $0x71c] sm:$0xf]  ;;  %v17932_v4 = vld [vmem:[%s19977_s7 + $0x594] sm:$0xf0] }
 0x15d   : > { %3760 = vmatpush.bf16.msrb.mxu0 %v12337_v23  ;;  %v3534_v17 = vpop.f32.mrf.mxu2  ;;  %v13009_v33 = vor.u32 %v17980_v16, %v13006_v19  ;;  %v18156_v8 = vld [vmem:[%s19977_s7 + $0xc94] sm:$0xf0]  ;;  %v17806_v16 = vld [vmem:[%s19977_s7 + $0x1a4] sm:$0xf0] }
 0x15e   : > { %3773 = vmatpush.bf16.msrb.mxu1 %v12785_v25  ;;  %v3547_v23 = vpop.f32.mrf.mxu3  ;;  %v17862_v25 = vld [vmem:[%s19977_s7 + $0x364] sm:$0xf0]  ;;  %v12732_v17 = vld [vmem:[%s19977_s7 + $0x4f0] sm:$0xf] }
 0x15f   : > { %3786 = vmatpush.bf16.msrb.mxu2 %v13233_v26  ;;  %v12956_v26 = vld [vmem:[%s19977_s7 + $0x6b0] sm:$0xf]  ;;  %v12509_v37 = vor.u32 %v17862_v25, %v12508_v24  ;;  %v18030_v23 = vld [vmem:[%s19977_s7 + $0x8a4] sm:$0xf0] }
 0x160   : > { %3799 = vmatpush.bf16.msrb.mxu3 %v13681_v32  ;;  %v12561_v32 = vor.u32 %v17868_v14, %v12558_v15  ;;  %v12957_v38 = vor.u32 %v17974_v29, %v12956_v26  ;;  %v13237_v14 = vor.u32 %v18044_v6, %v13236_v5  ;;  %v12284_v15 = vld [vmem:[%s19977_s7 + $0x170] sm:$0xf]  ;;  %v18142_v26 = vld [vmem:[%s19977_s7 + $0xc24] sm:$0xf0]  ;;  %v12733_v29 = vor.u32 %v17918_v21, %v12732_v17  ;;  %v17988_v6 = vld [vmem:[%s19977_s7 + $0x754] sm:$0xf0] }
 0x161   : > { %3761 = vmatpush.bf16.msrb.mxu0 %v12281_v39  ;;  %v13405_v39 = vor.u32 %v18086_v31, %v13404_v30  ;;  %v13628_v25 = vld [vmem:[%s19977_s7 + $0xbf0] sm:$0xf]  ;;  %v13181_v30 = vor.u32 %v18030_v23, %v13180_v22  ;;  %v12228_v31 = vld [vmem:[%s19977_s7 + $0x100] sm:$0xf]  ;;  %v18002_v56 = vld [vmem:[%s19977_s7 + $0x7c4] sm:$0xf0] }
 0x162   : > { %3774 = vmatpush.bf16.msrb.mxu1 %v12729_v40  ;;  %v12452_v40 = vld [vmem:[%s19977_s7 + $0x2c0] sm:$0xf]  ;;  %v13629_v35 = vor.u32 %v18142_v26, %v13628_v25  ;;  %v18079_v17 = vld [vmem:[%s19977_s7 + $0xa34] sm:$0xf]  ;;  %v13854_v23 = vld [vmem:[%s19977_s7 + $0xde8] sm:$0xf0] }
 0x163   : > { %3787 = vmatpush.bf16.msrb.mxu2 %v13177_v41  ;;  %v17848_v41 = vld [vmem:[%s19977_s7 + $0x2f4] sm:$0xf0]  ;;  %v18191_v22 = vld [vmem:[%s19977_s7 + $0xdb4] sm:$0xf] }
 0x164   : > { %3800 = vmatpush.bf16.msrb.mxu3 %v13625_v46  ;;  %v18072_v46 = vld [vmem:[%s19977_s7 + $0x9f4] sm:$0xf0]  ;;  %v12453_v49 = vor.u32 %v17848_v41, %v12452_v40  ;;  %v13572_v41 = vld [vmem:[%s19977_s7 + $0xb80] sm:$0xf] }
 0x165   : > { %3762 = vmatpush.bf16.msrb.mxu0 %v12225_v55  ;;  %v13349_v51 = vor.u32 %v18072_v46, %v13348_v45  ;;  %v13797_v55 = vor.u32 %v18184_v48, %v13796_v47  ;;  %v13573_v53 = vor.u32 %v18128_v42, %v13572_v41  ;;  %v17827_v41 = vld [vmem:[%s19977_s7 + $0x254] sm:$0xf]  ;;  %v12398_v42 = vld [vmem:[%s19977_s7 + $0x288] sm:$0xf0] }
 0x166   : > { %3775 = vmatpush.bf16.msrb.mxu1 %v12673_v58  ;;  %v18058_v58 = vld [vmem:[%s19977_s7 + $0x984] sm:$0xf0] }
 0x167   : > { %3788 = vmatpush.bf16.msrb.mxu2 %v13121_v59  ;;  %v13740_v59 = vld [vmem:[%s19977_s7 + $0xcd0] sm:$0xf]  ;;  %v13293_v63 = vor.u32 %v18058_v58, %v13292_v57 }
 0x168   : > { %3801 = vmatpush.bf16.msrb.mxu3 %v13569_v0  ;;  %v12340_v0 = vld [vmem:[%s19977_s7 + $0x1e0] sm:$0xf]  ;;  %v13741_v3 = vor.u32 %v18170_v60, %v13740_v59  ;;  %v13516_v58 = vld [vmem:[%s19977_s7 + $0xb10] sm:$0xf]  ;;  %v18114_v59 = vld [vmem:[%s19977_s7 + $0xb44] sm:$0xf0] }
 0x169   : > { %3763 = vmatpush.bf16.msrb.mxu0 %v12169_v7  ;;  %v13684_v7 = vld [vmem:[%s19977_s7 + $0xc60] sm:$0xf]  ;;  %v12341_v9 = vor.u32 %v17820_v1, %v12340_v0  ;;  %v13517_v5 = vor.u32 %v18114_v59, %v13516_v58  ;;  %v18037_v58 = vld [vmem:[%s19977_s7 + $0x8e4] sm:$0xf]  ;;  %v13238_v59 = vld [vmem:[%s19977_s7 + $0x918] sm:$0xf0] }
 0x16a   : > { %3776 = vmatpush.bf16.msrb.mxu1 %v12617_v12  ;;  %v13685_v19 = vor.u32 %v18156_v8, %v13684_v7  ;;  %v12564_v1 = vld [vmem:[%s19977_s7 + $0x3a0] sm:$0xf]  ;;  %v18100_v8 = vld [vmem:[%s19977_s7 + $0xad4] sm:$0xf0] }
 0x16b   : > { %3789 = vmatpush.bf16.msrb.mxu2 %v13065_v13  ;;  %v12789_v13 = vor.u32 %v17932_v4, %v12788_v2  ;;  %v17876_v2 = vld [vmem:[%s19977_s7 + $0x3d4] sm:$0xf0]  ;;  %v13460_v7 = vld [vmem:[%s19977_s7 + $0xaa0] sm:$0xf] }
 0x16c   : > { %3802 = vmatpush.bf16.msrb.mxu3 %v13513_v18 }
 0x16d   : > { %3764 = vmatpush.bf16.msrb.mxu0 %v12113_v28  ;;  %v3558_v12 = vpop.f32.mrf.mxu0  ;;  %v12285_v28 = vor.u32 %v17806_v16, %v12284_v15  ;;  %v12958_v16 = vld [vmem:[%s19977_s7 + $0x6e8] sm:$0xf0] }
 0x16e   : > { %3777 = vmatpush.bf16.msrb.mxu1 %v12561_v32  ;;  %v3571_v18 = vpop.f32.mrf.mxu1  ;;  %v17792_v32 = vld [vmem:[%s19977_s7 + $0x134] sm:$0xf0] }
 0x16f   : > { %3790 = vmatpush.bf16.msrb.mxu2 %v13009_v33  ;;  %v3572_v24 = vadd.f32 %v3571_v18, %v3558_v12  ;;  %v12676_v33 = vld [vmem:[%s19977_s7 + $0x480] sm:$0xf]  ;;  %v12229_v44 = vor.u32 %v17792_v32, %v12228_v31  ;;  %v17855_v12 = vld [vmem:[%s19977_s7 + $0x334] sm:$0xf]  ;;  %v13406_v18 = vld [vmem:[%s19977_s7 + $0xa68] sm:$0xf0]  ;;  %v13857_v32 = vor.u32 %v18191_v22, %v13854_v23 }
 0x170   : > { %3803 = vmatpush.bf16.msrb.mxu3 %v13457_v36  ;;  %3765 = vmatmul.bf16.vlgmr.msrb.gmra.mxu0 %v20109_v20  ;;  %v17904_v36 = vld [vmem:[%s19977_s7 + $0x4b4] sm:$0xf0]  ;;  %v17953_v31 = vld [vmem:[%s19977_s7 + $0x644] sm:$0xf] }
 0x171   : > { %3809 = vmatpush.bf16.msra.mxu0 %v12509_v37  ;;  %3778 = vmatmul.bf16.vlgmr.msrb.gmra.mxu1 %v20115_v27  ;;  %v13124_v37 = vld [vmem:[%s19977_s7 + $0x800] sm:$0xf]  ;;  %v12677_v47 = vor.u32 %v17904_v36, %v12676_v33  ;;  %v12902_v33 = vld [vmem:[%s19977_s7 + $0x678] sm:$0xf0]  ;;  %v18177_v36 = vld [vmem:[%s19977_s7 + $0xd44] sm:$0xf] }
 0x172   : > { %3822 = vmatpush.bf16.msra.mxu1 %v12957_v38  ;;  %3791 = vmatmul.bf16.vlgmr.msrb.gmra.mxu2 %v20097_v10  ;;  %v18016_v38 = vld [vmem:[%s19977_s7 + $0x834] sm:$0xf0] }
 0x173   : > { %3835 = vmatpush.bf16.msra.mxu2 %v13405_v39  ;;  %3804 = vmatmul.bf16.vlgmr.msrb.gmra.mxu3 %v20099_v11  ;;  %v13125_v48 = vor.u32 %v18016_v38, %v13124_v37  ;;  %v13798_v37 = vld [vmem:[%s19977_s7 + $0xd78] sm:$0xf0] }
 0x174   : > { %3848 = vmatpush.bf16.msra.mxu3 %v13853_v43  ;;  %v686_v43 = vld [vmem:[#allocation2 + $0x18] sm:$0xff] }
 0x175   : > { %3810 = vmatpush.bf16.msra.mxu0 %v12453_v49  ;;  %v3584_v34 = vpop.f32.mrf.mxu2  ;;  %v3560_v46 = vpop.f32.mrf.mxu0  ;;  %v12172_v49 = vld [vmem:[%s19977_s7 + $0x90] sm:$0xf] }
 0x176   : > { %3823 = vmatpush.bf16.msra.mxu1 %v12901_v50  ;;  %v3585_v39 = vadd.f32 %v3584_v34, %v3572_v24  ;;  %v3597_v40 = vpop.f32.mrf.mxu3  ;;  %v17778_v50 = vld [vmem:[%s19977_s7 + $0xc4] sm:$0xf0]  ;;  %v3573_v52 = vpop.f32.mrf.mxu1  ;;  %v13461_v24 = vor.u32 %v18100_v8, %v13460_v7  ;;  %v18065_v34 = vld [vmem:[%s19977_s7 + $0x9c4] sm:$0xf]  ;;  %v18051_v46 = vld [vmem:[%s19977_s7 + $0x954] sm:$0xf] }
 0x177   : > { %3836 = vmatpush.bf16.msra.mxu2 %v13349_v51  ;;  %v12620_v51 = vld [vmem:[%s19977_s7 + $0x410] sm:$0xf]  ;;  %v12173_v60 = vor.u32 %v17778_v50, %v12172_v49  ;;  %v13742_v49 = vld [vmem:[%s19977_s7 + $0xd08] sm:$0xf0]  ;;  %v12401_v50 = vor.u32 %v17827_v41, %v12398_v42  ;;  %v18023_v8 = vld [vmem:[%s19977_s7 + $0x874] sm:$0xf] }
 0x178   : > { %3849 = vmatpush.bf16.msra.mxu3 %v13797_v55  ;;  %v3598_v45 = vadd.f32 %v3597_v40, %v3585_v39  ;;  %v13068_v55 = vld [vmem:[%s19977_s7 + $0x790] sm:$0xf]  ;;  %v12905_v39 = vor.u32 %v17953_v31, %v12902_v33  ;;  %v12734_v7 = vld [vmem:[%s19977_s7 + $0x528] sm:$0xf0]  ;;  %v13574_v31 = vld [vmem:[%s19977_s7 + $0xbb8] sm:$0xf0] }
 0x179   : > { %3811 = vmatpush.bf16.msra.mxu0 %v12397_v61  ;;  %v12116_v61 = vld [vmem:[%s19977_s7 + $0x20] sm:$0xf]  ;;  %v13069_v0 = vor.u32 %v18002_v56, %v13068_v55  ;;  %v17925_v55 = vld [vmem:[%s19977_s7 + $0x564] sm:$0xf] }
 0x17a   : > { %3824 = vmatpush.bf16.msra.mxu1 %v12845_v62  ;;  %v4124_v57 = vadd.f32 %v3598_v45, %v686_v43  ;;  %v17764_v62 = vld [vmem:[%s19977_s7 + $0x54] sm:$0xf0]  ;;  %v17939_v43 = vld [vmem:[%s19977_s7 + $0x5d4] sm:$0xf]  ;;  %v12846_v45 = vld [vmem:[%s19977_s7 + $0x608] sm:$0xf0] }
 0x17b   : > { %3837 = vmatpush.bf16.msra.mxu2 %v13293_v63  ;;  %v12621_v63 = vor.u32 %v17890_v54, %v12620_v51  ;;  %v12117_v15 = vor.u32 %v17764_v62, %v12116_v61  ;;  %v12849_v51 = vor.u32 %v17939_v43, %v12846_v45  ;;  %v12342_v54 = vld [vmem:[%s19977_s7 + $0x218] sm:$0xf0]  ;;  %v12622_v43 = vld [vmem:[%s19977_s7 + $0x448] sm:$0xf0] }
 0x17c   : > { %3850 = vmatpush.bf16.msra.mxu3 %v13741_v3  ;;  %4138 = vst [vmem:[#allocation2 + $0x18] sm:$0xff] %v4124_v57  ;;  %v13012_v3 = vld [vmem:[%s19977_s7 + $0x720] sm:$0xf]  ;;  %v12790_v57 = vld [vmem:[%s19977_s7 + $0x598] sm:$0xf0] }
 0x17d   : > { %3812 = vmatpush.bf16.msra.mxu0 %v12341_v9  ;;  %v3586_v4 = vpop.f32.mrf.mxu2  ;;  %v13013_v21 = vor.u32 %v17988_v6, %v13012_v3  ;;  %v13686_v61 = vld [vmem:[%s19977_s7 + $0xc98] sm:$0xf0]  ;;  %v12286_v3 = vld [vmem:[%s19977_s7 + $0x1a8] sm:$0xf0] }
 0x17e   : > { %3825 = vmatpush.bf16.msra.mxu1 %v12789_v13  ;;  %v3599_v9 = vpop.f32.mrf.mxu3  ;;  %v12510_v13 = vld [vmem:[%s19977_s7 + $0x368] sm:$0xf0]  ;;  %v17911_v4 = vld [vmem:[%s19977_s7 + $0x4f4] sm:$0xf] }
 0x17f   : > { %3838 = vmatpush.bf16.msra.mxu2 %v13237_v14  ;;  %v17967_v14 = vld [vmem:[%s19977_s7 + $0x6b4] sm:$0xf]  ;;  %v12513_v25 = vor.u32 %v17855_v12, %v12510_v13  ;;  %v13182_v9 = vld [vmem:[%s19977_s7 + $0x8a8] sm:$0xf0] }
 0x180   : > { %3851 = vmatpush.bf16.msra.mxu3 %v13685_v19  ;;  %v12565_v19 = vor.u32 %v17876_v2, %v12564_v1  ;;  %v12961_v26 = vor.u32 %v17967_v14, %v12958_v16  ;;  %v13241_v1 = vor.u32 %v18037_v58, %v13238_v59  ;;  %v17799_v2 = vld [vmem:[%s19977_s7 + $0x174] sm:$0xf]  ;;  %v13630_v14 = vld [vmem:[%s19977_s7 + $0xc28] sm:$0xf0]  ;;  %v12737_v16 = vor.u32 %v17911_v4, %v12734_v7  ;;  %v13014_v59 = vld [vmem:[%s19977_s7 + $0x758] sm:$0xf0] }
 0x181   : > { %3813 = vmatpush.bf16.msra.mxu0 %v12285_v28  ;;  %v13409_v28 = vor.u32 %v18079_v17, %v13406_v18  ;;  %v18135_v13 = vld [vmem:[%s19977_s7 + $0xbf4] sm:$0xf]  ;;  %v13185_v17 = vor.u32 %v18023_v8, %v13182_v9  ;;  %v17785_v18 = vld [vmem:[%s19977_s7 + $0x104] sm:$0xf]  ;;  %v13070_v45 = vld [vmem:[%s19977_s7 + $0x7c8] sm:$0xf0] }
 0x182   : > { %3826 = vmatpush.bf16.msra.mxu1 %v12733_v29  ;;  %v17841_v29 = vld [vmem:[%s19977_s7 + $0x2c4] sm:$0xf]  ;;  %v13633_v23 = vor.u32 %v18135_v13, %v13630_v14  ;;  %v13412_v4 = vld [vmem:[%s19977_s7 + $0xa38] sm:$0xf]  ;;  %v18199_v9 = vld [vmem:[%s19977_s7 + $0xdec] sm:$0xf0] }
 0x183   : > { %3839 = vmatpush.bf16.msra.mxu2 %v13181_v30  ;;  %v12454_v30 = vld [vmem:[%s19977_s7 + $0x2f8] sm:$0xf0]  ;;  %v13860_v8 = vld [vmem:[%s19977_s7 + $0xdb8] sm:$0xf] }
 0x184   : > { %3852 = vmatpush.bf16.msra.mxu3 %v13629_v35  ;;  %v13350_v35 = vld [vmem:[%s19977_s7 + $0x9f8] sm:$0xf0]  ;;  %v12457_v38 = vor.u32 %v17841_v29, %v12454_v30  ;;  %v18121_v30 = vld [vmem:[%s19977_s7 + $0xb84] sm:$0xf] }
 0x185   : > { %3814 = vmatpush.bf16.msra.mxu0 %v12229_v44  ;;  %v13353_v40 = vor.u32 %v18065_v34, %v13350_v35  ;;  %v13801_v44 = vor.u32 %v18177_v36, %v13798_v37  ;;  %v13577_v42 = vor.u32 %v18121_v30, %v13574_v31  ;;  %v12404_v30 = vld [vmem:[%s19977_s7 + $0x258] sm:$0xf]  ;;  %v17835_v31 = vld [vmem:[%s19977_s7 + $0x28c] sm:$0xf0] }
 0x186   : > { %3827 = vmatpush.bf16.msra.mxu1 %v12677_v47  ;;  %v13294_v47 = vld [vmem:[%s19977_s7 + $0x988] sm:$0xf0] }
 0x187   : > { %3840 = vmatpush.bf16.msra.mxu2 %v13125_v48  ;;  %v18163_v48 = vld [vmem:[%s19977_s7 + $0xcd4] sm:$0xf]  ;;  %v13297_v52 = vor.u32 %v18051_v46, %v13294_v47 }
 0x188   : > { %3853 = vmatpush.bf16.msra.mxu3 %v13573_v53  ;;  %v17813_v53 = vld [vmem:[%s19977_s7 + $0x1e4] sm:$0xf]  ;;  %v13745_v56 = vor.u32 %v18163_v48, %v13742_v49  ;;  %v18107_v47 = vld [vmem:[%s19977_s7 + $0xb14] sm:$0xf]  ;;  %v13518_v48 = vld [vmem:[%s19977_s7 + $0xb48] sm:$0xf0] }
 0x189   : > { %3815 = vmatpush.bf16.msra.mxu0 %v12173_v60  ;;  %v18149_v60 = vld [vmem:[%s19977_s7 + $0xc64] sm:$0xf]  ;;  %v12345_v62 = vor.u32 %v17813_v53, %v12342_v54  ;;  %v13521_v58 = vor.u32 %v18107_v47, %v13518_v48  ;;  %v13244_v47 = vld [vmem:[%s19977_s7 + $0x8e8] sm:$0xf]  ;;  %v18045_v48 = vld [vmem:[%s19977_s7 + $0x91c] sm:$0xf0] }
 0x18a   : > { %3828 = vmatpush.bf16.msra.mxu1 %v12621_v63  ;;  %v13689_v6 = vor.u32 %v18149_v60, %v13686_v61  ;;  %v17869_v54 = vld [vmem:[%s19977_s7 + $0x3a4] sm:$0xf]  ;;  %v13462_v61 = vld [vmem:[%s19977_s7 + $0xad8] sm:$0xf0] }
 0x18b   : > { %3841 = vmatpush.bf16.msra.mxu2 %v13069_v0  ;;  %v12793_v0 = vor.u32 %v17925_v55, %v12790_v57  ;;  %v12566_v55 = vld [vmem:[%s19977_s7 + $0x3d8] sm:$0xf0]  ;;  %v18093_v60 = vld [vmem:[%s19977_s7 + $0xaa4] sm:$0xf] }
 0x18c   : > { %3854 = vmatpush.bf16.msra.mxu3 %v13517_v5 }
 0x18d   : > { %3816 = vmatpush.bf16.msra.mxu0 %v12117_v15  ;;  %v3610_v63 = vpop.f32.mrf.mxu0  ;;  %v12289_v15 = vor.u32 %v17799_v2, %v12286_v3  ;;  %v17975_v3 = vld [vmem:[%s19977_s7 + $0x6ec] sm:$0xf0] }
 0x18e   : > { %3829 = vmatpush.bf16.msra.mxu1 %v12565_v19  ;;  %v3623_v5 = vpop.f32.mrf.mxu1  ;;  %v12230_v19 = vld [vmem:[%s19977_s7 + $0x138] sm:$0xf0] }
 0x18f   : > { %3842 = vmatpush.bf16.msra.mxu2 %v13013_v21  ;;  %v3624_v12 = vadd.f32 %v3623_v5, %v3610_v63  ;;  %v17897_v21 = vld [vmem:[%s19977_s7 + $0x484] sm:$0xf]  ;;  %v12233_v33 = vor.u32 %v17785_v18, %v12230_v19  ;;  %v12516_v63 = vld [vmem:[%s19977_s7 + $0x338] sm:$0xf]  ;;  %v18087_v5 = vld [vmem:[%s19977_s7 + $0xa6c] sm:$0xf0]  ;;  %v13861_v19 = vor.u32 %v18199_v9, %v13860_v8 }
 0x190   : > { %3855 = vmatpush.bf16.msra.mxu3 %v13461_v24  ;;  %3817 = vmatmul.bf16.vlgmr.msra.gmra.mxu0 %v20109_v20  ;;  %v12678_v24 = vld [vmem:[%s19977_s7 + $0x4b8] sm:$0xf0]  ;;  %v12908_v18 = vld [vmem:[%s19977_s7 + $0x648] sm:$0xf] }
 0x191   : > { %3861 = vmatpush.bf16.msrb.mxu0 %v12513_v25  ;;  %3830 = vmatmul.bf16.vlgmr.msra.gmra.mxu1 %v20115_v27  ;;  %v18009_v25 = vld [vmem:[%s19977_s7 + $0x804] sm:$0xf]  ;;  %v12681_v36 = vor.u32 %v17897_v21, %v12678_v24  ;;  %v17961_v21 = vld [vmem:[%s19977_s7 + $0x67c] sm:$0xf0]  ;;  %v13804_v24 = vld [vmem:[%s19977_s7 + $0xd48] sm:$0xf] }
 0x192   : > { %3874 = vmatpush.bf16.msrb.mxu1 %v12961_v26  ;;  %3843 = vmatmul.bf16.vlgmr.msra.gmra.mxu2 %v20097_v10  ;;  %v13126_v26 = vld [vmem:[%s19977_s7 + $0x838] sm:$0xf0] }
 0x193   : > { %3887 = vmatpush.bf16.msrb.mxu2 %v13409_v28  ;;  %3856 = vmatmul.bf16.vlgmr.msra.gmra.mxu3 %v20099_v11  ;;  %v13129_v37 = vor.u32 %v18009_v25, %v13126_v26  ;;  %v18185_v25 = vld [vmem:[%s19977_s7 + $0xd7c] sm:$0xf0] }
 0x194   : > { %3900 = vmatpush.bf16.msrb.mxu3 %v13857_v32  ;;  %v687_v32 = vld [vmem:[#allocation2 + $0x50] sm:$0xff] }
 0x195   : > { %3862 = vmatpush.bf16.msrb.mxu0 %v12457_v38  ;;  %v3636_v22 = vpop.f32.mrf.mxu2  ;;  %v3612_v35 = vpop.f32.mrf.mxu0  ;;  %v17771_v38 = vld [vmem:[%s19977_s7 + $0x94] sm:$0xf] }
 0x196   : > { %3875 = vmatpush.bf16.msrb.mxu1 %v12905_v39  ;;  %v3637_v28 = vadd.f32 %v3636_v22, %v3624_v12  ;;  %v3649_v29 = vpop.f32.mrf.mxu3  ;;  %v12174_v39 = vld [vmem:[%s19977_s7 + $0xc8] sm:$0xf0]  ;;  %v3625_v41 = vpop.f32.mrf.mxu1  ;;  %v13465_v12 = vor.u32 %v18093_v60, %v13462_v61  ;;  %v13356_v22 = vld [vmem:[%s19977_s7 + $0x9c8] sm:$0xf]  ;;  %v13300_v35 = vld [vmem:[%s19977_s7 + $0x958] sm:$0xf] }
 0x197   : > { %3888 = vmatpush.bf16.msrb.mxu2 %v13353_v40  ;;  %v17883_v40 = vld [vmem:[%s19977_s7 + $0x414] sm:$0xf]  ;;  %v12177_v49 = vor.u32 %v17771_v38, %v12174_v39  ;;  %v18171_v38 = vld [vmem:[%s19977_s7 + $0xd0c] sm:$0xf0]  ;;  %v12405_v39 = vor.u32 %v17835_v31, %v12404_v30  ;;  %v13188_v61 = vld [vmem:[%s19977_s7 + $0x878] sm:$0xf] }
 0x198   : > { %3901 = vmatpush.bf16.msrb.mxu3 %v13801_v44  ;;  %v3650_v34 = vadd.f32 %v3649_v29, %v3637_v28  ;;  %v17995_v44 = vld [vmem:[%s19977_s7 + $0x794] sm:$0xf]  ;;  %v12909_v28 = vor.u32 %v17961_v21, %v12908_v18  ;;  %v17919_v60 = vld [vmem:[%s19977_s7 + $0x52c] sm:$0xf0]  ;;  %v18129_v18 = vld [vmem:[%s19977_s7 + $0xbbc] sm:$0xf0] }
 0x199   : > { %3863 = vmatpush.bf16.msrb.mxu0 %v12401_v50  ;;  %v17757_v50 = vld [vmem:[%s19977_s7 + $0x24] sm:$0xf]  ;;  %v13073_v53 = vor.u32 %v17995_v44, %v13070_v45  ;;  %v12796_v44 = vld [vmem:[%s19977_s7 + $0x568] sm:$0xf] }
 0x19a   : > { %3876 = vmatpush.bf16.msrb.mxu1 %v12849_v51  ;;  %v4125_v46 = vadd.f32 %v3650_v34, %v687_v32  ;;  %v12118_v51 = vld [vmem:[%s19977_s7 + $0x58] sm:$0xf0]  ;;  %v12852_v32 = vld [vmem:[%s19977_s7 + $0x5d8] sm:$0xf]  ;;  %v17947_v34 = vld [vmem:[%s19977_s7 + $0x60c] sm:$0xf0] }
 0x19b   : > { %3889 = vmatpush.bf16.msrb.mxu2 %v13297_v52  ;;  %v12625_v52 = vor.u32 %v17883_v40, %v12622_v43  ;;  %v12121_v2 = vor.u32 %v17757_v50, %v12118_v51  ;;  %v12853_v40 = vor.u32 %v17947_v34, %v12852_v32  ;;  %v17821_v43 = vld [vmem:[%s19977_s7 + $0x21c] sm:$0xf0]  ;;  %v17891_v32 = vld [vmem:[%s19977_s7 + $0x44c] sm:$0xf0] }
 0x19c   : > { %3902 = vmatpush.bf16.msrb.mxu3 %v13745_v56  ;;  %4139 = vst [vmem:[#allocation2 + $0x50] sm:$0xff] %v4125_v46  ;;  %v17981_v56 = vld [vmem:[%s19977_s7 + $0x724] sm:$0xf]  ;;  %v17933_v46 = vld [vmem:[%s19977_s7 + $0x59c] sm:$0xf0] }
 0x19d   : > { %3864 = vmatpush.bf16.msrb.mxu0 %v12345_v62  ;;  %v3638_v57 = vpop.f32.mrf.mxu2  ;;  %v13017_v7 = vor.u32 %v17981_v56, %v13014_v59  ;;  %v18157_v50 = vld [vmem:[%s19977_s7 + $0xc9c] sm:$0xf0]  ;;  %v17807_v56 = vld [vmem:[%s19977_s7 + $0x1ac] sm:$0xf0] }
 0x19e   : > { %3877 = vmatpush.bf16.msrb.mxu1 %v12793_v0  ;;  %v3651_v62 = vpop.f32.mrf.mxu3  ;;  %v17863_v0 = vld [vmem:[%s19977_s7 + $0x36c] sm:$0xf0]  ;;  %v12740_v57 = vld [vmem:[%s19977_s7 + $0x4f8] sm:$0xf] }
 0x19f   : > { %3890 = vmatpush.bf16.msrb.mxu2 %v13241_v1  ;;  %v12964_v1 = vld [vmem:[%s19977_s7 + $0x6b8] sm:$0xf]  ;;  %v12517_v13 = vor.u32 %v17863_v0, %v12516_v63  ;;  %v18031_v62 = vld [vmem:[%s19977_s7 + $0x8ac] sm:$0xf0] }
 0x1a0   : > { %3903 = vmatpush.bf16.msrb.mxu3 %v13689_v6  ;;  %v12569_v6 = vor.u32 %v17869_v54, %v12566_v55  ;;  %v12965_v14 = vor.u32 %v17975_v3, %v12964_v1  ;;  %v13245_v54 = vor.u32 %v18045_v48, %v13244_v47  ;;  %v12292_v55 = vld [vmem:[%s19977_s7 + $0x178] sm:$0xf]  ;;  %v18143_v1 = vld [vmem:[%s19977_s7 + $0xc2c] sm:$0xf0]  ;;  %v12741_v3 = vor.u32 %v17919_v60, %v12740_v57  ;;  %v17989_v48 = vld [vmem:[%s19977_s7 + $0x75c] sm:$0xf0] }
 0x1a1   : > { %3865 = vmatpush.bf16.msrb.mxu0 %v12289_v15  ;;  %v13413_v15 = vor.u32 %v18087_v5, %v13412_v4  ;;  %v13636_v0 = vld [vmem:[%s19977_s7 + $0xbf8] sm:$0xf]  ;;  %v13189_v4 = vor.u32 %v18031_v62, %v13188_v61  ;;  %v12236_v5 = vld [vmem:[%s19977_s7 + $0x108] sm:$0xf]  ;;  %v18003_v34 = vld [vmem:[%s19977_s7 + $0x7cc] sm:$0xf0] }
 0x1a2   : > { %3878 = vmatpush.bf16.msrb.mxu1 %v12737_v16  ;;  %v12460_v16 = vld [vmem:[%s19977_s7 + $0x2c8] sm:$0xf]  ;;  %v13637_v9 = vor.u32 %v18143_v1, %v13636_v0  ;;  %v18080_v57 = vld [vmem:[%s19977_s7 + $0xa3c] sm:$0xf]  ;;  %v13862_v62 = vld [vmem:[%s19977_s7 + $0xdf0] sm:$0xf0] }
 0x1a3   : > { %3891 = vmatpush.bf16.msrb.mxu2 %v13185_v17  ;;  %v17849_v17 = vld [vmem:[%s19977_s7 + $0x2fc] sm:$0xf0]  ;;  %v18192_v61 = vld [vmem:[%s19977_s7 + $0xdbc] sm:$0xf] }
 0x1a4   : > { %3904 = vmatpush.bf16.msrb.mxu3 %v13633_v23  ;;  %v18073_v23 = vld [vmem:[%s19977_s7 + $0x9fc] sm:$0xf0]  ;;  %v12461_v26 = vor.u32 %v17849_v17, %v12460_v16  ;;  %v13580_v17 = vld [vmem:[%s19977_s7 + $0xb88] sm:$0xf] }
 0x1a5   : > { %3866 = vmatpush.bf16.msrb.mxu0 %v12233_v33  ;;  %v13357_v29 = vor.u32 %v18073_v23, %v13356_v22  ;;  %v13805_v33 = vor.u32 %v18185_v25, %v13804_v24  ;;  %v13581_v31 = vor.u32 %v18129_v18, %v13580_v17  ;;  %v17828_v17 = vld [vmem:[%s19977_s7 + $0x25c] sm:$0xf]  ;;  %v12406_v18 = vld [vmem:[%s19977_s7 + $0x290] sm:$0xf0] }
 0x1a6   : > { %3879 = vmatpush.bf16.msrb.mxu1 %v12681_v36  ;;  %v18059_v36 = vld [vmem:[%s19977_s7 + $0x98c] sm:$0xf0] }
 0x1a7   : > { %3892 = vmatpush.bf16.msrb.mxu2 %v13129_v37  ;;  %v13748_v37 = vld [vmem:[%s19977_s7 + $0xcd8] sm:$0xf]  ;;  %v13301_v41 = vor.u32 %v18059_v36, %v13300_v35 }
 0x1a8   : > { %3905 = vmatpush.bf16.msrb.mxu3 %v13577_v42  ;;  %v12348_v42 = vld [vmem:[%s19977_s7 + $0x1e8] sm:$0xf]  ;;  %v13749_v45 = vor.u32 %v18171_v38, %v13748_v37  ;;  %v13524_v36 = vld [vmem:[%s19977_s7 + $0xb18] sm:$0xf]  ;;  %v18115_v37 = vld [vmem:[%s19977_s7 + $0xb4c] sm:$0xf0] }
 0x1a9   : > { %3867 = vmatpush.bf16.msrb.mxu0 %v12177_v49  ;;  %v13692_v49 = vld [vmem:[%s19977_s7 + $0xc68] sm:$0xf]  ;;  %v12349_v51 = vor.u32 %v17821_v43, %v12348_v42  ;;  %v13525_v47 = vor.u32 %v18115_v37, %v13524_v36  ;;  %v18038_v36 = vld [vmem:[%s19977_s7 + $0x8ec] sm:$0xf]  ;;  %v13246_v37 = vld [vmem:[%s19977_s7 + $0x920] sm:$0xf0] }
 0x1aa   : > { %3880 = vmatpush.bf16.msrb.mxu1 %v12625_v52  ;;  %v13693_v59 = vor.u32 %v18157_v50, %v13692_v49  ;;  %v12572_v43 = vld [vmem:[%s19977_s7 + $0x3a8] sm:$0xf]  ;;  %v18101_v50 = vld [vmem:[%s19977_s7 + $0xadc] sm:$0xf0] }
 0x1ab   : > { %3893 = vmatpush.bf16.msrb.mxu2 %v13073_v53  ;;  %v12797_v53 = vor.u32 %v17933_v46, %v12796_v44  ;;  %v17877_v44 = vld [vmem:[%s19977_s7 + $0x3dc] sm:$0xf0]  ;;  %v13468_v49 = vld [vmem:[%s19977_s7 + $0xaa8] sm:$0xf] }
 0x1ac   : > { %3906 = vmatpush.bf16.msrb.mxu3 %v13521_v58 }
 0x1ad   : > { %3868 = vmatpush.bf16.msrb.mxu0 %v12121_v2  ;;  %v3662_v52 = vpop.f32.mrf.mxu0  ;;  %v12293_v2 = vor.u32 %v17807_v56, %v12292_v55  ;;  %v12966_v56 = vld [vmem:[%s19977_s7 + $0x6f0] sm:$0xf0] }
 0x1ae   : > { %3881 = vmatpush.bf16.msrb.mxu1 %v12569_v6  ;;  %v3675_v58 = vpop.f32.mrf.mxu1  ;;  %v17793_v6 = vld [vmem:[%s19977_s7 + $0x13c] sm:$0xf0] }
 0x1af   : > { %3894 = vmatpush.bf16.msrb.mxu2 %v13017_v7  ;;  %v3676_v63 = vadd.f32 %v3675_v58, %v3662_v52  ;;  %v12684_v7 = vld [vmem:[%s19977_s7 + $0x488] sm:$0xf]  ;;  %v12237_v21 = vor.u32 %v17793_v6, %v12236_v5  ;;  %v17856_v52 = vld [vmem:[%s19977_s7 + $0x33c] sm:$0xf]  ;;  %v13414_v58 = vld [vmem:[%s19977_s7 + $0xa70] sm:$0xf0]  ;;  %v13865_v6 = vor.u32 %v18192_v61, %v13862_v62 }
 0x1b0   : > { %3907 = vmatpush.bf16.msrb.mxu3 %v13465_v12  ;;  %3869 = vmatmul.bf16.vlgmr.msrb.gmra.mxu0 %v20109_v20  ;;  %v17905_v12 = vld [vmem:[%s19977_s7 + $0x4bc] sm:$0xf0]  ;;  %v17954_v5 = vld [vmem:[%s19977_s7 + $0x64c] sm:$0xf] }
 0x1b1   : > { %3913 = vmatpush.bf16.msra.mxu0 %v12517_v13  ;;  %3882 = vmatmul.bf16.vlgmr.msrb.gmra.mxu1 %v20115_v27  ;;  %v13132_v13 = vld [vmem:[%s19977_s7 + $0x808] sm:$0xf]  ;;  %v12685_v24 = vor.u32 %v17905_v12, %v12684_v7  ;;  %v12910_v7 = vld [vmem:[%s19977_s7 + $0x680] sm:$0xf0]  ;;  %v18178_v12 = vld [vmem:[%s19977_s7 + $0xd4c] sm:$0xf] }
 0x1b2   : > { %3926 = vmatpush.bf16.msra.mxu1 %v12965_v14  ;;  %3895 = vmatmul.bf16.vlgmr.msrb.gmra.mxu2 %v20097_v10  ;;  %v18017_v14 = vld [vmem:[%s19977_s7 + $0x83c] sm:$0xf0] }
 0x1b3   : > { %3939 = vmatpush.bf16.msra.mxu2 %v13413_v15  ;;  %3908 = vmatmul.bf16.vlgmr.msrb.gmra.mxu3 %v20099_v11  ;;  %v13133_v25 = vor.u32 %v18017_v14, %v13132_v13  ;;  %v13806_v13 = vld [vmem:[%s19977_s7 + $0xd80] sm:$0xf0] }
 0x1b4   : > { %3952 = vmatpush.bf16.msra.mxu3 %v13861_v19  ;;  %v688_v19 = vld [vmem:[#allocation2 + $0x68] sm:$0xff] }
 0x1b5   : > { %3914 = vmatpush.bf16.msra.mxu0 %v12461_v26  ;;  %v3688_v8 = vpop.f32.mrf.mxu2  ;;  %v3664_v23 = vpop.f32.mrf.mxu0  ;;  %v12180_v26 = vld [vmem:[%s19977_s7 + $0x98] sm:$0xf] }
 0x1b6   : > { %3927 = vmatpush.bf16.msra.mxu1 %v12909_v28  ;;  %v3689_v15 = vadd.f32 %v3688_v8, %v3676_v63  ;;  %v3701_v16 = vpop.f32.mrf.mxu3  ;;  %v17779_v28 = vld [vmem:[%s19977_s7 + $0xcc] sm:$0xf0]  ;;  %v3677_v30 = vpop.f32.mrf.mxu1  ;;  %v13469_v63 = vor.u32 %v18101_v50, %v13468_v49  ;;  %v18066_v8 = vld [vmem:[%s19977_s7 + $0x9cc] sm:$0xf]  ;;  %v18052_v23 = vld [vmem:[%s19977_s7 + $0x95c] sm:$0xf] }
 0x1b7   : > { %3940 = vmatpush.bf16.msra.mxu2 %v13357_v29  ;;  %v12628_v29 = vld [vmem:[%s19977_s7 + $0x418] sm:$0xf]  ;;  %v12181_v38 = vor.u32 %v17779_v28, %v12180_v26  ;;  %v13750_v26 = vld [vmem:[%s19977_s7 + $0xd10] sm:$0xf0]  ;;  %v12409_v28 = vor.u32 %v17828_v17, %v12406_v18  ;;  %v18024_v50 = vld [vmem:[%s19977_s7 + $0x87c] sm:$0xf] }
 0x1b8   : > { %3953 = vmatpush.bf16.msra.mxu3 %v13805_v33  ;;  %v3702_v22 = vadd.f32 %v3701_v16, %v3689_v15  ;;  %v13076_v33 = vld [vmem:[%s19977_s7 + $0x798] sm:$0xf]  ;;  %v12913_v15 = vor.u32 %v17954_v5, %v12910_v7  ;;  %v12742_v49 = vld [vmem:[%s19977_s7 + $0x530] sm:$0xf0]  ;;  %v13582_v5 = vld [vmem:[%s19977_s7 + $0xbc0] sm:$0xf0] }
 0x1b9   : > { %3915 = vmatpush.bf16.msra.mxu0 %v12405_v39  ;;  %v12124_v39 = vld [vmem:[%s19977_s7 + $0x28] sm:$0xf]  ;;  %v13077_v42 = vor.u32 %v18003_v34, %v13076_v33  ;;  %v17926_v33 = vld [vmem:[%s19977_s7 + $0x56c] sm:$0xf] }
 0x1ba   : > { %3928 = vmatpush.bf16.msra.mxu1 %v12853_v40  ;;  %v4126_v35 = vadd.f32 %v3702_v22, %v688_v19  ;;  %v17765_v40 = vld [vmem:[%s19977_s7 + $0x5c] sm:$0xf0]  ;;  %v17940_v19 = vld [vmem:[%s19977_s7 + $0x5dc] sm:$0xf]  ;;  %v12854_v22 = vld [vmem:[%s19977_s7 + $0x610] sm:$0xf0] }
 0x1bb   : > { %3941 = vmatpush.bf16.msra.mxu2 %v13301_v41  ;;  %v12629_v41 = vor.u32 %v17891_v32, %v12628_v29  ;;  %v12125_v55 = vor.u32 %v17765_v40, %v12124_v39  ;;  %v12857_v29 = vor.u32 %v17940_v19, %v12854_v22  ;;  %v12350_v32 = vld [vmem:[%s19977_s7 + $0x220] sm:$0xf0]  ;;  %v12630_v19 = vld [vmem:[%s19977_s7 + $0x450] sm:$0xf0] }
 0x1bc   : > { %3954 = vmatpush.bf16.msra.mxu3 %v13749_v45  ;;  %4140 = vst [vmem:[#allocation2 + $0x68] sm:$0xff] %v4126_v35  ;;  %v13020_v45 = vld [vmem:[%s19977_s7 + $0x728] sm:$0xf]  ;;  %v12798_v35 = vld [vmem:[%s19977_s7 + $0x5a0] sm:$0xf0] }
 0x1bd   : > { %3916 = vmatpush.bf16.msra.mxu0 %v12349_v51  ;;  %v3690_v46 = vpop.f32.mrf.mxu2  ;;  %v13021_v60 = vor.u32 %v17989_v48, %v13020_v45  ;;  %v13694_v39 = vld [vmem:[%s19977_s7 + $0xca0] sm:$0xf0]  ;;  %v12294_v45 = vld [vmem:[%s19977_s7 + $0x1b0] sm:$0xf0] }
 0x1be   : > { %3929 = vmatpush.bf16.msra.mxu1 %v12797_v53  ;;  %v3703_v51 = vpop.f32.mrf.mxu3  ;;  %v12518_v53 = vld [vmem:[%s19977_s7 + $0x370] sm:$0xf0]  ;;  %v17912_v46 = vld [vmem:[%s19977_s7 + $0x4fc] sm:$0xf] }
 0x1bf   : > { %3942 = vmatpush.bf16.msra.mxu2 %v13245_v54  ;;  %v17968_v54 = vld [vmem:[%s19977_s7 + $0x6bc] sm:$0xf]  ;;  %v12521_v0 = vor.u32 %v17856_v52, %v12518_v53  ;;  %v13190_v51 = vld [vmem:[%s19977_s7 + $0x8b0] sm:$0xf0] }
 0x1c0   : > { %3955 = vmatpush.bf16.msra.mxu3 %v13693_v59  ;;  %v12573_v59 = vor.u32 %v17877_v44, %v12572_v43  ;;  %v12969_v1 = vor.u32 %v17968_v54, %v12966_v56  ;;  %v13249_v43 = vor.u32 %v18038_v36, %v13246_v37  ;;  %v17800_v44 = vld [vmem:[%s19977_s7 + $0x17c] sm:$0xf]  ;;  %v13638_v54 = vld [vmem:[%s19977_s7 + $0xc30] sm:$0xf0]  ;;  %v12745_v56 = vor.u32 %v17912_v46, %v12742_v49  ;;  %v13022_v37 = vld [vmem:[%s19977_s7 + $0x760] sm:$0xf0] }
 0x1c1   : > { %3917 = vmatpush.bf16.msra.mxu0 %v12293_v2  ;;  %v13417_v2 = vor.u32 %v18080_v57, %v13414_v58  ;;  %v18136_v53 = vld [vmem:[%s19977_s7 + $0xbfc] sm:$0xf]  ;;  %v13193_v57 = vor.u32 %v18024_v50, %v13190_v51  ;;  %v17786_v58 = vld [vmem:[%s19977_s7 + $0x10c] sm:$0xf]  ;;  %v13078_v22 = vld [vmem:[%s19977_s7 + $0x7d0] sm:$0xf0] }
 0x1c2   : > { %3930 = vmatpush.bf16.msra.mxu1 %v12741_v3  ;;  %v17842_v3 = vld [vmem:[%s19977_s7 + $0x2cc] sm:$0xf]  ;;  %v13641_v62 = vor.u32 %v18136_v53, %v13638_v54  ;;  %v13420_v46 = vld [vmem:[%s19977_s7 + $0xa40] sm:$0xf]  ;;  %v18200_v51 = vld [vmem:[%s19977_s7 + $0xdf4] sm:$0xf0] }
 0x1c3   : > { %3943 = vmatpush.bf16.msra.mxu2 %v13189_v4  ;;  %v12462_v4 = vld [vmem:[%s19977_s7 + $0x300] sm:$0xf0]  ;;  %v13868_v50 = vld [vmem:[%s19977_s7 + $0xdc0] sm:$0xf] }
 0x1c4   : > { %3956 = vmatpush.bf16.msra.mxu3 %v13637_v9  ;;  %v13358_v9 = vld [vmem:[%s19977_s7 + $0xa00] sm:$0xf0]  ;;  %v12465_v14 = vor.u32 %v17842_v3, %v12462_v4  ;;  %v18122_v4 = vld [vmem:[%s19977_s7 + $0xb8c] sm:$0xf] }
 0x1c5   : > { %3918 = vmatpush.bf16.msra.mxu0 %v12237_v21  ;;  %v13361_v16 = vor.u32 %v18066_v8, %v13358_v9  ;;  %v13809_v21 = vor.u32 %v18178_v12, %v13806_v13  ;;  %v13585_v18 = vor.u32 %v18122_v4, %v13582_v5  ;;  %v12412_v4 = vld [vmem:[%s19977_s7 + $0x260] sm:$0xf]  ;;  %v17836_v5 = vld [vmem:[%s19977_s7 + $0x294] sm:$0xf0] }
 0x1c6   : > { %3931 = vmatpush.bf16.msra.mxu1 %v12685_v24  ;;  %v13302_v24 = vld [vmem:[%s19977_s7 + $0x990] sm:$0xf0] }
 0x1c7   : > { %3944 = vmatpush.bf16.msra.mxu2 %v13133_v25  ;;  %v18164_v25 = vld [vmem:[%s19977_s7 + $0xcdc] sm:$0xf]  ;;  %v13305_v30 = vor.u32 %v18052_v23, %v13302_v24 }
 0x1c8   : > { %3957 = vmatpush.bf16.msra.mxu3 %v13581_v31  ;;  %v17814_v31 = vld [vmem:[%s19977_s7 + $0x1ec] sm:$0xf]  ;;  %v13753_v34 = vor.u32 %v18164_v25, %v13750_v26  ;;  %v18108_v24 = vld [vmem:[%s19977_s7 + $0xb1c] sm:$0xf]  ;;  %v13526_v25 = vld [vmem:[%s19977_s7 + $0xb50] sm:$0xf0] }
 0x1c9   : > { %3919 = vmatpush.bf16.msra.mxu0 %v12181_v38  ;;  %v18150_v38 = vld [vmem:[%s19977_s7 + $0xc6c] sm:$0xf]  ;;  %v12353_v40 = vor.u32 %v17814_v31, %v12350_v32  ;;  %v13529_v36 = vor.u32 %v18108_v24, %v13526_v25  ;;  %v13252_v24 = vld [vmem:[%s19977_s7 + $0x8f0] sm:$0xf]  ;;  %v18046_v25 = vld [vmem:[%s19977_s7 + $0x924] sm:$0xf0] }
 0x1ca   : > { %3932 = vmatpush.bf16.msra.mxu1 %v12629_v41  ;;  %v13697_v48 = vor.u32 %v18150_v38, %v13694_v39  ;;  %v17870_v32 = vld [vmem:[%s19977_s7 + $0x3ac] sm:$0xf]  ;;  %v13470_v39 = vld [vmem:[%s19977_s7 + $0xae0] sm:$0xf0] }
 0x1cb   : > { %3945 = vmatpush.bf16.msra.mxu2 %v13077_v42  ;;  %v12801_v42 = vor.u32 %v17926_v33, %v12798_v35  ;;  %v12574_v33 = vld [vmem:[%s19977_s7 + $0x3e0] sm:$0xf0]  ;;  %v18094_v38 = vld [vmem:[%s19977_s7 + $0xaac] sm:$0xf] }
 0x1cc   : > { %3958 = vmatpush.bf16.msra.mxu3 %v13525_v47 }
 0x1cd   : > { %3920 = vmatpush.bf16.msra.mxu0 %v12125_v55  ;;  %v3714_v41 = vpop.f32.mrf.mxu0  ;;  %v12297_v55 = vor.u32 %v17800_v44, %v12294_v45  ;;  %v17976_v45 = vld [vmem:[%s19977_s7 + $0x6f4] sm:$0xf0] }
 0x1ce   : > { %3933 = vmatpush.bf16.msra.mxu1 %v12573_v59  ;;  %v3727_v47 = vpop.f32.mrf.mxu1  ;;  %v12238_v59 = vld [vmem:[%s19977_s7 + $0x140] sm:$0xf0] }
 0x1cf   : > { %3946 = vmatpush.bf16.msra.mxu2 %v13021_v60  ;;  %v3728_v52 = vadd.f32 %v3727_v47, %v3714_v41  ;;  %v17898_v60 = vld [vmem:[%s19977_s7 + $0x48c] sm:$0xf]  ;;  %v12241_v7 = vor.u32 %v17786_v58, %v12238_v59  ;;  %v12524_v41 = vld [vmem:[%s19977_s7 + $0x340] sm:$0xf]  ;;  %v18088_v47 = vld [vmem:[%s19977_s7 + $0xa74] sm:$0xf0]  ;;  %v13869_v59 = vor.u32 %v18200_v51, %v13868_v50 }
 0x1d0   : > { %3959 = vmatpush.bf16.msra.mxu3 %v13469_v63  ;;  %3921 = vmatmul.bf16.vlgmr.msra.gmra.mxu0 %v20109_v20  ;;  %v12686_v63 = vld [vmem:[%s19977_s7 + $0x4c0] sm:$0xf0]  ;;  %v12916_v58 = vld [vmem:[%s19977_s7 + $0x650] sm:$0xf] }
 0x1d1   : > { %3965 = vmatpush.bf16.msrb.mxu0 %v12521_v0  ;;  %3934 = vmatmul.bf16.vlgmr.msra.gmra.mxu1 %v20115_v27  ;;  %v18010_v0 = vld [vmem:[%s19977_s7 + $0x80c] sm:$0xf]  ;;  %v12689_v12 = vor.u32 %v17898_v60, %v12686_v63  ;;  %v17962_v60 = vld [vmem:[%s19977_s7 + $0x684] sm:$0xf0]  ;;  %v13812_v63 = vld [vmem:[%s19977_s7 + $0xd50] sm:$0xf] }
 0x1d2   : > { %3978 = vmatpush.bf16.msrb.mxu1 %v12969_v1  ;;  %3947 = vmatmul.bf16.vlgmr.msra.gmra.mxu2 %v20097_v10  ;;  %v13134_v1 = vld [vmem:[%s19977_s7 + $0x840] sm:$0xf0] }
 0x1d3   : > { %3991 = vmatpush.bf16.msrb.mxu2 %v13417_v2  ;;  %3960 = vmatmul.bf16.vlgmr.msra.gmra.mxu3 %v20099_v11  ;;  %v13137_v13 = vor.u32 %v18010_v0, %v13134_v1  ;;  %v18186_v0 = vld [vmem:[%s19977_s7 + $0xd84] sm:$0xf0] }
 0x1d4   : > { %4004 = vmatpush.bf16.msrb.mxu3 %v13865_v6  ;;  %v689_v6 = vld [vmem:[#allocation2 + $0x8] sm:$0xff] }
 0x1d5   : > { %3966 = vmatpush.bf16.msrb.mxu0 %v12465_v14  ;;  %v3740_v61 = vpop.f32.mrf.mxu2  ;;  %v3716_v9 = vpop.f32.mrf.mxu0  ;;  %v17772_v14 = vld [vmem:[%s19977_s7 + $0x9c] sm:$0xf] }
 0x1d6   : > { %3979 = vmatpush.bf16.msrb.mxu1 %v12913_v15  ;;  %v3741_v2 = vadd.f32 %v3740_v61, %v3728_v52  ;;  %v3753_v3 = vpop.f32.mrf.mxu3  ;;  %v12182_v15 = vld [vmem:[%s19977_s7 + $0xd0] sm:$0xf0]  ;;  %v3729_v17 = vpop.f32.mrf.mxu1  ;;  %v13473_v52 = vor.u32 %v18094_v38, %v13470_v39  ;;  %v13364_v61 = vld [vmem:[%s19977_s7 + $0x9d0] sm:$0xf]  ;;  %v13308_v9 = vld [vmem:[%s19977_s7 + $0x960] sm:$0xf] }
 0x1d7   : > { %3992 = vmatpush.bf16.msrb.mxu2 %v13361_v16  ;;  %v17884_v16 = vld [vmem:[%s19977_s7 + $0x41c] sm:$0xf]  ;;  %v12185_v26 = vor.u32 %v17772_v14, %v12182_v15  ;;  %v18172_v14 = vld [vmem:[%s19977_s7 + $0xd14] sm:$0xf0]  ;;  %v12413_v15 = vor.u32 %v17836_v5, %v12412_v4  ;;  %v13196_v39 = vld [vmem:[%s19977_s7 + $0x880] sm:$0xf] }
 0x1d8   : > { %4005 = vmatpush.bf16.msrb.mxu3 %v13809_v21  ;;  %v3754_v8 = vadd.f32 %v3753_v3, %v3741_v2  ;;  %v17996_v21 = vld [vmem:[%s19977_s7 + $0x79c] sm:$0xf]  ;;  %v12917_v2 = vor.u32 %v17962_v60, %v12916_v58  ;;  %v17920_v38 = vld [vmem:[%s19977_s7 + $0x534] sm:$0xf0]  ;;  %v18130_v58 = vld [vmem:[%s19977_s7 + $0xbc4] sm:$0xf0] }
 0x1d9   : > { %3967 = vmatpush.bf16.msrb.mxu0 %v12409_v28  ;;  %v17758_v28 = vld [vmem:[%s19977_s7 + $0x2c] sm:$0xf]  ;;  %v13081_v31 = vor.u32 %v17996_v21, %v13078_v22  ;;  %v12804_v21 = vld [vmem:[%s19977_s7 + $0x570] sm:$0xf] }
 0x1da   : > { %3980 = vmatpush.bf16.msrb.mxu1 %v12857_v29  ;;  %v4127_v23 = vadd.f32 %v3754_v8, %v689_v6  ;;  %v12126_v29 = vld [vmem:[%s19977_s7 + $0x60] sm:$0xf0]  ;;  %v12860_v6 = vld [vmem:[%s19977_s7 + $0x5e0] sm:$0xf]  ;;  %v17948_v8 = vld [vmem:[%s19977_s7 + $0x614] sm:$0xf0] }
 0x1db   : > { %3993 = vmatpush.bf16.msrb.mxu2 %v13305_v30  ;;  %v12633_v30 = vor.u32 %v17884_v16, %v12630_v19  ;;  %v12129_v44 = vor.u32 %v17758_v28, %v12126_v29  ;;  %v12861_v16 = vor.u32 %v17948_v8, %v12860_v6  ;;  %v17822_v19 = vld [vmem:[%s19977_s7 + $0x224] sm:$0xf0]  ;;  %v17892_v6 = vld [vmem:[%s19977_s7 + $0x454] sm:$0xf0] }
 0x1dc   : > { %4006 = vmatpush.bf16.msrb.mxu3 %v13753_v34  ;;  %4141 = vst [vmem:[#allocation2 + $0x8] sm:$0xff] %v4127_v23  ;;  %v17982_v34 = vld [vmem:[%s19977_s7 + $0x72c] sm:$0xf]  ;;  %v17934_v23 = vld [vmem:[%s19977_s7 + $0x5a4] sm:$0xf0] }
 0x1dd   : > { %3968 = vmatpush.bf16.msrb.mxu0 %v12353_v40  ;;  %v3742_v35 = vpop.f32.mrf.mxu2  ;;  %v13025_v49 = vor.u32 %v17982_v34, %v13022_v37  ;;  %v18158_v28 = vld [vmem:[%s19977_s7 + $0xca4] sm:$0xf0]  ;;  %v17808_v34 = vld [vmem:[%s19977_s7 + $0x1b4] sm:$0xf0] }
 0x1de   : > { %3981 = vmatpush.bf16.msrb.mxu1 %v12801_v42  ;;  %v3755_v40 = vpop.f32.mrf.mxu3  ;;  %v17864_v42 = vld [vmem:[%s19977_s7 + $0x374] sm:$0xf0]  ;;  %v12748_v35 = vld [vmem:[%s19977_s7 + $0x500] sm:$0xf] }
 0x1df   : > { %3994 = vmatpush.bf16.msrb.mxu2 %v13249_v43  ;;  %v12972_v43 = vld [vmem:[%s19977_s7 + $0x6c0] sm:$0xf]  ;;  %v12525_v53 = vor.u32 %v17864_v42, %v12524_v41  ;;  %v18032_v40 = vld [vmem:[%s19977_s7 + $0x8b4] sm:$0xf0] }
 0x1e0   : > { %4007 = vmatpush.bf16.msrb.mxu3 %v13697_v48  ;;  %v12577_v48 = vor.u32 %v17870_v32, %v12574_v33  ;;  %v12973_v54 = vor.u32 %v17976_v45, %v12972_v43  ;;  %v13253_v32 = vor.u32 %v18046_v25, %v13252_v24  ;;  %v12300_v33 = vld [vmem:[%s19977_s7 + $0x180] sm:$0xf]  ;;  %v18144_v43 = vld [vmem:[%s19977_s7 + $0xc34] sm:$0xf0]  ;;  %v12749_v45 = vor.u32 %v17920_v38, %v12748_v35  ;;  %v17990_v25 = vld [vmem:[%s19977_s7 + $0x764] sm:$0xf0] }
 0x1e1   : > { %3969 = vmatpush.bf16.msrb.mxu0 %v12297_v55  ;;  %v13421_v55 = vor.u32 %v18088_v47, %v13420_v46  ;;  %v13644_v42 = vld [vmem:[%s19977_s7 + $0xc00] sm:$0xf]  ;;  %v13197_v46 = vor.u32 %v18032_v40, %v13196_v39  ;;  %v12244_v47 = vld [vmem:[%s19977_s7 + $0x110] sm:$0xf]  ;;  %v18004_v8 = vld [vmem:[%s19977_s7 + $0x7d4] sm:$0xf0] }
 0x1e2   : > { %3982 = vmatpush.bf16.msrb.mxu1 %v12745_v56  ;;  %v12468_v56 = vld [vmem:[%s19977_s7 + $0x2d0] sm:$0xf]  ;;  %v13645_v51 = vor.u32 %v18144_v43, %v13644_v42  ;;  %v18081_v35 = vld [vmem:[%s19977_s7 + $0xa44] sm:$0xf]  ;;  %v13870_v40 = vld [vmem:[%s19977_s7 + $0xdf8] sm:$0xf0] }
 0x1e3   : > { %3995 = vmatpush.bf16.msrb.mxu2 %v13193_v57  ;;  %v17850_v57 = vld [vmem:[%s19977_s7 + $0x304] sm:$0xf0]  ;;  %v18193_v39 = vld [vmem:[%s19977_s7 + $0xdc4] sm:$0xf] }
 0x1e4   : > { %4008 = vmatpush.bf16.msrb.mxu3 %v13641_v62  ;;  %v18074_v62 = vld [vmem:[%s19977_s7 + $0xa04] sm:$0xf0]  ;;  %v12469_v1 = vor.u32 %v17850_v57, %v12468_v56  ;;  %v13588_v57 = vld [vmem:[%s19977_s7 + $0xb90] sm:$0xf] }
 0x1e5   : > { %3970 = vmatpush.bf16.msrb.mxu0 %v12241_v7  ;;  %v13365_v3 = vor.u32 %v18074_v62, %v13364_v61  ;;  %v13813_v7 = vor.u32 %v18186_v0, %v13812_v63  ;;  %v13589_v5 = vor.u32 %v18130_v58, %v13588_v57  ;;  %v17829_v57 = vld [vmem:[%s19977_s7 + $0x264] sm:$0xf]  ;;  %v12414_v58 = vld [vmem:[%s19977_s7 + $0x298] sm:$0xf0] }
 0x1e6   : > { %3983 = vmatpush.bf16.msrb.mxu1 %v12689_v12  ;;  %v18060_v12 = vld [vmem:[%s19977_s7 + $0x994] sm:$0xf0] }
 0x1e7   : > { %3996 = vmatpush.bf16.msrb.mxu2 %v13137_v13  ;;  %v13756_v13 = vld [vmem:[%s19977_s7 + $0xce0] sm:$0xf]  ;;  %v13309_v17 = vor.u32 %v18060_v12, %v13308_v9 }
 0x1e8   : > { %4009 = vmatpush.bf16.msrb.mxu3 %v13585_v18  ;;  %v12356_v18 = vld [vmem:[%s19977_s7 + $0x1f0] sm:$0xf]  ;;  %v13757_v22 = vor.u32 %v18172_v14, %v13756_v13  ;;  %v13532_v12 = vld [vmem:[%s19977_s7 + $0xb20] sm:$0xf]  ;;  %v18116_v13 = vld [vmem:[%s19977_s7 + $0xb54] sm:$0xf0] }
 0x1e9   : > { %3971 = vmatpush.bf16.msrb.mxu0 %v12185_v26  ;;  %v13700_v26 = vld [vmem:[%s19977_s7 + $0xc70] sm:$0xf]  ;;  %v12357_v29 = vor.u32 %v17822_v19, %v12356_v18  ;;  %v13533_v24 = vor.u32 %v18116_v13, %v13532_v12  ;;  %v18039_v12 = vld [vmem:[%s19977_s7 + $0x8f4] sm:$0xf]  ;;  %v13254_v13 = vld [vmem:[%s19977_s7 + $0x928] sm:$0xf0] }
 0x1ea   : > { %3984 = vmatpush.bf16.msrb.mxu1 %v12633_v30  ;;  %v13701_v37 = vor.u32 %v18158_v28, %v13700_v26  ;;  %v12580_v19 = vld [vmem:[%s19977_s7 + $0x3b0] sm:$0xf]  ;;  %v18102_v28 = vld [vmem:[%s19977_s7 + $0xae4] sm:$0xf0] }
 0x1eb   : > { %3997 = vmatpush.bf16.msrb.mxu2 %v13081_v31  ;;  %v12805_v31 = vor.u32 %v17934_v23, %v12804_v21  ;;  %v17878_v21 = vld [vmem:[%s19977_s7 + $0x3e4] sm:$0xf0]  ;;  %v13476_v26 = vld [vmem:[%s19977_s7 + $0xab0] sm:$0xf] }
 0x1ec   : > { %4010 = vmatpush.bf16.msrb.mxu3 %v13529_v36 }
 0x1ed   : > { %3972 = vmatpush.bf16.msrb.mxu0 %v12129_v44  ;;  %v3766_v30 = vpop.f32.mrf.mxu0  ;;  %v12301_v44 = vor.u32 %v17808_v34, %v12300_v33  ;;  %v12974_v34 = vld [vmem:[%s19977_s7 + $0x6f8] sm:$0xf0] }
 0x1ee   : > { %3985 = vmatpush.bf16.msrb.mxu1 %v12577_v48  ;;  %v3779_v36 = vpop.f32.mrf.mxu1  ;;  %v17794_v48 = vld [vmem:[%s19977_s7 + $0x144] sm:$0xf0] }
 0x1ef   : > { %3998 = vmatpush.bf16.msrb.mxu2 %v13025_v49  ;;  %v3780_v41 = vadd.f32 %v3779_v36, %v3766_v30  ;;  %v12692_v49 = vld [vmem:[%s19977_s7 + $0x490] sm:$0xf]  ;;  %v12245_v60 = vor.u32 %v17794_v48, %v12244_v47  ;;  %v17857_v30 = vld [vmem:[%s19977_s7 + $0x344] sm:$0xf]  ;;  %v13422_v36 = vld [vmem:[%s19977_s7 + $0xa78] sm:$0xf0]  ;;  %v13873_v48 = vor.u32 %v18193_v39, %v13870_v40 }
 0x1f0   : > { %4011 = vmatpush.bf16.msrb.mxu3 %v13473_v52  ;;  %3973 = vmatmul.bf16.vlgmr.msrb.gmra.mxu0 %v20109_v20  ;;  %v17906_v52 = vld [vmem:[%s19977_s7 + $0x4c4] sm:$0xf0]  ;;  %v17955_v47 = vld [vmem:[%s19977_s7 + $0x654] sm:$0xf] }
 0x1f1   : > { %4017 = vmatpush.bf16.msra.mxu0 %v12525_v53  ;;  %3986 = vmatmul.bf16.vlgmr.msrb.gmra.mxu1 %v20115_v27  ;;  %v13140_v53 = vld [vmem:[%s19977_s7 + $0x810] sm:$0xf]  ;;  %v12693_v63 = vor.u32 %v17906_v52, %v12692_v49  ;;  %v12918_v49 = vld [vmem:[%s19977_s7 + $0x688] sm:$0xf0]  ;;  %v18179_v52 = vld [vmem:[%s19977_s7 + $0xd54] sm:$0xf] }
 0x1f2   : > { %4030 = vmatpush.bf16.msra.mxu1 %v12973_v54  ;;  %3999 = vmatmul.bf16.vlgmr.msrb.gmra.mxu2 %v20097_v10  ;;  %v18018_v54 = vld [vmem:[%s19977_s7 + $0x844] sm:$0xf0] }
 0x1f3   : > { %4043 = vmatpush.bf16.msra.mxu2 %v13421_v55  ;;  %4012 = vmatmul.bf16.vlgmr.msrb.gmra.mxu3 %v20099_v11  ;;  %v13141_v0 = vor.u32 %v18018_v54, %v13140_v53  ;;  %v13814_v53 = vld [vmem:[%s19977_s7 + $0xd88] sm:$0xf0] }
 0x1f4   : > { %4056 = vmatpush.bf16.msra.mxu3 %v13869_v59  ;;  %v690_v59 = vld [vmem:[#allocation2 + $0x48] sm:$0xff] }
 0x1f5   : > { %4018 = vmatpush.bf16.msra.mxu0 %v12469_v1  ;;  %v3792_v50 = vpop.f32.mrf.mxu2  ;;  %v3768_v62 = vpop.f32.mrf.mxu0  ;;  %v12188_v1 = vld [vmem:[%s19977_s7 + $0xa0] sm:$0xf] }
 0x1f6   : > { %4031 = vmatpush.bf16.msra.mxu1 %v12917_v2  ;;  %v3793_v55 = vadd.f32 %v3792_v50, %v3780_v41  ;;  %v3805_v56 = vpop.f32.mrf.mxu3  ;;  %v17780_v2 = vld [vmem:[%s19977_s7 + $0xd4] sm:$0xf0]  ;;  %v3781_v4 = vpop.f32.mrf.mxu1  ;;  %v13477_v41 = vor.u32 %v18102_v28, %v13476_v26  ;;  %v18067_v50 = vld [vmem:[%s19977_s7 + $0x9d4] sm:$0xf]  ;;  %v18053_v62 = vld [vmem:[%s19977_s7 + $0x964] sm:$0xf] }
 0x1f7   : > { %4044 = vmatpush.bf16.msra.mxu2 %v13365_v3  ;;  %v12636_v3 = vld [vmem:[%s19977_s7 + $0x420] sm:$0xf]  ;;  %v12189_v14 = vor.u32 %v17780_v2, %v12188_v1  ;;  %v13758_v1 = vld [vmem:[%s19977_s7 + $0xd18] sm:$0xf0]  ;;  %v12417_v2 = vor.u32 %v17829_v57, %v12414_v58  ;;  %v18025_v28 = vld [vmem:[%s19977_s7 + $0x884] sm:$0xf] }
 0x1f8   : > { %4057 = vmatpush.bf16.msra.mxu3 %v13813_v7  ;;  %v3806_v61 = vadd.f32 %v3805_v56, %v3793_v55  ;;  %v13084_v7 = vld [vmem:[%s19977_s7 + $0x7a0] sm:$0xf]  ;;  %v12921_v55 = vor.u32 %v17955_v47, %v12918_v49  ;;  %v12750_v26 = vld [vmem:[%s19977_s7 + $0x538] sm:$0xf0]  ;;  %v13590_v47 = vld [vmem:[%s19977_s7 + $0xbc8] sm:$0xf0] }
 0x1f9   : > { %4019 = vmatpush.bf16.msra.mxu0 %v12413_v15  ;;  %v12132_v15 = vld [vmem:[%s19977_s7 + $0x30] sm:$0xf]  ;;  %v13085_v18 = vor.u32 %v18004_v8, %v13084_v7  ;;  %v17927_v7 = vld [vmem:[%s19977_s7 + $0x574] sm:$0xf] }
 0x1fa   : > { %4032 = vmatpush.bf16.msra.mxu1 %v12861_v16  ;;  %v4128_v9 = vadd.f32 %v3806_v61, %v690_v59  ;;  %v17766_v16 = vld [vmem:[%s19977_s7 + $0x64] sm:$0xf0]  ;;  %v17941_v59 = vld [vmem:[%s19977_s7 + $0x5e4] sm:$0xf]  ;;  %v12862_v61 = vld [vmem:[%s19977_s7 + $0x618] sm:$0xf0] }
 0x1fb   : > { %4045 = vmatpush.bf16.msra.mxu2 %v13309_v17  ;;  %v12637_v17 = vor.u32 %v17892_v6, %v12636_v3  ;;  %v12133_v33 = vor.u32 %v17766_v16, %v12132_v15  ;;  %v12865_v3 = vor.u32 %v17941_v59, %v12862_v61  ;;  %v12358_v6 = vld [vmem:[%s19977_s7 + $0x228] sm:$0xf0]  ;;  %v12638_v59 = vld [vmem:[%s19977_s7 + $0x458] sm:$0xf0] }
 0x1fc   : > { %4058 = vmatpush.bf16.msra.mxu3 %v13757_v22  ;;  %4142 = vst [vmem:[#allocation2 + $0x48] sm:$0xff] %v4128_v9  ;;  %v13028_v22 = vld [vmem:[%s19977_s7 + $0x730] sm:$0xf]  ;;  %v12806_v9 = vld [vmem:[%s19977_s7 + $0x5a8] sm:$0xf0] }
 0x1fd   : > { %4020 = vmatpush.bf16.msra.mxu0 %v12357_v29  ;;  %v3794_v23 = vpop.f32.mrf.mxu2  ;;  %v13029_v38 = vor.u32 %v17990_v25, %v13028_v22  ;;  %v13702_v15 = vld [vmem:[%s19977_s7 + $0xca8] sm:$0xf0]  ;;  %v12302_v22 = vld [vmem:[%s19977_s7 + $0x1b8] sm:$0xf0] }
 0x1fe   : > { %4033 = vmatpush.bf16.msra.mxu1 %v12805_v31  ;;  %v3807_v29 = vpop.f32.mrf.mxu3  ;;  %v12526_v31 = vld [vmem:[%s19977_s7 + $0x378] sm:$0xf0]  ;;  %v17913_v23 = vld [vmem:[%s19977_s7 + $0x504] sm:$0xf] }
 0x1ff   : > { %4046 = vmatpush.bf16.msra.mxu2 %v13253_v32  ;;  %v17969_v32 = vld [vmem:[%s19977_s7 + $0x6c4] sm:$0xf]  ;;  %v12529_v42 = vor.u32 %v17857_v30, %v12526_v31  ;;  %v13198_v29 = vld [vmem:[%s19977_s7 + $0x8b8] sm:$0xf0] }
 0x200   : > { %4059 = vmatpush.bf16.msra.mxu3 %v13701_v37  ;;  %v12581_v37 = vor.u32 %v17878_v21, %v12580_v19  ;;  %v12977_v43 = vor.u32 %v17969_v32, %v12974_v34  ;;  %v13257_v19 = vor.u32 %v18039_v12, %v13254_v13  ;;  %v17801_v21 = vld [vmem:[%s19977_s7 + $0x184] sm:$0xf]  ;;  %v13646_v32 = vld [vmem:[%s19977_s7 + $0xc38] sm:$0xf0]  ;;  %v12753_v34 = vor.u32 %v17913_v23, %v12750_v26  ;;  %v17983_v12 = vld [vmem:[%s19977_s7 + $0x734] sm:$0xf] }
 0x201   : > { %4021 = vmatpush.bf16.msra.mxu0 %v12301_v44  ;;  %v13425_v44 = vor.u32 %v18081_v35, %v13422_v36  ;;  %v18137_v31 = vld [vmem:[%s19977_s7 + $0xc04] sm:$0xf]  ;;  %v13201_v35 = vor.u32 %v18025_v28, %v13198_v29  ;;  %v17787_v36 = vld [vmem:[%s19977_s7 + $0x114] sm:$0xf]  ;;  %v13086_v61 = vld [vmem:[%s19977_s7 + $0x7d8] sm:$0xf0] }
 0x202   : > { %4034 = vmatpush.bf16.msra.mxu1 %v12749_v45  ;;  %v17843_v45 = vld [vmem:[%s19977_s7 + $0x2d4] sm:$0xf]  ;;  %v13649_v40 = vor.u32 %v18137_v31, %v13646_v32  ;;  %v13030_v13 = vld [vmem:[%s19977_s7 + $0x768] sm:$0xf0] }
 0x203   : > { %4047 = vmatpush.bf16.msra.mxu2 %v13197_v46  ;;  %v12470_v46 = vld [vmem:[%s19977_s7 + $0x308] sm:$0xf0] }
 0x204   : > { %4060 = vmatpush.bf16.msra.mxu3 %v13645_v51  ;;  %v13366_v51 = vld [vmem:[%s19977_s7 + $0xa08] sm:$0xf0]  ;;  %v12473_v54 = vor.u32 %v17843_v45, %v12470_v46  ;;  %v18123_v46 = vld [vmem:[%s19977_s7 + $0xb94] sm:$0xf] }
 0x205   : > { %4022 = vmatpush.bf16.msra.mxu0 %v12245_v60  ;;  %v13369_v56 = vor.u32 %v18067_v50, %v13366_v51  ;;  %v13817_v60 = vor.u32 %v18179_v52, %v13814_v53  ;;  %v13593_v58 = vor.u32 %v18123_v46, %v13590_v47  ;;  %v692_v29 = vld [vmem:[#allocation2 + $0x20] sm:$0xff] }
 0x206   : > { %4035 = vmatpush.bf16.msra.mxu1 %v12693_v63  ;;  %v13310_v63 = vld [vmem:[%s19977_s7 + $0x998] sm:$0xf0] }
 0x207   : > { %4048 = vmatpush.bf16.msra.mxu2 %v13141_v0  ;;  %v18165_v0 = vld [vmem:[%s19977_s7 + $0xce4] sm:$0xf]  ;;  %v13313_v4 = vor.u32 %v18053_v62, %v13310_v63 }
 0x208   : > { %4061 = vmatpush.bf16.msra.mxu3 %v13589_v5  ;;  %v17815_v5 = vld [vmem:[%s19977_s7 + $0x1f4] sm:$0xf]  ;;  %v13761_v8 = vor.u32 %v18165_v0, %v13758_v1  ;;  %v18109_v63 = vld [vmem:[%s19977_s7 + $0xb24] sm:$0xf]  ;;  %v13534_v0 = vld [vmem:[%s19977_s7 + $0xb58] sm:$0xf0] }
 0x209   : > { %4023 = vmatpush.bf16.msra.mxu0 %v12189_v14  ;;  %v18151_v14 = vld [vmem:[%s19977_s7 + $0xc74] sm:$0xf]  ;;  %v12361_v16 = vor.u32 %v17815_v5, %v12358_v6  ;;  %v12134_v5 = vld [vmem:[%s19977_s7 + $0x68] sm:$0xf0] }
 0x20a   : > { %4036 = vmatpush.bf16.msra.mxu1 %v12637_v17  ;;  %v13705_v25 = vor.u32 %v18151_v14, %v13702_v15  ;;  %v17871_v6 = vld [vmem:[%s19977_s7 + $0x3b4] sm:$0xf] }
 0x20b   : > { %4049 = vmatpush.bf16.msra.mxu2 %v13085_v18  ;;  %v12809_v18 = vor.u32 %v17927_v7, %v12806_v9  ;;  %v12582_v9 = vld [vmem:[%s19977_s7 + $0x3e8] sm:$0xf0]  ;;  %v18095_v15 = vld [vmem:[%s19977_s7 + $0xab4] sm:$0xf] }
 0x20c   : > { %4062 = vmatpush.bf16.msra.mxu3 %v13533_v24 }
 0x20d   : > { %4024 = vmatpush.bf16.msra.mxu0 %v12133_v33  ;;  %v3818_v17 = vpop.f32.mrf.mxu0  ;;  %v12305_v33 = vor.u32 %v17801_v21, %v12302_v22 }
 0x20e   : > { %4037 = vmatpush.bf16.msra.mxu1 %v12581_v37  ;;  %v3831_v24 = vpop.f32.mrf.mxu1  ;;  %v12246_v37 = vld [vmem:[%s19977_s7 + $0x148] sm:$0xf0] }
 0x20f   : > { %4050 = vmatpush.bf16.msra.mxu2 %v13029_v38  ;;  %v3832_v30 = vadd.f32 %v3831_v24, %v3818_v17  ;;  %v17899_v38 = vld [vmem:[%s19977_s7 + $0x494] sm:$0xf]  ;;  %v12249_v49 = vor.u32 %v17787_v36, %v12246_v37 }
 0x210   : > { %4063 = vmatpush.bf16.msra.mxu3 %v13477_v41  ;;  %4025 = vmatmul.bf16.vlgmr.msra.gmra.mxu0 %v20109_v20  ;;  %v12694_v41 = vld [vmem:[%s19977_s7 + $0x4c8] sm:$0xf0] }
 0x211   : > { %4069 = vmatpush.bf16.msrb.mxu0 %v12529_v42  ;;  %4038 = vmatmul.bf16.vlgmr.msra.gmra.mxu1 %v20115_v27  ;;  %v18011_v42 = vld [vmem:[%s19977_s7 + $0x814] sm:$0xf]  ;;  %v12697_v52 = vor.u32 %v17899_v38, %v12694_v41  ;;  %v693_v38 = vld [vmem:[#allocation2 + $0x10] sm:$0xff] }
 0x212   : > { %4082 = vmatpush.bf16.msrb.mxu1 %v12977_v43  ;;  %4051 = vmatmul.bf16.vlgmr.msra.gmra.mxu2 %v20097_v10  ;;  %v13142_v43 = vld [vmem:[%s19977_s7 + $0x848] sm:$0xf0] }
 0x213   : > { %4095 = vmatpush.bf16.msrb.mxu2 %v13425_v44  ;;  %4064 = vmatmul.bf16.vlgmr.msra.gmra.mxu3 %v20099_v11  ;;  %v13145_v53 = vor.u32 %v18011_v42, %v13142_v43 }
 0x214   : > { %4108 = vmatpush.bf16.msrb.mxu3 %v13873_v48  ;;  %v691_v48 = vld [vmem:[#allocation2 + $0x40] sm:$0xff] }
 0x215   : > { %4070 = vmatpush.bf16.msrb.mxu0 %v12473_v54  ;;  %v3844_v39 = vpop.f32.mrf.mxu2  ;;  %v3820_v51 = vpop.f32.mrf.mxu0  ;;  %v17773_v54 = vld [vmem:[%s19977_s7 + $0xa4] sm:$0xf] }
 0x216   : > { %4083 = vmatpush.bf16.msrb.mxu1 %v12921_v55  ;;  %v3845_v44 = vadd.f32 %v3844_v39, %v3832_v30  ;;  %v3857_v45 = vpop.f32.mrf.mxu3  ;;  %v12190_v55 = vld [vmem:[%s19977_s7 + $0xd8] sm:$0xf0]  ;;  %v3833_v57 = vpop.f32.mrf.mxu1  ;;  %v694_v51 = vld [vmem:[#allocation2 + $0x38] sm:$0xff] }
 0x217   : > { %4096 = vmatpush.bf16.msrb.mxu2 %v13369_v56  ;;  %v17885_v56 = vld [vmem:[%s19977_s7 + $0x424] sm:$0xf]  ;;  %v12193_v1 = vor.u32 %v17773_v54, %v12190_v55 }
 0x218   : > { %4109 = vmatpush.bf16.msrb.mxu3 %v13817_v60  ;;  %v3858_v50 = vadd.f32 %v3857_v45, %v3845_v44  ;;  %v17997_v60 = vld [vmem:[%s19977_s7 + $0x7a4] sm:$0xf] }
 0x219   : > { %4071 = vmatpush.bf16.msrb.mxu0 %v12417_v2  ;;  %v12641_v2 = vor.u32 %v17885_v56, %v12638_v59 }
 0x21a   : > { %4084 = vmatpush.bf16.msrb.mxu1 %v12865_v3  ;;  %v4129_v62 = vadd.f32 %v3858_v50, %v691_v48  ;;  %v13089_v3 = vor.u32 %v17997_v60, %v13086_v61 }
 0x21b   : > { %4097 = vmatpush.bf16.msrb.mxu2 %v13313_v4  ;;  %v17759_v4 = vld [vmem:[%s19977_s7 + $0x34] sm:$0xf] }
 0x21c   : > { %4110 = vmatpush.bf16.msrb.mxu3 %v13761_v8  ;;  %4143 = vst [vmem:[#allocation2 + $0x40] sm:$0xff] %v4129_v62  ;;  %v13537_v8 = vor.u32 %v18109_v63, %v13534_v0  ;;  %v12137_v17 = vor.u32 %v17759_v4, %v12134_v5  ;;  %v695_v0 = vld [vmem:[#allocation2 + $0x60] sm:$0xff] }
 0x21d   : > { %4072 = vmatpush.bf16.msrb.mxu0 %v12361_v16  ;;  %v3846_v7 = vpop.f32.mrf.mxu2  ;;  %v13478_v16 = vld [vmem:[%s19977_s7 + $0xae8] sm:$0xf0] }
 0x21e   : > { %4085 = vmatpush.bf16.msrb.mxu1 %v12809_v18  ;;  %v3859_v14 = vpop.f32.mrf.mxu3  ;;  %v12585_v18 = vor.u32 %v17871_v6, %v12582_v9  ;;  %v13481_v21 = vor.u32 %v18095_v15, %v13478_v16  ;;  %v696_v16 = vld [vmem:[#allocation2 + $0x28] sm:$0xff] }
 0x21f   : > { %4098 = vmatpush.bf16.msrb.mxu2 %v13257_v19  ;;  %v13033_v19 = vor.u32 %v17983_v12, %v13030_v13 }
 0x220   : > { %4111 = vmatpush.bf16.msrb.mxu3 %v13705_v25 }
 0x221   : > { %4073 = vmatpush.bf16.msrb.mxu0 %v12305_v33 }
 0x222   : > { %4086 = vmatpush.bf16.msrb.mxu1 %v12753_v34 }
 0x223   : > { %4099 = vmatpush.bf16.msrb.mxu2 %v13201_v35 }
 0x224   : > { %4112 = vmatpush.bf16.msrb.mxu3 %v13649_v40 }
 0x225   : > { %4074 = vmatpush.bf16.msrb.mxu0 %v12249_v49 }
 0x226   : > { %4087 = vmatpush.bf16.msrb.mxu1 %v12697_v52 }
 0x227   : > { %4100 = vmatpush.bf16.msrb.mxu2 %v13145_v53 }
 0x228   : > { %4113 = vmatpush.bf16.msrb.mxu3 %v13593_v58 }
 0x229   : > { %4075 = vmatpush.bf16.msrb.mxu0 %v12193_v1 }
 0x22a   : > { %4088 = vmatpush.bf16.msrb.mxu1 %v12641_v2 }
 0x22b   : > { %4101 = vmatpush.bf16.msrb.mxu2 %v13089_v3 }
 0x22c   : > { %4114 = vmatpush.bf16.msrb.mxu3 %v13537_v8 }
 0x22d   : > { %4076 = vmatpush.bf16.msrb.mxu0 %v12137_v17  ;;  %v3870_v22 = vpop.f32.mrf.mxu0 }
 0x22e   : > { %4089 = vmatpush.bf16.msrb.mxu1 %v12585_v18  ;;  %v3883_v23 = vpop.f32.mrf.mxu1 }
 0x22f   : > { %4102 = vmatpush.bf16.msrb.mxu2 %v13033_v19  ;;  %v3884_v24 = vadd.f32 %v3883_v23, %v3870_v22 }
 0x230   : > { %4115 = vmatpush.bf16.msrb.mxu3 %v13481_v21  ;;  %4077 = vmatmul.bf16.vlgmr.msrb.gmra.mxu0 %v20109_v20 }
 0x231   : > { %4090 = vmatmul.bf16.vlgmr.msrb.gmra.mxu1 %v20115_v27 }
 0x232   : > { %4103 = vmatmul.bf16.vlgmr.msrb.gmra.mxu2 %v20097_v10 }
 0x233   : > { %4116 = vmatmul.bf16.vlgmr.msrb.gmra.mxu3 %v20099_v11 }
 0x235   : > { %v3896_v25 = vpop.f32.mrf.mxu2  ;;  %v3872_v31 = vpop.f32.mrf.mxu0 }
 0x236   : > { %v3897_v26 = vadd.f32 %v3896_v25, %v3884_v24  ;;  %v3909_v28 = vpop.f32.mrf.mxu3  ;;  %v3885_v32 = vpop.f32.mrf.mxu1 }
 0x238   : > { %v3910_v30 = vadd.f32 %v3909_v28, %v3897_v26 }
 0x23a   : > { %v4130_v33 = vadd.f32 %v3910_v30, %v692_v29 }
 0x23c   : > { %4144 = vst [vmem:[#allocation2 + $0x20] sm:$0xff] %v4130_v33 }
 0x23d   : > { %v3898_v34 = vpop.f32.mrf.mxu2 }
 0x23e   : > { %v3911_v20 = vpop.f32.mrf.mxu3 }
 0x24d   : > { %v3922_v35 = vpop.f32.mrf.mxu0 }
 0x24e   : > { %v3935_v27 = vpop.f32.mrf.mxu1 }
 0x24f   : > { %v3936_v36 = vadd.f32 %v3935_v27, %v3922_v35 }
 0x255   : > { %v3948_v10 = vpop.f32.mrf.mxu2  ;;  %v3924_v40 = vpop.f32.mrf.mxu0 }
 0x256   : > { %v3949_v37 = vadd.f32 %v3948_v10, %v3936_v36  ;;  %v3961_v11 = vpop.f32.mrf.mxu3  ;;  %v3937_v41 = vpop.f32.mrf.mxu1 }
 0x258   : > { %v3962_v39 = vadd.f32 %v3961_v11, %v3949_v37 }
 0x25a   : > { %v4131_v42 = vadd.f32 %v3962_v39, %v693_v38 }
 0x25c   : > { %4145 = vst [vmem:[#allocation2 + $0x10] sm:$0xff] %v4131_v42 }
 0x25d   : > { %v3950_v43 = vpop.f32.mrf.mxu2 }
 0x25e   : > { %v3963_v44 = vpop.f32.mrf.mxu3 }
 0x26d   : > { %v3974_v45 = vpop.f32.mrf.mxu0 }
 0x26e   : > { %v3987_v46 = vpop.f32.mrf.mxu1 }
 0x26f   : > { %v3988_v47 = vadd.f32 %v3987_v46, %v3974_v45 }
 0x275   : > { %v4000_v48 = vpop.f32.mrf.mxu2  ;;  %v3976_v53 = vpop.f32.mrf.mxu0 }
 0x276   : > { %v4001_v49 = vadd.f32 %v4000_v48, %v3988_v47  ;;  %v4013_v50 = vpop.f32.mrf.mxu3  ;;  %v3989_v54 = vpop.f32.mrf.mxu1 }
 0x278   : > { %v4014_v52 = vadd.f32 %v4013_v50, %v4001_v49 }
 0x27a   : > { %v4132_v55 = vadd.f32 %v4014_v52, %v694_v51 }
 0x27c   : > { %4146 = vst [vmem:[#allocation2 + $0x38] sm:$0xff] %v4132_v55 }
 0x27d   : > { %v4002_v56 = vpop.f32.mrf.mxu2 }
 0x27e   : > { %v4015_v57 = vpop.f32.mrf.mxu3 }
 0x28d   : > { %v4026_v58 = vpop.f32.mrf.mxu0 }
 0x28e   : > { %v4039_v59 = vpop.f32.mrf.mxu1 }
 0x28f   : > { %v4040_v60 = vadd.f32 %v4039_v59, %v4026_v58 }
 0x295   : > { %v4052_v61 = vpop.f32.mrf.mxu2  ;;  %v4028_v2 = vpop.f32.mrf.mxu0 }
 0x296   : > { %v4053_v62 = vadd.f32 %v4052_v61, %v4040_v60  ;;  %v4065_v63 = vpop.f32.mrf.mxu3  ;;  %v4041_v3 = vpop.f32.mrf.mxu1 }
 0x298   : > { %v4066_v1 = vadd.f32 %v4065_v63, %v4053_v62 }
 0x29a   : > { %v4133_v4 = vadd.f32 %v4066_v1, %v695_v0 }
 0x29c   : > { %4147 = vst [vmem:[#allocation2 + $0x60] sm:$0xff] %v4133_v4 }
 0x29d   : > { %v4054_v5 = vpop.f32.mrf.mxu2 }
 0x29e   : > { %v4067_v6 = vpop.f32.mrf.mxu3 }
 0x2ad   : > { %v4078_v7 = vpop.f32.mrf.mxu0 }
 0x2ae   : > { %v4091_v8 = vpop.f32.mrf.mxu1 }
 0x2af   : > { %v4092_v9 = vadd.f32 %v4091_v8, %v4078_v7 }
 0x2b5   : > { %v4104_v12 = vpop.f32.mrf.mxu2  ;;  %v4080_v15 = vpop.f32.mrf.mxu0 }
 0x2b6   : > { %v4105_v13 = vadd.f32 %v4104_v12, %v4092_v9  ;;  %v4117_v14 = vpop.f32.mrf.mxu3  ;;  %v4093_v17 = vpop.f32.mrf.mxu1 }
 0x2b8   : > { %v4118_v18 = vadd.f32 %v4117_v14, %v4105_v13 }
 0x2ba   : > { %v4134_v19 = vadd.f32 %v4118_v18, %v696_v16  ;;  %4152 = sbr.rel (%p13874_p1) target bundleno = 2753 (0xac1), region = 116 }
 0x2bc   : > { %4148 = vst [vmem:[#allocation2 + $0x28] sm:$0xff] %v4134_v19 }
 0x2bd   : > { %v4106_v21 = vpop.f32.mrf.mxu2 }
 0x2be   : > { %v4119_v22 = vpop.f32.mrf.mxu3 }
 0x2bf   : > { %v14101_v23 = vld [vmem:[#allocation10 + $0x1c0] sm:$0xf]  ;;  %vm11834_vm1 = vcmask 7168  }
 0x2c0   : > { %v18261_v24 = vld [vmem:[#allocation10 + $0x1dc] sm:$0xf0] }
 0x2c1   : > { %v14357_v25 = vld [vmem:[#allocation10 + $0x3c0] sm:$0xf]  ;;  %v14102_v26 = vor.u32 %v18261_v24, %v14101_v23 }
 0x2c2   : > { %v18325_v28 = vld [vmem:[#allocation10 + $0x3dc] sm:$0xf0] }
 0x2c3   : > { %v14613_v29 = vld [vmem:[#allocation10 + $0x5c0] sm:$0xf]  ;;  %v14358_v31 = vor.u32 %v18325_v28, %v14357_v25  ;;  %9635 = vmatpush.bf16.msra.mxu0 %v14102_v26 }
 0x2c4   : > { %v18389_v30 = vld [vmem:[#allocation10 + $0x5dc] sm:$0xf0] }
 0x2c5   : > { %v14614_v32 = vor.u32 %v18389_v30, %v14613_v29  ;;  %v14869_v33 = vld [vmem:[#allocation10 + $0x7c0] sm:$0xf]  ;;  %9648 = vmatpush.bf16.msra.mxu1 %v14358_v31 }
 0x2c6   : > { %v18453_v34 = vld [vmem:[#allocation10 + $0x7dc] sm:$0xf0] }
 0x2c7   : > { %v14069_v20 = vld [vmem:[#allocation10 + $0x180] sm:$0xf]  ;;  %v14870_v35 = vor.u32 %v18453_v34, %v14869_v33  ;;  %9661 = vmatpush.bf16.msra.mxu2 %v14614_v32 }
 0x2c8   : > { %v18253_v27 = vld [vmem:[#allocation10 + $0x19c] sm:$0xf0] }
 0x2c9   : > { %v14325_v36 = vld [vmem:[#allocation10 + $0x380] sm:$0xf]  ;;  %v14070_v37 = vor.u32 %v18253_v27, %v14069_v20  ;;  %9674 = vmatpush.bf16.msra.mxu3 %v14870_v35 }
 0x2ca   : > { %v18317_v10 = vld [vmem:[#allocation10 + $0x39c] sm:$0xf0] }
 0x2cb   : > { %v14326_v11 = vor.u32 %v18317_v10, %v14325_v36  ;;  %v14581_v38 = vld [vmem:[#allocation10 + $0x580] sm:$0xf]  ;;  %9636 = vmatpush.bf16.msra.mxu0 %v14070_v37 }
 0x2cc   : > { %v18381_v39 = vld [vmem:[#allocation10 + $0x59c] sm:$0xf0] }
 0x2cd   : > { %v14837_v40 = vld [vmem:[#allocation10 + $0x780] sm:$0xf]  ;;  %v14582_v41 = vor.u32 %v18381_v39, %v14581_v38  ;;  %9649 = vmatpush.bf16.msra.mxu1 %v14326_v11 }
 0x2ce   : > { %v18445_v42 = vld [vmem:[#allocation10 + $0x79c] sm:$0xf0] }
 0x2cf   : > { %v14037_v43 = vld [vmem:[#allocation10 + $0x140] sm:$0xf]  ;;  %v14838_v45 = vor.u32 %v18445_v42, %v14837_v40  ;;  %9662 = vmatpush.bf16.msra.mxu2 %v14582_v41 }
 0x2d0   : > { %v18245_v44 = vld [vmem:[#allocation10 + $0x15c] sm:$0xf0] }
 0x2d1   : > { %v14293_v46 = vld [vmem:[#allocation10 + $0x340] sm:$0xf]  ;;  %v14038_v49 = vor.u32 %v18245_v44, %v14037_v43  ;;  %9675 = vmatpush.bf16.msra.mxu3 %v14838_v45 }
 0x2d2   : > { %v18309_v47 = vld [vmem:[#allocation10 + $0x35c] sm:$0xf0] }
 0x2d3   : > { %v14549_v48 = vld [vmem:[#allocation10 + $0x540] sm:$0xf]  ;;  %v14294_v53 = vor.u32 %v18309_v47, %v14293_v46  ;;  %9637 = vmatpush.bf16.msra.mxu0 %v14038_v49 }
 0x2d4   : > { %v18373_v50 = vld [vmem:[#allocation10 + $0x55c] sm:$0xf0] }
 0x2d5   : > { %v14805_v51 = vld [vmem:[#allocation10 + $0x740] sm:$0xf]  ;;  %v14550_v54 = vor.u32 %v18373_v50, %v14549_v48  ;;  %9650 = vmatpush.bf16.msra.mxu1 %v14294_v53 }
 0x2d6   : > { %v18437_v52 = vld [vmem:[#allocation10 + $0x75c] sm:$0xf0] }
 0x2d7   : > { %v14005_v55 = vld [vmem:[#allocation10 + $0x100] sm:$0xf]  ;;  %v14806_v58 = vor.u32 %v18437_v52, %v14805_v51  ;;  %9663 = vmatpush.bf16.msra.mxu2 %v14550_v54 }
 0x2d8   : > { %v18237_v56 = vld [vmem:[#allocation10 + $0x11c] sm:$0xf0] }
 0x2d9   : > { %v14261_v57 = vld [vmem:[#allocation10 + $0x300] sm:$0xf]  ;;  %v14006_v0 = vor.u32 %v18237_v56, %v14005_v55  ;;  %9676 = vmatpush.bf16.msra.mxu3 %v14806_v58 }
 0x2da   : > { %v18301_v59 = vld [vmem:[#allocation10 + $0x31c] sm:$0xf0] }
 0x2db   : > { %v14517_v60 = vld [vmem:[#allocation10 + $0x500] sm:$0xf]  ;;  %v14262_v1 = vor.u32 %v18301_v59, %v14261_v57  ;;  %9638 = vmatpush.bf16.msra.mxu0 %v14006_v0 }
 0x2dc   : > { %v18365_v61 = vld [vmem:[#allocation10 + $0x51c] sm:$0xf0] }
 0x2dd   : > { %v14773_v62 = vld [vmem:[#allocation10 + $0x700] sm:$0xf]  ;;  %v14518_v2 = vor.u32 %v18365_v61, %v14517_v60  ;;  %9651 = vmatpush.bf16.msra.mxu1 %v14262_v1 }
 0x2de   : > { %v18429_v63 = vld [vmem:[#allocation10 + $0x71c] sm:$0xf0] }
 0x2df   : > { %v13973_v3 = vld [vmem:[#allocation10 + $0xc0] sm:$0xf]  ;;  %v14774_v6 = vor.u32 %v18429_v63, %v14773_v62  ;;  %9664 = vmatpush.bf16.msra.mxu2 %v14518_v2 }
 0x2e0   : > { %v18229_v4 = vld [vmem:[#allocation10 + $0xdc] sm:$0xf0] }
 0x2e1   : > { %v14229_v5 = vld [vmem:[#allocation10 + $0x2c0] sm:$0xf]  ;;  %v13974_v14 = vor.u32 %v18229_v4, %v13973_v3  ;;  %9677 = vmatpush.bf16.msra.mxu3 %v14774_v6 }
 0x2e2   : > { %v18293_v7 = vld [vmem:[#allocation10 + $0x2dc] sm:$0xf0] }
 0x2e3   : > { %v14485_v8 = vld [vmem:[#allocation10 + $0x4c0] sm:$0xf]  ;;  %v14230_v15 = vor.u32 %v18293_v7, %v14229_v5  ;;  %9639 = vmatpush.bf16.msra.mxu0 %v13974_v14 }
 0x2e4   : > { %v18357_v9 = vld [vmem:[#allocation10 + $0x4dc] sm:$0xf0] }
 0x2e5   : > { %v14741_v12 = vld [vmem:[#allocation10 + $0x6c0] sm:$0xf]  ;;  %v14486_v16 = vor.u32 %v18357_v9, %v14485_v8  ;;  %9652 = vmatpush.bf16.msra.mxu1 %v14230_v15 }
 0x2e6   : > { %v18421_v13 = vld [vmem:[#allocation10 + $0x6dc] sm:$0xf0] }
 0x2e7   : > { %v13941_v17 = vld [vmem:[#allocation10 + $0x80] sm:$0xf]  ;;  %v14742_v21 = vor.u32 %v18421_v13, %v14741_v12  ;;  %9665 = vmatpush.bf16.msra.mxu2 %v14486_v16 }
 0x2e8   : > { %v18221_v18 = vld [vmem:[#allocation10 + $0x9c] sm:$0xf0] }
 0x2e9   : > { %v14197_v19 = vld [vmem:[#allocation10 + $0x280] sm:$0xf]  ;;  %v13942_v28 = vor.u32 %v18221_v18, %v13941_v17  ;;  %9678 = vmatpush.bf16.msra.mxu3 %v14742_v21 }
 0x2ea   : > { %v18285_v22 = vld [vmem:[#allocation10 + $0x29c] sm:$0xf0] }
 0x2eb   : > { %v14453_v23 = vld [vmem:[#allocation10 + $0x480] sm:$0xf]  ;;  %v14198_v29 = vor.u32 %v18285_v22, %v14197_v19  ;;  %9640 = vmatpush.bf16.msra.mxu0 %v13942_v28 }
 0x2ec   : > { %v18349_v24 = vld [vmem:[#allocation10 + $0x49c] sm:$0xf0] }
 0x2ed   : > { %v14709_v25 = vld [vmem:[#allocation10 + $0x680] sm:$0xf]  ;;  %v14454_v30 = vor.u32 %v18349_v24, %v14453_v23  ;;  %9653 = vmatpush.bf16.msra.mxu1 %v14198_v29 }
 0x2ee   : > { %v18413_v26 = vld [vmem:[#allocation10 + $0x69c] sm:$0xf0] }
 0x2ef   : > { %v13909_v31 = vld [vmem:[#allocation10 + $0x40] sm:$0xf]  ;;  %v14710_v34 = vor.u32 %v18413_v26, %v14709_v25  ;;  %9666 = vmatpush.bf16.msra.mxu2 %v14454_v30 }
 0x2f0   : > { %v18213_v32 = vld [vmem:[#allocation10 + $0x5c] sm:$0xf0] }
 0x2f1   : > { %v14165_v33 = vld [vmem:[#allocation10 + $0x240] sm:$0xf]  ;;  %v13910_v37 = vor.u32 %v18213_v32, %v13909_v31  ;;  %9679 = vmatpush.bf16.msra.mxu3 %v14710_v34  ;;  %v20969_v31 = vld [vmem:[#allocation9] sm:$0xff] }
 0x2f2   : > { %v18277_v20 = vld [vmem:[#allocation10 + $0x25c] sm:$0xf0]  ;;  %v4153_v34 = vld [vmem:[#allocation2 + $0x30] sm:$0xff] }
 0x2f3   : > { %v14421_v35 = vld [vmem:[#allocation10 + $0x440] sm:$0xf]  ;;  %v14166_v39 = vor.u32 %v18277_v20, %v14165_v33  ;;  %9641 = vmatpush.bf16.msra.mxu0 %v13910_v37  ;;  %v4173_v33 = vperm.slane %v20969_v31, 2  ;;  %v4171_v20 = vperm.slane %v20969_v31, 0 }
 0x2f4   : > { %v18341_v27 = vld [vmem:[#allocation10 + $0x45c] sm:$0xf0] }
 0x2f5   : > { %v14677_v36 = vld [vmem:[#allocation10 + $0x640] sm:$0xf]  ;;  %v14422_v40 = vor.u32 %v18341_v27, %v14421_v35  ;;  %9654 = vmatpush.bf16.msra.mxu1 %v14166_v39  ;;  %v4174_v27 = vperm.slane %v20969_v31, 3 }
 0x2f6   : > { %v18405_v10 = vld [vmem:[#allocation10 + $0x65c] sm:$0xf0] }
 0x2f7   : > { %v13877_v11 = vld [vmem:[#allocation10] sm:$0xf]  ;;  %v14678_v44 = vor.u32 %v18405_v10, %v14677_v36  ;;  %9667 = vmatpush.bf16.msra.mxu2 %v14422_v40  ;;  %v4199_v40 = vadd.f32 %v4171_v20, %v4153_v34 }
 0x2f8   : > { %v18205_v38 = vld [vmem:[#allocation10 + $0x1c] sm:$0xf0] }
 0x2f9   : > { %v14133_v41 = vld [vmem:[#allocation10 + $0x200] sm:$0xf]  ;;  %v13878_v51 = vor.u32 %v18205_v38, %v13877_v11  ;;  %9680 = vmatpush.bf16.msra.mxu3 %v14678_v44 }
 0x2fa   : > { %v18269_v42 = vld [vmem:[#allocation10 + $0x21c] sm:$0xf0] }
 0x2fb   : > { %v14389_v43 = vld [vmem:[#allocation10 + $0x400] sm:$0xf]  ;;  %v14134_v55 = vor.u32 %v18269_v42, %v14133_v41  ;;  %9642 = vmatpush.bf16.msra.mxu0 %v13878_v51  ;;  %v4213_v51 = vmax.f32 %v4199_v40, 0.0 }
 0x2fc   : > { %v18333_v45 = vld [vmem:[#allocation10 + $0x41c] sm:$0xf0] }
 0x2fd   : > { %v14645_v46 = vld [vmem:[#allocation10 + $0x600] sm:$0xf]  ;;  %v14390_v56 = vor.u32 %v18333_v45, %v14389_v43  ;;  %9655 = vmatpush.bf16.msra.mxu1 %v14134_v55 }
 0x2fe   : > { %v18397_v47 = vld [vmem:[#allocation10 + $0x61c] sm:$0xf0] }
 0x2ff   : > { %v15125_v48 = vld [vmem:[#allocation10 + $0x9c0] sm:$0xf]  ;;  %v14646_v59 = vor.u32 %v18397_v47, %v14645_v46  ;;  %9668 = vmatpush.bf16.msra.mxu2 %v14390_v56  ;;  %v4172_v47 = vperm.slane %v20969_v31, 1 }
 0x300   : > { %v18517_v49 = vld [vmem:[#allocation10 + $0x9dc] sm:$0xf0] }
 0x301   : > { %v15381_v50 = vld [vmem:[#allocation10 + $0xbc0] sm:$0xf]  ;;  %v15126_v60 = vor.u32 %v18517_v49, %v15125_v48  ;;  %9681 = vmatpush.bf16.msra.mxu3 %v14646_v59 }
 0x302   : > { %v18581_v52 = vld [vmem:[#allocation10 + $0xbdc] sm:$0xf0] }
 0x303   : > { %v15637_v53 = vld [vmem:[#allocation10 + $0xdc0] sm:$0xf]  ;;  %v15382_v61 = vor.u32 %v18581_v52, %v15381_v50  ;;  %9687 = vmatpush.bf16.msrb.mxu0 %v15126_v60 }
 0x304   : > { %v18645_v54 = vld [vmem:[#allocation10 + $0xddc] sm:$0xf0] }
 0x305   : > { %v15893_v57 = vld [vmem:[#allocation10 + $0xfc0] sm:$0xf]  ;;  %v15638_v62 = vor.u32 %v18645_v54, %v15637_v53  ;;  %9700 = vmatpush.bf16.msrb.mxu1 %v15382_v61  ;;  %v20977_v61 = vpack.c.bf16 %v4213_v51, %v4213_v51 }
 0x306   : > { %v18709_v58 = vld [vmem:[#allocation10 + $0xfdc] sm:$0xf0] }
 0x307   : > { %v15093_v63 = vld [vmem:[#allocation10 + $0x980] sm:$0xf]  ;;  %v15894_v2 = vor.u32 %v18709_v58, %v15893_v57  ;;  %9713 = vmatpush.bf16.msrb.mxu2 %v15638_v62  ;;  %9643 = vmatmul.bf16.vlgmr.msra.gmra.mxu0 %v20977_v61 }
 0x308   : > { %v18509_v0 = vld [vmem:[#allocation10 + $0x99c] sm:$0xf0] }
 0x309   : > { %v15349_v1 = vld [vmem:[#allocation10 + $0xb80] sm:$0xf]  ;;  %v15094_v8 = vor.u32 %v18509_v0, %v15093_v63  ;;  %9726 = vmatpush.bf16.msrb.mxu3 %v15894_v2 }
 0x30a   : > { %v18573_v3 = vld [vmem:[#allocation10 + $0xb9c] sm:$0xf0] }
 0x30b   : > { %v15605_v4 = vld [vmem:[#allocation10 + $0xd80] sm:$0xf]  ;;  %v15350_v13 = vor.u32 %v18573_v3, %v15349_v1  ;;  %9688 = vmatpush.bf16.msrb.mxu0 %v15094_v8 }
 0x30c   : > { %v18637_v5 = vld [vmem:[#allocation10 + $0xd9c] sm:$0xf0] }
 0x30d   : > { %v15861_v6 = vld [vmem:[#allocation10 + $0xf80] sm:$0xf]  ;;  %v15606_v14 = vor.u32 %v18637_v5, %v15605_v4  ;;  %9701 = vmatpush.bf16.msrb.mxu1 %v15350_v13 }
 0x30e   : > { %v18701_v7 = vld [vmem:[#allocation10 + $0xf9c] sm:$0xf0] }
 0x30f   : > { %v15061_v9 = vld [vmem:[#allocation10 + $0x940] sm:$0xf]  ;;  %v15862_v18 = vor.u32 %v18701_v7, %v15861_v6  ;;  %9714 = vmatpush.bf16.msrb.mxu2 %v15606_v14 }
 0x310   : > { %v18501_v12 = vld [vmem:[#allocation10 + $0x95c] sm:$0xf0] }
 0x311   : > { %v15317_v15 = vld [vmem:[#allocation10 + $0xb40] sm:$0xf]  ;;  %v15062_v26 = vor.u32 %v18501_v12, %v15061_v9  ;;  %9727 = vmatpush.bf16.msrb.mxu3 %v15862_v18 }
 0x312   : > { %v18565_v16 = vld [vmem:[#allocation10 + $0xb5c] sm:$0xf0] }
 0x313   : > { %v15573_v17 = vld [vmem:[#allocation10 + $0xd40] sm:$0xf]  ;;  %v15318_v28 = vor.u32 %v18565_v16, %v15317_v15  ;;  %9689 = vmatpush.bf16.msrb.mxu0 %v15062_v26 }
 0x314   : > { %v18629_v19 = vld [vmem:[#allocation10 + $0xd5c] sm:$0xf0] }
 0x315   : > { %v15829_v21 = vld [vmem:[#allocation10 + $0xf40] sm:$0xf]  ;;  %v15574_v32 = vor.u32 %v18629_v19, %v15573_v17  ;;  %9702 = vmatpush.bf16.msrb.mxu1 %v15318_v28  ;;  %v4177_v19 = vperm.slane %v20969_v31, 6 }
 0x316   : > { %v18693_v22 = vld [vmem:[#allocation10 + $0xf5c] sm:$0xf0] }
 0x317   : > { %v15029_v23 = vld [vmem:[#allocation10 + $0x900] sm:$0xf]  ;;  %v15830_v36 = vor.u32 %v18693_v22, %v15829_v21  ;;  %9715 = vmatpush.bf16.msrb.mxu2 %v15574_v32  ;;  %v4175_v32 = vperm.slane %v20969_v31, 4 }
 0x318   : > { %v18493_v24 = vld [vmem:[#allocation10 + $0x91c] sm:$0xf0] }
 0x319   : > { %v15285_v25 = vld [vmem:[#allocation10 + $0xb00] sm:$0xf]  ;;  %v15030_v43 = vor.u32 %v18493_v24, %v15029_v23  ;;  %9728 = vmatpush.bf16.msrb.mxu3 %v15830_v36 }
 0x31a   : > { %v18557_v29 = vld [vmem:[#allocation10 + $0xb1c] sm:$0xf0] }
 0x31b   : > { %v4155_v30 = vld [vmem:[#allocation2 + $0x58] sm:$0xff]  ;;  %v4154_v42 = vld [vmem:[#allocation2] sm:$0xff]  ;;  %v15286_v44 = vor.u32 %v18557_v29, %v15285_v25  ;;  %9690 = vmatpush.bf16.msrb.mxu0 %v15030_v43  ;;  %v4159_v25 = vld [vmem:[#allocation2 + $0x8] sm:$0xff] }
 0x31c   : > { %v4156_v35 = vld [vmem:[#allocation2 + $0x18] sm:$0xff]  ;;  %v4201_v39 = vadd.f32 %v4173_v33, %v4155_v30  ;;  %v4200_v57 = vadd.f32 %v4172_v47, %v4154_v42  ;;  %v4157_v30 = vld [vmem:[#allocation2 + $0x50] sm:$0xff]  ;;  %v4178_v42 = vperm.slane %v20969_v31, 7  ;;  %v4158_v43 = vld [vmem:[#allocation2 + $0x68] sm:$0xff] }
 0x31d   : > { %v15541_v10 = vld [vmem:[#allocation10 + $0xd00] sm:$0xf]  ;;  %v4202_v41 = vadd.f32 %v4174_v27, %v4156_v35  ;;  %9703 = vmatpush.bf16.msrb.mxu1 %v15286_v44  ;;  %v4203_v40 = vadd.f32 %v4175_v32, %v4157_v30  ;;  %v4176_v44 = vperm.slane %v20969_v31, 5 }
 0x31e   : > { %v18621_v37 = vld [vmem:[#allocation10 + $0xd1c] sm:$0xf0]  ;;  %v4215_v50 = vmax.f32 %v4201_v39, 0.0  ;;  %v4214_v0 = vmax.f32 %v4200_v57, 0.0 }
 0x31f   : > { %v15797_v11 = vld [vmem:[#allocation10 + $0xf00] sm:$0xf]  ;;  %v15542_v48 = vor.u32 %v18621_v37, %v15541_v10  ;;  %v4216_v52 = vmax.f32 %v4202_v41, 0.0  ;;  %v4160_v41 = vld [vmem:[#allocation2 + $0x48] sm:$0xff] }
 0x320   : > { %v18685_v38 = vld [vmem:[#allocation10 + $0xf1c] sm:$0xf0]  ;;  %v20975_v60 = vpack.c.bf16 %v4215_v50, %v4215_v50  ;;  %v20982_v12 = vpack.c.bf16 %v4214_v0, %v4214_v0  ;;  %v4217_v0 = vmax.f32 %v4203_v40, 0.0 }
 0x321   : > { %v14997_v45 = vld [vmem:[#allocation10 + $0x8c0] sm:$0xf]  ;;  %v15798_v53 = vor.u32 %v18685_v38, %v15797_v11  ;;  %v20979_v62 = vpack.c.bf16 %v4216_v52, %v4216_v52  ;;  %9716 = vmatpush.bf16.msrb.mxu2 %v15542_v48  ;;  %v4205_v11 = vadd.f32 %v4177_v19, %v4159_v25  ;;  %v4206_v52 = vadd.f32 %v4178_v42, %v4160_v41 }
 0x322   : > { %v18485_v46 = vld [vmem:[#allocation10 + $0x8dc] sm:$0xf0]  ;;  %9669 = vmatmul.bf16.vlgmr.msra.gmra.mxu2 %v20975_v60  ;;  %9656 = vmatmul.bf16.vlgmr.msra.gmra.mxu1 %v20982_v12 }
 0x323   : > { %v15253_v49 = vld [vmem:[#allocation10 + $0xac0] sm:$0xf]  ;;  %v14998_v63 = vor.u32 %v18485_v46, %v14997_v45  ;;  %9729 = vmatpush.bf16.msrb.mxu3 %v15798_v53  ;;  %v4204_v53 = vadd.f32 %v4176_v44, %v4158_v43  ;;  %v4219_v57 = vmax.f32 %v4205_v11, 0.0 }
 0x324   : > { %v18549_v54 = vld [vmem:[#allocation10 + $0xadc] sm:$0xf0]  ;;  %9682 = vmatmul.bf16.vlgmr.msra.gmra.mxu3 %v20979_v62 }
 0x325   : > { %v15509_v55 = vld [vmem:[#allocation10 + $0xcc0] sm:$0xf]  ;;  %v15254_v1 = vor.u32 %v18549_v54, %v15253_v49  ;;  %9691 = vmatpush.bf16.msrb.mxu0 %v14998_v63 }
 0x326   : > { %v18613_v56 = vld [vmem:[#allocation10 + $0xcdc] sm:$0xf0] }
 0x327   : > { %v15765_v58 = vld [vmem:[#allocation10 + $0xec0] sm:$0xf]  ;;  %v15510_v2 = vor.u32 %v18613_v56, %v15509_v55  ;;  %9704 = vmatpush.bf16.msrb.mxu1 %v15254_v1  ;;  %v4220_v1 = vmax.f32 %v4206_v52, 0.0 }
 0x328   : > { %v18677_v59 = vld [vmem:[#allocation10 + $0xedc] sm:$0xf0] }
 0x329   : > { %v14965_v3 = vld [vmem:[#allocation10 + $0x880] sm:$0xf]  ;;  %v15766_v6 = vor.u32 %v18677_v59, %v15765_v58  ;;  %9717 = vmatpush.bf16.msrb.mxu2 %v15510_v2 }
 0x32a   : > { %v18477_v4 = vld [vmem:[#allocation10 + $0x89c] sm:$0xf0] }
 0x32b   : > { %v15221_v5 = vld [vmem:[#allocation10 + $0xa80] sm:$0xf]  ;;  %v14966_v16 = vor.u32 %v18477_v4, %v14965_v3  ;;  %9730 = vmatpush.bf16.msrb.mxu3 %v15766_v6  ;;  %v4218_v4 = vmax.f32 %v4204_v53, 0.0 }
 0x32c   : > { %v18541_v7 = vld [vmem:[#allocation10 + $0xa9c] sm:$0xf0] }
 0x32d   : > { %v15477_v8 = vld [vmem:[#allocation10 + $0xc80] sm:$0xf]  ;;  %v15222_v21 = vor.u32 %v18541_v7, %v15221_v5  ;;  %9692 = vmatpush.bf16.msrb.mxu0 %v14966_v16 }
 0x32e   : > { %v18605_v9 = vld [vmem:[#allocation10 + $0xc9c] sm:$0xf0] }
 0x32f   : > { %v15733_v13 = vld [vmem:[#allocation10 + $0xe80] sm:$0xf]  ;;  %v15478_v22 = vor.u32 %v18605_v9, %v15477_v8  ;;  %9705 = vmatpush.bf16.msrb.mxu1 %v15222_v21  ;;  %v20993_v21 = vpack.c.bf16 %v4217_v0, %v4217_v0 }
 0x330   : > { %v18669_v14 = vld [vmem:[#allocation10 + $0xe9c] sm:$0xf0] }
 0x331   : > { %v14933_v15 = vld [vmem:[#allocation10 + $0x840] sm:$0xf]  ;;  %v15734_v26 = vor.u32 %v18669_v14, %v15733_v13  ;;  %9718 = vmatpush.bf16.msrb.mxu2 %v15478_v22  ;;  %v20995_v22 = vpack.c.bf16 %v4220_v1, %v4220_v1 }
 0x332   : > { %v18469_v17 = vld [vmem:[#allocation10 + $0x85c] sm:$0xf0] }
 0x333   : > { %v15189_v18 = vld [vmem:[#allocation10 + $0xa40] sm:$0xf]  ;;  %v14934_v35 = vor.u32 %v18469_v17, %v14933_v15  ;;  %9731 = vmatpush.bf16.msrb.mxu3 %v15734_v26  ;;  %v20991_v17 = vpack.c.bf16 %v4219_v57, %v4219_v57 }
 0x334   : > { %v18533_v23 = vld [vmem:[#allocation10 + $0xa5c] sm:$0xf0] }
 0x335   : > { %v15445_v24 = vld [vmem:[#allocation10 + $0xc40] sm:$0xf]  ;;  %v15190_v27 = vor.u32 %v18533_v23, %v15189_v18  ;;  %9693 = vmatpush.bf16.msrb.mxu0 %v14934_v35 }
 0x336   : > { %v18597_v28 = vld [vmem:[#allocation10 + $0xc5c] sm:$0xf0] }
 0x337   : > { %v15701_v29 = vld [vmem:[#allocation10 + $0xe40] sm:$0xf]  ;;  %v15446_v38 = vor.u32 %v18597_v28, %v15445_v24  ;;  %9706 = vmatpush.bf16.msrb.mxu1 %v15190_v27  ;;  %v20997_v24 = vpack.c.bf16 %v4218_v4, %v4218_v4 }
 0x338   : > { %v18661_v33 = vld [vmem:[#allocation10 + $0xe5c] sm:$0xf0] }
 0x339   : > { %v14901_v34 = vld [vmem:[#allocation10 + $0x800] sm:$0xf]  ;;  %v15702_v45 = vor.u32 %v18661_v33, %v15701_v29  ;;  %9719 = vmatpush.bf16.msrb.mxu2 %v15446_v38 }
 0x33a   : > { %v18461_v20 = vld [vmem:[#allocation10 + $0x81c] sm:$0xf0] }
 0x33b   : > { %v15157_v36 = vld [vmem:[#allocation10 + $0xa00] sm:$0xf]  ;;  %v14902_v54 = vor.u32 %v18461_v20, %v14901_v34  ;;  %9732 = vmatpush.bf16.msrb.mxu3 %v15702_v45 }
 0x33c   : > { %v18525_v10 = vld [vmem:[#allocation10 + $0xa1c] sm:$0xf0] }
 0x33d   : > { %v15413_v37 = vld [vmem:[#allocation10 + $0xc00] sm:$0xf]  ;;  %v15158_v58 = vor.u32 %v18525_v10, %v15157_v36  ;;  %9694 = vmatpush.bf16.msrb.mxu0 %v14902_v54 }
 0x33e   : > { %v18589_v39 = vld [vmem:[#allocation10 + $0xc1c] sm:$0xf0] }
 0x33f   : > { %v15669_v46 = vld [vmem:[#allocation10 + $0xe00] sm:$0xf]  ;;  %v15414_v59 = vor.u32 %v18589_v39, %v15413_v37  ;;  %9707 = vmatpush.bf16.msrb.mxu1 %v15158_v58 }
 0x340   : > { %v18653_v47 = vld [vmem:[#allocation10 + $0xe1c] sm:$0xf0]  ;;  %9695 = vmatmul.bf16.vlgmr.msrb.gmra.mxu0 %v20993_v21 }
 0x341   : > { %v16149_v48 = vld [vmem:[#allocation10 + $0x11c0] sm:$0xf]  ;;  %v15670_v2 = vor.u32 %v18653_v47, %v15669_v46  ;;  %9720 = vmatpush.bf16.msrb.mxu2 %v15414_v59 }
 0x342   : > { %v18773_v49 = vld [vmem:[#allocation10 + $0x11dc] sm:$0xf0]  ;;  %9708 = vmatmul.bf16.vlgmr.msrb.gmra.mxu1 %v20997_v24 }
 0x343   : > { %v16405_v50 = vld [vmem:[#allocation10 + $0x13c0] sm:$0xf]  ;;  %v16150_v3 = vor.u32 %v18773_v49, %v16149_v48  ;;  %9733 = vmatpush.bf16.msrb.mxu3 %v15670_v2 }
 0x344   : > { %v18837_v51 = vld [vmem:[#allocation10 + $0x13dc] sm:$0xf0]  ;;  %9721 = vmatmul.bf16.vlgmr.msrb.gmra.mxu2 %v20991_v17 }
 0x345   : > { %v16661_v55 = vld [vmem:[#allocation10 + $0x15c0] sm:$0xf]  ;;  %v16406_v5 = vor.u32 %v18837_v51, %v16405_v50  ;;  %9739 = vmatpush.bf16.msra.mxu0 %v16150_v3  ;;  %v21003_v3 = vld [vmem:[#allocation9 + $0x8] sm:$0x3f] }
 0x346   : > { %v18901_v56 = vld [vmem:[#allocation10 + $0x15dc] sm:$0xf0]  ;;  %9734 = vmatmul.bf16.vlgmr.msrb.gmra.mxu3 %v20995_v22 }
 0x347   : > { %v16917_v31 = vld [vmem:[#allocation10 + $0x17c0] sm:$0xf]  ;;  %v16662_v6 = vor.u32 %v18901_v56, %v16661_v55  ;;  %9752 = vmatpush.bf16.msra.mxu1 %v16406_v5 }
 0x348   : > { %v18965_v63 = vld [vmem:[#allocation10 + $0x17dc] sm:$0xf0] }
 0x349   : > { %v16117_v7 = vld [vmem:[#allocation10 + $0x1180] sm:$0xf]  ;;  %v16918_v13 = vor.u32 %v18965_v63, %v16917_v31  ;;  %9765 = vmatpush.bf16.msra.mxu2 %v16662_v6 }
 0x34a   : > { %v18765_v8 = vld [vmem:[#allocation10 + $0x119c] sm:$0xf0] }
 0x34b   : > { %v16373_v9 = vld [vmem:[#allocation10 + $0x1380] sm:$0xf]  ;;  %v16118_v23 = vor.u32 %v18765_v8, %v16117_v7  ;;  %9778 = vmatpush.bf16.msra.mxu3 %v16918_v13 }
 0x34c   : > { %v18829_v14 = vld [vmem:[#allocation10 + $0x139c] sm:$0xf0] }
 0x34d   : > { %v16629_v15 = vld [vmem:[#allocation10 + $0x1580] sm:$0xf]  ;;  %v16374_v25 = vor.u32 %v18829_v14, %v16373_v9  ;;  %9740 = vmatpush.bf16.msra.mxu0 %v16118_v23 }
 0x34e   : > { %v18893_v16 = vld [vmem:[#allocation10 + $0x159c] sm:$0xf0] }
 0x34f   : > { %v16885_v18 = vld [vmem:[#allocation10 + $0x1780] sm:$0xf]  ;;  %v16630_v26 = vor.u32 %v18893_v16, %v16629_v15  ;;  %9753 = vmatpush.bf16.msra.mxu1 %v16374_v25 }
 0x350   : > { %v18957_v19 = vld [vmem:[#allocation10 + $0x179c] sm:$0xf0] }
 0x351   : > { %v16085_v28 = vld [vmem:[#allocation10 + $0x1140] sm:$0xf]  ;;  %v16886_v32 = vor.u32 %v18957_v19, %v16885_v18  ;;  %9766 = vmatpush.bf16.msra.mxu2 %v16630_v26  ;;  %v4179_v18 = vperm.slane %v21003_v3, 0 }
 0x352   : > { %v18757_v29 = vld [vmem:[#allocation10 + $0x115c] sm:$0xf0] }
 0x353   : > { %v16341_v30 = vld [vmem:[#allocation10 + $0x1340] sm:$0xf]  ;;  %v16086_v36 = vor.u32 %v18757_v29, %v16085_v28  ;;  %9779 = vmatpush.bf16.msra.mxu3 %v16886_v32  ;;  %v4181_v28 = vperm.slane %v21003_v3, 2  ;;  %v4180_v29 = vperm.slane %v21003_v3, 1 }
 0x354   : > { %v18821_v33 = vld [vmem:[#allocation10 + $0x135c] sm:$0xf0] }
 0x355   : > { %v16597_v34 = vld [vmem:[#allocation10 + $0x1540] sm:$0xf]  ;;  %v16342_v10 = vor.u32 %v18821_v33, %v16341_v30  ;;  %9741 = vmatpush.bf16.msra.mxu0 %v16086_v36  ;;  %v4163_v33 = vld [vmem:[#allocation2 + $0x10] sm:$0xff] }
 0x356   : > { %v18885_v20 = vld [vmem:[#allocation10 + $0x155c] sm:$0xf0] }
 0x357   : > { %v16853_v35 = vld [vmem:[#allocation10 + $0x1740] sm:$0xf]  ;;  %v16598_v37 = vor.u32 %v18885_v20, %v16597_v34  ;;  %9754 = vmatpush.bf16.msra.mxu1 %v16342_v10  ;;  %v4182_v20 = vperm.slane %v21003_v3, 3 }
 0x358   : > { %v18949_v27 = vld [vmem:[#allocation10 + $0x175c] sm:$0xf0] }
 0x359   : > { %v16053_v11 = vld [vmem:[#allocation10 + $0x1100] sm:$0xf]  ;;  %v16854_v40 = vor.u32 %v18949_v27, %v16853_v35  ;;  %9767 = vmatpush.bf16.msra.mxu2 %v16598_v37 }
 0x35a   : > { %v18749_v38 = vld [vmem:[#allocation10 + $0x111c] sm:$0xf0] }
 0x35b   : > { %v16309_v39 = vld [vmem:[#allocation10 + $0x1300] sm:$0xf]  ;;  %v16054_v46 = vor.u32 %v18749_v38, %v16053_v11  ;;  %9780 = vmatpush.bf16.msra.mxu3 %v16854_v40 }
 0x35c   : > { %v18813_v41 = vld [vmem:[#allocation10 + $0x131c] sm:$0xf0] }
 0x35d   : > { %v16565_v42 = vld [vmem:[#allocation10 + $0x1500] sm:$0xf]  ;;  %v16310_v47 = vor.u32 %v18813_v41, %v16309_v39  ;;  %9742 = vmatpush.bf16.msra.mxu0 %v16054_v46 }
 0x35e   : > { %v18877_v43 = vld [vmem:[#allocation10 + $0x151c] sm:$0xf0] }
 0x35f   : > { %v16821_v44 = vld [vmem:[#allocation10 + $0x1700] sm:$0xf]  ;;  %v16566_v48 = vor.u32 %v18877_v43, %v16565_v42  ;;  %9755 = vmatpush.bf16.msra.mxu1 %v16310_v47 }
 0x360   : > { %v18941_v45 = vld [vmem:[#allocation10 + $0x171c] sm:$0xf0] }
 0x361   : > { %v16021_v49 = vld [vmem:[#allocation10 + $0x10c0] sm:$0xf]  ;;  %v16822_v52 = vor.u32 %v18941_v45, %v16821_v44  ;;  %9768 = vmatpush.bf16.msra.mxu2 %v16566_v48  ;;  %v4209_v45 = vadd.f32 %v4181_v28, %v4163_v33  ;;  %v18313_v28 = vld [vmem:[#allocation10 + $0x384] sm:$0xf] }
 0x362   : > { %v18741_v50 = vld [vmem:[#allocation10 + $0x10dc] sm:$0xf0] }
 0x363   : > { %v16277_v51 = vld [vmem:[#allocation10 + $0x12c0] sm:$0xf]  ;;  %v16022_v58 = vor.u32 %v18741_v50, %v16021_v49  ;;  %9781 = vmatpush.bf16.msra.mxu3 %v16822_v52 }
 0x364   : > { %v18805_v53 = vld [vmem:[#allocation10 + $0x12dc] sm:$0xf0] }
 0x365   : > { %v16533_v54 = vld [vmem:[#allocation10 + $0x14c0] sm:$0xf]  ;;  %v16278_v63 = vor.u32 %v18805_v53, %v16277_v51  ;;  %9743 = vmatpush.bf16.msra.mxu0 %v16022_v58 }
 0x366   : > { %v18869_v55 = vld [vmem:[#allocation10 + $0x14dc] sm:$0xf0] }
 0x367   : > { %v16789_v56 = vld [vmem:[#allocation10 + $0x16c0] sm:$0xf]  ;;  %v16534_v0 = vor.u32 %v18869_v55, %v16533_v54  ;;  %9756 = vmatpush.bf16.msra.mxu1 %v16278_v63  ;;  %v18321_v63 = vld [vmem:[#allocation10 + $0x3c4] sm:$0xf] }
 0x368   : > { %v18933_v57 = vld [vmem:[#allocation10 + $0x16dc] sm:$0xf0] }
 0x369   : > { %v15989_v59 = vld [vmem:[#allocation10 + $0x1080] sm:$0xf]  ;;  %v16790_v4 = vor.u32 %v18933_v57, %v16789_v56  ;;  %9769 = vmatpush.bf16.msra.mxu2 %v16534_v0  ;;  %v18257_v56 = vld [vmem:[#allocation10 + $0x1c4] sm:$0xf] }
 0x36a   : > { %v18733_v31 = vld [vmem:[#allocation10 + $0x109c] sm:$0xf0]  ;;  %v14103_v57 = vld [vmem:[#allocation10 + $0x1e0] sm:$0xf0] }
 0x36b   : > { %v16245_v1 = vld [vmem:[#allocation10 + $0x1280] sm:$0xf]  ;;  %v15990_v14 = vor.u32 %v18733_v31, %v15989_v59  ;;  %9782 = vmatpush.bf16.msra.mxu3 %v16790_v4  ;;  %v14359_v0 = vld [vmem:[#allocation10 + $0x3e0] sm:$0xf0] }
 0x36c   : > { %v18797_v2 = vld [vmem:[#allocation10 + $0x129c] sm:$0xf0] }
 0x36d   : > { %v16501_v5 = vld [vmem:[#allocation10 + $0x1480] sm:$0xf]  ;;  %v16246_v19 = vor.u32 %v18797_v2, %v16245_v1  ;;  %9744 = vmatpush.bf16.msra.mxu0 %v15990_v14  ;;  %v4223_v1 = vmax.f32 %v4209_v45, 0.0 }
 0x36e   : > { %v18861_v6 = vld [vmem:[#allocation10 + $0x149c] sm:$0xf0] }
 0x36f   : > { %v16757_v7 = vld [vmem:[#allocation10 + $0x1680] sm:$0xf]  ;;  %v16502_v23 = vor.u32 %v18861_v6, %v16501_v5  ;;  %9757 = vmatpush.bf16.msra.mxu1 %v16246_v19  ;;  %v18249_v19 = vld [vmem:[#allocation10 + $0x184] sm:$0xf] }
 0x370   : > { %v18925_v8 = vld [vmem:[#allocation10 + $0x169c] sm:$0xf0] }
 0x371   : > { %v15957_v9 = vld [vmem:[#allocation10 + $0x1040] sm:$0xf]  ;;  %v16758_v30 = vor.u32 %v18925_v8, %v16757_v7  ;;  %9770 = vmatpush.bf16.msra.mxu2 %v16502_v23  ;;  %v14106_v8 = vor.u32 %v18257_v56, %v14103_v57  ;;  %v14071_v23 = vld [vmem:[#allocation10 + $0x1a0] sm:$0xf0] }
 0x372   : > { %v18725_v13 = vld [vmem:[#allocation10 + $0x105c] sm:$0xf0] }
 0x373   : > { %v16213_v15 = vld [vmem:[#allocation10 + $0x1240] sm:$0xf]  ;;  %v15958_v10 = vor.u32 %v18725_v13, %v15957_v9  ;;  %9783 = vmatpush.bf16.msra.mxu3 %v16758_v30 }
 0x374   : > { %v18789_v16 = vld [vmem:[#allocation10 + $0x125c] sm:$0xf0] }
 0x375   : > { %v16469_v25 = vld [vmem:[#allocation10 + $0x1440] sm:$0xf]  ;;  %v16214_v37 = vor.u32 %v18789_v16, %v16213_v15  ;;  %9745 = vmatpush.bf16.msra.mxu0 %v15958_v10  ;;  %v14362_v15 = vor.u32 %v18321_v63, %v14359_v0  ;;  %v13975_v63 = vld [vmem:[#allocation10 + $0xe0] sm:$0xf0] }
 0x376   : > { %v4161_v26 = vld [vmem:[#allocation2 + $0x40] sm:$0xff]  ;;  %v4164_v36 = vld [vmem:[#allocation2 + $0x38] sm:$0xff] }
 0x377   : > { %v18853_v32 = vld [vmem:[#allocation10 + $0x145c] sm:$0xf0]  ;;  %v4207_v40 = vadd.f32 %v4179_v18, %v4161_v26  ;;  %v4210_v51 = vadd.f32 %v4182_v20, %v4164_v36  ;;  %9758 = vmatpush.bf16.msra.mxu1 %v16214_v37  ;;  %v18241_v37 = vld [vmem:[#allocation10 + $0x144] sm:$0xf] }
 0x378   : > { %v4162_v34 = vld [vmem:[#allocation2 + $0x20] sm:$0xff]  ;;  %v16470_v41 = vor.u32 %v18853_v32, %v16469_v25  ;;  %v21011_v25 = vpack.c.bf16 %v4223_v1, %v4223_v1 }
 0x379   : > { %v16725_v35 = vld [vmem:[#allocation10 + $0x1640] sm:$0xf]  ;;  %v4208_v46 = vadd.f32 %v4180_v29, %v4162_v34  ;;  %v4221_v58 = vmax.f32 %v4207_v40, 0.0  ;;  %v4224_v6 = vmax.f32 %v4210_v51, 0.0  ;;  %v14327_v29 = vld [vmem:[#allocation10 + $0x3a0] sm:$0xf0]  ;;  %v14074_v34 = vor.u32 %v18249_v19, %v14071_v23 }
 0x37a   : > { %v18917_v27 = vld [vmem:[#allocation10 + $0x165c] sm:$0xf0]  ;;  %9771 = vmatpush.bf16.msra.mxu2 %v16470_v41  ;;  %v14330_v36 = vor.u32 %v18313_v28, %v14327_v29  ;;  %v14263_v51 = vld [vmem:[#allocation10 + $0x320] sm:$0xf0] }
 0x37b   : > { %v15925_v11 = vld [vmem:[#allocation10 + $0x1000] sm:$0xf]  ;;  %v16726_v47 = vor.u32 %v18917_v27, %v16725_v35  ;;  %v4222_v2 = vmax.f32 %v4208_v46, 0.0  ;;  %v21009_v16 = vpack.c.bf16 %v4221_v58, %v4221_v58  ;;  %v21015_v30 = vpack.c.bf16 %v4224_v6, %v4224_v6  ;;  %v18289_v0 = vld [vmem:[#allocation10 + $0x2c4] sm:$0xf] }
 0x37c   : > { %v18717_v38 = vld [vmem:[#allocation10 + $0x101c] sm:$0xf0]  ;;  %v14231_v1 = vld [vmem:[#allocation10 + $0x2e0] sm:$0xf0] }
 0x37d   : > { %v16181_v39 = vld [vmem:[#allocation10 + $0x1200] sm:$0xf]  ;;  %v15926_v55 = vor.u32 %v18717_v38, %v15925_v11  ;;  %9784 = vmatpush.bf16.msra.mxu3 %v16726_v47  ;;  %v21013_v26 = vpack.c.bf16 %v4222_v2, %v4222_v2  ;;  %v14039_v11 = vld [vmem:[#allocation10 + $0x160] sm:$0xf0] }
 0x37e   : > { %v18781_v42 = vld [vmem:[#allocation10 + $0x121c] sm:$0xf0]  ;;  %v18305_v38 = vld [vmem:[#allocation10 + $0x344] sm:$0xf] }
 0x37f   : > { %v16437_v43 = vld [vmem:[#allocation10 + $0x1400] sm:$0xf]  ;;  %v16182_v59 = vor.u32 %v18781_v42, %v16181_v39  ;;  %9746 = vmatpush.bf16.msra.mxu0 %v15926_v55  ;;  %v14295_v39 = vld [vmem:[#allocation10 + $0x360] sm:$0xf0]  ;;  %v14042_v42 = vor.u32 %v18241_v37, %v14039_v11 }
 0x380   : > { %v18845_v44 = vld [vmem:[#allocation10 + $0x141c] sm:$0xf0]  ;;  %v14298_v46 = vor.u32 %v18305_v38, %v14295_v39  ;;  %v14199_v19 = vld [vmem:[#allocation10 + $0x2a0] sm:$0xf0]  ;;  %v4166_v38 = vld [vmem:[#allocation2 + $0x28] sm:$0xff] }
 0x381   : > { %v16693_v48 = vld [vmem:[#allocation10 + $0x1600] sm:$0xf]  ;;  %v16438_v31 = vor.u32 %v18845_v44, %v16437_v43  ;;  %9759 = vmatpush.bf16.msra.mxu1 %v16182_v59  ;;  %v18209_v37 = vld [vmem:[#allocation10 + $0x44] sm:$0xf] }
 0x382   : > { %v18909_v49 = vld [vmem:[#allocation10 + $0x161c] sm:$0xf0]  ;;  %9747 = vmatmul.bf16.vlgmr.msra.gmra.mxu0 %v21009_v16  ;;  %v13911_v11 = vld [vmem:[#allocation10 + $0x60] sm:$0xf0] }
 0x383   : > { %v17173_v50 = vld [vmem:[#allocation10 + $0x19c0] sm:$0xf]  ;;  %v16694_v4 = vor.u32 %v18909_v49, %v16693_v48  ;;  %9772 = vmatpush.bf16.msra.mxu2 %v16438_v31  ;;  %v18233_v48 = vld [vmem:[#allocation10 + $0x104] sm:$0xf] }
 0x384   : > { %v19029_v52 = vld [vmem:[#allocation10 + $0x19dc] sm:$0xf0]  ;;  %9760 = vmatmul.bf16.vlgmr.msra.gmra.mxu1 %v21013_v26  ;;  %v14007_v49 = vld [vmem:[#allocation10 + $0x120] sm:$0xf0] }
 0x385   : > { %v17429_v53 = vld [vmem:[#allocation10 + $0x1bc0] sm:$0xf]  ;;  %v17174_v5 = vor.u32 %v19029_v52, %v17173_v50  ;;  %9785 = vmatpush.bf16.msra.mxu3 %v16694_v4  ;;  %v18297_v50 = vld [vmem:[#allocation10 + $0x304] sm:$0xf] }
 0x386   : > { %v19093_v54 = vld [vmem:[#allocation10 + $0x1bdc] sm:$0xf0]  ;;  %9773 = vmatmul.bf16.vlgmr.msra.gmra.mxu2 %v21011_v25  ;;  %v14266_v58 = vor.u32 %v18297_v50, %v14263_v51  ;;  %v18225_v31 = vld [vmem:[#allocation10 + $0xc4] sm:$0xf] }
 0x387   : > { %v17430_v7 = vor.u32 %v19093_v54, %v17429_v53  ;;  %v17141_v9 = vld [vmem:[#allocation10 + $0x1980] sm:$0xf]  ;;  %9791 = vmatpush.bf16.msrb.mxu0 %v17174_v5  ;;  %9817 = vmatpush.bf16.msrb.mxu2 %v14106_v8  ;;  %v14010_v54 = vor.u32 %v18233_v48, %v14007_v49  ;;  %v18273_v39 = vld [vmem:[#allocation10 + $0x244] sm:$0xf] }
 0x388   : > { %v19021_v13 = vld [vmem:[#allocation10 + $0x199c] sm:$0xf0]  ;;  %9786 = vmatmul.bf16.vlgmr.msra.gmra.mxu3 %v21015_v30  ;;  %v18201_v49 = vld [vmem:[#allocation10 + $0x4] sm:$0xf] }
 0x389   : > { %v17397_v14 = vld [vmem:[#allocation10 + $0x1b80] sm:$0xf]  ;;  %v17142_v32 = vor.u32 %v19021_v13, %v17141_v9  ;;  %9804 = vmatpush.bf16.msrb.mxu1 %v17430_v7  ;;  %9830 = vmatpush.bf16.msrb.mxu3 %v14362_v15  ;;  %v13978_v7 = vor.u32 %v18225_v31, %v13975_v63  ;;  %v18217_v13 = vld [vmem:[#allocation10 + $0x84] sm:$0xf] }
 0x38a   : > { %v19085_v18 = vld [vmem:[#allocation10 + $0x1b9c] sm:$0xf0]  ;;  %v13943_v15 = vld [vmem:[#allocation10 + $0xa0] sm:$0xf0] }
 0x38b   : > { %v17398_v33 = vor.u32 %v19085_v18, %v17397_v14  ;;  %v17109_v20 = vld [vmem:[#allocation10 + $0x1940] sm:$0xf]  ;;  %9792 = vmatpush.bf16.msrb.mxu0 %v17142_v32  ;;  %9818 = vmatpush.bf16.msrb.mxu2 %v14074_v34  ;;  %v14234_v14 = vor.u32 %v18289_v0, %v14231_v1  ;;  %v18281_v18 = vld [vmem:[#allocation10 + $0x284] sm:$0xf]  ;;  %v4183_v32 = vperm.slane %v21003_v3, 4  ;;  %v13946_v34 = vor.u32 %v18217_v13, %v13943_v15 }
 0x38c   : > { %v19013_v35 = vld [vmem:[#allocation10 + $0x195c] sm:$0xf0]  ;;  %v15127_v31 = vld [vmem:[#allocation10 + $0x9e0] sm:$0xf0] }
 0x38d   : > { %v17365_v27 = vld [vmem:[#allocation10 + $0x1b40] sm:$0xf]  ;;  %v17110_v40 = vor.u32 %v19013_v35, %v17109_v20  ;;  %9805 = vmatpush.bf16.msrb.mxu1 %v17398_v33  ;;  %9831 = vmatpush.bf16.msrb.mxu3 %v14330_v36  ;;  %v4184_v36 = vperm.slane %v21003_v3, 5  ;;  %v13879_v3 = vld [vmem:[#allocation10 + $0x20] sm:$0xf0] }
 0x38e   : > { %v19077_v10 = vld [vmem:[#allocation10 + $0x1b5c] sm:$0xf0]  ;;  %v13882_v1 = vor.u32 %v18201_v49, %v13879_v3  ;;  %v18377_v13 = vld [vmem:[#allocation10 + $0x584] sm:$0xf] }
 0x38f   : > { %v17366_v41 = vor.u32 %v19077_v10, %v17365_v27  ;;  %v17077_v43 = vld [vmem:[#allocation10 + $0x1900] sm:$0xf]  ;;  %9793 = vmatpush.bf16.msrb.mxu0 %v17110_v40  ;;  %9819 = vmatpush.bf16.msrb.mxu2 %v14042_v42  ;;  %v14202_v10 = vor.u32 %v18281_v18, %v14199_v19  ;;  %v14167_v40 = vld [vmem:[#allocation10 + $0x260] sm:$0xf0]  ;;  %v4212_v50 = vadd.f32 %v4184_v36, %v4166_v38 }
 0x390   : > { %v19005_v44 = vld [vmem:[#allocation10 + $0x191c] sm:$0xf0]  ;;  %v14170_v51 = vor.u32 %v18273_v39, %v14167_v40  ;;  %v18441_v15 = vld [vmem:[#allocation10 + $0x784] sm:$0xf] }
 0x391   : > { %v17333_v45 = vld [vmem:[#allocation10 + $0x1b00] sm:$0xf]  ;;  %v17078_v52 = vor.u32 %v19005_v44, %v17077_v43  ;;  %9806 = vmatpush.bf16.msrb.mxu1 %v17366_v41  ;;  %9832 = vmatpush.bf16.msrb.mxu3 %v14298_v46  ;;  %v18369_v36 = vld [vmem:[#allocation10 + $0x544] sm:$0xf] }
 0x392   : > { %v19069_v47 = vld [vmem:[#allocation10 + $0x1b1c] sm:$0xf0]  ;;  %v14807_v38 = vld [vmem:[#allocation10 + $0x760] sm:$0xf0] }
 0x393   : > { %v17334_v53 = vor.u32 %v19069_v47, %v17333_v45  ;;  %v17045_v55 = vld [vmem:[#allocation10 + $0x18c0] sm:$0xf]  ;;  %9794 = vmatpush.bf16.msrb.mxu0 %v17078_v52  ;;  %9820 = vmatpush.bf16.msrb.mxu2 %v14010_v54  ;;  %v13914_v47 = vor.u32 %v18209_v37, %v13911_v11  ;;  %v18265_v52 = vld [vmem:[#allocation10 + $0x204] sm:$0xf] }
 0x394   : > { %v18997_v56 = vld [vmem:[#allocation10 + $0x18dc] sm:$0xf0]  ;;  %v18385_v54 = vld [vmem:[#allocation10 + $0x5c4] sm:$0xf] }
 0x395   : > { %v17301_v57 = vld [vmem:[#allocation10 + $0x1ac0] sm:$0xf]  ;;  %v17046_v2 = vor.u32 %v18997_v56, %v17045_v55  ;;  %9807 = vmatpush.bf16.msrb.mxu1 %v17334_v53  ;;  %9833 = vmatpush.bf16.msrb.mxu3 %v14266_v58  ;;  %v14135_v53 = vld [vmem:[#allocation10 + $0x220] sm:$0xf0] }
 0x396   : > { %v19061_v59 = vld [vmem:[#allocation10 + $0x1adc] sm:$0xf0]  ;;  %v14615_v55 = vld [vmem:[#allocation10 + $0x5e0] sm:$0xf0] }
 0x397   : > { %v17013_v4 = vld [vmem:[#allocation10 + $0x1880] sm:$0xf]  ;;  %v17302_v6 = vor.u32 %v19061_v59, %v17301_v57  ;;  %9795 = vmatpush.bf16.msrb.mxu0 %v17046_v2  ;;  %9821 = vmatpush.bf16.msrb.mxu2 %v13978_v7  ;;  %v18449_v56 = vld [vmem:[#allocation10 + $0x7c4] sm:$0xf]  ;;  %v14618_v7 = vor.u32 %v18385_v54, %v14615_v55 }
 0x398   : > { %v18989_v5 = vld [vmem:[#allocation10 + $0x189c] sm:$0xf0]  ;;  %v14871_v57 = vld [vmem:[#allocation10 + $0x7e0] sm:$0xf0] }
 0x399   : > { %v17269_v8 = vld [vmem:[#allocation10 + $0x1a80] sm:$0xf]  ;;  %v17014_v23 = vor.u32 %v18989_v5, %v17013_v4  ;;  %9808 = vmatpush.bf16.msrb.mxu1 %v17302_v6  ;;  %9834 = vmatpush.bf16.msrb.mxu3 %v14234_v14  ;;  %v18513_v59 = vld [vmem:[#allocation10 + $0x9c4] sm:$0xf]  ;;  %v4226_v5 = vmax.f32 %v4212_v50, 0.0  ;;  %v14138_v6 = vor.u32 %v18265_v52, %v14135_v53 }
 0x39a   : > { %v19053_v9 = vld [vmem:[#allocation10 + $0x1a9c] sm:$0xf0]  ;;  %v18577_v2 = vld [vmem:[#allocation10 + $0xbc4] sm:$0xf] }
 0x39b   : > { %v16981_v28 = vld [vmem:[#allocation10 + $0x1840] sm:$0xf]  ;;  %v17270_v33 = vor.u32 %v19053_v9, %v17269_v8  ;;  %9796 = vmatpush.bf16.msrb.mxu0 %v17014_v23  ;;  %9822 = vmatpush.bf16.msrb.mxu2 %v13946_v34  ;;  %v15383_v4 = vld [vmem:[#allocation10 + $0xbe0] sm:$0xf0]  ;;  %v14874_v8 = vor.u32 %v18449_v56, %v14871_v57  ;;  %v15130_v9 = vor.u32 %v18513_v59, %v15127_v31 }
 0x39c   : > { %v18981_v29 = vld [vmem:[#allocation10 + $0x185c] sm:$0xf0]  ;;  %v14583_v14 = vld [vmem:[#allocation10 + $0x5a0] sm:$0xf0]  ;;  %v15386_v18 = vor.u32 %v18577_v2, %v15383_v4 }
 0x39d   : > { %v17237_v20 = vld [vmem:[#allocation10 + $0x1a40] sm:$0xf]  ;;  %v16982_v41 = vor.u32 %v18981_v29, %v16981_v28  ;;  %9809 = vmatpush.bf16.msrb.mxu1 %v17270_v33  ;;  %9835 = vmatpush.bf16.msrb.mxu3 %v14202_v10  ;;  %v14839_v23 = vld [vmem:[#allocation10 + $0x7a0] sm:$0xf0] }
 0x39e   : > { %v19045_v35 = vld [vmem:[#allocation10 + $0x1a5c] sm:$0xf0]  ;;  %v18505_v28 = vld [vmem:[#allocation10 + $0x984] sm:$0xf] }
 0x39f   : > { %v4165_v27 = vld [vmem:[#allocation2 + $0x60] sm:$0xff]  ;;  %v17238_v46 = vor.u32 %v19045_v35, %v17237_v20  ;;  %9797 = vmatpush.bf16.msrb.mxu0 %v16982_v41  ;;  %9823 = vmatpush.bf16.msrb.mxu2 %v13914_v47  ;;  %v14586_v20 = vor.u32 %v18377_v13, %v14583_v14  ;;  %v14842_v35 = vor.u32 %v18441_v15, %v14839_v23 }
 0x3a0   : > { %v16949_v42 = vld [vmem:[#allocation10 + $0x1800] sm:$0xf]  ;;  %v4211_v45 = vadd.f32 %v4183_v32, %v4165_v27  ;;  %v15095_v29 = vld [vmem:[#allocation10 + $0x9a0] sm:$0xf0]  ;;  %v21025_v32 = vpack.c.bf16 %v4226_v5, %v4226_v5 }
 0x3a1   : > { %v18973_v43 = vld [vmem:[#allocation10 + $0x181c] sm:$0xf0]  ;;  %9810 = vmatpush.bf16.msrb.mxu1 %v17238_v46  ;;  %9836 = vmatpush.bf16.msrb.mxu3 %v14170_v51  ;;  %v18569_v33 = vld [vmem:[#allocation10 + $0xb84] sm:$0xf]  ;;  %v15098_v27 = vor.u32 %v18505_v28, %v15095_v29 }
 0x3a2   : > { %v17205_v44 = vld [vmem:[#allocation10 + $0x1a00] sm:$0xf]  ;;  %v16950_v58 = vor.u32 %v18973_v43, %v16949_v42  ;;  %v4225_v63 = vmax.f32 %v4211_v45, 0.0  ;;  %v15351_v34 = vld [vmem:[#allocation10 + $0xba0] sm:$0xf0] }
 0x3a3   : > { %v19037_v48 = vld [vmem:[#allocation10 + $0x1a1c] sm:$0xf0]  ;;  %9824 = vmatpush.bf16.msrb.mxu2 %v13882_v1  ;;  %v14551_v10 = vld [vmem:[#allocation10 + $0x560] sm:$0xf0]  ;;  %v15354_v11 = vor.u32 %v18569_v33, %v15351_v34 }
 0x3a4   : > { %v17206_v0 = vor.u32 %v19037_v48, %v17205_v44  ;;  %9798 = vmatpush.bf16.msrb.mxu0 %v16950_v58  ;;  %v21023_v19 = vpack.c.bf16 %v4225_v63, %v4225_v63  ;;  %v18433_v37 = vld [vmem:[#allocation10 + $0x744] sm:$0xf]  ;;  %v14554_v43 = vor.u32 %v18369_v36, %v14551_v10 }
 0x3a5   : > { %9837 = vmatpush.bf16.msrb.mxu3 %v14138_v6  ;;  %v18497_v39 = vld [vmem:[#allocation10 + $0x944] sm:$0xf]  ;;  %v14810_v44 = vor.u32 %v18433_v37, %v14807_v38 }
 0x3a6   : > { %9811 = vmatpush.bf16.msrb.mxu1 %v17206_v0  ;;  %v15063_v40 = vld [vmem:[#allocation10 + $0x960] sm:$0xf0]  ;;  %9825 = vmatmul.bf16.vlgmr.msrb.gmra.mxu2 %v20977_v61 }
 0x3a7   : > { %9869 = vmatpush.bf16.msra.mxu2 %v15130_v9  ;;  %9799 = vmatmul.bf16.vlgmr.msrb.gmra.mxu0 %v21023_v19  ;;  %v18561_v41 = vld [vmem:[#allocation10 + $0xb44] sm:$0xf]  ;;  %v15066_v45 = vor.u32 %v18497_v39, %v15063_v40 }
 0x3a8   : > { %9843 = vmatpush.bf16.msra.mxu0 %v14618_v7  ;;  %v15319_v42 = vld [vmem:[#allocation10 + $0xb60] sm:$0xf0]  ;;  %9838 = vmatmul.bf16.vlgmr.msrb.gmra.mxu3 %v20982_v12 }
 0x3a9   : > { %9882 = vmatpush.bf16.msra.mxu3 %v15386_v18  ;;  %9812 = vmatmul.bf16.vlgmr.msrb.gmra.mxu1 %v21025_v32  ;;  %v18361_v46 = vld [vmem:[#allocation10 + $0x504] sm:$0xf]  ;;  %v15322_v49 = vor.u32 %v18561_v41, %v15319_v42 }
 0x3aa   : > { %9856 = vmatpush.bf16.msra.mxu1 %v14874_v8  ;;  %v14519_v47 = vld [vmem:[#allocation10 + $0x520] sm:$0xf0] }
 0x3ab   : > { %9870 = vmatpush.bf16.msra.mxu2 %v15098_v27  ;;  %v18425_v48 = vld [vmem:[#allocation10 + $0x704] sm:$0xf]  ;;  %v14522_v54 = vor.u32 %v18361_v46, %v14519_v47 }
 0x3ac   : > { %9844 = vmatpush.bf16.msra.mxu0 %v14586_v20  ;;  %v14775_v3 = vld [vmem:[#allocation10 + $0x720] sm:$0xf0] }
 0x3ad   : > { %9883 = vmatpush.bf16.msra.mxu3 %v15354_v11  ;;  %v18489_v50 = vld [vmem:[#allocation10 + $0x904] sm:$0xf]  ;;  %v14778_v55 = vor.u32 %v18425_v48, %v14775_v3 }
 0x3ae   : > { %9857 = vmatpush.bf16.msra.mxu1 %v14842_v35  ;;  %v15031_v51 = vld [vmem:[#allocation10 + $0x920] sm:$0xf0] }
 0x3af   : > { %v18553_v52 = vld [vmem:[#allocation10 + $0xb04] sm:$0xf]  ;;  %9871 = vmatpush.bf16.msra.mxu2 %v15066_v45  ;;  %v15034_v56 = vor.u32 %v18489_v50, %v15031_v51 }
 0x3b0   : > { %v15287_v53 = vld [vmem:[#allocation10 + $0xb20] sm:$0xf0]  ;;  %9845 = vmatpush.bf16.msra.mxu0 %v14554_v43 }
 0x3b1   : > { %v18353_v57 = vld [vmem:[#allocation10 + $0x4c4] sm:$0xf]  ;;  %9884 = vmatpush.bf16.msra.mxu3 %v15322_v49  ;;  %v15290_v31 = vor.u32 %v18553_v52, %v15287_v53 }
 0x3b2   : > { %9858 = vmatpush.bf16.msra.mxu1 %v14810_v44  ;;  %v14487_v58 = vld [vmem:[#allocation10 + $0x4e0] sm:$0xf0] }
 0x3b3   : > { %v18417_v59 = vld [vmem:[#allocation10 + $0x6c4] sm:$0xf]  ;;  %v14490_v5 = vor.u32 %v18353_v57, %v14487_v58  ;;  %9872 = vmatpush.bf16.msra.mxu2 %v15034_v56 }
 0x3b4   : > { %v14743_v63 = vld [vmem:[#allocation10 + $0x6e0] sm:$0xf0]  ;;  %9846 = vmatpush.bf16.msra.mxu0 %v14522_v54 }
 0x3b5   : > { %v18481_v0 = vld [vmem:[#allocation10 + $0x8c4] sm:$0xf]  ;;  %v14746_v6 = vor.u32 %v18417_v59, %v14743_v63  ;;  %9885 = vmatpush.bf16.msra.mxu3 %v15290_v31 }
 0x3b6   : > { %v14999_v1 = vld [vmem:[#allocation10 + $0x8e0] sm:$0xf0]  ;;  %9859 = vmatpush.bf16.msra.mxu1 %v14778_v55 }
 0x3b7   : > { %v18545_v2 = vld [vmem:[#allocation10 + $0xac4] sm:$0xf]  ;;  %v15002_v7 = vor.u32 %v18481_v0, %v14999_v1 }
 0x3b8   : > { %v15255_v4 = vld [vmem:[#allocation10 + $0xae0] sm:$0xf0]  ;;  %9847 = vmatpush.bf16.msra.mxu0 %v14490_v5 }
 0x3b9   : > { %v18345_v8 = vld [vmem:[#allocation10 + $0x484] sm:$0xf]  ;;  %v15258_v14 = vor.u32 %v18545_v2, %v15255_v4  ;;  %9873 = vmatpush.bf16.msra.mxu2 %v15002_v7 }
 0x3ba   : > { %v14455_v9 = vld [vmem:[#allocation10 + $0x4a0] sm:$0xf0]  ;;  %9860 = vmatpush.bf16.msra.mxu1 %v14746_v6 }
 0x3bb   : > { %v18409_v13 = vld [vmem:[#allocation10 + $0x684] sm:$0xf]  ;;  %v14458_v33 = vor.u32 %v18345_v8, %v14455_v9  ;;  %9886 = vmatpush.bf16.msra.mxu3 %v15258_v14 }
 0x3bc   : > { %v14711_v15 = vld [vmem:[#allocation10 + $0x6a0] sm:$0xf0] }
 0x3bd   : > { %v18473_v18 = vld [vmem:[#allocation10 + $0x884] sm:$0xf]  ;;  %v14714_v34 = vor.u32 %v18409_v13, %v14711_v15  ;;  %9848 = vmatpush.bf16.msra.mxu0 %v14458_v33 }
 0x3be   : > { %v14967_v23 = vld [vmem:[#allocation10 + $0x8a0] sm:$0xf0] }
 0x3bf   : > { %v18537_v28 = vld [vmem:[#allocation10 + $0xa84] sm:$0xf]  ;;  %v14970_v20 = vor.u32 %v18473_v18, %v14967_v23  ;;  %9861 = vmatpush.bf16.msra.mxu1 %v14714_v34 }
 0x3c0   : > { %v15223_v29 = vld [vmem:[#allocation10 + $0xaa0] sm:$0xf0] }
 0x3c1   : > { %v18337_v35 = vld [vmem:[#allocation10 + $0x444] sm:$0xf]  ;;  %v15226_v10 = vor.u32 %v18537_v28, %v15223_v29  ;;  %9874 = vmatpush.bf16.msra.mxu2 %v14970_v20 }
 0x3c2   : > { %v14423_v27 = vld [vmem:[#allocation10 + $0x460] sm:$0xf0] }
 0x3c3   : > { %v18401_v36 = vld [vmem:[#allocation10 + $0x644] sm:$0xf]  ;;  %v14426_v41 = vor.u32 %v18337_v35, %v14423_v27  ;;  %9887 = vmatpush.bf16.msra.mxu3 %v15226_v10 }
 0x3c4   : > { %v14679_v37 = vld [vmem:[#allocation10 + $0x660] sm:$0xf0] }
 0x3c5   : > { %v18465_v11 = vld [vmem:[#allocation10 + $0x844] sm:$0xf]  ;;  %v14682_v44 = vor.u32 %v18401_v36, %v14679_v37  ;;  %9849 = vmatpush.bf16.msra.mxu0 %v14426_v41 }
 0x3c6   : > { %v14935_v38 = vld [vmem:[#allocation10 + $0x860] sm:$0xf0] }
 0x3c7   : > { %v18529_v39 = vld [vmem:[#allocation10 + $0xa44] sm:$0xf]  ;;  %v14938_v45 = vor.u32 %v18465_v11, %v14935_v38  ;;  %9862 = vmatpush.bf16.msra.mxu1 %v14682_v44 }
 0x3c8   : > { %v15191_v40 = vld [vmem:[#allocation10 + $0xa60] sm:$0xf0] }
 0x3c9   : > { %v18329_v42 = vld [vmem:[#allocation10 + $0x404] sm:$0xf]  ;;  %v15194_v49 = vor.u32 %v18529_v39, %v15191_v40  ;;  %9875 = vmatpush.bf16.msra.mxu2 %v14938_v45 }
 0x3ca   : > { %v14391_v43 = vld [vmem:[#allocation10 + $0x420] sm:$0xf0] }
 0x3cb   : > { %v18393_v46 = vld [vmem:[#allocation10 + $0x604] sm:$0xf]  ;;  %v14394_v55 = vor.u32 %v18329_v42, %v14391_v43  ;;  %9888 = vmatpush.bf16.msra.mxu3 %v15194_v49 }
 0x3cc   : > { %v14647_v47 = vld [vmem:[#allocation10 + $0x620] sm:$0xf0] }
 0x3cd   : > { %v18457_v48 = vld [vmem:[#allocation10 + $0x804] sm:$0xf]  ;;  %v14650_v59 = vor.u32 %v18393_v46, %v14647_v47  ;;  %9850 = vmatpush.bf16.msra.mxu0 %v14394_v55 }
 0x3ce   : > { %v14903_v3 = vld [vmem:[#allocation10 + $0x820] sm:$0xf0] }
 0x3cf   : > { %v18521_v50 = vld [vmem:[#allocation10 + $0xa04] sm:$0xf]  ;;  %v14906_v31 = vor.u32 %v18457_v48, %v14903_v3  ;;  %9863 = vmatpush.bf16.msra.mxu1 %v14650_v59 }
 0x3d0   : > { %v15159_v51 = vld [vmem:[#allocation10 + $0xa20] sm:$0xf0]  ;;  %9851 = vmatmul.bf16.vlgmr.msra.gmra.mxu0 %v20975_v60 }
 0x3d1   : > { %v18641_v52 = vld [vmem:[#allocation10 + $0xdc4] sm:$0xf]  ;;  %v15162_v1 = vor.u32 %v18521_v50, %v15159_v51  ;;  %9876 = vmatpush.bf16.msra.mxu2 %v14906_v31 }
 0x3d2   : > { %v15639_v53 = vld [vmem:[#allocation10 + $0xde0] sm:$0xf0]  ;;  %9864 = vmatmul.bf16.vlgmr.msra.gmra.mxu1 %v20979_v62 }
 0x3d3   : > { %v18705_v54 = vld [vmem:[#allocation10 + $0xfc4] sm:$0xf]  ;;  %v15642_v2 = vor.u32 %v18641_v52, %v15639_v53  ;;  %9889 = vmatpush.bf16.msra.mxu3 %v15162_v1 }
 0x3d4   : > { %v15895_v56 = vld [vmem:[#allocation10 + $0xfe0] sm:$0xf0]  ;;  %9877 = vmatmul.bf16.vlgmr.msra.gmra.mxu2 %v20993_v21 }
 0x3d5   : > { %v18769_v57 = vld [vmem:[#allocation10 + $0x11c4] sm:$0xf]  ;;  %v15898_v4 = vor.u32 %v18705_v54, %v15895_v56  ;;  %9895 = vmatpush.bf16.msrb.mxu0 %v15642_v2 }
 0x3d6   : > { %v16151_v58 = vld [vmem:[#allocation10 + $0x11e0] sm:$0xf0]  ;;  %9890 = vmatmul.bf16.vlgmr.msra.gmra.mxu3 %v20997_v24 }
 0x3d7   : > { %v18833_v63 = vld [vmem:[#allocation10 + $0x13c4] sm:$0xf]  ;;  %v16154_v5 = vor.u32 %v18769_v57, %v16151_v58  ;;  %9908 = vmatpush.bf16.msrb.mxu1 %v15898_v4 }
 0x3d8   : > { %v16407_v0 = vld [vmem:[#allocation10 + $0x13e0] sm:$0xf0] }
 0x3d9   : > { %v18633_v6 = vld [vmem:[#allocation10 + $0xd84] sm:$0xf]  ;;  %v16410_v9 = vor.u32 %v18833_v63, %v16407_v0  ;;  %9921 = vmatpush.bf16.msrb.mxu2 %v16154_v5 }
 0x3da   : > { %v15607_v7 = vld [vmem:[#allocation10 + $0xda0] sm:$0xf0] }
 0x3db   : > { %v18697_v8 = vld [vmem:[#allocation10 + $0xf84] sm:$0xf]  ;;  %v15610_v28 = vor.u32 %v18633_v6, %v15607_v7  ;;  %9934 = vmatpush.bf16.msrb.mxu3 %v16410_v9 }
 0x3dc   : > { %v15863_v13 = vld [vmem:[#allocation10 + $0xfa0] sm:$0xf0] }
 0x3dd   : > { %v18761_v14 = vld [vmem:[#allocation10 + $0x1184] sm:$0xf]  ;;  %v15866_v29 = vor.u32 %v18697_v8, %v15863_v13  ;;  %9896 = vmatpush.bf16.msrb.mxu0 %v15610_v28 }
 0x3de   : > { %v16119_v15 = vld [vmem:[#allocation10 + $0x11a0] sm:$0xf0] }
 0x3df   : > { %v18825_v18 = vld [vmem:[#allocation10 + $0x1384] sm:$0xf]  ;;  %v16122_v33 = vor.u32 %v18761_v14, %v16119_v15  ;;  %9909 = vmatpush.bf16.msrb.mxu1 %v15866_v29 }
 0x3e0   : > { %v16375_v23 = vld [vmem:[#allocation10 + $0x13a0] sm:$0xf0] }
 0x3e1   : > { %v18625_v34 = vld [vmem:[#allocation10 + $0xd44] sm:$0xf]  ;;  %v16378_v27 = vor.u32 %v18825_v18, %v16375_v23  ;;  %9922 = vmatpush.bf16.msrb.mxu2 %v16122_v33 }
 0x3e2   : > { %v15575_v20 = vld [vmem:[#allocation10 + $0xd60] sm:$0xf0] }
 0x3e3   : > { %v18689_v35 = vld [vmem:[#allocation10 + $0xf44] sm:$0xf]  ;;  %v15578_v39 = vor.u32 %v18625_v34, %v15575_v20  ;;  %9935 = vmatpush.bf16.msrb.mxu3 %v16378_v27 }
 0x3e4   : > { %v15831_v36 = vld [vmem:[#allocation10 + $0xf60] sm:$0xf0] }
 0x3e5   : > { %v18753_v10 = vld [vmem:[#allocation10 + $0x1144] sm:$0xf]  ;;  %v15834_v40 = vor.u32 %v18689_v35, %v15831_v36  ;;  %9897 = vmatpush.bf16.msrb.mxu0 %v15578_v39 }
 0x3e6   : > { %v16087_v37 = vld [vmem:[#allocation10 + $0x1160] sm:$0xf0] }
 0x3e7   : > { %v18817_v11 = vld [vmem:[#allocation10 + $0x1344] sm:$0xf]  ;;  %v16090_v41 = vor.u32 %v18753_v10, %v16087_v37  ;;  %9910 = vmatpush.bf16.msrb.mxu1 %v15834_v40 }
 0x3e8   : > { %v16343_v38 = vld [vmem:[#allocation10 + $0x1360] sm:$0xf0] }
 0x3e9   : > { %v18617_v42 = vld [vmem:[#allocation10 + $0xd04] sm:$0xf]  ;;  %v16346_v45 = vor.u32 %v18817_v11, %v16343_v38  ;;  %9923 = vmatpush.bf16.msrb.mxu2 %v16090_v41 }
 0x3ea   : > { %v15543_v43 = vld [vmem:[#allocation10 + $0xd20] sm:$0xf0] }
 0x3eb   : > { %v18681_v44 = vld [vmem:[#allocation10 + $0xf04] sm:$0xf]  ;;  %v15546_v50 = vor.u32 %v18617_v42, %v15543_v43  ;;  %9936 = vmatpush.bf16.msrb.mxu3 %v16346_v45  ;;  %v9644_v42 = vpop.f32.mrf.mxu0 }
 0x3ec   : > { %v15799_v46 = vld [vmem:[#allocation10 + $0xf20] sm:$0xf0] }
 0x3ed   : > { %v18745_v47 = vld [vmem:[#allocation10 + $0x1104] sm:$0xf]  ;;  %v15802_v51 = vor.u32 %v18681_v44, %v15799_v46  ;;  %9898 = vmatpush.bf16.msrb.mxu0 %v15546_v50 }
 0x3ee   : > { %v16055_v48 = vld [vmem:[#allocation10 + $0x1120] sm:$0xf0] }
 0x3ef   : > { %v18809_v49 = vld [vmem:[#allocation10 + $0x1304] sm:$0xf]  ;;  %v16058_v52 = vor.u32 %v18745_v47, %v16055_v48  ;;  %9911 = vmatpush.bf16.msrb.mxu1 %v15802_v51 }
 0x3f0   : > { %v16311_v3 = vld [vmem:[#allocation10 + $0x1320] sm:$0xf0] }
 0x3f1   : > { %v18609_v53 = vld [vmem:[#allocation10 + $0xcc4] sm:$0xf]  ;;  %v16314_v56 = vor.u32 %v18809_v49, %v16311_v3  ;;  %9924 = vmatpush.bf16.msrb.mxu2 %v16058_v52  ;;  %v9657_v49 = vpop.f32.mrf.mxu1 }
 0x3f2   : > { %v15511_v54 = vld [vmem:[#allocation10 + $0xce0] sm:$0xf0] }
 0x3f3   : > { %v18673_v55 = vld [vmem:[#allocation10 + $0xec4] sm:$0xf]  ;;  %v15514_v0 = vor.u32 %v18609_v53, %v15511_v54  ;;  %9937 = vmatpush.bf16.msrb.mxu3 %v16314_v56 }
 0x3f4   : > { %v15767_v57 = vld [vmem:[#allocation10 + $0xee0] sm:$0xf0] }
 0x3f5   : > { %v18737_v58 = vld [vmem:[#allocation10 + $0x10c4] sm:$0xf]  ;;  %v15770_v2 = vor.u32 %v18673_v55, %v15767_v57  ;;  %9899 = vmatpush.bf16.msrb.mxu0 %v15514_v0 }
 0x3f6   : > { %v16023_v59 = vld [vmem:[#allocation10 + $0x10e0] sm:$0xf0] }
 0x3f7   : > { %v18801_v31 = vld [vmem:[#allocation10 + $0x12c4] sm:$0xf]  ;;  %v16026_v4 = vor.u32 %v18737_v58, %v16023_v59  ;;  %9912 = vmatpush.bf16.msrb.mxu1 %v15770_v2 }
 0x3f8   : > { %v16279_v63 = vld [vmem:[#allocation10 + $0x12e0] sm:$0xf0] }
 0x3f9   : > { %v18601_v1 = vld [vmem:[#allocation10 + $0xc84] sm:$0xf]  ;;  %v16282_v8 = vor.u32 %v18801_v31, %v16279_v63  ;;  %9925 = vmatpush.bf16.msrb.mxu2 %v16026_v4  ;;  %v9670_v4 = vpop.f32.mrf.mxu2 }
 0x3fa   : > { %v15479_v5 = vld [vmem:[#allocation10 + $0xca0] sm:$0xf0] }
 0x3fb   : > { %v18665_v6 = vld [vmem:[#allocation10 + $0xe84] sm:$0xf]  ;;  %v15482_v23 = vor.u32 %v18601_v1, %v15479_v5  ;;  %9938 = vmatpush.bf16.msrb.mxu3 %v16282_v8  ;;  %v9683_v8 = vpop.f32.mrf.mxu3 }
 0x3fc   : > { %v15735_v7 = vld [vmem:[#allocation10 + $0xea0] sm:$0xf0] }
 0x3fd   : > { %v18729_v9 = vld [vmem:[#allocation10 + $0x1084] sm:$0xf]  ;;  %v15738_v29 = vor.u32 %v18665_v6, %v15735_v7  ;;  %9900 = vmatpush.bf16.msrb.mxu0 %v15482_v23 }
 0x3fe   : > { %v15991_v13 = vld [vmem:[#allocation10 + $0x10a0] sm:$0xf0] }
 0x3ff   : > { %v21035_v14 = vld [vmem:[#allocation12] sm:$0xff]  ;;  %v15994_v33 = vor.u32 %v18729_v9, %v15991_v13  ;;  %9913 = vmatpush.bf16.msrb.mxu1 %v15738_v29 }
 0x400   : > { %v18793_v15 = vld [vmem:[#allocation10 + $0x1284] sm:$0xf]  ;;  %v5139_v35 = vperm.slane %v21035_v14, 0 }
 0x401   : > { %v16247_v18 = vld [vmem:[#allocation10 + $0x12a0] sm:$0xf0]  ;;  %9926 = vmatpush.bf16.msrb.mxu2 %v15994_v33 }
 0x402   : > { %v18593_v28 = vld [vmem:[#allocation10 + $0xc44] sm:$0xf]  ;;  %v16250_v27 = vor.u32 %v18793_v15, %v16247_v18  ;;  %v9645_v48 = vadd.f32 %v9644_v42, %v5139_v35  ;;  %v9646_v35 = vpop.f32.mrf.mxu0 }
 0x403   : > { %v15447_v34 = vld [vmem:[#allocation10 + $0xc60] sm:$0xf0] }
 0x404   : > { %v18657_v20 = vld [vmem:[#allocation10 + $0xe44] sm:$0xf]  ;;  %v15450_v39 = vor.u32 %v18593_v28, %v15447_v34  ;;  %9939 = vmatpush.bf16.msrb.mxu3 %v16250_v27  ;;  %v9658_v56 = vadd.f32 %v9657_v49, %v9645_v48  ;;  %v9672_v48 = vpop.f32.mrf.mxu2 }
 0x405   : > { %v15703_v36 = vld [vmem:[#allocation10 + $0xe60] sm:$0xf0] }
 0x406   : > { %v18721_v10 = vld [vmem:[#allocation10 + $0x1044] sm:$0xf]  ;;  %v15706_v43 = vor.u32 %v18657_v20, %v15703_v36  ;;  %9901 = vmatpush.bf16.msrb.mxu0 %v15450_v39  ;;  %v9671_v7 = vadd.f32 %v9670_v4, %v9658_v56 }
 0x407   : > { %v15959_v37 = vld [vmem:[#allocation10 + $0x1060] sm:$0xf0] }
 0x408   : > { %v18785_v11 = vld [vmem:[#allocation10 + $0x1244] sm:$0xf]  ;;  %v15962_v44 = vor.u32 %v18721_v10, %v15959_v37  ;;  %9914 = vmatpush.bf16.msrb.mxu1 %v15706_v43  ;;  %v9684_v20 = vadd.f32 %v9683_v8, %v9671_v7  ;;  %v9659_v10 = vpop.f32.mrf.mxu1 }
 0x409   : > { %v16215_v38 = vld [vmem:[#allocation10 + $0x1260] sm:$0xf0] }
 0x40a   : > { %v18585_v40 = vld [vmem:[#allocation10 + $0xc04] sm:$0xf]  ;;  %v16218_v3 = vor.u32 %v18785_v11, %v16215_v38  ;;  %9927 = vmatpush.bf16.msrb.mxu2 %v15962_v44 }
 0x40b   : > { %v15415_v41 = vld [vmem:[#allocation10 + $0xc20] sm:$0xf0] }
 0x40c   : > { %v18649_v45 = vld [vmem:[#allocation10 + $0xe04] sm:$0xf]  ;;  %v15418_v57 = vor.u32 %v18585_v40, %v15415_v41  ;;  %9940 = vmatpush.bf16.msrb.mxu3 %v16218_v3  ;;  %v9685_v3 = vpop.f32.mrf.mxu3 }
 0x40d   : > { %v15671_v46 = vld [vmem:[#allocation10 + $0xe20] sm:$0xf0] }
 0x40e   : > { %v18713_v47 = vld [vmem:[#allocation10 + $0x1004] sm:$0xf]  ;;  %v15674_v63 = vor.u32 %v18649_v45, %v15671_v46  ;;  %9902 = vmatpush.bf16.msrb.mxu0 %v15418_v57 }
 0x40f   : > { %v15927_v50 = vld [vmem:[#allocation10 + $0x1020] sm:$0xf0] }
 0x410   : > { %v18777_v51 = vld [vmem:[#allocation10 + $0x1204] sm:$0xf]  ;;  %v15930_v0 = vor.u32 %v18713_v47, %v15927_v50  ;;  %9915 = vmatpush.bf16.msrb.mxu1 %v15674_v63  ;;  %v9709_v8 = vpop.f32.mrf.mxu1 }
 0x411   : > { %v16183_v52 = vld [vmem:[#allocation10 + $0x1220] sm:$0xf0]  ;;  %9903 = vmatmul.bf16.vlgmr.msrb.gmra.mxu0 %v20991_v17 }
 0x412   : > { %v18897_v53 = vld [vmem:[#allocation10 + $0x15c4] sm:$0xf]  ;;  %v16186_v5 = vor.u32 %v18777_v51, %v16183_v52  ;;  %9928 = vmatpush.bf16.msrb.mxu2 %v15930_v0  ;;  %v9696_v0 = vpop.f32.mrf.mxu0 }
 0x413   : > { %v16663_v54 = vld [vmem:[#allocation10 + $0x15e0] sm:$0xf0]  ;;  %9916 = vmatmul.bf16.vlgmr.msrb.gmra.mxu1 %v20995_v22  ;;  %v9697_v7 = vadd.f32 %v9696_v0, %v9684_v20 }
 0x414   : > { %v18961_v55 = vld [vmem:[#allocation10 + $0x17c4] sm:$0xf]  ;;  %v16666_v6 = vor.u32 %v18897_v53, %v16663_v54  ;;  %9941 = vmatpush.bf16.msrb.mxu3 %v16186_v5 }
 0x415   : > { %v16919_v58 = vld [vmem:[#allocation10 + $0x17e0] sm:$0xf0]  ;;  %9929 = vmatmul.bf16.vlgmr.msrb.gmra.mxu2 %v21009_v16 }
 0x416   : > { %v19025_v59 = vld [vmem:[#allocation10 + $0x19c4] sm:$0xf]  ;;  %v16922_v9 = vor.u32 %v18961_v55, %v16919_v58  ;;  %9947 = vmatpush.bf16.msra.mxu0 %v16666_v6 }
 0x417   : > { %v17175_v31 = vld [vmem:[#allocation10 + $0x19e0] sm:$0xf0]  ;;  %9942 = vmatmul.bf16.vlgmr.msrb.gmra.mxu3 %v21013_v26 }
 0x418   : > { %v19089_v1 = vld [vmem:[#allocation10 + $0x1bc4] sm:$0xf]  ;;  %v17178_v13 = vor.u32 %v19025_v59, %v17175_v31  ;;  %9960 = vmatpush.bf16.msra.mxu1 %v16922_v9 }
 0x419   : > { %v17431_v2 = vld [vmem:[#allocation10 + $0x1be0] sm:$0xf0] }
 0x41a   : > { %v18889_v15 = vld [vmem:[#allocation10 + $0x1584] sm:$0xf]  ;;  %v17434_v28 = vor.u32 %v19089_v1, %v17431_v2  ;;  %9973 = vmatpush.bf16.msra.mxu2 %v17178_v13 }
 0x41b   : > { %v16631_v18 = vld [vmem:[#allocation10 + $0x15a0] sm:$0xf0] }
 0x41c   : > { %v18953_v23 = vld [vmem:[#allocation10 + $0x1784] sm:$0xf]  ;;  %v16634_v37 = vor.u32 %v18889_v15, %v16631_v18  ;;  %9986 = vmatpush.bf16.msra.mxu3 %v17434_v28 }
 0x41d   : > { %v16887_v29 = vld [vmem:[#allocation10 + $0x17a0] sm:$0xf0] }
 0x41e   : > { %v19017_v33 = vld [vmem:[#allocation10 + $0x1984] sm:$0xf]  ;;  %v16890_v11 = vor.u32 %v18953_v23, %v16887_v29  ;;  %9948 = vmatpush.bf16.msra.mxu0 %v16634_v37  ;;  %v9710_v29 = vadd.f32 %v9709_v8, %v9697_v7  ;;  %v9722_v37 = vpop.f32.mrf.mxu2 }
 0x41f   : > { %v17143_v34 = vld [vmem:[#allocation10 + $0x19a0] sm:$0xf0] }
 0x420   : > { %v19081_v27 = vld [vmem:[#allocation10 + $0x1b84] sm:$0xf]  ;;  %v17146_v38 = vor.u32 %v19017_v33, %v17143_v34  ;;  %9961 = vmatpush.bf16.msra.mxu1 %v16890_v11 }
 0x421   : > { %v17399_v36 = vld [vmem:[#allocation10 + $0x1ba0] sm:$0xf0] }
 0x422   : > { %v18881_v39 = vld [vmem:[#allocation10 + $0x1544] sm:$0xf]  ;;  %v17402_v42 = vor.u32 %v19081_v27, %v17399_v36  ;;  %9974 = vmatpush.bf16.msra.mxu2 %v17146_v38 }
 0x423   : > { %v16599_v40 = vld [vmem:[#allocation10 + $0x1560] sm:$0xf0] }
 0x424   : > { %v18945_v41 = vld [vmem:[#allocation10 + $0x1744] sm:$0xf]  ;;  %v16602_v49 = vor.u32 %v18881_v39, %v16599_v40  ;;  %9987 = vmatpush.bf16.msra.mxu3 %v17402_v42  ;;  %v9723_v40 = vadd.f32 %v9722_v37, %v9710_v29  ;;  %v18326_v29 = vld [vmem:[#allocation10 + $0x3e4] sm:$0xf0] }
 0x425   : > { %v16855_v43 = vld [vmem:[#allocation10 + $0x1760] sm:$0xf0] }
 0x426   : > { %v19009_v44 = vld [vmem:[#allocation10 + $0x1944] sm:$0xf]  ;;  %v16858_v50 = vor.u32 %v18945_v41, %v16855_v43  ;;  %9949 = vmatpush.bf16.msra.mxu0 %v16602_v49  ;;  %v9735_v41 = vpop.f32.mrf.mxu3 }
 0x427   : > { %v17111_v45 = vld [vmem:[#allocation10 + $0x1960] sm:$0xf0] }
 0x428   : > { %v19073_v46 = vld [vmem:[#allocation10 + $0x1b44] sm:$0xf]  ;;  %v17114_v51 = vor.u32 %v19009_v44, %v17111_v45  ;;  %9962 = vmatpush.bf16.msra.mxu1 %v16858_v50  ;;  %v21042_v45 = vadd.f32 %v9735_v41, %v9723_v40  ;;  %v18254_v40 = vld [vmem:[#allocation10 + $0x1a4] sm:$0xf0] }
 0x429   : > { %v17367_v47 = vld [vmem:[#allocation10 + $0x1b60] sm:$0xf0]  ;;  %v14333_v41 = vld [vmem:[#allocation10 + $0x388] sm:$0xf] }
 0x42a   : > { %v18873_v52 = vld [vmem:[#allocation10 + $0x1504] sm:$0xf]  ;;  %v17370_v55 = vor.u32 %v19073_v46, %v17367_v47  ;;  %9975 = vmatpush.bf16.msra.mxu2 %v17114_v51  ;;  %v9698_v46 = vpop.f32.mrf.mxu0  ;;  %v9711_v51 = vpop.f32.mrf.mxu1 }
 0x42b   : > { %v16567_v53 = vld [vmem:[#allocation10 + $0x1520] sm:$0xf0]  ;;  %v18382_v46 = vld [vmem:[#allocation10 + $0x5a4] sm:$0xf0] }
 0x42c   : > { %v18937_v54 = vld [vmem:[#allocation10 + $0x1704] sm:$0xf]  ;;  %v16570_v63 = vor.u32 %v18873_v52, %v16567_v53  ;;  %9988 = vmatpush.bf16.msra.mxu3 %v17370_v55  ;;  %v14045_v51 = vld [vmem:[#allocation10 + $0x148] sm:$0xf] }
 0x42d   : > { %v16823_v56 = vld [vmem:[#allocation10 + $0x1720] sm:$0xf0] }
 0x42e   : > { %v19001_v57 = vld [vmem:[#allocation10 + $0x1904] sm:$0xf]  ;;  %v16826_v1 = vor.u32 %v18937_v54, %v16823_v56  ;;  %9950 = vmatpush.bf16.msra.mxu0 %v16570_v63 }
 0x42f   : > { %v17079_v58 = vld [vmem:[#allocation10 + $0x1920] sm:$0xf0] }
 0x430   : > { %v19065_v59 = vld [vmem:[#allocation10 + $0x1b04] sm:$0xf]  ;;  %v17082_v2 = vor.u32 %v19001_v57, %v17079_v58  ;;  %9963 = vmatpush.bf16.msra.mxu1 %v16826_v1 }
 0x431   : > { %v17335_v31 = vld [vmem:[#allocation10 + $0x1b20] sm:$0xf0] }
 0x432   : > { %v18865_v4 = vld [vmem:[#allocation10 + $0x14c4] sm:$0xf]  ;;  %v17338_v9 = vor.u32 %v19065_v59, %v17335_v31  ;;  %9976 = vmatpush.bf16.msra.mxu2 %v17082_v2 }
 0x433   : > { %v16535_v5 = vld [vmem:[#allocation10 + $0x14e0] sm:$0xf0] }
 0x434   : > { %v18929_v6 = vld [vmem:[#allocation10 + $0x16c4] sm:$0xf]  ;;  %v16538_v33 = vor.u32 %v18865_v4, %v16535_v5  ;;  %9989 = vmatpush.bf16.msra.mxu3 %v17338_v9  ;;  %v9724_v5 = vpop.f32.mrf.mxu2 }
 0x435   : > { %v16791_v13 = vld [vmem:[#allocation10 + $0x16e0] sm:$0xf0] }
 0x436   : > { %v18993_v15 = vld [vmem:[#allocation10 + $0x18c4] sm:$0xf]  ;;  %v16794_v34 = vor.u32 %v18929_v6, %v16791_v13  ;;  %9951 = vmatpush.bf16.msra.mxu0 %v16538_v33  ;;  %v9737_v13 = vpop.f32.mrf.mxu3  ;;  %v14621_v33 = vld [vmem:[#allocation10 + $0x5c8] sm:$0xf] }
 0x437   : > { %v17047_v18 = vld [vmem:[#allocation10 + $0x18e0] sm:$0xf0]  ;;  %v14781_v13 = vld [vmem:[#allocation10 + $0x708] sm:$0xf] }
 0x438   : > { %v19057_v23 = vld [vmem:[#allocation10 + $0x1ac4] sm:$0xf]  ;;  %v17050_v35 = vor.u32 %v18993_v15, %v17047_v18  ;;  %9964 = vmatpush.bf16.msra.mxu1 %v16794_v34  ;;  %v14109_v15 = vld [vmem:[#allocation10 + $0x1c8] sm:$0xf] }
 0x439   : > { %v17303_v28 = vld [vmem:[#allocation10 + $0x1ae0] sm:$0xf0]  ;;  %v18262_v18 = vld [vmem:[#allocation10 + $0x1e4] sm:$0xf0] }
 0x43a   : > { %v18857_v27 = vld [vmem:[#allocation10 + $0x1484] sm:$0xf]  ;;  %v17306_v20 = vor.u32 %v19057_v23, %v17303_v28  ;;  %9977 = vmatpush.bf16.msra.mxu2 %v17050_v35  ;;  %v14365_v23 = vld [vmem:[#allocation10 + $0x3c8] sm:$0xf] }
 0x43b   : > { %v16503_v36 = vld [vmem:[#allocation10 + $0x14a0] sm:$0xf0]  ;;  %v18390_v34 = vld [vmem:[#allocation10 + $0x5e4] sm:$0xf0] }
 0x43c   : > { %v18921_v10 = vld [vmem:[#allocation10 + $0x1684] sm:$0xf]  ;;  %v16506_v44 = vor.u32 %v18857_v27, %v16503_v36  ;;  %9990 = vmatpush.bf16.msra.mxu3 %v17306_v20  ;;  %v14877_v36 = vld [vmem:[#allocation10 + $0x7c8] sm:$0xf]  ;;  %v14110_v20 = vor.u32 %v18262_v18, %v14109_v15 }
 0x43d   : > { %v16759_v11 = vld [vmem:[#allocation10 + $0x16a0] sm:$0xf0]  ;;  %v18430_v15 = vld [vmem:[#allocation10 + $0x724] sm:$0xf0] }
 0x43e   : > { %v18985_v38 = vld [vmem:[#allocation10 + $0x1884] sm:$0xf]  ;;  %v16762_v47 = vor.u32 %v18921_v10, %v16759_v11  ;;  %9952 = vmatpush.bf16.msra.mxu0 %v16506_v44  ;;  %v18454_v10 = vld [vmem:[#allocation10 + $0x7e4] sm:$0xf0]  ;;  %v14366_v11 = vor.u32 %v18326_v29, %v14365_v23 }
 0x43f   : > { %v17015_v39 = vld [vmem:[#allocation10 + $0x18a0] sm:$0xf0]  ;;  %v14589_v44 = vld [vmem:[#allocation10 + $0x588] sm:$0xf] }
 0x440   : > { %v19049_v42 = vld [vmem:[#allocation10 + $0x1a84] sm:$0xf]  ;;  %v17018_v48 = vor.u32 %v18985_v38, %v17015_v39  ;;  %9965 = vmatpush.bf16.msra.mxu1 %v16762_v47  ;;  %v14622_v38 = vor.u32 %v18390_v34, %v14621_v33  ;;  %v14077_v39 = vld [vmem:[#allocation10 + $0x188] sm:$0xf] }
 0x441   : > { %v17271_v43 = vld [vmem:[#allocation10 + $0x1aa0] sm:$0xf0]  ;;  %v14845_v47 = vld [vmem:[#allocation10 + $0x788] sm:$0xf] }
 0x442   : > { %v18849_v49 = vld [vmem:[#allocation10 + $0x1444] sm:$0xf]  ;;  %v17274_v52 = vor.u32 %v19049_v42, %v17271_v43  ;;  %9978 = vmatpush.bf16.msra.mxu2 %v17018_v48  ;;  %v14878_v42 = vor.u32 %v18454_v10, %v14877_v36  ;;  %v18318_v43 = vld [vmem:[#allocation10 + $0x3a4] sm:$0xf0]  ;;  %v14782_v36 = vor.u32 %v18430_v15, %v14781_v13 }
 0x443   : > { %v16471_v3 = vld [vmem:[#allocation10 + $0x1460] sm:$0xf0]  ;;  %v18446_v48 = vld [vmem:[#allocation10 + $0x7a4] sm:$0xf0] }
 0x444   : > { %v18913_v50 = vld [vmem:[#allocation10 + $0x1644] sm:$0xf]  ;;  %v16474_v58 = vor.u32 %v18849_v49, %v16471_v3  ;;  %9991 = vmatpush.bf16.msra.mxu3 %v17274_v52  ;;  %v14078_v49 = vor.u32 %v18254_v40, %v14077_v39  ;;  %v14334_v3 = vor.u32 %v18318_v43, %v14333_v41  ;;  %v18246_v52 = vld [vmem:[#allocation10 + $0x164] sm:$0xf0] }
 0x445   : > { %v16727_v53 = vld [vmem:[#allocation10 + $0x1660] sm:$0xf0]  ;;  %v13981_v34 = vld [vmem:[#allocation10 + $0xc8] sm:$0xf] }
 0x446   : > { %v18977_v54 = vld [vmem:[#allocation10 + $0x1844] sm:$0xf]  ;;  %v16730_v63 = vor.u32 %v18913_v50, %v16727_v53  ;;  %9953 = vmatpush.bf16.msra.mxu0 %v16474_v58  ;;  %v14590_v50 = vor.u32 %v18382_v46, %v14589_v44  ;;  %v14301_v53 = vld [vmem:[#allocation10 + $0x348] sm:$0xf] }
 0x447   : > { %v16983_v55 = vld [vmem:[#allocation10 + $0x1860] sm:$0xf0]  ;;  %v14813_v58 = vld [vmem:[#allocation10 + $0x748] sm:$0xf] }
 0x448   : > { %v19041_v56 = vld [vmem:[#allocation10 + $0x1a44] sm:$0xf]  ;;  %v16986_v0 = vor.u32 %v18977_v54, %v16983_v55  ;;  %9966 = vmatpush.bf16.msra.mxu1 %v16730_v63  ;;  %v14846_v54 = vor.u32 %v18446_v48, %v14845_v47  ;;  %v18310_v55 = vld [vmem:[#allocation10 + $0x364] sm:$0xf0]  ;;  %v9774_v47 = vpop.f32.mrf.mxu2 }
 0x449   : > { %v17239_v57 = vld [vmem:[#allocation10 + $0x1a60] sm:$0xf0]  ;;  %v14302_v63 = vor.u32 %v18310_v55, %v14301_v53  ;;  %v18422_v39 = vld [vmem:[#allocation10 + $0x6e4] sm:$0xf0] }
 0x44a   : > { %v18841_v59 = vld [vmem:[#allocation10 + $0x1404] sm:$0xf]  ;;  %v17242_v6 = vor.u32 %v19041_v56, %v17239_v57  ;;  %9979 = vmatpush.bf16.msra.mxu2 %v16986_v0  ;;  %v14557_v56 = vld [vmem:[#allocation10 + $0x548] sm:$0xf] }
 0x44b   : > { %v16439_v31 = vld [vmem:[#allocation10 + $0x1420] sm:$0xf0]  ;;  %v18374_v57 = vld [vmem:[#allocation10 + $0x564] sm:$0xf0] }
 0x44c   : > { %v18905_v1 = vld [vmem:[#allocation10 + $0x1604] sm:$0xf]  ;;  %v16442_v28 = vor.u32 %v18841_v59, %v16439_v31  ;;  %9992 = vmatpush.bf16.msra.mxu3 %v17242_v6  ;;  %v18438_v59 = vld [vmem:[#allocation10 + $0x764] sm:$0xf0]  ;;  %v14046_v31 = vor.u32 %v18246_v52, %v14045_v51  ;;  %v14558_v0 = vor.u32 %v18374_v57, %v14557_v56  ;;  %v9787_v51 = vpop.f32.mrf.mxu3 }
 0x44d   : > { %v16695_v2 = vld [vmem:[#allocation10 + $0x1620] sm:$0xf0]  ;;  %v14814_v5 = vor.u32 %v18438_v59, %v14813_v58  ;;  %v18302_v6 = vld [vmem:[#allocation10 + $0x324] sm:$0xf0] }
 0x44e   : > { %v18969_v4 = vld [vmem:[#allocation10 + $0x1804] sm:$0xf]  ;;  %v16698_v35 = vor.u32 %v18905_v1, %v16695_v2  ;;  %9954 = vmatpush.bf16.msra.mxu0 %v16442_v28  ;;  %v14013_v1 = vld [vmem:[#allocation10 + $0x108] sm:$0xf]  ;;  %v9761_v28 = vpop.f32.mrf.mxu1 }
 0x44f   : > { %v16951_v7 = vld [vmem:[#allocation10 + $0x1820] sm:$0xf0]  ;;  %v18238_v2 = vld [vmem:[#allocation10 + $0x124] sm:$0xf0] }
 0x450   : > { %v19033_v8 = vld [vmem:[#allocation10 + $0x1a04] sm:$0xf]  ;;  %v16954_v27 = vor.u32 %v18969_v4, %v16951_v7  ;;  %9967 = vmatpush.bf16.msra.mxu1 %v16698_v35  ;;  %v14269_v4 = vld [vmem:[#allocation10 + $0x308] sm:$0xf]  ;;  %v14014_v23 = vor.u32 %v18238_v2, %v14013_v1 }
 0x451   : > { %v17207_v9 = vld [vmem:[#allocation10 + $0x1a20] sm:$0xf0]  ;;  %9955 = vmatmul.bf16.vlgmr.msra.gmra.mxu0 %v21011_v25  ;;  %v14525_v7 = vld [vmem:[#allocation10 + $0x508] sm:$0xf]  ;;  %v14270_v29 = vor.u32 %v18302_v6, %v14269_v4 }
 0x452   : > { %v17210_v37 = vor.u32 %v19033_v8, %v17207_v9  ;;  %9980 = vmatpush.bf16.msra.mxu2 %v16954_v27  ;;  %9999 = vmatpush.bf16.msrb.mxu0 %v14110_v20  ;;  %v18366_v8 = vld [vmem:[#allocation10 + $0x524] sm:$0xf0]  ;;  %v9748_v9 = vpop.f32.mrf.mxu0 }
 0x453   : > { %9968 = vmatmul.bf16.vlgmr.msra.gmra.mxu1 %v21015_v30  ;;  %v9749_v18 = vadd.f32 %v9748_v9, %v21042_v45  ;;  %v14526_v33 = vor.u32 %v18366_v8, %v14525_v7  ;;  %v18230_v35 = vld [vmem:[#allocation10 + $0xe4] sm:$0xf0] }
 0x454   : > { %9993 = vmatpush.bf16.msra.mxu3 %v17210_v37  ;;  %10012 = vmatpush.bf16.msrb.mxu1 %v14366_v11  ;;  %v14237_v27 = vld [vmem:[#allocation10 + $0x2c8] sm:$0xf]  ;;  %v13982_v40 = vor.u32 %v18230_v35, %v13981_v34 }
 0x455   : > { %9981 = vmatmul.bf16.vlgmr.msra.gmra.mxu2 %v21023_v19  ;;  %v9762_v10 = vadd.f32 %v9761_v28, %v9749_v18  ;;  %v18294_v37 = vld [vmem:[#allocation10 + $0x2e4] sm:$0xf0] }
 0x456   : > { %10025 = vmatpush.bf16.msrb.mxu2 %v14622_v38  ;;  %10000 = vmatpush.bf16.msrb.mxu0 %v14078_v49  ;;  %v14493_v20 = vld [vmem:[#allocation10 + $0x4c8] sm:$0xf]  ;;  %v14238_v45 = vor.u32 %v18294_v37, %v14237_v27  ;;  %v9763_v56 = vpop.f32.mrf.mxu1 }
 0x457   : > { %9994 = vmatmul.bf16.vlgmr.msra.gmra.mxu3 %v21025_v32  ;;  %v18358_v11 = vld [vmem:[#allocation10 + $0x4e4] sm:$0xf0] }
 0x458   : > { %10038 = vmatpush.bf16.msrb.mxu3 %v14878_v42  ;;  %10013 = vmatpush.bf16.msrb.mxu1 %v14334_v3  ;;  %v14749_v38 = vld [vmem:[#allocation10 + $0x6c8] sm:$0xf]  ;;  %v14494_v41 = vor.u32 %v18358_v11, %v14493_v20  ;;  %v9789_v11 = vpop.f32.mrf.mxu3 }
 0x459   : > { %v13949_v42 = vld [vmem:[#allocation10 + $0x88] sm:$0xf]  ;;  %v14750_v46 = vor.u32 %v18422_v39, %v14749_v38 }
 0x45a   : > { %10026 = vmatpush.bf16.msrb.mxu2 %v14590_v50  ;;  %10001 = vmatpush.bf16.msrb.mxu0 %v14046_v31  ;;  %v18222_v43 = vld [vmem:[#allocation10 + $0xa4] sm:$0xf0]  ;;  %v9775_v50 = vadd.f32 %v9774_v47, %v9762_v10 }
 0x45b   : > { %v14205_v44 = vld [vmem:[#allocation10 + $0x288] sm:$0xf]  ;;  %v13950_v55 = vor.u32 %v18222_v43, %v13949_v42 }
 0x45c   : > { %10039 = vmatpush.bf16.msrb.mxu3 %v14846_v54  ;;  %10014 = vmatpush.bf16.msrb.mxu1 %v14302_v63  ;;  %v18286_v48 = vld [vmem:[#allocation10 + $0x2a4] sm:$0xf0]  ;;  %v9750_v54 = vpop.f32.mrf.mxu0  ;;  %v21049_v57 = vadd.f32 %v9787_v51, %v9775_v50 }
 0x45d   : > { %v14461_v49 = vld [vmem:[#allocation10 + $0x488] sm:$0xf]  ;;  %v14206_v58 = vor.u32 %v18286_v48, %v14205_v44 }
 0x45e   : > { %10027 = vmatpush.bf16.msrb.mxu2 %v14558_v0  ;;  %10002 = vmatpush.bf16.msrb.mxu0 %v14014_v23  ;;  %v18350_v3 = vld [vmem:[#allocation10 + $0x4a4] sm:$0xf0] }
 0x45f   : > { %v14717_v52 = vld [vmem:[#allocation10 + $0x688] sm:$0xf]  ;;  %v14462_v59 = vor.u32 %v18350_v3, %v14461_v49 }
 0x460   : > { %10040 = vmatpush.bf16.msrb.mxu3 %v14814_v5  ;;  %10015 = vmatpush.bf16.msrb.mxu1 %v14270_v29  ;;  %v18414_v53 = vld [vmem:[#allocation10 + $0x6a4] sm:$0xf0] }
 0x461   : > { %v13917_v31 = vld [vmem:[#allocation10 + $0x48] sm:$0xf]  ;;  %v14718_v1 = vor.u32 %v18414_v53, %v14717_v52 }
 0x462   : > { %10028 = vmatpush.bf16.msrb.mxu2 %v14526_v33  ;;  %10003 = vmatpush.bf16.msrb.mxu0 %v13982_v40  ;;  %v18214_v63 = vld [vmem:[#allocation10 + $0x64] sm:$0xf0] }
 0x463   : > { %v14173_v0 = vld [vmem:[#allocation10 + $0x248] sm:$0xf]  ;;  %v13918_v8 = vor.u32 %v18214_v63, %v13917_v31 }
 0x464   : > { %10041 = vmatpush.bf16.msrb.mxu3 %v14782_v36  ;;  %10016 = vmatpush.bf16.msrb.mxu1 %v14238_v45  ;;  %v18278_v2 = vld [vmem:[#allocation10 + $0x264] sm:$0xf0]  ;;  %v9776_v36 = vpop.f32.mrf.mxu2 }
 0x465   : > { %v14429_v4 = vld [vmem:[#allocation10 + $0x448] sm:$0xf]  ;;  %v14174_v15 = vor.u32 %v18278_v2, %v14173_v0  ;;  %v9800_v36 = vpop.f32.mrf.mxu0 }
 0x466   : > { %10029 = vmatpush.bf16.msrb.mxu2 %v14494_v41  ;;  %v18342_v5 = vld [vmem:[#allocation10 + $0x464] sm:$0xf0]  ;;  %10004 = vmatpush.bf16.msrb.mxu0 %v13950_v55 }
 0x467   : > { %v14685_v6 = vld [vmem:[#allocation10 + $0x648] sm:$0xf]  ;;  %v14430_v18 = vor.u32 %v18342_v5, %v14429_v4 }
 0x468   : > { %10042 = vmatpush.bf16.msrb.mxu3 %v14750_v46  ;;  %v18406_v7 = vld [vmem:[#allocation10 + $0x664] sm:$0xf0]  ;;  %10017 = vmatpush.bf16.msrb.mxu1 %v14206_v58 }
 0x469   : > { %v13885_v9 = vld [vmem:[#allocation10 + $0x8] sm:$0xf]  ;;  %v14686_v33 = vor.u32 %v18406_v7, %v14685_v6 }
 0x46a   : > { %v18206_v13 = vld [vmem:[#allocation10 + $0x24] sm:$0xf0]  ;;  %10030 = vmatpush.bf16.msrb.mxu2 %v14462_v59  ;;  %10005 = vmatpush.bf16.msrb.mxu0 %v13918_v8 }
 0x46b   : > { %v14141_v23 = vld [vmem:[#allocation10 + $0x208] sm:$0xf]  ;;  %v13886_v38 = vor.u32 %v18206_v13, %v13885_v9 }
 0x46c   : > { %v18270_v28 = vld [vmem:[#allocation10 + $0x224] sm:$0xf0]  ;;  %10043 = vmatpush.bf16.msrb.mxu3 %v14718_v1  ;;  %10018 = vmatpush.bf16.msrb.mxu1 %v14174_v15 }
 0x46d   : > { %v14397_v29 = vld [vmem:[#allocation10 + $0x408] sm:$0xf]  ;;  %v14142_v41 = vor.u32 %v18270_v28, %v14141_v23 }
 0x46e   : > { %v18334_v34 = vld [vmem:[#allocation10 + $0x424] sm:$0xf0]  ;;  %10031 = vmatpush.bf16.msrb.mxu2 %v14430_v18  ;;  %10006 = vmatpush.bf16.msrb.mxu0 %v13886_v38  ;;  %v9813_v38 = vpop.f32.mrf.mxu1 }
 0x46f   : > { %v14653_v35 = vld [vmem:[#allocation10 + $0x608] sm:$0xf]  ;;  %v14398_v42 = vor.u32 %v18334_v34, %v14397_v29 }
 0x470   : > { %v18398_v27 = vld [vmem:[#allocation10 + $0x624] sm:$0xf0]  ;;  %10044 = vmatpush.bf16.msrb.mxu3 %v14686_v33  ;;  %10019 = vmatpush.bf16.msrb.mxu1 %v14142_v41 }
 0x471   : > { %v15133_v10 = vld [vmem:[#allocation10 + $0x9c8] sm:$0xf]  ;;  %v14654_v46 = vor.u32 %v18398_v27, %v14653_v35  ;;  %10007 = vmatmul.bf16.vlgmr.msrb.gmra.mxu0 %v20977_v61 }
 0x472   : > { %v18518_v37 = vld [vmem:[#allocation10 + $0x9e4] sm:$0xf0]  ;;  %10032 = vmatpush.bf16.msrb.mxu2 %v14398_v42 }
 0x473   : > { %v15389_v20 = vld [vmem:[#allocation10 + $0xbc8] sm:$0xf]  ;;  %v15134_v47 = vor.u32 %v18518_v37, %v15133_v10  ;;  %10020 = vmatmul.bf16.vlgmr.msrb.gmra.mxu1 %v20982_v12 }
 0x474   : > { %v18582_v39 = vld [vmem:[#allocation10 + $0xbe4] sm:$0xf0]  ;;  %10045 = vmatpush.bf16.msrb.mxu3 %v14654_v46 }
 0x475   : > { %v15645_v40 = vld [vmem:[#allocation10 + $0xdc8] sm:$0xf]  ;;  %v15390_v48 = vor.u32 %v18582_v39, %v15389_v20  ;;  %10051 = vmatpush.bf16.msra.mxu0 %v15134_v47  ;;  %10033 = vmatmul.bf16.vlgmr.msrb.gmra.mxu2 %v20975_v60  ;;  %v9801_v20 = vadd.f32 %v9800_v36, %v21049_v57  ;;  %v5140_v57 = vperm.slane %v21035_v14, 1  ;;  %v9802_v14 = vpop.f32.mrf.mxu0 }
 0x476   : > { %v18646_v45 = vld [vmem:[#allocation10 + $0xde4] sm:$0xf0] }
 0x477   : > { %v15901_v43 = vld [vmem:[#allocation10 + $0xfc8] sm:$0xf]  ;;  %v15646_v49 = vor.u32 %v18646_v45, %v15645_v40  ;;  %10064 = vmatpush.bf16.msra.mxu1 %v15390_v48  ;;  %10046 = vmatmul.bf16.vlgmr.msrb.gmra.mxu3 %v20979_v62 }
 0x478   : > { %v18710_v44 = vld [vmem:[#allocation10 + $0xfe4] sm:$0xf0] }
 0x479   : > { %v15101_v3 = vld [vmem:[#allocation10 + $0x988] sm:$0xf]  ;;  %v15902_v52 = vor.u32 %v18710_v44, %v15901_v43  ;;  %10077 = vmatpush.bf16.msra.mxu2 %v15646_v49  ;;  %v21056_v44 = vadd.f32 %v9813_v38, %v9801_v20 }
 0x47a   : > { %v18510_v50 = vld [vmem:[#allocation10 + $0x9a4] sm:$0xf0] }
 0x47b   : > { %v15357_v51 = vld [vmem:[#allocation10 + $0xb88] sm:$0xf]  ;;  %v15102_v59 = vor.u32 %v18510_v50, %v15101_v3  ;;  %10090 = vmatpush.bf16.msra.mxu3 %v15902_v52 }
 0x47c   : > { %v18574_v53 = vld [vmem:[#allocation10 + $0xba4] sm:$0xf0] }
 0x47d   : > { %v15613_v54 = vld [vmem:[#allocation10 + $0xd88] sm:$0xf]  ;;  %v15358_v31 = vor.u32 %v18574_v53, %v15357_v51  ;;  %10052 = vmatpush.bf16.msra.mxu0 %v15102_v59 }
 0x47e   : > { %v18638_v55 = vld [vmem:[#allocation10 + $0xda4] sm:$0xf0] }
 0x47f   : > { %v15869_v56 = vld [vmem:[#allocation10 + $0xf88] sm:$0xf]  ;;  %v15614_v63 = vor.u32 %v18638_v55, %v15613_v54  ;;  %10065 = vmatpush.bf16.msra.mxu1 %v15358_v31 }
 0x480   : > { %v18702_v58 = vld [vmem:[#allocation10 + $0xfa4] sm:$0xf0] }
 0x481   : > { %v15069_v0 = vld [vmem:[#allocation10 + $0x948] sm:$0xf]  ;;  %v15870_v4 = vor.u32 %v18702_v58, %v15869_v56  ;;  %10078 = vmatpush.bf16.msra.mxu2 %v15614_v63  ;;  %v9826_v63 = vpop.f32.mrf.mxu2 }
 0x482   : > { %v18502_v1 = vld [vmem:[#allocation10 + $0x964] sm:$0xf0] }
 0x483   : > { %v15325_v2 = vld [vmem:[#allocation10 + $0xb48] sm:$0xf]  ;;  %v15070_v13 = vor.u32 %v18502_v1, %v15069_v0  ;;  %10091 = vmatpush.bf16.msra.mxu3 %v15870_v4  ;;  %v9839_v4 = vpop.f32.mrf.mxu3 }
 0x484   : > { %v18566_v5 = vld [vmem:[#allocation10 + $0xb64] sm:$0xf0] }
 0x485   : > { %v15581_v6 = vld [vmem:[#allocation10 + $0xd48] sm:$0xf]  ;;  %v15326_v15 = vor.u32 %v18566_v5, %v15325_v2  ;;  %10053 = vmatpush.bf16.msra.mxu0 %v15070_v13  ;;  %v9827_v2 = vadd.f32 %v9826_v63, %v5140_v57 }
 0x486   : > { %v18630_v7 = vld [vmem:[#allocation10 + $0xd64] sm:$0xf0] }
 0x487   : > { %v15837_v8 = vld [vmem:[#allocation10 + $0xf48] sm:$0xf]  ;;  %v15582_v18 = vor.u32 %v18630_v7, %v15581_v6  ;;  %10066 = vmatpush.bf16.msra.mxu1 %v15326_v15  ;;  %v9815_v6 = vpop.f32.mrf.mxu1 }
 0x488   : > { %v18694_v9 = vld [vmem:[#allocation10 + $0xf64] sm:$0xf0] }
 0x489   : > { %v15037_v23 = vld [vmem:[#allocation10 + $0x908] sm:$0xf]  ;;  %v15838_v33 = vor.u32 %v18694_v9, %v15837_v8  ;;  %10079 = vmatpush.bf16.msra.mxu2 %v15582_v18  ;;  %v21059_v18 = vadd.f32 %v9839_v4, %v9827_v2 }
 0x48a   : > { %v18494_v28 = vld [vmem:[#allocation10 + $0x924] sm:$0xf0] }
 0x48b   : > { %v15293_v29 = vld [vmem:[#allocation10 + $0xb08] sm:$0xf]  ;;  %v15038_v11 = vor.u32 %v18494_v28, %v15037_v23  ;;  %10092 = vmatpush.bf16.msra.mxu3 %v15838_v33 }
 0x48c   : > { %v18558_v34 = vld [vmem:[#allocation10 + $0xb24] sm:$0xf0] }
 0x48d   : > { %v15549_v35 = vld [vmem:[#allocation10 + $0xd08] sm:$0xf]  ;;  %v15294_v39 = vor.u32 %v18558_v34, %v15293_v29  ;;  %10054 = vmatpush.bf16.msra.mxu0 %v15038_v11 }
 0x48e   : > { %v18622_v27 = vld [vmem:[#allocation10 + $0xd24] sm:$0xf0] }
 0x48f   : > { %v15805_v10 = vld [vmem:[#allocation10 + $0xf08] sm:$0xf]  ;;  %v15550_v40 = vor.u32 %v18622_v27, %v15549_v35  ;;  %10067 = vmatpush.bf16.msra.mxu1 %v15294_v39 }
 0x490   : > { %v18686_v37 = vld [vmem:[#allocation10 + $0xf24] sm:$0xf0] }
 0x491   : > { %v15005_v45 = vld [vmem:[#allocation10 + $0x8c8] sm:$0xf]  ;;  %v15806_v43 = vor.u32 %v18686_v37, %v15805_v10  ;;  %10080 = vmatpush.bf16.msra.mxu2 %v15550_v40 }
 0x492   : > { %v18486_v41 = vld [vmem:[#allocation10 + $0x8e4] sm:$0xf0] }
 0x493   : > { %v15261_v42 = vld [vmem:[#allocation10 + $0xac8] sm:$0xf]  ;;  %v15006_v50 = vor.u32 %v18486_v41, %v15005_v45  ;;  %10093 = vmatpush.bf16.msra.mxu3 %v15806_v43  ;;  %v9828_v43 = vpop.f32.mrf.mxu2 }
 0x494   : > { %v18550_v46 = vld [vmem:[#allocation10 + $0xae4] sm:$0xf0] }
 0x495   : > { %v15517_v47 = vld [vmem:[#allocation10 + $0xcc8] sm:$0xf]  ;;  %v15262_v51 = vor.u32 %v18550_v46, %v15261_v42  ;;  %10055 = vmatpush.bf16.msra.mxu0 %v15006_v50 }
 0x496   : > { %v18614_v48 = vld [vmem:[#allocation10 + $0xce4] sm:$0xf0] }
 0x497   : > { %v15773_v49 = vld [vmem:[#allocation10 + $0xec8] sm:$0xf]  ;;  %v15518_v52 = vor.u32 %v18614_v48, %v15517_v47  ;;  %10068 = vmatpush.bf16.msra.mxu1 %v15262_v51 }
 0x498   : > { %v18678_v3 = vld [vmem:[#allocation10 + $0xee4] sm:$0xf0] }
 0x499   : > { %v14973_v53 = vld [vmem:[#allocation10 + $0x888] sm:$0xf]  ;;  %v15774_v56 = vor.u32 %v18678_v3, %v15773_v49  ;;  %10081 = vmatpush.bf16.msra.mxu2 %v15518_v52  ;;  %v9841_v49 = vpop.f32.mrf.mxu3 }
 0x49a   : > { %v18478_v54 = vld [vmem:[#allocation10 + $0x8a4] sm:$0xf0] }
 0x49b   : > { %v15229_v55 = vld [vmem:[#allocation10 + $0xa88] sm:$0xf]  ;;  %v14974_v5 = vor.u32 %v18478_v54, %v14973_v53  ;;  %10094 = vmatpush.bf16.msra.mxu3 %v15774_v56 }
 0x49c   : > { %v18542_v58 = vld [vmem:[#allocation10 + $0xaa4] sm:$0xf0] }
 0x49d   : > { %v15485_v59 = vld [vmem:[#allocation10 + $0xc88] sm:$0xf]  ;;  %v15230_v7 = vor.u32 %v18542_v58, %v15229_v55  ;;  %10056 = vmatpush.bf16.msra.mxu0 %v14974_v5 }
 0x49e   : > { %v18606_v31 = vld [vmem:[#allocation10 + $0xca4] sm:$0xf0] }
 0x49f   : > { %v15741_v0 = vld [vmem:[#allocation10 + $0xe88] sm:$0xf]  ;;  %v15486_v8 = vor.u32 %v18606_v31, %v15485_v59  ;;  %10069 = vmatpush.bf16.msra.mxu1 %v15230_v7 }
 0x4a0   : > { %v18670_v1 = vld [vmem:[#allocation10 + $0xea4] sm:$0xf0] }
 0x4a1   : > { %v14941_v9 = vld [vmem:[#allocation10 + $0x848] sm:$0xf]  ;;  %v15742_v23 = vor.u32 %v18670_v1, %v15741_v0  ;;  %10082 = vmatpush.bf16.msra.mxu2 %v15486_v8 }
 0x4a2   : > { %v18470_v13 = vld [vmem:[#allocation10 + $0x864] sm:$0xf0] }
 0x4a3   : > { %v15197_v15 = vld [vmem:[#allocation10 + $0xa48] sm:$0xf]  ;;  %v14942_v27 = vor.u32 %v18470_v13, %v14941_v9  ;;  %10095 = vmatpush.bf16.msra.mxu3 %v15742_v23 }
 0x4a4   : > { %v18534_v28 = vld [vmem:[#allocation10 + $0xa64] sm:$0xf0] }
 0x4a5   : > { %v15453_v29 = vld [vmem:[#allocation10 + $0xc48] sm:$0xf]  ;;  %v15198_v37 = vor.u32 %v18534_v28, %v15197_v15  ;;  %10057 = vmatpush.bf16.msra.mxu0 %v14942_v27 }
 0x4a6   : > { %v18598_v33 = vld [vmem:[#allocation10 + $0xc64] sm:$0xf0] }
 0x4a7   : > { %v15709_v34 = vld [vmem:[#allocation10 + $0xe48] sm:$0xf]  ;;  %v15454_v20 = vor.u32 %v18598_v33, %v15453_v29  ;;  %10070 = vmatpush.bf16.msra.mxu1 %v15198_v37 }
 0x4a8   : > { %v18662_v35 = vld [vmem:[#allocation10 + $0xe64] sm:$0xf0] }
 0x4a9   : > { %v14909_v36 = vld [vmem:[#allocation10 + $0x808] sm:$0xf]  ;;  %v15710_v40 = vor.u32 %v18662_v35, %v15709_v34  ;;  %10083 = vmatpush.bf16.msra.mxu2 %v15454_v20 }
 0x4aa   : > { %v18462_v10 = vld [vmem:[#allocation10 + $0x824] sm:$0xf0] }
 0x4ab   : > { %v15165_v11 = vld [vmem:[#allocation10 + $0xa08] sm:$0xf]  ;;  %v14910_v3 = vor.u32 %v18462_v10, %v14909_v36  ;;  %10096 = vmatpush.bf16.msra.mxu3 %v15710_v40 }
 0x4ac   : > { %v18526_v38 = vld [vmem:[#allocation10 + $0xa24] sm:$0xf0] }
 0x4ad   : > { %v15421_v39 = vld [vmem:[#allocation10 + $0xc08] sm:$0xf]  ;;  %v15166_v52 = vor.u32 %v18526_v38, %v15165_v11  ;;  %10058 = vmatpush.bf16.msra.mxu0 %v14910_v3 }
 0x4ae   : > { %v18590_v45 = vld [vmem:[#allocation10 + $0xc24] sm:$0xf0] }
 0x4af   : > { %v15677_v41 = vld [vmem:[#allocation10 + $0xe08] sm:$0xf]  ;;  %v15422_v53 = vor.u32 %v18590_v45, %v15421_v39  ;;  %10071 = vmatpush.bf16.msra.mxu1 %v15166_v52 }
 0x4b0   : > { %v18654_v42 = vld [vmem:[#allocation10 + $0xe24] sm:$0xf0]  ;;  %10059 = vmatmul.bf16.vlgmr.msra.gmra.mxu0 %v20993_v21 }
 0x4b1   : > { %v16157_v46 = vld [vmem:[#allocation10 + $0x11c8] sm:$0xf]  ;;  %v15678_v56 = vor.u32 %v18654_v42, %v15677_v41  ;;  %10084 = vmatpush.bf16.msra.mxu2 %v15422_v53  ;;  %v9865_v53 = vpop.f32.mrf.mxu1 }
 0x4b2   : > { %v18774_v47 = vld [vmem:[#allocation10 + $0x11e4] sm:$0xf0]  ;;  %10072 = vmatmul.bf16.vlgmr.msra.gmra.mxu1 %v20997_v24 }
 0x4b3   : > { %v16413_v48 = vld [vmem:[#allocation10 + $0x13c8] sm:$0xf]  ;;  %v16158_v58 = vor.u32 %v18774_v47, %v16157_v46  ;;  %10097 = vmatpush.bf16.msra.mxu3 %v15678_v56 }
 0x4b4   : > { %v18838_v57 = vld [vmem:[#allocation10 + $0x13e4] sm:$0xf0]  ;;  %10085 = vmatmul.bf16.vlgmr.msra.gmra.mxu2 %v20991_v17 }
 0x4b5   : > { %v16669_v50 = vld [vmem:[#allocation10 + $0x15c8] sm:$0xf]  ;;  %v16414_v59 = vor.u32 %v18838_v57, %v16413_v48  ;;  %10103 = vmatpush.bf16.msrb.mxu0 %v16158_v58  ;;  %v9852_v48 = vpop.f32.mrf.mxu0 }
 0x4b6   : > { %v18902_v51 = vld [vmem:[#allocation10 + $0x15e4] sm:$0xf0]  ;;  %10098 = vmatmul.bf16.vlgmr.msra.gmra.mxu3 %v20995_v22  ;;  %v9853_v52 = vadd.f32 %v9852_v48, %v21059_v18 }
 0x4b7   : > { %v16925_v54 = vld [vmem:[#allocation10 + $0x17c8] sm:$0xf]  ;;  %v16670_v31 = vor.u32 %v18902_v51, %v16669_v50  ;;  %10116 = vmatpush.bf16.msrb.mxu1 %v16414_v59 }
 0x4b8   : > { %v18966_v55 = vld [vmem:[#allocation10 + $0x17e4] sm:$0xf0] }
 0x4b9   : > { %v16125_v63 = vld [vmem:[#allocation10 + $0x1188] sm:$0xf]  ;;  %v16926_v2 = vor.u32 %v18966_v55, %v16925_v54  ;;  %10129 = vmatpush.bf16.msrb.mxu2 %v16670_v31 }
 0x4ba   : > { %v18766_v0 = vld [vmem:[#allocation10 + $0x11a4] sm:$0xf0] }
 0x4bb   : > { %v16381_v1 = vld [vmem:[#allocation10 + $0x1388] sm:$0xf]  ;;  %v16126_v8 = vor.u32 %v18766_v0, %v16125_v63  ;;  %10142 = vmatpush.bf16.msrb.mxu3 %v16926_v2  ;;  %v9866_v63 = vadd.f32 %v9865_v53, %v9853_v52 }
 0x4bc   : > { %v18830_v4 = vld [vmem:[#allocation10 + $0x13a4] sm:$0xf0] }
 0x4bd   : > { %v16637_v14 = vld [vmem:[#allocation10 + $0x1588] sm:$0xf]  ;;  %v16382_v9 = vor.u32 %v18830_v4, %v16381_v1  ;;  %10104 = vmatpush.bf16.msrb.mxu0 %v16126_v8 }
 0x4be   : > { %v18894_v5 = vld [vmem:[#allocation10 + $0x15a4] sm:$0xf0] }
 0x4bf   : > { %v16893_v6 = vld [vmem:[#allocation10 + $0x1788] sm:$0xf]  ;;  %v16638_v13 = vor.u32 %v18894_v5, %v16637_v14  ;;  %10117 = vmatpush.bf16.msrb.mxu1 %v16382_v9 }
 0x4c0   : > { %v18958_v7 = vld [vmem:[#allocation10 + $0x17a4] sm:$0xf0] }
 0x4c1   : > { %v16093_v15 = vld [vmem:[#allocation10 + $0x1148] sm:$0xf]  ;;  %v16894_v29 = vor.u32 %v18958_v7, %v16893_v6  ;;  %10130 = vmatpush.bf16.msrb.mxu2 %v16638_v13  ;;  %v9878_v6 = vpop.f32.mrf.mxu2 }
 0x4c2   : > { %v18758_v23 = vld [vmem:[#allocation10 + $0x1164] sm:$0xf0]  ;;  %v9879_v13 = vadd.f32 %v9878_v6, %v9866_v63 }
 0x4c3   : > { %v16349_v28 = vld [vmem:[#allocation10 + $0x1348] sm:$0xf]  ;;  %v16094_v10 = vor.u32 %v18758_v23, %v16093_v15  ;;  %10143 = vmatpush.bf16.msrb.mxu3 %v16894_v29  ;;  %v9891_v15 = vpop.f32.mrf.mxu3 }
 0x4c4   : > { %v18822_v33 = vld [vmem:[#allocation10 + $0x1364] sm:$0xf0] }
 0x4c5   : > { %v16605_v34 = vld [vmem:[#allocation10 + $0x1548] sm:$0xf]  ;;  %v16350_v37 = vor.u32 %v18822_v33, %v16349_v28  ;;  %10105 = vmatpush.bf16.msrb.mxu0 %v16094_v10  ;;  %v21066_v33 = vadd.f32 %v9891_v15, %v9879_v13 }
 0x4c6   : > { %v18886_v35 = vld [vmem:[#allocation10 + $0x1564] sm:$0xf0] }
 0x4c7   : > { %v16861_v27 = vld [vmem:[#allocation10 + $0x1748] sm:$0xf]  ;;  %v16606_v20 = vor.u32 %v18886_v35, %v16605_v34  ;;  %10118 = vmatpush.bf16.msrb.mxu1 %v16350_v37  ;;  %v9854_v34 = vpop.f32.mrf.mxu0 }
 0x4c8   : > { %v18950_v36 = vld [vmem:[#allocation10 + $0x1764] sm:$0xf0]  ;;  %v14079_v34 = vld [vmem:[#allocation10 + $0x1a8] sm:$0xf0] }
 0x4c9   : > { %v16061_v11 = vld [vmem:[#allocation10 + $0x1108] sm:$0xf]  ;;  %v16862_v40 = vor.u32 %v18950_v36, %v16861_v27  ;;  %10131 = vmatpush.bf16.msrb.mxu2 %v16606_v20  ;;  %v9867_v20 = vpop.f32.mrf.mxu1 }
 0x4ca   : > { %v18750_v38 = vld [vmem:[#allocation10 + $0x1124] sm:$0xf0] }
 0x4cb   : > { %v16317_v39 = vld [vmem:[#allocation10 + $0x1308] sm:$0xf]  ;;  %v16062_v47 = vor.u32 %v18750_v38, %v16061_v11  ;;  %10144 = vmatpush.bf16.msrb.mxu3 %v16862_v40 }
 0x4cc   : > { %v18814_v45 = vld [vmem:[#allocation10 + $0x1324] sm:$0xf0] }
 0x4cd   : > { %v16573_v41 = vld [vmem:[#allocation10 + $0x1508] sm:$0xf]  ;;  %v16318_v49 = vor.u32 %v18814_v45, %v16317_v39  ;;  %10106 = vmatpush.bf16.msrb.mxu0 %v16062_v47 }
 0x4ce   : > { %v18878_v42 = vld [vmem:[#allocation10 + $0x1524] sm:$0xf0] }
 0x4cf   : > { %v16829_v43 = vld [vmem:[#allocation10 + $0x1708] sm:$0xf]  ;;  %v16574_v3 = vor.u32 %v18878_v42, %v16573_v41  ;;  %10119 = vmatpush.bf16.msrb.mxu1 %v16318_v49 }
 0x4d0   : > { %v18942_v46 = vld [vmem:[#allocation10 + $0x1724] sm:$0xf0] }
 0x4d1   : > { %v16029_v57 = vld [vmem:[#allocation10 + $0x10c8] sm:$0xf]  ;;  %v16830_v54 = vor.u32 %v18942_v46, %v16829_v43  ;;  %10132 = vmatpush.bf16.msrb.mxu2 %v16574_v3 }
 0x4d2   : > { %v18742_v50 = vld [vmem:[#allocation10 + $0x10e4] sm:$0xf0] }
 0x4d3   : > { %v16285_v51 = vld [vmem:[#allocation10 + $0x12c8] sm:$0xf]  ;;  %v16030_v0 = vor.u32 %v18742_v50, %v16029_v57  ;;  %10145 = vmatpush.bf16.msrb.mxu3 %v16830_v54  ;;  %v9880_v50 = vpop.f32.mrf.mxu2 }
 0x4d4   : > { %v18806_v55 = vld [vmem:[#allocation10 + $0x12e4] sm:$0xf0] }
 0x4d5   : > { %v16541_v56 = vld [vmem:[#allocation10 + $0x14c8] sm:$0xf]  ;;  %v16286_v1 = vor.u32 %v18806_v55, %v16285_v51  ;;  %10107 = vmatpush.bf16.msrb.mxu0 %v16030_v0  ;;  %v9893_v55 = vpop.f32.mrf.mxu3  ;;  %v18258_v0 = vld [vmem:[#allocation10 + $0x1cc] sm:$0xf] }
 0x4d6   : > { %v18870_v58 = vld [vmem:[#allocation10 + $0x14e4] sm:$0xf0]  ;;  %v18298_v55 = vld [vmem:[#allocation10 + $0x30c] sm:$0xf] }
 0x4d7   : > { %v16797_v59 = vld [vmem:[#allocation10 + $0x16c8] sm:$0xf]  ;;  %v16542_v2 = vor.u32 %v18870_v58, %v16541_v56  ;;  %10120 = vmatpush.bf16.msrb.mxu1 %v16286_v1  ;;  %v14111_v1 = vld [vmem:[#allocation10 + $0x1e8] sm:$0xf0] }
 0x4d8   : > { %v18934_v31 = vld [vmem:[#allocation10 + $0x16e4] sm:$0xf0] }
 0x4d9   : > { %v15997_v4 = vld [vmem:[#allocation10 + $0x1088] sm:$0xf]  ;;  %v16798_v18 = vor.u32 %v18934_v31, %v16797_v59  ;;  %10133 = vmatpush.bf16.msrb.mxu2 %v16542_v2 }
 0x4da   : > { %v18734_v14 = vld [vmem:[#allocation10 + $0x10a4] sm:$0xf0] }
 0x4db   : > { %v16253_v5 = vld [vmem:[#allocation10 + $0x1288] sm:$0xf]  ;;  %v15998_v29 = vor.u32 %v18734_v14, %v15997_v4  ;;  %10146 = vmatpush.bf16.msrb.mxu3 %v16798_v18  ;;  %v18322_v14 = vld [vmem:[#allocation10 + $0x3cc] sm:$0xf] }
 0x4dc   : > { %v18798_v7 = vld [vmem:[#allocation10 + $0x12a4] sm:$0xf0] }
 0x4dd   : > { %v16509_v8 = vld [vmem:[#allocation10 + $0x1488] sm:$0xf]  ;;  %v16254_v35 = vor.u32 %v18798_v7, %v16253_v5  ;;  %10108 = vmatpush.bf16.msrb.mxu0 %v15998_v29  ;;  %v14367_v5 = vld [vmem:[#allocation10 + $0x3e8] sm:$0xf0] }
 0x4de   : > { %v18862_v9 = vld [vmem:[#allocation10 + $0x14a4] sm:$0xf0]  ;;  %v18250_v29 = vld [vmem:[#allocation10 + $0x18c] sm:$0xf] }
 0x4df   : > { %v16765_v23 = vld [vmem:[#allocation10 + $0x1688] sm:$0xf]  ;;  %v16510_v27 = vor.u32 %v18862_v9, %v16509_v8  ;;  %10121 = vmatpush.bf16.msrb.mxu1 %v16254_v35  ;;  %v14114_v8 = vor.u32 %v18258_v0, %v14111_v1  ;;  %v18314_v35 = vld [vmem:[#allocation10 + $0x38c] sm:$0xf] }
 0x4e0   : > { %v18926_v28 = vld [vmem:[#allocation10 + $0x16a4] sm:$0xf0] }
 0x4e1   : > { %v15965_v36 = vld [vmem:[#allocation10 + $0x1048] sm:$0xf]  ;;  %v16766_v11 = vor.u32 %v18926_v28, %v16765_v23  ;;  %10134 = vmatpush.bf16.msrb.mxu2 %v16510_v27  ;;  %v14370_v23 = vor.u32 %v18322_v14, %v14367_v5  ;;  %v14335_v27 = vld [vmem:[#allocation10 + $0x3a8] sm:$0xf0] }
 0x4e2   : > { %v18726_v10 = vld [vmem:[#allocation10 + $0x1064] sm:$0xf0] }
 0x4e3   : > { %v16221_v37 = vld [vmem:[#allocation10 + $0x1248] sm:$0xf]  ;;  %v15966_v42 = vor.u32 %v18726_v10, %v15965_v36  ;;  %10147 = vmatpush.bf16.msrb.mxu3 %v16766_v11 }
 0x4e4   : > { %v18790_v38 = vld [vmem:[#allocation10 + $0x1264] sm:$0xf0] }
 0x4e5   : > { %v16477_v39 = vld [vmem:[#allocation10 + $0x1448] sm:$0xf]  ;;  %v16222_v47 = vor.u32 %v18790_v38, %v16221_v37  ;;  %10109 = vmatpush.bf16.msrb.mxu0 %v15966_v42  ;;  %v14082_v37 = vor.u32 %v18250_v29, %v14079_v34  ;;  %v18306_v42 = vld [vmem:[#allocation10 + $0x34c] sm:$0xf] }
 0x4e6   : > { %v18854_v40 = vld [vmem:[#allocation10 + $0x1464] sm:$0xf0] }
 0x4e7   : > { %v16733_v45 = vld [vmem:[#allocation10 + $0x1648] sm:$0xf]  ;;  %v16478_v48 = vor.u32 %v18854_v40, %v16477_v39  ;;  %10122 = vmatpush.bf16.msrb.mxu1 %v16222_v47  ;;  %v14338_v39 = vor.u32 %v18314_v35, %v14335_v27  ;;  %v9930_v35 = vpop.f32.mrf.mxu2 }
 0x4e8   : > { %v18918_v41 = vld [vmem:[#allocation10 + $0x1664] sm:$0xf0] }
 0x4e9   : > { %v15933_v43 = vld [vmem:[#allocation10 + $0x1008] sm:$0xf]  ;;  %v16734_v51 = vor.u32 %v18918_v41, %v16733_v45  ;;  %10135 = vmatpush.bf16.msrb.mxu2 %v16478_v48  ;;  %v18242_v45 = vld [vmem:[#allocation10 + $0x14c] sm:$0xf] }
 0x4ea   : > { %v18718_v46 = vld [vmem:[#allocation10 + $0x1024] sm:$0xf0]  ;;  %v14047_v41 = vld [vmem:[#allocation10 + $0x168] sm:$0xf0] }
 0x4eb   : > { %v16189_v49 = vld [vmem:[#allocation10 + $0x1208] sm:$0xf]  ;;  %v15934_v31 = vor.u32 %v18718_v46, %v15933_v43  ;;  %10148 = vmatpush.bf16.msrb.mxu3 %v16734_v51  ;;  %v14303_v43 = vld [vmem:[#allocation10 + $0x368] sm:$0xf0]  ;;  %v14050_v48 = vor.u32 %v18242_v45, %v14047_v41 }
 0x4ec   : > { %v18782_v3 = vld [vmem:[#allocation10 + $0x1224] sm:$0xf0]  ;;  %v14306_v50 = vor.u32 %v18306_v42, %v14303_v43 }
 0x4ed   : > { %v16445_v57 = vld [vmem:[#allocation10 + $0x1408] sm:$0xf]  ;;  %v16190_v2 = vor.u32 %v18782_v3, %v16189_v49  ;;  %10110 = vmatpush.bf16.msrb.mxu0 %v15934_v31  ;;  %v9917_v31 = vpop.f32.mrf.mxu1 }
 0x4ee   : > { %v18846_v52 = vld [vmem:[#allocation10 + $0x1424] sm:$0xf0] }
 0x4ef   : > { %v16701_v53 = vld [vmem:[#allocation10 + $0x1608] sm:$0xf]  ;;  %v16446_v4 = vor.u32 %v18846_v52, %v16445_v57  ;;  %10123 = vmatpush.bf16.msrb.mxu1 %v16190_v2  ;;  %v18234_v52 = vld [vmem:[#allocation10 + $0x10c] sm:$0xf] }
 0x4f0   : > { %v18910_v54 = vld [vmem:[#allocation10 + $0x1624] sm:$0xf0]  ;;  %10111 = vmatmul.bf16.vlgmr.msrb.gmra.mxu0 %v21009_v16 }
 0x4f1   : > { %v17181_v56 = vld [vmem:[#allocation10 + $0x19c8] sm:$0xf]  ;;  %v16702_v6 = vor.u32 %v18910_v54, %v16701_v53  ;;  %10136 = vmatpush.bf16.msrb.mxu2 %v16446_v4  ;;  %v14015_v53 = vld [vmem:[#allocation10 + $0x128] sm:$0xf0]  ;;  %v9904_v54 = vpop.f32.mrf.mxu0 }
 0x4f2   : > { %v19030_v58 = vld [vmem:[#allocation10 + $0x19e4] sm:$0xf0]  ;;  %10124 = vmatmul.bf16.vlgmr.msrb.gmra.mxu1 %v21013_v26  ;;  %v14018_v0 = vor.u32 %v18234_v52, %v14015_v53  ;;  %v14175_v52 = vld [vmem:[#allocation10 + $0x268] sm:$0xf0] }
 0x4f3   : > { %v17437_v59 = vld [vmem:[#allocation10 + $0x1bc8] sm:$0xf]  ;;  %v17182_v18 = vor.u32 %v19030_v58, %v17181_v56  ;;  %10149 = vmatpush.bf16.msrb.mxu3 %v16702_v6  ;;  %v14271_v56 = vld [vmem:[#allocation10 + $0x328] sm:$0xf0]  ;;  %v9905_v58 = vadd.f32 %v9904_v54, %v21066_v33 }
 0x4f4   : > { %v19094_v63 = vld [vmem:[#allocation10 + $0x1be4] sm:$0xf0]  ;;  %10137 = vmatmul.bf16.vlgmr.msrb.gmra.mxu2 %v21011_v25  ;;  %v14274_v14 = vor.u32 %v18298_v55, %v14271_v56 }
 0x4f5   : > { %v17438_v7 = vor.u32 %v19094_v63, %v17437_v59  ;;  %v17149_v9 = vld [vmem:[#allocation10 + $0x1988] sm:$0xf]  ;;  %10155 = vmatpush.bf16.msra.mxu0 %v17182_v18  ;;  %10181 = vmatpush.bf16.msra.mxu2 %v14114_v8  ;;  %v9918_v5 = vadd.f32 %v9917_v31, %v9905_v58  ;;  %v18226_v18 = vld [vmem:[#allocation10 + $0xcc] sm:$0xf]  ;;  %v9919_v45 = vpop.f32.mrf.mxu1 }
 0x4f6   : > { %v19022_v13 = vld [vmem:[#allocation10 + $0x19a4] sm:$0xf0]  ;;  %10150 = vmatmul.bf16.vlgmr.msrb.gmra.mxu3 %v21015_v30  ;;  %v18290_v8 = vld [vmem:[#allocation10 + $0x2cc] sm:$0xf] }
 0x4f7   : > { %v17405_v15 = vld [vmem:[#allocation10 + $0x1b88] sm:$0xf]  ;;  %v17150_v36 = vor.u32 %v19022_v13, %v17149_v9  ;;  %10168 = vmatpush.bf16.msra.mxu1 %v17438_v7  ;;  %10194 = vmatpush.bf16.msra.mxu3 %v14370_v23  ;;  %v13983_v7 = vld [vmem:[#allocation10 + $0xe8] sm:$0xf0] }
 0x4f8   : > { %v19086_v28 = vld [vmem:[#allocation10 + $0x1ba4] sm:$0xf0]  ;;  %v14239_v9 = vld [vmem:[#allocation10 + $0x2e8] sm:$0xf0] }
 0x4f9   : > { %v17406_v10 = vor.u32 %v19086_v28, %v17405_v15  ;;  %v17117_v20 = vld [vmem:[#allocation10 + $0x1948] sm:$0xf]  ;;  %10156 = vmatpush.bf16.msra.mxu0 %v17150_v36  ;;  %10182 = vmatpush.bf16.msra.mxu2 %v14082_v37  ;;  %v13986_v15 = vor.u32 %v18226_v18, %v13983_v7  ;;  %v14242_v34 = vor.u32 %v18290_v8, %v14239_v9  ;;  %v18218_v36 = vld [vmem:[#allocation10 + $0x8c] sm:$0xf] }
 0x4fa   : > { %v19014_v11 = vld [vmem:[#allocation10 + $0x1964] sm:$0xf0]  ;;  %v9931_v37 = vadd.f32 %v9930_v35, %v9918_v5  ;;  %v18386_v5 = vld [vmem:[#allocation10 + $0x5cc] sm:$0xf] }
 0x4fb   : > { %v17373_v38 = vld [vmem:[#allocation10 + $0x1b48] sm:$0xf]  ;;  %v17118_v46 = vor.u32 %v19014_v11, %v17117_v20  ;;  %10169 = vmatpush.bf16.msra.mxu1 %v17406_v10  ;;  %10195 = vmatpush.bf16.msra.mxu3 %v14338_v39  ;;  %v13951_v10 = vld [vmem:[#allocation10 + $0xa8] sm:$0xf0]  ;;  %v9943_v20 = vpop.f32.mrf.mxu3  ;;  %v9906_v39 = vpop.f32.mrf.mxu0 }
 0x4fc   : > { %v19078_v40 = vld [vmem:[#allocation10 + $0x1b64] sm:$0xf0]  ;;  %v18282_v11 = vld [vmem:[#allocation10 + $0x28c] sm:$0xf]  ;;  %v21073_v41 = vadd.f32 %v9943_v20, %v9931_v37  ;;  %v13954_v43 = vor.u32 %v18218_v36, %v13951_v10 }
 0x4fd   : > { %v17374_v47 = vor.u32 %v19078_v40, %v17373_v38  ;;  %v17085_v49 = vld [vmem:[#allocation10 + $0x1908] sm:$0xf]  ;;  %10157 = vmatpush.bf16.msra.mxu0 %v17118_v46  ;;  %10183 = vmatpush.bf16.msra.mxu2 %v14050_v48  ;;  %v14207_v38 = vld [vmem:[#allocation10 + $0x2a8] sm:$0xf0] }
 0x4fe   : > { %v19006_v3 = vld [vmem:[#allocation10 + $0x1924] sm:$0xf0]  ;;  %v18450_v18 = vld [vmem:[#allocation10 + $0x7cc] sm:$0xf] }
 0x4ff   : > { %v17341_v57 = vld [vmem:[#allocation10 + $0x1b08] sm:$0xf]  ;;  %v17086_v59 = vor.u32 %v19006_v3, %v17085_v49  ;;  %10170 = vmatpush.bf16.msra.mxu1 %v17374_v47  ;;  %10196 = vmatpush.bf16.msra.mxu3 %v14306_v50  ;;  %v14210_v49 = vor.u32 %v18282_v11, %v14207_v38  ;;  %v13919_v50 = vld [vmem:[#allocation10 + $0x68] sm:$0xf0] }
 0x500   : > { %v19070_v51 = vld [vmem:[#allocation10 + $0x1b24] sm:$0xf0]  ;;  %v14879_v9 = vld [vmem:[#allocation10 + $0x7e8] sm:$0xf0] }
 0x501   : > { %v17342_v63 = vor.u32 %v19070_v51, %v17341_v57  ;;  %v17053_v1 = vld [vmem:[#allocation10 + $0x18c8] sm:$0xf]  ;;  %10158 = vmatpush.bf16.msra.mxu0 %v17086_v59  ;;  %10184 = vmatpush.bf16.msra.mxu2 %v14018_v0  ;;  %v18210_v57 = vld [vmem:[#allocation10 + $0x4c] sm:$0xf] }
 0x502   : > { %v18998_v2 = vld [vmem:[#allocation10 + $0x18e4] sm:$0xf0]  ;;  %v18274_v51 = vld [vmem:[#allocation10 + $0x24c] sm:$0xf]  ;;  %v13922_v58 = vor.u32 %v18210_v57, %v13919_v50 }
 0x503   : > { %v17309_v4 = vld [vmem:[#allocation10 + $0x1ac8] sm:$0xf]  ;;  %v17054_v13 = vor.u32 %v18998_v2, %v17053_v1  ;;  %10171 = vmatpush.bf16.msra.mxu1 %v17342_v63  ;;  %10197 = vmatpush.bf16.msra.mxu3 %v14274_v14  ;;  %v18202_v63 = vld [vmem:[#allocation10 + $0xc] sm:$0xf]  ;;  %v14178_v0 = vor.u32 %v18274_v51, %v14175_v52  ;;  %v9932_v14 = vpop.f32.mrf.mxu2  ;;  %v9945_v7 = vpop.f32.mrf.mxu3 }
 0x504   : > { %v19062_v6 = vld [vmem:[#allocation10 + $0x1ae4] sm:$0xf0]  ;;  %v13887_v1 = vld [vmem:[#allocation10 + $0x28] sm:$0xf0]  ;;  %v9956_v14 = vpop.f32.mrf.mxu0 }
 0x505   : > { %v17310_v33 = vor.u32 %v19062_v6, %v17309_v4  ;;  %v17021_v23 = vld [vmem:[#allocation10 + $0x1888] sm:$0xf]  ;;  %10159 = vmatpush.bf16.msra.mxu0 %v17054_v13  ;;  %10185 = vmatpush.bf16.msra.mxu2 %v13986_v15  ;;  %v18266_v2 = vld [vmem:[#allocation10 + $0x20c] sm:$0xf] }
 0x506   : > { %v18990_v28 = vld [vmem:[#allocation10 + $0x18a4] sm:$0xf0]  ;;  %v14143_v4 = vld [vmem:[#allocation10 + $0x228] sm:$0xf0] }
 0x507   : > { %v17277_v29 = vld [vmem:[#allocation10 + $0x1a88] sm:$0xf]  ;;  %v17022_v40 = vor.u32 %v18990_v28, %v17021_v23  ;;  %10172 = vmatpush.bf16.msra.mxu1 %v17310_v33  ;;  %10198 = vmatpush.bf16.msra.mxu3 %v14242_v34  ;;  %v14623_v6 = vld [vmem:[#allocation10 + $0x5e8] sm:$0xf0]  ;;  %v13890_v23 = vor.u32 %v18202_v63, %v13887_v1  ;;  %v14146_v34 = vor.u32 %v18266_v2, %v14143_v4 }
 0x508   : > { %v19054_v27 = vld [vmem:[#allocation10 + $0x1aa4] sm:$0xf0]  ;;  %v18514_v13 = vld [vmem:[#allocation10 + $0x9cc] sm:$0xf]  ;;  %v14626_v35 = vor.u32 %v18386_v5, %v14623_v6 }
 0x509   : > { %v17278_v42 = vor.u32 %v19054_v27, %v17277_v29  ;;  %v16989_v46 = vld [vmem:[#allocation10 + $0x1848] sm:$0xf]  ;;  %10160 = vmatpush.bf16.msra.mxu0 %v17022_v40  ;;  %10186 = vmatpush.bf16.msra.mxu2 %v13954_v43  ;;  %v15135_v33 = vld [vmem:[#allocation10 + $0x9e8] sm:$0xf0]  ;;  %v14882_v27 = vor.u32 %v18450_v18, %v14879_v9  ;;  %v9957_v18 = vadd.f32 %v9956_v14, %v21073_v41 }
 0x50a   : > { %v18982_v47 = vld [vmem:[#allocation10 + $0x1864] sm:$0xf0]  ;;  %v18578_v28 = vld [vmem:[#allocation10 + $0xbcc] sm:$0xf]  ;;  %v15138_v36 = vor.u32 %v18514_v13, %v15135_v33 }
 0x50b   : > { %v17245_v48 = vld [vmem:[#allocation10 + $0x1a48] sm:$0xf]  ;;  %v16990_v53 = vor.u32 %v18982_v47, %v16989_v46  ;;  %10173 = vmatpush.bf16.msra.mxu1 %v17278_v42  ;;  %10199 = vmatpush.bf16.msra.mxu3 %v14210_v49  ;;  %v15391_v29 = vld [vmem:[#allocation10 + $0xbe8] sm:$0xf0] }
 0x50c   : > { %v19046_v3 = vld [vmem:[#allocation10 + $0x1a64] sm:$0xf0]  ;;  %v18378_v10 = vld [vmem:[#allocation10 + $0x58c] sm:$0xf]  ;;  %v15394_v11 = vor.u32 %v18578_v28, %v15391_v29 }
 0x50d   : > { %v16957_v54 = vld [vmem:[#allocation10 + $0x1808] sm:$0xf]  ;;  %v17246_v56 = vor.u32 %v19046_v3, %v17245_v48  ;;  %10161 = vmatpush.bf16.msra.mxu0 %v16990_v53  ;;  %10187 = vmatpush.bf16.msra.mxu2 %v13922_v58  ;;  %v14591_v37 = vld [vmem:[#allocation10 + $0x5a8] sm:$0xf0] }
 0x50e   : > { %v18974_v55 = vld [vmem:[#allocation10 + $0x1824] sm:$0xf0]  ;;  %v18442_v20 = vld [vmem:[#allocation10 + $0x78c] sm:$0xf]  ;;  %v14594_v43 = vor.u32 %v18378_v10, %v14591_v37 }
 0x50f   : > { %v17213_v59 = vld [vmem:[#allocation10 + $0x1a08] sm:$0xf]  ;;  %v16958_v8 = vor.u32 %v18974_v55, %v16957_v54  ;;  %10174 = vmatpush.bf16.msra.mxu1 %v17246_v56  ;;  %10200 = vmatpush.bf16.msra.mxu3 %v14178_v0  ;;  %v14847_v38 = vld [vmem:[#allocation10 + $0x7a8] sm:$0xf0] }
 0x510   : > { %v19038_v31 = vld [vmem:[#allocation10 + $0x1a24] sm:$0xf0]  ;;  %v18506_v39 = vld [vmem:[#allocation10 + $0x98c] sm:$0xf]  ;;  %v14850_v46 = vor.u32 %v18442_v20, %v14847_v38 }
 0x511   : > { %v17214_v15 = vor.u32 %v19038_v31, %v17213_v59  ;;  %10162 = vmatpush.bf16.msra.mxu0 %v16958_v8  ;;  %v15103_v40 = vld [vmem:[#allocation10 + $0x9a8] sm:$0xf0]  ;;  %10188 = vmatpush.bf16.msra.mxu2 %v13890_v23  ;;  %v9969_v8 = vpop.f32.mrf.mxu1 }
 0x512   : > { %v18570_v45 = vld [vmem:[#allocation10 + $0xb8c] sm:$0xf]  ;;  %v15106_v47 = vor.u32 %v18506_v39, %v15103_v40  ;;  %v9970_v29 = vadd.f32 %v9969_v8, %v9957_v18 }
 0x513   : > { %10175 = vmatpush.bf16.msra.mxu1 %v17214_v15  ;;  %v15359_v42 = vld [vmem:[#allocation10 + $0xba8] sm:$0xf0]  ;;  %10201 = vmatpush.bf16.msra.mxu3 %v14146_v34 }
 0x514   : > { %v18370_v48 = vld [vmem:[#allocation10 + $0x54c] sm:$0xf]  ;;  %10163 = vmatmul.bf16.vlgmr.msra.gmra.mxu0 %v21023_v19  ;;  %v15362_v57 = vor.u32 %v18570_v45, %v15359_v42  ;;  %10189 = vmatmul.bf16.vlgmr.msra.gmra.mxu2 %v20977_v61  ;;  %v9982_v45 = vpop.f32.mrf.mxu2 }
 0x515   : > { %10207 = vmatpush.bf16.msrb.mxu0 %v14626_v35  ;;  %10233 = vmatpush.bf16.msrb.mxu2 %v15138_v36  ;;  %v14559_v49 = vld [vmem:[#allocation10 + $0x568] sm:$0xf0] }
 0x516   : > { %v18434_v3 = vld [vmem:[#allocation10 + $0x74c] sm:$0xf]  ;;  %10176 = vmatmul.bf16.vlgmr.msra.gmra.mxu1 %v21025_v32  ;;  %v14562_v55 = vor.u32 %v18370_v48, %v14559_v49  ;;  %10202 = vmatmul.bf16.vlgmr.msra.gmra.mxu3 %v20982_v12  ;;  %v9995_v48 = vpop.f32.mrf.mxu3 }
 0x517   : > { %10220 = vmatpush.bf16.msrb.mxu1 %v14882_v27  ;;  %10246 = vmatpush.bf16.msrb.mxu3 %v15394_v11  ;;  %v14815_v50 = vld [vmem:[#allocation10 + $0x768] sm:$0xf0] }
 0x518   : > { %v18498_v51 = vld [vmem:[#allocation10 + $0x94c] sm:$0xf]  ;;  %v14818_v56 = vor.u32 %v18434_v3, %v14815_v50 }
 0x519   : > { %v15071_v52 = vld [vmem:[#allocation10 + $0x968] sm:$0xf0]  ;;  %10208 = vmatpush.bf16.msrb.mxu0 %v14594_v43  ;;  %10234 = vmatpush.bf16.msrb.mxu2 %v15106_v47  ;;  %v9983_v47 = vadd.f32 %v9982_v45, %v9970_v29 }
 0x51a   : > { %v18562_v53 = vld [vmem:[#allocation10 + $0xb4c] sm:$0xf]  ;;  %v15074_v58 = vor.u32 %v18498_v51, %v15071_v52  ;;  %v9971_v51 = vpop.f32.mrf.mxu1 }
 0x51b   : > { %v15327_v54 = vld [vmem:[#allocation10 + $0xb68] sm:$0xf0]  ;;  %10221 = vmatpush.bf16.msrb.mxu1 %v14850_v46  ;;  %10247 = vmatpush.bf16.msrb.mxu3 %v15362_v57  ;;  %v9958_v57 = vpop.f32.mrf.mxu0  ;;  %v21080_v52 = vadd.f32 %v9995_v48, %v9983_v47 }
 0x51c   : > { %v18362_v59 = vld [vmem:[#allocation10 + $0x50c] sm:$0xf]  ;;  %v15330_v0 = vor.u32 %v18562_v53, %v15327_v54 }
 0x51d   : > { %v14527_v31 = vld [vmem:[#allocation10 + $0x528] sm:$0xf0]  ;;  %10209 = vmatpush.bf16.msrb.mxu0 %v14562_v55  ;;  %10235 = vmatpush.bf16.msrb.mxu2 %v15074_v58 }
 0x51e   : > { %v18426_v63 = vld [vmem:[#allocation10 + $0x70c] sm:$0xf]  ;;  %v14530_v7 = vor.u32 %v18362_v59, %v14527_v31 }
 0x51f   : > { %v14783_v1 = vld [vmem:[#allocation10 + $0x728] sm:$0xf0]  ;;  %10222 = vmatpush.bf16.msrb.mxu1 %v14818_v56  ;;  %10248 = vmatpush.bf16.msrb.mxu3 %v15330_v0 }
 0x520   : > { %v18490_v2 = vld [vmem:[#allocation10 + $0x90c] sm:$0xf]  ;;  %v14786_v9 = vor.u32 %v18426_v63, %v14783_v1 }
 0x521   : > { %v15039_v4 = vld [vmem:[#allocation10 + $0x928] sm:$0xf0]  ;;  %10210 = vmatpush.bf16.msrb.mxu0 %v14530_v7 }
 0x522   : > { %v18554_v5 = vld [vmem:[#allocation10 + $0xb0c] sm:$0xf]  ;;  %v15042_v13 = vor.u32 %v18490_v2, %v15039_v4 }
 0x523   : > { %v15295_v6 = vld [vmem:[#allocation10 + $0xb28] sm:$0xf0]  ;;  %10223 = vmatpush.bf16.msrb.mxu1 %v14786_v9 }
 0x524   : > { %v18354_v33 = vld [vmem:[#allocation10 + $0x4cc] sm:$0xf]  ;;  %v15298_v28 = vor.u32 %v18554_v5, %v15295_v6  ;;  %10236 = vmatpush.bf16.msrb.mxu2 %v15042_v13 }
 0x525   : > { %v14495_v15 = vld [vmem:[#allocation10 + $0x4e8] sm:$0xf0] }
 0x526   : > { %v18418_v23 = vld [vmem:[#allocation10 + $0x6cc] sm:$0xf]  ;;  %v14498_v37 = vor.u32 %v18354_v33, %v14495_v15  ;;  %10249 = vmatpush.bf16.msrb.mxu3 %v15298_v28  ;;  %v9984_v28 = vpop.f32.mrf.mxu2 }
 0x527   : > { %v14751_v34 = vld [vmem:[#allocation10 + $0x6e8] sm:$0xf0] }
 0x528   : > { %v18482_v35 = vld [vmem:[#allocation10 + $0x8cc] sm:$0xf]  ;;  %v14754_v41 = vor.u32 %v18418_v23, %v14751_v34  ;;  %10211 = vmatpush.bf16.msrb.mxu0 %v14498_v37 }
 0x529   : > { %v15007_v27 = vld [vmem:[#allocation10 + $0x8e8] sm:$0xf0] }
 0x52a   : > { %v18546_v36 = vld [vmem:[#allocation10 + $0xacc] sm:$0xf]  ;;  %v15010_v20 = vor.u32 %v18482_v35, %v15007_v27  ;;  %10224 = vmatpush.bf16.msrb.mxu1 %v14754_v41  ;;  %v9997_v27 = vpop.f32.mrf.mxu3 }
 0x52b   : > { %v15263_v10 = vld [vmem:[#allocation10 + $0xae8] sm:$0xf0] }
 0x52c   : > { %v18346_v11 = vld [vmem:[#allocation10 + $0x48c] sm:$0xf]  ;;  %v15266_v40 = vor.u32 %v18546_v36, %v15263_v10  ;;  %10237 = vmatpush.bf16.msrb.mxu2 %v15010_v20 }
 0x52d   : > { %v14463_v38 = vld [vmem:[#allocation10 + $0x4a8] sm:$0xf0] }
 0x52e   : > { %v18410_v39 = vld [vmem:[#allocation10 + $0x68c] sm:$0xf]  ;;  %v14466_v50 = vor.u32 %v18346_v11, %v14463_v38  ;;  %10250 = vmatpush.bf16.msrb.mxu3 %v15266_v40 }
 0x52f   : > { %v14719_v42 = vld [vmem:[#allocation10 + $0x6a8] sm:$0xf0] }
 0x530   : > { %v18474_v43 = vld [vmem:[#allocation10 + $0x88c] sm:$0xf]  ;;  %v14722_v53 = vor.u32 %v18410_v39, %v14719_v42  ;;  %10212 = vmatpush.bf16.msrb.mxu0 %v14466_v50 }
 0x531   : > { %v14975_v46 = vld [vmem:[#allocation10 + $0x8a8] sm:$0xf0] }
 0x532   : > { %v18538_v49 = vld [vmem:[#allocation10 + $0xa8c] sm:$0xf]  ;;  %v14978_v54 = vor.u32 %v18474_v43, %v14975_v46  ;;  %10225 = vmatpush.bf16.msrb.mxu1 %v14722_v53 }
 0x533   : > { %v15231_v3 = vld [vmem:[#allocation10 + $0xaa8] sm:$0xf0] }
 0x534   : > { %v18338_v55 = vld [vmem:[#allocation10 + $0x44c] sm:$0xf]  ;;  %v15234_v59 = vor.u32 %v18538_v49, %v15231_v3  ;;  %10238 = vmatpush.bf16.msrb.mxu2 %v14978_v54 }
 0x535   : > { %v14431_v56 = vld [vmem:[#allocation10 + $0x468] sm:$0xf0] }
 0x536   : > { %v18402_v58 = vld [vmem:[#allocation10 + $0x64c] sm:$0xf]  ;;  %v14434_v4 = vor.u32 %v18338_v55, %v14431_v56  ;;  %10251 = vmatpush.bf16.msrb.mxu3 %v15234_v59 }
 0x537   : > { %v14687_v31 = vld [vmem:[#allocation10 + $0x668] sm:$0xf0] }
 0x538   : > { %v18466_v63 = vld [vmem:[#allocation10 + $0x84c] sm:$0xf]  ;;  %v14690_v6 = vor.u32 %v18402_v58, %v14687_v31  ;;  %10213 = vmatpush.bf16.msrb.mxu0 %v14434_v4 }
 0x539   : > { %v14943_v0 = vld [vmem:[#allocation10 + $0x868] sm:$0xf0] }
 0x53a   : > { %v18530_v1 = vld [vmem:[#allocation10 + $0xa4c] sm:$0xf]  ;;  %v14946_v18 = vor.u32 %v18466_v63, %v14943_v0  ;;  %10226 = vmatpush.bf16.msrb.mxu1 %v14690_v6 }
 0x53b   : > { %v15199_v2 = vld [vmem:[#allocation10 + $0xa68] sm:$0xf0] }
 0x53c   : > { %v18330_v14 = vld [vmem:[#allocation10 + $0x40c] sm:$0xf]  ;;  %v15202_v13 = vor.u32 %v18530_v1, %v15199_v2  ;;  %10239 = vmatpush.bf16.msrb.mxu2 %v14946_v18 }
 0x53d   : > { %v14399_v5 = vld [vmem:[#allocation10 + $0x428] sm:$0xf0] }
 0x53e   : > { %v18394_v7 = vld [vmem:[#allocation10 + $0x60c] sm:$0xf]  ;;  %v14402_v36 = vor.u32 %v18330_v14, %v14399_v5  ;;  %10252 = vmatpush.bf16.msrb.mxu3 %v15202_v13  ;;  %v21086_v13 = vld [vmem:[#allocation12] sm:$0xff] }
 0x53f   : > { %v14655_v8 = vld [vmem:[#allocation10 + $0x628] sm:$0xf0] }
 0x540   : > { %v18458_v9 = vld [vmem:[#allocation10 + $0x80c] sm:$0xf]  ;;  %v14658_v20 = vor.u32 %v18394_v7, %v14655_v8  ;;  %10214 = vmatpush.bf16.msrb.mxu0 %v14402_v36  ;;  %v10008_v36 = vpop.f32.mrf.mxu0 }
 0x541   : > { %v14911_v33 = vld [vmem:[#allocation10 + $0x828] sm:$0xf0] }
 0x542   : > { %v18522_v15 = vld [vmem:[#allocation10 + $0xa0c] sm:$0xf]  ;;  %v14914_v11 = vor.u32 %v18458_v9, %v14911_v33  ;;  %10227 = vmatpush.bf16.msrb.mxu1 %v14658_v20  ;;  %v5141_v33 = vperm.slane %v21086_v13, 2 }
 0x543   : > { %v15167_v23 = vld [vmem:[#allocation10 + $0xa28] sm:$0xf0]  ;;  %10215 = vmatmul.bf16.vlgmr.msrb.gmra.mxu0 %v20975_v60 }
 0x544   : > { %v18642_v29 = vld [vmem:[#allocation10 + $0xdcc] sm:$0xf]  ;;  %v15170_v40 = vor.u32 %v18522_v15, %v15167_v23  ;;  %10240 = vmatpush.bf16.msrb.mxu2 %v14914_v11 }
 0x545   : > { %v15647_v34 = vld [vmem:[#allocation10 + $0xde8] sm:$0xf0]  ;;  %10228 = vmatmul.bf16.vlgmr.msrb.gmra.mxu1 %v20979_v62 }
 0x546   : > { %v18706_v35 = vld [vmem:[#allocation10 + $0xfcc] sm:$0xf]  ;;  %v15650_v45 = vor.u32 %v18642_v29, %v15647_v34  ;;  %10253 = vmatpush.bf16.msrb.mxu3 %v15170_v40 }
 0x547   : > { %v15903_v10 = vld [vmem:[#allocation10 + $0xfe8] sm:$0xf0]  ;;  %10241 = vmatmul.bf16.vlgmr.msrb.gmra.mxu2 %v20993_v21 }
 0x548   : > { %v18770_v37 = vld [vmem:[#allocation10 + $0x11cc] sm:$0xf]  ;;  %v15906_v42 = vor.u32 %v18706_v35, %v15903_v10  ;;  %10259 = vmatpush.bf16.msra.mxu0 %v15650_v45 }
 0x549   : > { %v16159_v41 = vld [vmem:[#allocation10 + $0x11e8] sm:$0xf0]  ;;  %10254 = vmatmul.bf16.vlgmr.msrb.gmra.mxu3 %v20997_v24 }
 0x54a   : > { %v18834_v38 = vld [vmem:[#allocation10 + $0x13cc] sm:$0xf]  ;;  %v16162_v43 = vor.u32 %v18770_v37, %v16159_v41  ;;  %10272 = vmatpush.bf16.msra.mxu1 %v15906_v42 }
 0x54b   : > { %v16415_v39 = vld [vmem:[#allocation10 + $0x13e8] sm:$0xf0] }
 0x54c   : > { %v18634_v46 = vld [vmem:[#allocation10 + $0xd8c] sm:$0xf]  ;;  %v16418_v49 = vor.u32 %v18834_v38, %v16415_v39  ;;  %10285 = vmatpush.bf16.msra.mxu2 %v16162_v43  ;;  %v10009_v38 = vadd.f32 %v10008_v36, %v5141_v33  ;;  %v10021_v39 = vpop.f32.mrf.mxu1 }
 0x54d   : > { %v15615_v47 = vld [vmem:[#allocation10 + $0xda8] sm:$0xf0] }
 0x54e   : > { %v18698_v48 = vld [vmem:[#allocation10 + $0xf8c] sm:$0xf]  ;;  %v15618_v54 = vor.u32 %v18634_v46, %v15615_v47  ;;  %10298 = vmatpush.bf16.msra.mxu3 %v16418_v49 }
 0x54f   : > { %v15871_v3 = vld [vmem:[#allocation10 + $0xfa8] sm:$0xf0] }
 0x550   : > { %v18762_v57 = vld [vmem:[#allocation10 + $0x118c] sm:$0xf]  ;;  %v15874_v55 = vor.u32 %v18698_v48, %v15871_v3  ;;  %10260 = vmatpush.bf16.msra.mxu0 %v15618_v54  ;;  %v10022_v48 = vadd.f32 %v10021_v39, %v10009_v38  ;;  %v10034_v54 = vpop.f32.mrf.mxu2 }
 0x551   : > { %v16127_v50 = vld [vmem:[#allocation10 + $0x11a8] sm:$0xf0] }
 0x552   : > { %v18826_v51 = vld [vmem:[#allocation10 + $0x138c] sm:$0xf]  ;;  %v16130_v56 = vor.u32 %v18762_v57, %v16127_v50  ;;  %10273 = vmatpush.bf16.msra.mxu1 %v15874_v55 }
 0x553   : > { %v16383_v53 = vld [vmem:[#allocation10 + $0x13a8] sm:$0xf0] }
 0x554   : > { %v18626_v58 = vld [vmem:[#allocation10 + $0xd4c] sm:$0xf]  ;;  %v16386_v63 = vor.u32 %v18826_v51, %v16383_v53  ;;  %10286 = vmatpush.bf16.msra.mxu2 %v16130_v56 }
 0x555   : > { %v15583_v59 = vld [vmem:[#allocation10 + $0xd68] sm:$0xf0] }
 0x556   : > { %v18690_v31 = vld [vmem:[#allocation10 + $0xf4c] sm:$0xf]  ;;  %v15586_v5 = vor.u32 %v18626_v58, %v15583_v59  ;;  %10299 = vmatpush.bf16.msra.mxu3 %v16386_v63  ;;  %v10047_v63 = vpop.f32.mrf.mxu3 }
 0x557   : > { %v15839_v0 = vld [vmem:[#allocation10 + $0xf68] sm:$0xf0] }
 0x558   : > { %v18754_v1 = vld [vmem:[#allocation10 + $0x114c] sm:$0xf]  ;;  %v15842_v18 = vor.u32 %v18690_v31, %v15839_v0  ;;  %10261 = vmatpush.bf16.msra.mxu0 %v15586_v5  ;;  %v10035_v31 = vadd.f32 %v10034_v54, %v10022_v48  ;;  %v10036_v38 = vpop.f32.mrf.mxu2 }
 0x559   : > { %v16095_v2 = vld [vmem:[#allocation10 + $0x1168] sm:$0xf0] }
 0x55a   : > { %v18818_v4 = vld [vmem:[#allocation10 + $0x134c] sm:$0xf]  ;;  %v16098_v7 = vor.u32 %v18754_v1, %v16095_v2  ;;  %10274 = vmatpush.bf16.msra.mxu1 %v15842_v18 }
 0x55b   : > { %v16351_v14 = vld [vmem:[#allocation10 + $0x1368] sm:$0xf0] }
 0x55c   : > { %v18618_v6 = vld [vmem:[#allocation10 + $0xd0c] sm:$0xf]  ;;  %v16354_v15 = vor.u32 %v18818_v4, %v16351_v14  ;;  %10287 = vmatpush.bf16.msra.mxu2 %v16098_v7  ;;  %v21089_v4 = vadd.f32 %v10047_v63, %v10035_v31  ;;  %v10010_v14 = vpop.f32.mrf.mxu0 }
 0x55d   : > { %v15551_v8 = vld [vmem:[#allocation10 + $0xd28] sm:$0xf0] }
 0x55e   : > { %v18682_v9 = vld [vmem:[#allocation10 + $0xf0c] sm:$0xf]  ;;  %v15554_v27 = vor.u32 %v18618_v6, %v15551_v8  ;;  %10300 = vmatpush.bf16.msra.mxu3 %v16354_v15 }
 0x55f   : > { %v15807_v23 = vld [vmem:[#allocation10 + $0xf28] sm:$0xf0] }
 0x560   : > { %v18746_v28 = vld [vmem:[#allocation10 + $0x110c] sm:$0xf]  ;;  %v15810_v10 = vor.u32 %v18682_v9, %v15807_v23  ;;  %10262 = vmatpush.bf16.msra.mxu0 %v15554_v27  ;;  %v10023_v9 = vpop.f32.mrf.mxu1 }
 0x561   : > { %v16063_v29 = vld [vmem:[#allocation10 + $0x1128] sm:$0xf0] }
 0x562   : > { %v18810_v34 = vld [vmem:[#allocation10 + $0x130c] sm:$0xf]  ;;  %v16066_v37 = vor.u32 %v18746_v28, %v16063_v29  ;;  %10275 = vmatpush.bf16.msra.mxu1 %v15810_v10 }
 0x563   : > { %v16319_v35 = vld [vmem:[#allocation10 + $0x1328] sm:$0xf0] }
 0x564   : > { %v18610_v41 = vld [vmem:[#allocation10 + $0xccc] sm:$0xf]  ;;  %v16322_v40 = vor.u32 %v18810_v34, %v16319_v35  ;;  %10288 = vmatpush.bf16.msra.mxu2 %v16066_v37 }
 0x565   : > { %v15519_v20 = vld [vmem:[#allocation10 + $0xce8] sm:$0xf0] }
 0x566   : > { %v18674_v11 = vld [vmem:[#allocation10 + $0xecc] sm:$0xf]  ;;  %v15522_v49 = vor.u32 %v18610_v41, %v15519_v20  ;;  %10301 = vmatpush.bf16.msra.mxu3 %v16322_v40 }
 0x567   : > { %v15775_v45 = vld [vmem:[#allocation10 + $0xee8] sm:$0xf0] }
 0x568   : > { %v18738_v42 = vld [vmem:[#allocation10 + $0x10cc] sm:$0xf]  ;;  %v15778_v3 = vor.u32 %v18674_v11, %v15775_v45  ;;  %10263 = vmatpush.bf16.msra.mxu0 %v15522_v49 }
 0x569   : > { %v16031_v43 = vld [vmem:[#allocation10 + $0x10e8] sm:$0xf0] }
 0x56a   : > { %v18802_v46 = vld [vmem:[#allocation10 + $0x12cc] sm:$0xf]  ;;  %v16034_v57 = vor.u32 %v18738_v42, %v16031_v43  ;;  %10276 = vmatpush.bf16.msra.mxu1 %v15778_v3  ;;  %v10049_v43 = vpop.f32.mrf.mxu3 }
 0x56b   : > { %v16287_v47 = vld [vmem:[#allocation10 + $0x12e8] sm:$0xf0] }
 0x56c   : > { %v18602_v50 = vld [vmem:[#allocation10 + $0xc8c] sm:$0xf]  ;;  %v16290_v55 = vor.u32 %v18802_v46, %v16287_v47  ;;  %10289 = vmatpush.bf16.msra.mxu2 %v16034_v57 }
 0x56d   : > { %v15487_v51 = vld [vmem:[#allocation10 + $0xca8] sm:$0xf0] }
 0x56e   : > { %v18666_v53 = vld [vmem:[#allocation10 + $0xe8c] sm:$0xf]  ;;  %v15490_v2 = vor.u32 %v18602_v50, %v15487_v51  ;;  %10302 = vmatpush.bf16.msra.mxu3 %v16290_v55 }
 0x56f   : > { %v15743_v56 = vld [vmem:[#allocation10 + $0xea8] sm:$0xf0] }
 0x570   : > { %v18730_v58 = vld [vmem:[#allocation10 + $0x108c] sm:$0xf]  ;;  %v15746_v5 = vor.u32 %v18666_v53, %v15743_v56  ;;  %10264 = vmatpush.bf16.msra.mxu0 %v15490_v2 }
 0x571   : > { %v15999_v59 = vld [vmem:[#allocation10 + $0x10a8] sm:$0xf0] }
 0x572   : > { %v18794_v0 = vld [vmem:[#allocation10 + $0x128c] sm:$0xf]  ;;  %v16002_v6 = vor.u32 %v18730_v58, %v15999_v59  ;;  %10277 = vmatpush.bf16.msra.mxu1 %v15746_v5 }
 0x573   : > { %v16255_v1 = vld [vmem:[#allocation10 + $0x12a8] sm:$0xf0] }
 0x574   : > { %v18594_v18 = vld [vmem:[#allocation10 + $0xc4c] sm:$0xf]  ;;  %v16258_v33 = vor.u32 %v18794_v0, %v16255_v1  ;;  %10290 = vmatpush.bf16.msra.mxu2 %v16002_v6 }
 0x575   : > { %v15455_v7 = vld [vmem:[#allocation10 + $0xc68] sm:$0xf0] }
 0x576   : > { %v18658_v8 = vld [vmem:[#allocation10 + $0xe4c] sm:$0xf]  ;;  %v15458_v35 = vor.u32 %v18594_v18, %v15455_v7  ;;  %10303 = vmatpush.bf16.msra.mxu3 %v16258_v33 }
 0x577   : > { %v15711_v15 = vld [vmem:[#allocation10 + $0xe68] sm:$0xf0] }
 0x578   : > { %v18722_v23 = vld [vmem:[#allocation10 + $0x104c] sm:$0xf]  ;;  %v15714_v10 = vor.u32 %v18658_v8, %v15711_v15  ;;  %10265 = vmatpush.bf16.msra.mxu0 %v15458_v35 }
 0x579   : > { %v15967_v28 = vld [vmem:[#allocation10 + $0x1068] sm:$0xf0] }
 0x57a   : > { %v18786_v29 = vld [vmem:[#allocation10 + $0x124c] sm:$0xf]  ;;  %v15970_v37 = vor.u32 %v18722_v23, %v15967_v28  ;;  %10278 = vmatpush.bf16.msra.mxu1 %v15714_v10 }
 0x57b   : > { %v16223_v34 = vld [vmem:[#allocation10 + $0x1268] sm:$0xf0] }
 0x57c   : > { %v18586_v27 = vld [vmem:[#allocation10 + $0xc0c] sm:$0xf]  ;;  %v16226_v39 = vor.u32 %v18786_v29, %v16223_v34  ;;  %10291 = vmatpush.bf16.msra.mxu2 %v15970_v37 }
 0x57d   : > { %v15423_v36 = vld [vmem:[#allocation10 + $0xc28] sm:$0xf0] }
 0x57e   : > { %v18650_v41 = vld [vmem:[#allocation10 + $0xe0c] sm:$0xf]  ;;  %v15426_v49 = vor.u32 %v18586_v27, %v15423_v36  ;;  %10304 = vmatpush.bf16.msra.mxu3 %v16226_v39 }
 0x57f   : > { %v15679_v20 = vld [vmem:[#allocation10 + $0xe28] sm:$0xf0] }
 0x580   : > { %v18714_v11 = vld [vmem:[#allocation10 + $0x100c] sm:$0xf]  ;;  %v15682_v51 = vor.u32 %v18650_v41, %v15679_v20  ;;  %10266 = vmatpush.bf16.msra.mxu0 %v15426_v49  ;;  %v10060_v49 = vpop.f32.mrf.mxu0 }
 0x581   : > { %v15935_v40 = vld [vmem:[#allocation10 + $0x1028] sm:$0xf0] }
 0x582   : > { %v18778_v45 = vld [vmem:[#allocation10 + $0x120c] sm:$0xf]  ;;  %v15938_v53 = vor.u32 %v18714_v11, %v15935_v40  ;;  %10279 = vmatpush.bf16.msra.mxu1 %v15682_v51 }
 0x583   : > { %v16191_v42 = vld [vmem:[#allocation10 + $0x1228] sm:$0xf0]  ;;  %10267 = vmatmul.bf16.vlgmr.msra.gmra.mxu0 %v20991_v17 }
 0x584   : > { %v18898_v46 = vld [vmem:[#allocation10 + $0x15cc] sm:$0xf]  ;;  %v16194_v56 = vor.u32 %v18778_v45, %v16191_v42  ;;  %10292 = vmatpush.bf16.msra.mxu2 %v15938_v53 }
 0x585   : > { %v16671_v47 = vld [vmem:[#allocation10 + $0x15e8] sm:$0xf0]  ;;  %10280 = vmatmul.bf16.vlgmr.msra.gmra.mxu1 %v20995_v22 }
 0x586   : > { %v18962_v48 = vld [vmem:[#allocation10 + $0x17cc] sm:$0xf]  ;;  %v16674_v58 = vor.u32 %v18898_v46, %v16671_v47  ;;  %10305 = vmatpush.bf16.msra.mxu3 %v16194_v56 }
 0x587   : > { %v16927_v3 = vld [vmem:[#allocation10 + $0x17e8] sm:$0xf0]  ;;  %10293 = vmatmul.bf16.vlgmr.msra.gmra.mxu2 %v21009_v16 }
 0x588   : > { %v19026_v57 = vld [vmem:[#allocation10 + $0x19cc] sm:$0xf]  ;;  %v16930_v59 = vor.u32 %v18962_v48, %v16927_v3  ;;  %10311 = vmatpush.bf16.msrb.mxu0 %v16674_v58 }
 0x589   : > { %v17183_v50 = vld [vmem:[#allocation10 + $0x19e8] sm:$0xf0]  ;;  %10306 = vmatmul.bf16.vlgmr.msra.gmra.mxu3 %v21013_v26 }
 0x58a   : > { %v19090_v54 = vld [vmem:[#allocation10 + $0x1bcc] sm:$0xf]  ;;  %v17186_v31 = vor.u32 %v19026_v57, %v17183_v50  ;;  %10324 = vmatpush.bf16.msrb.mxu1 %v16930_v59 }
 0x58b   : > { %v17439_v55 = vld [vmem:[#allocation10 + $0x1be8] sm:$0xf0] }
 0x58c   : > { %v18890_v63 = vld [vmem:[#allocation10 + $0x158c] sm:$0xf]  ;;  %v17442_v2 = vor.u32 %v19090_v54, %v17439_v55  ;;  %10337 = vmatpush.bf16.msrb.mxu2 %v17186_v31  ;;  %v10061_v54 = vadd.f32 %v10060_v49, %v21089_v4  ;;  %v10073_v55 = vpop.f32.mrf.mxu1 }
 0x58d   : > { %v16639_v0 = vld [vmem:[#allocation10 + $0x15a8] sm:$0xf0] }
 0x58e   : > { %v18954_v1 = vld [vmem:[#allocation10 + $0x178c] sm:$0xf]  ;;  %v16642_v8 = vor.u32 %v18890_v63, %v16639_v0  ;;  %10350 = vmatpush.bf16.msrb.mxu3 %v17442_v2 }
 0x58f   : > { %v16895_v14 = vld [vmem:[#allocation10 + $0x17a8] sm:$0xf0] }
 0x590   : > { %v19018_v5 = vld [vmem:[#allocation10 + $0x198c] sm:$0xf]  ;;  %v16898_v9 = vor.u32 %v18954_v1, %v16895_v14  ;;  %10312 = vmatpush.bf16.msrb.mxu0 %v16642_v8  ;;  %v10074_v1 = vadd.f32 %v10073_v55, %v10061_v54  ;;  %v10086_v8 = vpop.f32.mrf.mxu2 }
 0x591   : > { %v17151_v6 = vld [vmem:[#allocation10 + $0x19a8] sm:$0xf0] }
 0x592   : > { %v19082_v18 = vld [vmem:[#allocation10 + $0x1b8c] sm:$0xf]  ;;  %v17154_v33 = vor.u32 %v19018_v5, %v17151_v6  ;;  %10325 = vmatpush.bf16.msrb.mxu1 %v16898_v9 }
 0x593   : > { %v17407_v7 = vld [vmem:[#allocation10 + $0x1ba8] sm:$0xf0] }
 0x594   : > { %v18882_v15 = vld [vmem:[#allocation10 + $0x154c] sm:$0xf]  ;;  %v17410_v29 = vor.u32 %v19082_v18, %v17407_v7  ;;  %10338 = vmatpush.bf16.msrb.mxu2 %v17154_v33 }
 0x595   : > { %v16607_v23 = vld [vmem:[#allocation10 + $0x1568] sm:$0xf0] }
 0x596   : > { %v18946_v28 = vld [vmem:[#allocation10 + $0x174c] sm:$0xf]  ;;  %v16610_v37 = vor.u32 %v18882_v15, %v16607_v23  ;;  %10351 = vmatpush.bf16.msrb.mxu3 %v17410_v29  ;;  %v10087_v23 = vadd.f32 %v10086_v8, %v10074_v1  ;;  %v14373_v1 = vld [vmem:[#allocation10 + $0x3d0] sm:$0xf] }
 0x597   : > { %v16863_v34 = vld [vmem:[#allocation10 + $0x1768] sm:$0xf0]  ;;  %v14885_v8 = vld [vmem:[#allocation10 + $0x7d0] sm:$0xf] }
 0x598   : > { %v19010_v35 = vld [vmem:[#allocation10 + $0x194c] sm:$0xf]  ;;  %v16866_v41 = vor.u32 %v18946_v28, %v16863_v34  ;;  %10313 = vmatpush.bf16.msrb.mxu0 %v16610_v37  ;;  %v10099_v28 = vpop.f32.mrf.mxu3  ;;  %v10088_v54 = vpop.f32.mrf.mxu2 }
 0x599   : > { %v17119_v27 = vld [vmem:[#allocation10 + $0x1968] sm:$0xf0]  ;;  %v18239_v54 = vld [vmem:[#allocation10 + $0x12c] sm:$0xf0] }
 0x59a   : > { %v19074_v36 = vld [vmem:[#allocation10 + $0x1b4c] sm:$0xf]  ;;  %v17122_v20 = vor.u32 %v19010_v35, %v17119_v27  ;;  %10326 = vmatpush.bf16.msrb.mxu1 %v16866_v41  ;;  %v21096_v27 = vadd.f32 %v10099_v28, %v10087_v23  ;;  %v14085_v28 = vld [vmem:[#allocation10 + $0x190] sm:$0xf] }
 0x59b   : > { %v17375_v10 = vld [vmem:[#allocation10 + $0x1b68] sm:$0xf0] }
 0x59c   : > { %v18874_v11 = vld [vmem:[#allocation10 + $0x150c] sm:$0xf]  ;;  %v17378_v40 = vor.u32 %v19074_v36, %v17375_v10  ;;  %10339 = vmatpush.bf16.msrb.mxu2 %v17122_v20  ;;  %v10062_v36 = vpop.f32.mrf.mxu0 }
 0x59d   : > { %v16575_v38 = vld [vmem:[#allocation10 + $0x1528] sm:$0xf0]  ;;  %v18319_v36 = vld [vmem:[#allocation10 + $0x3ac] sm:$0xf0] }
 0x59e   : > { %v18938_v39 = vld [vmem:[#allocation10 + $0x170c] sm:$0xf]  ;;  %v16578_v48 = vor.u32 %v18874_v11, %v16575_v38  ;;  %10352 = vmatpush.bf16.msrb.mxu3 %v17378_v40  ;;  %v10075_v38 = vpop.f32.mrf.mxu1 }
 0x59f   : > { %v16831_v45 = vld [vmem:[#allocation10 + $0x1728] sm:$0xf0] }
 0x5a0   : > { %v19002_v42 = vld [vmem:[#allocation10 + $0x190c] sm:$0xf]  ;;  %v16834_v3 = vor.u32 %v18938_v39, %v16831_v45  ;;  %10314 = vmatpush.bf16.msrb.mxu0 %v16578_v48 }
 0x5a1   : > { %v17087_v43 = vld [vmem:[#allocation10 + $0x1928] sm:$0xf0] }
 0x5a2   : > { %v19066_v46 = vld [vmem:[#allocation10 + $0x1b0c] sm:$0xf]  ;;  %v17090_v57 = vor.u32 %v19002_v42, %v17087_v43  ;;  %10327 = vmatpush.bf16.msrb.mxu1 %v16834_v3 }
 0x5a3   : > { %v17343_v47 = vld [vmem:[#allocation10 + $0x1b28] sm:$0xf0] }
 0x5a4   : > { %v18866_v50 = vld [vmem:[#allocation10 + $0x14cc] sm:$0xf]  ;;  %v17346_v56 = vor.u32 %v19066_v46, %v17343_v47  ;;  %10340 = vmatpush.bf16.msrb.mxu2 %v17090_v57 }
 0x5a5   : > { %v16543_v51 = vld [vmem:[#allocation10 + $0x14e8] sm:$0xf0] }
 0x5a6   : > { %v18930_v53 = vld [vmem:[#allocation10 + $0x16cc] sm:$0xf]  ;;  %v16546_v2 = vor.u32 %v18866_v50, %v16543_v51  ;;  %10353 = vmatpush.bf16.msrb.mxu3 %v17346_v56 }
 0x5a7   : > { %v16799_v58 = vld [vmem:[#allocation10 + $0x16e8] sm:$0xf0] }
 0x5a8   : > { %v18994_v59 = vld [vmem:[#allocation10 + $0x18cc] sm:$0xf]  ;;  %v16802_v14 = vor.u32 %v18930_v53, %v16799_v58  ;;  %10315 = vmatpush.bf16.msrb.mxu0 %v16546_v2 }
 0x5a9   : > { %v17055_v31 = vld [vmem:[#allocation10 + $0x18e8] sm:$0xf0] }
 0x5aa   : > { %v19058_v63 = vld [vmem:[#allocation10 + $0x1acc] sm:$0xf]  ;;  %v17058_v5 = vor.u32 %v18994_v59, %v17055_v31  ;;  %10328 = vmatpush.bf16.msrb.mxu1 %v16802_v14  ;;  %v10101_v31 = vpop.f32.mrf.mxu3  ;;  %v18327_v14 = vld [vmem:[#allocation10 + $0x3ec] sm:$0xf0] }
 0x5ab   : > { %v17311_v0 = vld [vmem:[#allocation10 + $0x1ae8] sm:$0xf0]  ;;  %v18367_v31 = vld [vmem:[#allocation10 + $0x52c] sm:$0xf0] }
 0x5ac   : > { %v18858_v6 = vld [vmem:[#allocation10 + $0x148c] sm:$0xf]  ;;  %v17314_v4 = vor.u32 %v19058_v63, %v17311_v0  ;;  %10341 = vmatpush.bf16.msrb.mxu2 %v17058_v5  ;;  %v14117_v63 = vld [vmem:[#allocation10 + $0x1d0] sm:$0xf] }
 0x5ad   : > { %v16511_v18 = vld [vmem:[#allocation10 + $0x14a8] sm:$0xf0]  ;;  %v18263_v0 = vld [vmem:[#allocation10 + $0x1ec] sm:$0xf0] }
 0x5ae   : > { %v18922_v7 = vld [vmem:[#allocation10 + $0x168c] sm:$0xf]  ;;  %v16514_v35 = vor.u32 %v18858_v6, %v16511_v18  ;;  %10354 = vmatpush.bf16.msrb.mxu3 %v17314_v4  ;;  %v14629_v5 = vld [vmem:[#allocation10 + $0x5d0] sm:$0xf] }
 0x5af   : > { %v16767_v9 = vld [vmem:[#allocation10 + $0x16a8] sm:$0xf0]  ;;  %v18391_v6 = vld [vmem:[#allocation10 + $0x5ec] sm:$0xf0] }
 0x5b0   : > { %v18986_v33 = vld [vmem:[#allocation10 + $0x188c] sm:$0xf]  ;;  %v16770_v10 = vor.u32 %v18922_v7, %v16767_v9  ;;  %10316 = vmatpush.bf16.msrb.mxu0 %v16514_v35  ;;  %v18455_v4 = vld [vmem:[#allocation10 + $0x7ec] sm:$0xf0]  ;;  %v14630_v23 = vor.u32 %v18391_v6, %v14629_v5  ;;  %v10125_v5 = vpop.f32.mrf.mxu1 }
 0x5b1   : > { %v17023_v15 = vld [vmem:[#allocation10 + $0x18a8] sm:$0xf0]  ;;  %v14886_v35 = vor.u32 %v18455_v4, %v14885_v8  ;;  %v18231_v8 = vld [vmem:[#allocation10 + $0xec] sm:$0xf0] }
 0x5b2   : > { %v19050_v29 = vld [vmem:[#allocation10 + $0x1a8c] sm:$0xf]  ;;  %v17026_v37 = vor.u32 %v18986_v33, %v17023_v15  ;;  %10329 = vmatpush.bf16.msrb.mxu1 %v16770_v10  ;;  %v14118_v33 = vor.u32 %v18263_v0, %v14117_v63  ;;  %v14374_v15 = vor.u32 %v18327_v14, %v14373_v1  ;;  %v14597_v10 = vld [vmem:[#allocation10 + $0x590] sm:$0xf]  ;;  %v10112_v63 = vpop.f32.mrf.mxu0 }
 0x5b3   : > { %v17279_v34 = vld [vmem:[#allocation10 + $0x1aa8] sm:$0xf0]  ;;  %v14789_v0 = vld [vmem:[#allocation10 + $0x710] sm:$0xf] }
 0x5b4   : > { %v18850_v41 = vld [vmem:[#allocation10 + $0x144c] sm:$0xf]  ;;  %v17282_v39 = vor.u32 %v19050_v29, %v17279_v34  ;;  %10342 = vmatpush.bf16.msrb.mxu2 %v17026_v37  ;;  %v18255_v29 = vld [vmem:[#allocation10 + $0x1ac] sm:$0xf0] }
 0x5b5   : > { %v16479_v20 = vld [vmem:[#allocation10 + $0x1468] sm:$0xf0]  ;;  %v14341_v34 = vld [vmem:[#allocation10 + $0x390] sm:$0xf] }
 0x5b6   : > { %v18914_v11 = vld [vmem:[#allocation10 + $0x164c] sm:$0xf]  ;;  %v16482_v47 = vor.u32 %v18850_v41, %v16479_v20  ;;  %10355 = vmatpush.bf16.msrb.mxu3 %v17282_v39  ;;  %v18383_v37 = vld [vmem:[#allocation10 + $0x5ac] sm:$0xf0]  ;;  %v14342_v38 = vor.u32 %v18319_v36, %v14341_v34 }
 0x5b7   : > { %v16735_v40 = vld [vmem:[#allocation10 + $0x1668] sm:$0xf0]  ;;  %v14853_v41 = vld [vmem:[#allocation10 + $0x790] sm:$0xf]  ;;  %v14598_v39 = vor.u32 %v18383_v37, %v14597_v10 }
 0x5b8   : > { %v18978_v45 = vld [vmem:[#allocation10 + $0x184c] sm:$0xf]  ;;  %v16738_v3 = vor.u32 %v18914_v11, %v16735_v40  ;;  %10317 = vmatpush.bf16.msrb.mxu0 %v16482_v47  ;;  %v18447_v20 = vld [vmem:[#allocation10 + $0x7ac] sm:$0xf0]  ;;  %v14086_v11 = vor.u32 %v18255_v29, %v14085_v28 }
 0x5b9   : > { %v16991_v42 = vld [vmem:[#allocation10 + $0x1868] sm:$0xf0]  ;;  %v14053_v40 = vld [vmem:[#allocation10 + $0x150] sm:$0xf] }
 0x5ba   : > { %v19042_v43 = vld [vmem:[#allocation10 + $0x1a4c] sm:$0xf]  ;;  %v16994_v57 = vor.u32 %v18978_v45, %v16991_v42  ;;  %10330 = vmatpush.bf16.msrb.mxu1 %v16738_v3  ;;  %v18247_v45 = vld [vmem:[#allocation10 + $0x16c] sm:$0xf0] }
 0x5bb   : > { %v17247_v46 = vld [vmem:[#allocation10 + $0x1a68] sm:$0xf0]  ;;  %v14309_v42 = vld [vmem:[#allocation10 + $0x350] sm:$0xf] }
 0x5bc   : > { %v18842_v48 = vld [vmem:[#allocation10 + $0x140c] sm:$0xf]  ;;  %v17250_v55 = vor.u32 %v19042_v43, %v17247_v46  ;;  %10343 = vmatpush.bf16.msrb.mxu2 %v16994_v57  ;;  %v14854_v43 = vor.u32 %v18447_v20, %v14853_v41  ;;  %v18311_v46 = vld [vmem:[#allocation10 + $0x36c] sm:$0xf0]  ;;  %v14054_v57 = vor.u32 %v18247_v45, %v14053_v40 }
 0x5bd   : > { %v16447_v49 = vld [vmem:[#allocation10 + $0x1428] sm:$0xf0]  ;;  %v14565_v47 = vld [vmem:[#allocation10 + $0x550] sm:$0xf] }
 0x5be   : > { %v18906_v50 = vld [vmem:[#allocation10 + $0x160c] sm:$0xf]  ;;  %v16450_v2 = vor.u32 %v18842_v48, %v16447_v49  ;;  %10356 = vmatpush.bf16.msrb.mxu3 %v17250_v55  ;;  %v18375_v48 = vld [vmem:[#allocation10 + $0x56c] sm:$0xf0] }
 0x5bf   : > { %v16703_v51 = vld [vmem:[#allocation10 + $0x1628] sm:$0xf0]  ;;  %v14821_v49 = vld [vmem:[#allocation10 + $0x750] sm:$0xf] }
 0x5c0   : > { %v18970_v53 = vld [vmem:[#allocation10 + $0x180c] sm:$0xf]  ;;  %v16706_v18 = vor.u32 %v18906_v50, %v16703_v51  ;;  %10318 = vmatpush.bf16.msrb.mxu0 %v16450_v2  ;;  %v18439_v3 = vld [vmem:[#allocation10 + $0x76c] sm:$0xf0]  ;;  %v14310_v50 = vor.u32 %v18311_v46, %v14309_v42  ;;  %v14566_v51 = vor.u32 %v18375_v48, %v14565_v47  ;;  %v10113_v2 = vadd.f32 %v10112_v63, %v21096_v27  ;;  %v10151_v42 = vpop.f32.mrf.mxu3  ;;  %v10114_v47 = vpop.f32.mrf.mxu0 }
 0x5c1   : > { %v16959_v56 = vld [vmem:[#allocation10 + $0x1828] sm:$0xf0]  ;;  %v14277_v55 = vld [vmem:[#allocation10 + $0x310] sm:$0xf] }
 0x5c2   : > { %v19034_v58 = vld [vmem:[#allocation10 + $0x1a0c] sm:$0xf]  ;;  %v16962_v7 = vor.u32 %v18970_v53, %v16959_v56  ;;  %10331 = vmatpush.bf16.msrb.mxu1 %v16706_v18  ;;  %v14021_v53 = vld [vmem:[#allocation10 + $0x110] sm:$0xf]  ;;  %v14822_v56 = vor.u32 %v18439_v3, %v14821_v49  ;;  %v10127_v49 = vpop.f32.mrf.mxu1 }
 0x5c3   : > { %v17215_v59 = vld [vmem:[#allocation10 + $0x1a28] sm:$0xf0]  ;;  %10319 = vmatmul.bf16.vlgmr.msrb.gmra.mxu0 %v21011_v25  ;;  %v18431_v1 = vld [vmem:[#allocation10 + $0x72c] sm:$0xf0]  ;;  %v14022_v14 = vor.u32 %v18239_v54, %v14021_v53 }
 0x5c4   : > { %v17218_v9 = vor.u32 %v19034_v58, %v17215_v59  ;;  %10344 = vmatpush.bf16.msrb.mxu2 %v16962_v7  ;;  %10363 = vmatpush.bf16.msra.mxu0 %v14118_v33  ;;  %v18303_v58 = vld [vmem:[#allocation10 + $0x32c] sm:$0xf0]  ;;  %v10126_v33 = vadd.f32 %v10125_v5, %v10113_v2 }
 0x5c5   : > { %10332 = vmatmul.bf16.vlgmr.msrb.gmra.mxu1 %v21015_v30  ;;  %v14533_v59 = vld [vmem:[#allocation10 + $0x510] sm:$0xf]  ;;  %v14278_v6 = vor.u32 %v18303_v58, %v14277_v55 }
 0x5c6   : > { %10357 = vmatpush.bf16.msrb.mxu3 %v17218_v9  ;;  %10376 = vmatpush.bf16.msra.mxu1 %v14374_v15  ;;  %v14534_v18 = vor.u32 %v18367_v31, %v14533_v59  ;;  %v13989_v7 = vld [vmem:[#allocation10 + $0xd0] sm:$0xf]  ;;  %v14790_v9 = vor.u32 %v18431_v1, %v14789_v0 }
 0x5c7   : > { %10345 = vmatmul.bf16.vlgmr.msrb.gmra.mxu2 %v21023_v19  ;;  %v14245_v4 = vld [vmem:[#allocation10 + $0x2d0] sm:$0xf] }
 0x5c8   : > { %10389 = vmatpush.bf16.msra.mxu2 %v14630_v23  ;;  %10364 = vmatpush.bf16.msra.mxu0 %v14086_v11  ;;  %v18295_v15 = vld [vmem:[#allocation10 + $0x2ec] sm:$0xf0]  ;;  %v10138_v11 = vpop.f32.mrf.mxu2 }
 0x5c9   : > { %10358 = vmatmul.bf16.vlgmr.msrb.gmra.mxu3 %v21025_v32  ;;  %v14501_v23 = vld [vmem:[#allocation10 + $0x4d0] sm:$0xf]  ;;  %v14246_v27 = vor.u32 %v18295_v15, %v14245_v4  ;;  %v10139_v45 = vadd.f32 %v10138_v11, %v10126_v33 }
 0x5ca   : > { %10402 = vmatpush.bf16.msra.mxu3 %v14886_v35  ;;  %10377 = vmatpush.bf16.msra.mxu1 %v14342_v38  ;;  %v18359_v28 = vld [vmem:[#allocation10 + $0x4ec] sm:$0xf0]  ;;  %v13990_v35 = vor.u32 %v18231_v8, %v13989_v7 }
 0x5cb   : > { %v14757_v29 = vld [vmem:[#allocation10 + $0x6d0] sm:$0xf]  ;;  %v14502_v36 = vor.u32 %v18359_v28, %v14501_v23  ;;  %v21103_v3 = vadd.f32 %v10151_v42, %v10139_v45 }
 0x5cc   : > { %10390 = vmatpush.bf16.msra.mxu2 %v14598_v39  ;;  %10365 = vmatpush.bf16.msra.mxu0 %v14054_v57  ;;  %v18423_v34 = vld [vmem:[#allocation10 + $0x6ec] sm:$0xf0] }
 0x5cd   : > { %v13957_v10 = vld [vmem:[#allocation10 + $0x90] sm:$0xf]  ;;  %v14758_v20 = vor.u32 %v18423_v34, %v14757_v29  ;;  %v10153_v34 = vpop.f32.mrf.mxu3 }
 0x5ce   : > { %10403 = vmatpush.bf16.msra.mxu3 %v14854_v43  ;;  %10378 = vmatpush.bf16.msra.mxu1 %v14310_v50  ;;  %v18223_v37 = vld [vmem:[#allocation10 + $0xac] sm:$0xf0] }
 0x5cf   : > { %v14213_v41 = vld [vmem:[#allocation10 + $0x290] sm:$0xf]  ;;  %v13958_v48 = vor.u32 %v18223_v37, %v13957_v10 }
 0x5d0   : > { %10391 = vmatpush.bf16.msra.mxu2 %v14566_v51  ;;  %10366 = vmatpush.bf16.msra.mxu0 %v14022_v14  ;;  %v18287_v38 = vld [vmem:[#allocation10 + $0x2ac] sm:$0xf0]  ;;  %v10140_v15 = vpop.f32.mrf.mxu2 }
 0x5d1   : > { %v14469_v39 = vld [vmem:[#allocation10 + $0x490] sm:$0xf]  ;;  %v14214_v57 = vor.u32 %v18287_v38, %v14213_v41 }
 0x5d2   : > { %10404 = vmatpush.bf16.msra.mxu3 %v14822_v56  ;;  %10379 = vmatpush.bf16.msra.mxu1 %v14278_v6  ;;  %v18351_v40 = vld [vmem:[#allocation10 + $0x4ac] sm:$0xf0] }
 0x5d3   : > { %v14725_v43 = vld [vmem:[#allocation10 + $0x690] sm:$0xf]  ;;  %v14470_v50 = vor.u32 %v18351_v40, %v14469_v39 }
 0x5d4   : > { %10392 = vmatpush.bf16.msra.mxu2 %v14534_v18  ;;  %v18415_v46 = vld [vmem:[#allocation10 + $0x6ac] sm:$0xf0]  ;;  %10367 = vmatpush.bf16.msra.mxu0 %v13990_v35 }
 0x5d5   : > { %v13925_v51 = vld [vmem:[#allocation10 + $0x50] sm:$0xf]  ;;  %v14726_v55 = vor.u32 %v18415_v46, %v14725_v43 }
 0x5d6   : > { %10405 = vmatpush.bf16.msra.mxu3 %v14790_v9  ;;  %10380 = vmatpush.bf16.msra.mxu1 %v14246_v27  ;;  %v18215_v53 = vld [vmem:[#allocation10 + $0x6c] sm:$0xf0] }
 0x5d7   : > { %v14181_v54 = vld [vmem:[#allocation10 + $0x250] sm:$0xf]  ;;  %v13926_v0 = vor.u32 %v18215_v53, %v13925_v51 }
 0x5d8   : > { %10393 = vmatpush.bf16.msra.mxu2 %v14502_v36  ;;  %v18279_v56 = vld [vmem:[#allocation10 + $0x26c] sm:$0xf0]  ;;  %10368 = vmatpush.bf16.msra.mxu0 %v13958_v48 }
 0x5d9   : > { %v14437_v58 = vld [vmem:[#allocation10 + $0x450] sm:$0xf]  ;;  %v14182_v14 = vor.u32 %v18279_v56, %v14181_v54 }
 0x5da   : > { %10406 = vmatpush.bf16.msra.mxu3 %v14758_v20  ;;  %v18343_v59 = vld [vmem:[#allocation10 + $0x46c] sm:$0xf0]  ;;  %10381 = vmatpush.bf16.msra.mxu1 %v14214_v57 }
 0x5db   : > { %v14693_v31 = vld [vmem:[#allocation10 + $0x650] sm:$0xf]  ;;  %v14438_v5 = vor.u32 %v18343_v59, %v14437_v58 }
 0x5dc   : > { %v18407_v63 = vld [vmem:[#allocation10 + $0x66c] sm:$0xf0]  ;;  %10394 = vmatpush.bf16.msra.mxu2 %v14470_v50  ;;  %10369 = vmatpush.bf16.msra.mxu0 %v13926_v0 }
 0x5dd   : > { %v13893_v1 = vld [vmem:[#allocation10 + $0x10] sm:$0xf]  ;;  %v14694_v8 = vor.u32 %v18407_v63, %v14693_v31 }
 0x5de   : > { %v18207_v2 = vld [vmem:[#allocation10 + $0x2c] sm:$0xf0]  ;;  %10407 = vmatpush.bf16.msra.mxu3 %v14726_v55  ;;  %10382 = vmatpush.bf16.msra.mxu1 %v14182_v14 }
 0x5df   : > { %v14149_v6 = vld [vmem:[#allocation10 + $0x210] sm:$0xf]  ;;  %v13894_v35 = vor.u32 %v18207_v2, %v13893_v1 }
 0x5e0   : > { %v18271_v18 = vld [vmem:[#allocation10 + $0x22c] sm:$0xf0]  ;;  %10395 = vmatpush.bf16.msra.mxu2 %v14438_v5 }
 0x5e1   : > { %v14405_v7 = vld [vmem:[#allocation10 + $0x410] sm:$0xf]  ;;  %v14150_v37 = vor.u32 %v18271_v18, %v14149_v6  ;;  %10370 = vmatpush.bf16.msra.mxu0 %v13894_v35 }
 0x5e2   : > { %v18335_v4 = vld [vmem:[#allocation10 + $0x42c] sm:$0xf0]  ;;  %10408 = vmatpush.bf16.msra.mxu3 %v14694_v8 }
 0x5e3   : > { %v14661_v9 = vld [vmem:[#allocation10 + $0x610] sm:$0xf]  ;;  %v14406_v41 = vor.u32 %v18335_v4, %v14405_v7  ;;  %10383 = vmatpush.bf16.msra.mxu1 %v14150_v37 }
 0x5e4   : > { %v18399_v33 = vld [vmem:[#allocation10 + $0x62c] sm:$0xf0]  ;;  %10371 = vmatmul.bf16.vlgmr.msra.gmra.mxu0 %v20977_v61 }
 0x5e5   : > { %v15141_v23 = vld [vmem:[#allocation10 + $0x9d0] sm:$0xf]  ;;  %v14662_v38 = vor.u32 %v18399_v33, %v14661_v9  ;;  %10396 = vmatpush.bf16.msra.mxu2 %v14406_v41 }
 0x5e6   : > { %v18519_v28 = vld [vmem:[#allocation10 + $0x9ec] sm:$0xf0]  ;;  %10384 = vmatmul.bf16.vlgmr.msra.gmra.mxu1 %v20982_v12 }
 0x5e7   : > { %v15397_v29 = vld [vmem:[#allocation10 + $0xbd0] sm:$0xf]  ;;  %v15142_v39 = vor.u32 %v18519_v28, %v15141_v23  ;;  %10409 = vmatpush.bf16.msra.mxu3 %v14662_v38  ;;  %v10164_v28 = vpop.f32.mrf.mxu0 }
 0x5e8   : > { %v18583_v27 = vld [vmem:[#allocation10 + $0xbec] sm:$0xf0]  ;;  %10397 = vmatmul.bf16.vlgmr.msra.gmra.mxu2 %v20975_v60  ;;  %v10165_v35 = vadd.f32 %v10164_v28, %v21103_v3  ;;  %v5142_v3 = vperm.slane %v21086_v13, 3 }
 0x5e9   : > { %v15653_v36 = vld [vmem:[#allocation10 + $0xdd0] sm:$0xf]  ;;  %v15398_v40 = vor.u32 %v18583_v27, %v15397_v29  ;;  %10415 = vmatpush.bf16.msrb.mxu0 %v15142_v39 }
 0x5ea   : > { %v18647_v10 = vld [vmem:[#allocation10 + $0xdec] sm:$0xf0]  ;;  %10410 = vmatmul.bf16.vlgmr.msra.gmra.mxu3 %v20979_v62 }
 0x5eb   : > { %v15909_v20 = vld [vmem:[#allocation10 + $0xfd0] sm:$0xf]  ;;  %v15654_v45 = vor.u32 %v18647_v10, %v15653_v36  ;;  %10428 = vmatpush.bf16.msrb.mxu1 %v15398_v40  ;;  %v10177_v36 = vpop.f32.mrf.mxu1 }
 0x5ec   : > { %v18711_v11 = vld [vmem:[#allocation10 + $0xfec] sm:$0xf0]  ;;  %v21110_v39 = vadd.f32 %v10177_v36, %v10165_v35 }
 0x5ed   : > { %v15109_v42 = vld [vmem:[#allocation10 + $0x990] sm:$0xf]  ;;  %v15910_v47 = vor.u32 %v18711_v11, %v15909_v20  ;;  %10441 = vmatpush.bf16.msrb.mxu2 %v15654_v45 }
 0x5ee   : > { %v18511_v43 = vld [vmem:[#allocation10 + $0x9ac] sm:$0xf0] }
 0x5ef   : > { %v15365_v46 = vld [vmem:[#allocation10 + $0xb90] sm:$0xf]  ;;  %v15110_v53 = vor.u32 %v18511_v43, %v15109_v42  ;;  %10454 = vmatpush.bf16.msrb.mxu3 %v15910_v47  ;;  %v10166_v13 = vpop.f32.mrf.mxu0 }
 0x5f0   : > { %v18575_v48 = vld [vmem:[#allocation10 + $0xbac] sm:$0xf0] }
 0x5f1   : > { %v15621_v49 = vld [vmem:[#allocation10 + $0xd90] sm:$0xf]  ;;  %v15366_v54 = vor.u32 %v18575_v48, %v15365_v46  ;;  %10416 = vmatpush.bf16.msrb.mxu0 %v15110_v53 }
 0x5f2   : > { %v18639_v57 = vld [vmem:[#allocation10 + $0xdac] sm:$0xf0] }
 0x5f3   : > { %v15877_v50 = vld [vmem:[#allocation10 + $0xf90] sm:$0xf]  ;;  %v15622_v55 = vor.u32 %v18639_v57, %v15621_v49  ;;  %10429 = vmatpush.bf16.msrb.mxu1 %v15366_v54 }
 0x5f4   : > { %v18703_v51 = vld [vmem:[#allocation10 + $0xfac] sm:$0xf0] }
 0x5f5   : > { %v15077_v56 = vld [vmem:[#allocation10 + $0x950] sm:$0xf]  ;;  %v15878_v31 = vor.u32 %v18703_v51, %v15877_v50  ;;  %10442 = vmatpush.bf16.msrb.mxu2 %v15622_v55 }
 0x5f6   : > { %v18503_v58 = vld [vmem:[#allocation10 + $0x96c] sm:$0xf0] }
 0x5f7   : > { %v15333_v59 = vld [vmem:[#allocation10 + $0xb50] sm:$0xf]  ;;  %v15078_v5 = vor.u32 %v18503_v58, %v15077_v56  ;;  %10455 = vmatpush.bf16.msrb.mxu3 %v15878_v31  ;;  %v10190_v58 = vpop.f32.mrf.mxu2 }
 0x5f8   : > { %v18567_v63 = vld [vmem:[#allocation10 + $0xb6c] sm:$0xf0] }
 0x5f9   : > { %v15589_v0 = vld [vmem:[#allocation10 + $0xd50] sm:$0xf]  ;;  %v15334_v6 = vor.u32 %v18567_v63, %v15333_v59  ;;  %10417 = vmatpush.bf16.msrb.mxu0 %v15078_v5  ;;  %v10191_v63 = vadd.f32 %v10190_v58, %v5142_v3 }
 0x5fa   : > { %v18631_v1 = vld [vmem:[#allocation10 + $0xd6c] sm:$0xf0] }
 0x5fb   : > { %v15845_v2 = vld [vmem:[#allocation10 + $0xf50] sm:$0xf]  ;;  %v15590_v18 = vor.u32 %v18631_v1, %v15589_v0  ;;  %10430 = vmatpush.bf16.msrb.mxu1 %v15334_v6  ;;  %v10203_v0 = vpop.f32.mrf.mxu3 }
 0x5fc   : > { %v18695_v14 = vld [vmem:[#allocation10 + $0xf6c] sm:$0xf0] }
 0x5fd   : > { %v15045_v7 = vld [vmem:[#allocation10 + $0x910] sm:$0xf]  ;;  %v15846_v9 = vor.u32 %v18695_v14, %v15845_v2  ;;  %10443 = vmatpush.bf16.msrb.mxu2 %v15590_v18  ;;  %v10179_v2 = vpop.f32.mrf.mxu1 }
 0x5fe   : > { %v18495_v8 = vld [vmem:[#allocation10 + $0x92c] sm:$0xf0] }
 0x5ff   : > { %v15301_v4 = vld [vmem:[#allocation10 + $0xb10] sm:$0xf]  ;;  %v15046_v27 = vor.u32 %v18495_v8, %v15045_v7  ;;  %10456 = vmatpush.bf16.msrb.mxu3 %v15846_v9  ;;  %v21113_v8 = vadd.f32 %v10203_v0, %v10191_v63 }
 0x600   : > { %v18559_v33 = vld [vmem:[#allocation10 + $0xb2c] sm:$0xf0] }
 0x601   : > { %v15557_v15 = vld [vmem:[#allocation10 + $0xd10] sm:$0xf]  ;;  %v15302_v10 = vor.u32 %v18559_v33, %v15301_v4  ;;  %10418 = vmatpush.bf16.msrb.mxu0 %v15046_v27 }
 0x602   : > { %v18623_v23 = vld [vmem:[#allocation10 + $0xd2c] sm:$0xf0] }
 0x603   : > { %v15813_v29 = vld [vmem:[#allocation10 + $0xf10] sm:$0xf]  ;;  %v15558_v37 = vor.u32 %v18623_v23, %v15557_v15  ;;  %10431 = vmatpush.bf16.msrb.mxu1 %v15302_v10  ;;  %v10205_v3 = vpop.f32.mrf.mxu3 }
 0x604   : > { %v18687_v34 = vld [vmem:[#allocation10 + $0xf2c] sm:$0xf0] }
 0x605   : > { %v15013_v41 = vld [vmem:[#allocation10 + $0x8d0] sm:$0xf]  ;;  %v15814_v38 = vor.u32 %v18687_v34, %v15813_v29  ;;  %10444 = vmatpush.bf16.msrb.mxu2 %v15558_v37 }
 0x606   : > { %v18487_v20 = vld [vmem:[#allocation10 + $0x8ec] sm:$0xf0] }
 0x607   : > { %v15269_v11 = vld [vmem:[#allocation10 + $0xad0] sm:$0xf]  ;;  %v15014_v47 = vor.u32 %v18487_v20, %v15013_v41  ;;  %10457 = vmatpush.bf16.msrb.mxu3 %v15814_v38 }
 0x608   : > { %v18551_v40 = vld [vmem:[#allocation10 + $0xaec] sm:$0xf0] }
 0x609   : > { %v15525_v45 = vld [vmem:[#allocation10 + $0xcd0] sm:$0xf]  ;;  %v15270_v48 = vor.u32 %v18551_v40, %v15269_v11  ;;  %10419 = vmatpush.bf16.msrb.mxu0 %v15014_v47 }
 0x60a   : > { %v18615_v42 = vld [vmem:[#allocation10 + $0xcec] sm:$0xf0] }
 0x60b   : > { %v15781_v43 = vld [vmem:[#allocation10 + $0xed0] sm:$0xf]  ;;  %v15526_v49 = vor.u32 %v18615_v42, %v15525_v45  ;;  %10432 = vmatpush.bf16.msrb.mxu1 %v15270_v48  ;;  %v10192_v45 = vpop.f32.mrf.mxu2 }
 0x60c   : > { %v18679_v46 = vld [vmem:[#allocation10 + $0xeec] sm:$0xf0] }
 0x60d   : > { %v14981_v57 = vld [vmem:[#allocation10 + $0x890] sm:$0xf]  ;;  %v15782_v53 = vor.u32 %v18679_v46, %v15781_v43  ;;  %10445 = vmatpush.bf16.msrb.mxu2 %v15526_v49 }
 0x60e   : > { %v18479_v50 = vld [vmem:[#allocation10 + $0x8ac] sm:$0xf0] }
 0x60f   : > { %v15237_v51 = vld [vmem:[#allocation10 + $0xa90] sm:$0xf]  ;;  %v14982_v1 = vor.u32 %v18479_v50, %v14981_v57  ;;  %10458 = vmatpush.bf16.msrb.mxu3 %v15782_v53 }
 0x610   : > { %v18543_v54 = vld [vmem:[#allocation10 + $0xaac] sm:$0xf0] }
 0x611   : > { %v15493_v55 = vld [vmem:[#allocation10 + $0xc90] sm:$0xf]  ;;  %v15238_v14 = vor.u32 %v18543_v54, %v15237_v51  ;;  %10420 = vmatpush.bf16.msrb.mxu0 %v14982_v1 }
 0x612   : > { %v18607_v56 = vld [vmem:[#allocation10 + $0xcac] sm:$0xf0] }
 0x613   : > { %v15749_v59 = vld [vmem:[#allocation10 + $0xe90] sm:$0xf]  ;;  %v15494_v5 = vor.u32 %v18607_v56, %v15493_v55  ;;  %10433 = vmatpush.bf16.msrb.mxu1 %v15238_v14 }
 0x614   : > { %v18671_v31 = vld [vmem:[#allocation10 + $0xeac] sm:$0xf0] }
 0x615   : > { %v14949_v6 = vld [vmem:[#allocation10 + $0x850] sm:$0xf]  ;;  %v15750_v4 = vor.u32 %v18671_v31, %v15749_v59  ;;  %10446 = vmatpush.bf16.msrb.mxu2 %v15494_v5 }
 0x616   : > { %v18471_v18 = vld [vmem:[#allocation10 + $0x86c] sm:$0xf0] }
 0x617   : > { %v15205_v7 = vld [vmem:[#allocation10 + $0xa50] sm:$0xf]  ;;  %v14950_v29 = vor.u32 %v18471_v18, %v14949_v6  ;;  %10459 = vmatpush.bf16.msrb.mxu3 %v15750_v4 }
 0x618   : > { %v18535_v9 = vld [vmem:[#allocation10 + $0xa6c] sm:$0xf0] }
 0x619   : > { %v15461_v33 = vld [vmem:[#allocation10 + $0xc50] sm:$0xf]  ;;  %v15206_v27 = vor.u32 %v18535_v9, %v15205_v7  ;;  %10421 = vmatpush.bf16.msrb.mxu0 %v14950_v29 }
 0x61a   : > { %v18599_v15 = vld [vmem:[#allocation10 + $0xc6c] sm:$0xf0] }
 0x61b   : > { %v15717_v23 = vld [vmem:[#allocation10 + $0xe50] sm:$0xf]  ;;  %v15462_v36 = vor.u32 %v18599_v15, %v15461_v33  ;;  %10434 = vmatpush.bf16.msrb.mxu1 %v15206_v27 }
 0x61c   : > { %v18663_v28 = vld [vmem:[#allocation10 + $0xe6c] sm:$0xf0] }
 0x61d   : > { %v14917_v34 = vld [vmem:[#allocation10 + $0x810] sm:$0xf]  ;;  %v15718_v20 = vor.u32 %v18663_v28, %v15717_v23  ;;  %10447 = vmatpush.bf16.msrb.mxu2 %v15462_v36 }
 0x61e   : > { %v18463_v35 = vld [vmem:[#allocation10 + $0x82c] sm:$0xf0] }
 0x61f   : > { %v15173_v10 = vld [vmem:[#allocation10 + $0xa10] sm:$0xf]  ;;  %v14918_v47 = vor.u32 %v18463_v35, %v14917_v34  ;;  %10460 = vmatpush.bf16.msrb.mxu3 %v15718_v20 }
 0x620   : > { %v18527_v37 = vld [vmem:[#allocation10 + $0xa2c] sm:$0xf0] }
 0x621   : > { %v15429_v41 = vld [vmem:[#allocation10 + $0xc10] sm:$0xf]  ;;  %v15174_v50 = vor.u32 %v18527_v37, %v15173_v10  ;;  %10422 = vmatpush.bf16.msrb.mxu0 %v14918_v47  ;;  %v10216_v47 = vpop.f32.mrf.mxu0 }
 0x622   : > { %v18591_v11 = vld [vmem:[#allocation10 + $0xc2c] sm:$0xf0] }
 0x623   : > { %v15685_v38 = vld [vmem:[#allocation10 + $0xe10] sm:$0xf]  ;;  %v15430_v51 = vor.u32 %v18591_v11, %v15429_v41  ;;  %10435 = vmatpush.bf16.msrb.mxu1 %v15174_v50 }
 0x624   : > { %v18655_v40 = vld [vmem:[#allocation10 + $0xe2c] sm:$0xf0]  ;;  %10423 = vmatmul.bf16.vlgmr.msrb.gmra.mxu0 %v20993_v21 }
 0x625   : > { %v16165_v42 = vld [vmem:[#allocation10 + $0x11d0] sm:$0xf]  ;;  %v15686_v55 = vor.u32 %v18655_v40, %v15685_v38  ;;  %10448 = vmatpush.bf16.msrb.mxu2 %v15430_v51 }
 0x626   : > { %v18775_v43 = vld [vmem:[#allocation10 + $0x11ec] sm:$0xf0]  ;;  %10436 = vmatmul.bf16.vlgmr.msrb.gmra.mxu1 %v20997_v24 }
 0x627   : > { %v16421_v46 = vld [vmem:[#allocation10 + $0x13d0] sm:$0xf]  ;;  %v16166_v56 = vor.u32 %v18775_v43, %v16165_v42  ;;  %10461 = vmatpush.bf16.msrb.mxu3 %v15686_v55 }
 0x628   : > { %v18839_v48 = vld [vmem:[#allocation10 + $0x13ec] sm:$0xf0]  ;;  %10449 = vmatmul.bf16.vlgmr.msrb.gmra.mxu2 %v20991_v17 }
 0x629   : > { %v16677_v49 = vld [vmem:[#allocation10 + $0x15d0] sm:$0xf]  ;;  %v16422_v58 = vor.u32 %v18839_v48, %v16421_v46  ;;  %10467 = vmatpush.bf16.msra.mxu0 %v16166_v56 }
 0x62a   : > { %v18903_v57 = vld [vmem:[#allocation10 + $0x15ec] sm:$0xf0]  ;;  %10462 = vmatmul.bf16.vlgmr.msrb.gmra.mxu3 %v20995_v22 }
 0x62b   : > { %v16933_v53 = vld [vmem:[#allocation10 + $0x17d0] sm:$0xf]  ;;  %v16678_v59 = vor.u32 %v18903_v57, %v16677_v49  ;;  %10480 = vmatpush.bf16.msra.mxu1 %v16422_v58 }
 0x62c   : > { %v18967_v54 = vld [vmem:[#allocation10 + $0x17ec] sm:$0xf0] }
 0x62d   : > { %v16133_v31 = vld [vmem:[#allocation10 + $0x1190] sm:$0xf]  ;;  %v16934_v13 = vor.u32 %v18967_v54, %v16933_v53  ;;  %10493 = vmatpush.bf16.msra.mxu2 %v16678_v59  ;;  %v10217_v53 = vadd.f32 %v10216_v47, %v21113_v8  ;;  %v10229_v54 = vpop.f32.mrf.mxu1 }
 0x62e   : > { %v18767_v63 = vld [vmem:[#allocation10 + $0x11ac] sm:$0xf0] }
 0x62f   : > { %v16389_v0 = vld [vmem:[#allocation10 + $0x1390] sm:$0xf]  ;;  %v16134_v18 = vor.u32 %v18767_v63, %v16133_v31  ;;  %10506 = vmatpush.bf16.msra.mxu3 %v16934_v13 }
 0x630   : > { %v18831_v1 = vld [vmem:[#allocation10 + $0x13ac] sm:$0xf0] }
 0x631   : > { %v16645_v2 = vld [vmem:[#allocation10 + $0x1590] sm:$0xf]  ;;  %v16390_v7 = vor.u32 %v18831_v1, %v16389_v0  ;;  %10468 = vmatpush.bf16.msra.mxu0 %v16134_v18  ;;  %v10230_v0 = vadd.f32 %v10229_v54, %v10217_v53  ;;  %v10242_v18 = vpop.f32.mrf.mxu2 }
 0x632   : > { %v18895_v14 = vld [vmem:[#allocation10 + $0x15ac] sm:$0xf0] }
 0x633   : > { %v16901_v5 = vld [vmem:[#allocation10 + $0x1790] sm:$0xf]  ;;  %v16646_v4 = vor.u32 %v18895_v14, %v16645_v2  ;;  %10481 = vmatpush.bf16.msra.mxu1 %v16390_v7 }
 0x634   : > { %v18959_v6 = vld [vmem:[#allocation10 + $0x17ac] sm:$0xf0] }
 0x635   : > { %v16101_v9 = vld [vmem:[#allocation10 + $0x1150] sm:$0xf]  ;;  %v16902_v23 = vor.u32 %v18959_v6, %v16901_v5  ;;  %10494 = vmatpush.bf16.msra.mxu2 %v16646_v4 }
 0x636   : > { %v18759_v33 = vld [vmem:[#allocation10 + $0x116c] sm:$0xf0] }
 0x637   : > { %v16357_v15 = vld [vmem:[#allocation10 + $0x1350] sm:$0xf]  ;;  %v16102_v36 = vor.u32 %v18759_v33, %v16101_v9  ;;  %10507 = vmatpush.bf16.msra.mxu3 %v16902_v23  ;;  %v10243_v33 = vadd.f32 %v10242_v18, %v10230_v0  ;;  %v18323_v18 = vld [vmem:[#allocation10 + $0x3d4] sm:$0xf] }
 0x638   : > { %v18823_v28 = vld [vmem:[#allocation10 + $0x136c] sm:$0xf0] }
 0x639   : > { %v16613_v29 = vld [vmem:[#allocation10 + $0x1550] sm:$0xf]  ;;  %v16358_v10 = vor.u32 %v18823_v28, %v16357_v15  ;;  %10469 = vmatpush.bf16.msra.mxu0 %v16102_v36  ;;  %v10255_v15 = vpop.f32.mrf.mxu3  ;;  %v10244_v53 = vpop.f32.mrf.mxu2 }
 0x63a   : > { %v18887_v34 = vld [vmem:[#allocation10 + $0x156c] sm:$0xf0] }
 0x63b   : > { %v16869_v35 = vld [vmem:[#allocation10 + $0x1750] sm:$0xf]  ;;  %v16614_v37 = vor.u32 %v18887_v34, %v16613_v29  ;;  %10482 = vmatpush.bf16.msra.mxu1 %v16358_v10  ;;  %v21120_v34 = vadd.f32 %v10255_v15, %v10243_v33 }
 0x63c   : > { %v18951_v27 = vld [vmem:[#allocation10 + $0x176c] sm:$0xf0] }
 0x63d   : > { %v16069_v41 = vld [vmem:[#allocation10 + $0x1110] sm:$0xf]  ;;  %v16870_v38 = vor.u32 %v18951_v27, %v16869_v35  ;;  %10495 = vmatpush.bf16.msra.mxu2 %v16614_v37  ;;  %v10218_v35 = vpop.f32.mrf.mxu0 }
 0x63e   : > { %v18751_v20 = vld [vmem:[#allocation10 + $0x112c] sm:$0xf0] }
 0x63f   : > { %v16325_v11 = vld [vmem:[#allocation10 + $0x1310] sm:$0xf]  ;;  %v16070_v3 = vor.u32 %v18751_v20, %v16069_v41  ;;  %10508 = vmatpush.bf16.msra.mxu3 %v16870_v38  ;;  %v10231_v20 = vpop.f32.mrf.mxu1 }
 0x640   : > { %v18815_v40 = vld [vmem:[#allocation10 + $0x132c] sm:$0xf0] }
 0x641   : > { %v16581_v45 = vld [vmem:[#allocation10 + $0x1510] sm:$0xf]  ;;  %v16326_v48 = vor.u32 %v18815_v40, %v16325_v11  ;;  %10470 = vmatpush.bf16.msra.mxu0 %v16070_v3 }
 0x642   : > { %v18879_v42 = vld [vmem:[#allocation10 + $0x152c] sm:$0xf0] }
 0x643   : > { %v16837_v43 = vld [vmem:[#allocation10 + $0x1710] sm:$0xf]  ;;  %v16582_v49 = vor.u32 %v18879_v42, %v16581_v45  ;;  %10483 = vmatpush.bf16.msra.mxu1 %v16326_v48 }
 0x644   : > { %v18943_v46 = vld [vmem:[#allocation10 + $0x172c] sm:$0xf0] }
 0x645   : > { %v16037_v57 = vld [vmem:[#allocation10 + $0x10d0] sm:$0xf]  ;;  %v16838_v55 = vor.u32 %v18943_v46, %v16837_v43  ;;  %10496 = vmatpush.bf16.msra.mxu2 %v16582_v49 }
 0x646   : > { %v18743_v50 = vld [vmem:[#allocation10 + $0x10ec] sm:$0xf0] }
 0x647   : > { %v16293_v51 = vld [vmem:[#allocation10 + $0x12d0] sm:$0xf]  ;;  %v16038_v13 = vor.u32 %v18743_v50, %v16037_v57  ;;  %10509 = vmatpush.bf16.msra.mxu3 %v16838_v55 }
 0x648   : > { %v18807_v56 = vld [vmem:[#allocation10 + $0x12ec] sm:$0xf0] }
 0x649   : > { %v16549_v58 = vld [vmem:[#allocation10 + $0x14d0] sm:$0xf]  ;;  %v16294_v1 = vor.u32 %v18807_v56, %v16293_v51  ;;  %10471 = vmatpush.bf16.msra.mxu0 %v16038_v13 }
 0x64a   : > { %v18871_v59 = vld [vmem:[#allocation10 + $0x14ec] sm:$0xf0] }
 0x64b   : > { %v16805_v31 = vld [vmem:[#allocation10 + $0x16d0] sm:$0xf]  ;;  %v16550_v2 = vor.u32 %v18871_v59, %v16549_v58  ;;  %10484 = vmatpush.bf16.msra.mxu1 %v16294_v1  ;;  %v10257_v59 = vpop.f32.mrf.mxu3 }
 0x64c   : > { %v18935_v63 = vld [vmem:[#allocation10 + $0x16ec] sm:$0xf0]  ;;  %v14023_v59 = vld [vmem:[#allocation10 + $0x130] sm:$0xf0] }
 0x64d   : > { %v16005_v14 = vld [vmem:[#allocation10 + $0x1090] sm:$0xf]  ;;  %v16806_v8 = vor.u32 %v18935_v63, %v16805_v31  ;;  %10497 = vmatpush.bf16.msra.mxu2 %v16550_v2  ;;  %v18259_v2 = vld [vmem:[#allocation10 + $0x1d4] sm:$0xf] }
 0x64e   : > { %v18735_v5 = vld [vmem:[#allocation10 + $0x10ac] sm:$0xf0] }
 0x64f   : > { %v16261_v6 = vld [vmem:[#allocation10 + $0x1290] sm:$0xf]  ;;  %v16006_v29 = vor.u32 %v18735_v5, %v16005_v14  ;;  %10510 = vmatpush.bf16.msra.mxu3 %v16806_v8  ;;  %v14119_v14 = vld [vmem:[#allocation10 + $0x1f0] sm:$0xf0] }
 0x650   : > { %v18799_v7 = vld [vmem:[#allocation10 + $0x12ac] sm:$0xf0]  ;;  %v14375_v8 = vld [vmem:[#allocation10 + $0x3f0] sm:$0xf0]  ;;  %v14122_v33 = vor.u32 %v18259_v2, %v14119_v14  ;;  %v10281_v2 = vpop.f32.mrf.mxu1 }
 0x651   : > { %v16517_v4 = vld [vmem:[#allocation10 + $0x1490] sm:$0xf]  ;;  %v16262_v27 = vor.u32 %v18799_v7, %v16261_v6  ;;  %10472 = vmatpush.bf16.msra.mxu0 %v16006_v29  ;;  %v14378_v29 = vor.u32 %v18323_v18, %v14375_v8 }
 0x652   : > { %v18863_v9 = vld [vmem:[#allocation10 + $0x14ac] sm:$0xf0] }
 0x653   : > { %v16773_v23 = vld [vmem:[#allocation10 + $0x1690] sm:$0xf]  ;;  %v16518_v36 = vor.u32 %v18863_v9, %v16517_v4  ;;  %10485 = vmatpush.bf16.msra.mxu1 %v16262_v27  ;;  %v18251_v27 = vld [vmem:[#allocation10 + $0x194] sm:$0xf] }
 0x654   : > { %v18927_v28 = vld [vmem:[#allocation10 + $0x16ac] sm:$0xf0] }
 0x655   : > { %v15973_v10 = vld [vmem:[#allocation10 + $0x1050] sm:$0xf]  ;;  %v16774_v11 = vor.u32 %v18927_v28, %v16773_v23  ;;  %10498 = vmatpush.bf16.msra.mxu2 %v16518_v36  ;;  %v14087_v36 = vld [vmem:[#allocation10 + $0x1b0] sm:$0xf0] }
 0x656   : > { %v18727_v37 = vld [vmem:[#allocation10 + $0x106c] sm:$0xf0] }
 0x657   : > { %v16229_v41 = vld [vmem:[#allocation10 + $0x1250] sm:$0xf]  ;;  %v15974_v46 = vor.u32 %v18727_v37, %v15973_v10  ;;  %10511 = vmatpush.bf16.msra.mxu3 %v16774_v11  ;;  %v18315_v10 = vld [vmem:[#allocation10 + $0x394] sm:$0xf]  ;;  %v14090_v11 = vor.u32 %v18251_v27, %v14087_v36 }
 0x658   : > { %v18791_v38 = vld [vmem:[#allocation10 + $0x126c] sm:$0xf0]  ;;  %v14343_v37 = vld [vmem:[#allocation10 + $0x3b0] sm:$0xf0] }
 0x659   : > { %v16485_v40 = vld [vmem:[#allocation10 + $0x1450] sm:$0xf]  ;;  %v16230_v48 = vor.u32 %v18791_v38, %v16229_v41  ;;  %10473 = vmatpush.bf16.msra.mxu0 %v15974_v46  ;;  %v18243_v46 = vld [vmem:[#allocation10 + $0x154] sm:$0xf] }
 0x65a   : > { %v18855_v45 = vld [vmem:[#allocation10 + $0x146c] sm:$0xf0] }
 0x65b   : > { %v16741_v42 = vld [vmem:[#allocation10 + $0x1650] sm:$0xf]  ;;  %v16486_v49 = vor.u32 %v18855_v45, %v16485_v40  ;;  %10486 = vmatpush.bf16.msra.mxu1 %v16230_v48  ;;  %v14311_v48 = vld [vmem:[#allocation10 + $0x370] sm:$0xf0] }
 0x65c   : > { %v18919_v43 = vld [vmem:[#allocation10 + $0x166c] sm:$0xf0] }
 0x65d   : > { %v15941_v3 = vld [vmem:[#allocation10 + $0x1010] sm:$0xf]  ;;  %v16742_v54 = vor.u32 %v18919_v43, %v16741_v42  ;;  %10499 = vmatpush.bf16.msra.mxu2 %v16486_v49  ;;  %v14346_v42 = vor.u32 %v18315_v10, %v14343_v37 }
 0x65e   : > { %v18719_v47 = vld [vmem:[#allocation10 + $0x102c] sm:$0xf0] }
 0x65f   : > { %v16197_v57 = vld [vmem:[#allocation10 + $0x1210] sm:$0xf]  ;;  %v15942_v13 = vor.u32 %v18719_v47, %v15941_v3  ;;  %10512 = vmatpush.bf16.msra.mxu3 %v16742_v54  ;;  %v14055_v3 = vld [vmem:[#allocation10 + $0x170] sm:$0xf0] }
 0x660   : > { %v18783_v50 = vld [vmem:[#allocation10 + $0x122c] sm:$0xf0]  ;;  %v18307_v47 = vld [vmem:[#allocation10 + $0x354] sm:$0xf] }
 0x661   : > { %v16453_v51 = vld [vmem:[#allocation10 + $0x1410] sm:$0xf]  ;;  %v16198_v5 = vor.u32 %v18783_v50, %v16197_v57  ;;  %10474 = vmatpush.bf16.msra.mxu0 %v15942_v13  ;;  %v14058_v50 = vor.u32 %v18243_v46, %v14055_v3 }
 0x662   : > { %v18847_v55 = vld [vmem:[#allocation10 + $0x142c] sm:$0xf0] }
 0x663   : > { %v16709_v56 = vld [vmem:[#allocation10 + $0x1610] sm:$0xf]  ;;  %v16454_v6 = vor.u32 %v18847_v55, %v16453_v51  ;;  %10487 = vmatpush.bf16.msra.mxu1 %v16198_v5  ;;  %v14314_v55 = vor.u32 %v18307_v47, %v14311_v48  ;;  %v10283_v47 = vpop.f32.mrf.mxu1 }
 0x664   : > { %v18911_v58 = vld [vmem:[#allocation10 + $0x162c] sm:$0xf0]  ;;  %10475 = vmatmul.bf16.vlgmr.msra.gmra.mxu0 %v21009_v16  ;;  %v18507_v47 = vld [vmem:[#allocation10 + $0x994] sm:$0xf] }
 0x665   : > { %v17189_v31 = vld [vmem:[#allocation10 + $0x19d0] sm:$0xf]  ;;  %v16710_v7 = vor.u32 %v18911_v58, %v16709_v56  ;;  %10500 = vmatpush.bf16.msra.mxu2 %v16454_v6  ;;  %v18235_v58 = vld [vmem:[#allocation10 + $0x114] sm:$0xf] }
 0x666   : > { %v19031_v63 = vld [vmem:[#allocation10 + $0x19ec] sm:$0xf0]  ;;  %10488 = vmatmul.bf16.vlgmr.msra.gmra.mxu1 %v21013_v26  ;;  %v14026_v5 = vor.u32 %v18235_v58, %v14023_v59  ;;  %v13927_v58 = vld [vmem:[#allocation10 + $0x70] sm:$0xf0] }
 0x667   : > { %v17445_v0 = vld [vmem:[#allocation10 + $0x1bd0] sm:$0xf]  ;;  %v17190_v4 = vor.u32 %v19031_v63, %v17189_v31  ;;  %10513 = vmatpush.bf16.msra.mxu3 %v16710_v7  ;;  %v10268_v31 = vpop.f32.mrf.mxu0  ;;  %v18299_v63 = vld [vmem:[#allocation10 + $0x314] sm:$0xf] }
 0x668   : > { %v19095_v1 = vld [vmem:[#allocation10 + $0x1bec] sm:$0xf0]  ;;  %10501 = vmatmul.bf16.vlgmr.msra.gmra.mxu2 %v21011_v25  ;;  %v10269_v13 = vadd.f32 %v10268_v31, %v21120_v34  ;;  %v18275_v59 = vld [vmem:[#allocation10 + $0x254] sm:$0xf] }
 0x669   : > { %v17446_v9 = vor.u32 %v19095_v1, %v17445_v0  ;;  %v17157_v15 = vld [vmem:[#allocation10 + $0x1990] sm:$0xf]  ;;  %10519 = vmatpush.bf16.msrb.mxu0 %v17190_v4  ;;  %10545 = vmatpush.bf16.msrb.mxu2 %v14122_v33  ;;  %v14279_v0 = vld [vmem:[#allocation10 + $0x330] sm:$0xf0] }
 0x66a   : > { %v19023_v23 = vld [vmem:[#allocation10 + $0x19ac] sm:$0xf0]  ;;  %10514 = vmatmul.bf16.vlgmr.msra.gmra.mxu3 %v21015_v30  ;;  %v14282_v7 = vor.u32 %v18299_v63, %v14279_v0  ;;  %v10282_v4 = vadd.f32 %v10281_v2, %v10269_v13  ;;  %v18227_v33 = vld [vmem:[#allocation10 + $0xd4] sm:$0xf] }
 0x66b   : > { %v17413_v28 = vld [vmem:[#allocation10 + $0x1b90] sm:$0xf]  ;;  %v17158_v41 = vor.u32 %v19023_v23, %v17157_v15  ;;  %10532 = vmatpush.bf16.msrb.mxu1 %v17446_v9  ;;  %10558 = vmatpush.bf16.msrb.mxu3 %v14378_v29  ;;  %v13991_v15 = vld [vmem:[#allocation10 + $0xf0] sm:$0xf0] }
 0x66c   : > { %v19087_v35 = vld [vmem:[#allocation10 + $0x1bac] sm:$0xf0]  ;;  %v18291_v23 = vld [vmem:[#allocation10 + $0x2d4] sm:$0xf] }
 0x66d   : > { %v17414_v20 = vor.u32 %v19087_v35, %v17413_v28  ;;  %v17125_v38 = vld [vmem:[#allocation10 + $0x1950] sm:$0xf]  ;;  %10520 = vmatpush.bf16.msrb.mxu0 %v17158_v41  ;;  %10546 = vmatpush.bf16.msrb.mxu2 %v14090_v11  ;;  %v14247_v28 = vld [vmem:[#allocation10 + $0x2f0] sm:$0xf0]  ;;  %v13994_v35 = vor.u32 %v18227_v33, %v13991_v15  ;;  %v10294_v41 = vpop.f32.mrf.mxu2 }
 0x66e   : > { %v19015_v40 = vld [vmem:[#allocation10 + $0x196c] sm:$0xf0]  ;;  %v14250_v37 = vor.u32 %v18291_v23, %v14247_v28  ;;  %v18219_v11 = vld [vmem:[#allocation10 + $0x94] sm:$0xf] }
 0x66f   : > { %v17381_v45 = vld [vmem:[#allocation10 + $0x1b50] sm:$0xf]  ;;  %v17126_v49 = vor.u32 %v19015_v40, %v17125_v38  ;;  %10533 = vmatpush.bf16.msrb.mxu1 %v17414_v20  ;;  %10559 = vmatpush.bf16.msrb.mxu3 %v14346_v42  ;;  %v13959_v38 = vld [vmem:[#allocation10 + $0xb0] sm:$0xf0]  ;;  %v10295_v40 = vadd.f32 %v10294_v41, %v10282_v4  ;;  %v10270_v46 = vpop.f32.mrf.mxu0 }
 0x670   : > { %v19079_v43 = vld [vmem:[#allocation10 + $0x1b6c] sm:$0xf0]  ;;  %v18283_v42 = vld [vmem:[#allocation10 + $0x294] sm:$0xf] }
 0x671   : > { %v17382_v57 = vor.u32 %v19079_v43, %v17381_v45  ;;  %v17093_v51 = vld [vmem:[#allocation10 + $0x1910] sm:$0xf]  ;;  %10521 = vmatpush.bf16.msrb.mxu0 %v17126_v49  ;;  %10547 = vmatpush.bf16.msrb.mxu2 %v14058_v50  ;;  %v10307_v45 = vpop.f32.mrf.mxu3  ;;  %v14215_v43 = vld [vmem:[#allocation10 + $0x2b0] sm:$0xf0] }
 0x672   : > { %v19007_v53 = vld [vmem:[#allocation10 + $0x192c] sm:$0xf0]  ;;  %v21127_v48 = vadd.f32 %v10307_v45, %v10295_v40  ;;  %v14183_v31 = vld [vmem:[#allocation10 + $0x270] sm:$0xf0] }
 0x673   : > { %v17349_v54 = vld [vmem:[#allocation10 + $0x1b10] sm:$0xf]  ;;  %v17094_v1 = vor.u32 %v19007_v53, %v17093_v51  ;;  %10534 = vmatpush.bf16.msrb.mxu1 %v17382_v57  ;;  %10560 = vmatpush.bf16.msrb.mxu3 %v14314_v55  ;;  %v13962_v57 = vor.u32 %v18219_v11, %v13959_v38  ;;  %v14151_v4 = vld [vmem:[#allocation10 + $0x230] sm:$0xf0] }
 0x674   : > { %v19071_v56 = vld [vmem:[#allocation10 + $0x1b2c] sm:$0xf0]  ;;  %v18387_v33 = vld [vmem:[#allocation10 + $0x5d4] sm:$0xf] }
 0x675   : > { %v17350_v14 = vor.u32 %v19071_v56, %v17349_v54  ;;  %v17061_v6 = vld [vmem:[#allocation10 + $0x18d0] sm:$0xf]  ;;  %10522 = vmatpush.bf16.msrb.mxu0 %v17094_v1  ;;  %10548 = vmatpush.bf16.msrb.mxu2 %v14026_v5  ;;  %v14218_v54 = vor.u32 %v18283_v42, %v14215_v43  ;;  %v18211_v56 = vld [vmem:[#allocation10 + $0x54] sm:$0xf] }
 0x676   : > { %v18999_v18 = vld [vmem:[#allocation10 + $0x18ec] sm:$0xf0]  ;;  %v13930_v2 = vor.u32 %v18211_v56, %v13927_v58  ;;  %v14631_v15 = vld [vmem:[#allocation10 + $0x5f0] sm:$0xf0] }
 0x677   : > { %v17317_v8 = vld [vmem:[#allocation10 + $0x1ad0] sm:$0xf]  ;;  %v17062_v29 = vor.u32 %v18999_v18, %v17061_v6  ;;  %10535 = vmatpush.bf16.msrb.mxu1 %v17350_v14  ;;  %10561 = vmatpush.bf16.msrb.mxu3 %v14282_v7  ;;  %v18203_v6 = vld [vmem:[#allocation10 + $0x14] sm:$0xf]  ;;  %v14186_v18 = vor.u32 %v18275_v59, %v14183_v31  ;;  %v14634_v11 = vor.u32 %v18387_v33, %v14631_v15  ;;  %v10320_v15 = vpop.f32.mrf.mxu0 }
 0x678   : > { %v19063_v9 = vld [vmem:[#allocation10 + $0x1aec] sm:$0xf0]  ;;  %v18267_v7 = vld [vmem:[#allocation10 + $0x214] sm:$0xf] }
 0x679   : > { %v17318_v34 = vor.u32 %v19063_v9, %v17317_v8  ;;  %v17029_v27 = vld [vmem:[#allocation10 + $0x1890] sm:$0xf]  ;;  %10523 = vmatpush.bf16.msrb.mxu0 %v17062_v29  ;;  %10549 = vmatpush.bf16.msrb.mxu2 %v13994_v35  ;;  %v13895_v8 = vld [vmem:[#allocation10 + $0x30] sm:$0xf0]  ;;  %v10296_v9 = vpop.f32.mrf.mxu2  ;;  %v10309_v28 = vpop.f32.mrf.mxu3 }
 0x67a   : > { %v18991_v36 = vld [vmem:[#allocation10 + $0x18ac] sm:$0xf0]  ;;  %v18451_v23 = vld [vmem:[#allocation10 + $0x7d4] sm:$0xf] }
 0x67b   : > { %v17285_v10 = vld [vmem:[#allocation10 + $0x1a90] sm:$0xf]  ;;  %v17030_v3 = vor.u32 %v18991_v36, %v17029_v27  ;;  %10536 = vmatpush.bf16.msrb.mxu1 %v17318_v34  ;;  %10562 = vmatpush.bf16.msrb.mxu3 %v14250_v37  ;;  %v14887_v34 = vld [vmem:[#allocation10 + $0x7f0] sm:$0xf0] }
 0x67c   : > { %v19055_v20 = vld [vmem:[#allocation10 + $0x1aac] sm:$0xf0]  ;;  %v18515_v35 = vld [vmem:[#allocation10 + $0x9d4] sm:$0xf]  ;;  %v14890_v38 = vor.u32 %v18451_v23, %v14887_v34 }
 0x67d   : > { %v17286_v49 = vor.u32 %v19055_v20, %v17285_v10  ;;  %v16997_v50 = vld [vmem:[#allocation10 + $0x1850] sm:$0xf]  ;;  %10524 = vmatpush.bf16.msrb.mxu0 %v17030_v3  ;;  %10550 = vmatpush.bf16.msrb.mxu2 %v13962_v57  ;;  %v15143_v27 = vld [vmem:[#allocation10 + $0x9f0] sm:$0xf0]  ;;  %v13898_v10 = vor.u32 %v18203_v6, %v13895_v8  ;;  %v14154_v20 = vor.u32 %v18267_v7, %v14151_v4 }
 0x67e   : > { %v18983_v51 = vld [vmem:[#allocation10 + $0x186c] sm:$0xf0]  ;;  %v18579_v37 = vld [vmem:[#allocation10 + $0xbd4] sm:$0xf]  ;;  %v15146_v40 = vor.u32 %v18515_v35, %v15143_v27  ;;  %v10333_v35 = vpop.f32.mrf.mxu1 }
 0x67f   : > { %v17253_v53 = vld [vmem:[#allocation10 + $0x1a50] sm:$0xf]  ;;  %v16998_v63 = vor.u32 %v18983_v51, %v16997_v50  ;;  %10537 = vmatpush.bf16.msrb.mxu1 %v17286_v49  ;;  %10563 = vmatpush.bf16.msrb.mxu3 %v14218_v54  ;;  %v15399_v41 = vld [vmem:[#allocation10 + $0xbf0] sm:$0xf0] }
 0x680   : > { %v19047_v55 = vld [vmem:[#allocation10 + $0x1a6c] sm:$0xf0]  ;;  %v18379_v45 = vld [vmem:[#allocation10 + $0x594] sm:$0xf]  ;;  %v15402_v46 = vor.u32 %v18579_v37, %v15399_v41 }
 0x681   : > { %v16965_v0 = vld [vmem:[#allocation10 + $0x1810] sm:$0xf]  ;;  %v17254_v1 = vor.u32 %v19047_v55, %v17253_v53  ;;  %10525 = vmatpush.bf16.msrb.mxu0 %v16998_v63  ;;  %10551 = vmatpush.bf16.msrb.mxu2 %v13930_v2  ;;  %v14599_v42 = vld [vmem:[#allocation10 + $0x5b0] sm:$0xf0] }
 0x682   : > { %v18975_v13 = vld [vmem:[#allocation10 + $0x182c] sm:$0xf0]  ;;  %v18443_v43 = vld [vmem:[#allocation10 + $0x794] sm:$0xf]  ;;  %v14602_v51 = vor.u32 %v18379_v45, %v14599_v42 }
 0x683   : > { %v17221_v14 = vld [vmem:[#allocation10 + $0x1a10] sm:$0xf]  ;;  %v16966_v29 = vor.u32 %v18975_v13, %v16965_v0  ;;  %10538 = vmatpush.bf16.msrb.mxu1 %v17254_v1  ;;  %10564 = vmatpush.bf16.msrb.mxu3 %v14186_v18  ;;  %v14855_v3 = vld [vmem:[#allocation10 + $0x7b0] sm:$0xf0] }
 0x684   : > { %v19039_v5 = vld [vmem:[#allocation10 + $0x1a2c] sm:$0xf0]  ;;  %v15111_v49 = vld [vmem:[#allocation10 + $0x9b0] sm:$0xf0]  ;;  %v14858_v53 = vor.u32 %v18443_v43, %v14855_v3 }
 0x685   : > { %v17222_v36 = vor.u32 %v19039_v5, %v17221_v14  ;;  %10526 = vmatpush.bf16.msrb.mxu0 %v16966_v29  ;;  %10552 = vmatpush.bf16.msrb.mxu2 %v13898_v10  ;;  %v18571_v57 = vld [vmem:[#allocation10 + $0xb94] sm:$0xf]  ;;  %v15114_v54 = vor.u32 %v18507_v47, %v15111_v49  ;;  %v10321_v29 = vadd.f32 %v10320_v15, %v21127_v48 }
 0x686   : > { %v15367_v50 = vld [vmem:[#allocation10 + $0xbb0] sm:$0xf0] }
 0x687   : > { %10539 = vmatpush.bf16.msrb.mxu1 %v17222_v36  ;;  %10565 = vmatpush.bf16.msrb.mxu3 %v14154_v20  ;;  %v18371_v55 = vld [vmem:[#allocation10 + $0x554] sm:$0xf]  ;;  %v15370_v59 = vor.u32 %v18571_v57, %v15367_v50 }
 0x688   : > { %v14567_v56 = vld [vmem:[#allocation10 + $0x570] sm:$0xf0]  ;;  %10527 = vmatmul.bf16.vlgmr.msrb.gmra.mxu0 %v21023_v19  ;;  %10553 = vmatmul.bf16.vlgmr.msrb.gmra.mxu2 %v20977_v61 }
 0x689   : > { %10571 = vmatpush.bf16.msra.mxu0 %v14634_v11  ;;  %10597 = vmatpush.bf16.msra.mxu2 %v15146_v40  ;;  %v18435_v58 = vld [vmem:[#allocation10 + $0x754] sm:$0xf]  ;;  %v14570_v2 = vor.u32 %v18371_v55, %v14567_v56  ;;  %v10334_v11 = vadd.f32 %v10333_v35, %v10321_v29 }
 0x68a   : > { %v14823_v31 = vld [vmem:[#allocation10 + $0x770] sm:$0xf0]  ;;  %10540 = vmatmul.bf16.vlgmr.msrb.gmra.mxu1 %v21025_v32  ;;  %10566 = vmatmul.bf16.vlgmr.msrb.gmra.mxu3 %v20982_v12 }
 0x68b   : > { %10584 = vmatpush.bf16.msra.mxu1 %v14890_v38  ;;  %10610 = vmatpush.bf16.msra.mxu3 %v15402_v46  ;;  %v18499_v63 = vld [vmem:[#allocation10 + $0x954] sm:$0xf]  ;;  %v14826_v14 = vor.u32 %v18435_v58, %v14823_v31  ;;  %v10359_v58 = vpop.f32.mrf.mxu3 }
 0x68c   : > { %v15079_v0 = vld [vmem:[#allocation10 + $0x970] sm:$0xf0] }
 0x68d   : > { %v18563_v13 = vld [vmem:[#allocation10 + $0xb54] sm:$0xf]  ;;  %10572 = vmatpush.bf16.msra.mxu0 %v14602_v51  ;;  %10598 = vmatpush.bf16.msra.mxu2 %v15114_v54  ;;  %v15082_v5 = vor.u32 %v18499_v63, %v15079_v0  ;;  %v10346_v51 = vpop.f32.mrf.mxu2  ;;  %v10322_v63 = vpop.f32.mrf.mxu0 }
 0x68e   : > { %v15335_v1 = vld [vmem:[#allocation10 + $0xb70] sm:$0xf0]  ;;  %v10347_v56 = vadd.f32 %v10346_v51, %v10334_v11 }
 0x68f   : > { %10585 = vmatpush.bf16.msra.mxu1 %v14858_v53  ;;  %v18363_v6 = vld [vmem:[#allocation10 + $0x514] sm:$0xf]  ;;  %10611 = vmatpush.bf16.msra.mxu3 %v15370_v59  ;;  %v15338_v7 = vor.u32 %v18563_v13, %v15335_v1  ;;  %v10335_v13 = vpop.f32.mrf.mxu1 }
 0x690   : > { %v14535_v18 = vld [vmem:[#allocation10 + $0x530] sm:$0xf0]  ;;  %v21134_v1 = vadd.f32 %v10359_v58, %v10347_v56 }
 0x691   : > { %v18427_v8 = vld [vmem:[#allocation10 + $0x714] sm:$0xf]  ;;  %10573 = vmatpush.bf16.msra.mxu0 %v14570_v2  ;;  %v14538_v34 = vor.u32 %v18363_v6, %v14535_v18  ;;  %10599 = vmatpush.bf16.msra.mxu2 %v15082_v5 }
 0x692   : > { %v14791_v4 = vld [vmem:[#allocation10 + $0x730] sm:$0xf0] }
 0x693   : > { %v18491_v9 = vld [vmem:[#allocation10 + $0x914] sm:$0xf]  ;;  %10586 = vmatpush.bf16.msra.mxu1 %v14826_v14  ;;  %v14794_v27 = vor.u32 %v18427_v8, %v14791_v4  ;;  %10612 = vmatpush.bf16.msra.mxu3 %v15338_v7 }
 0x694   : > { %v15047_v33 = vld [vmem:[#allocation10 + $0x930] sm:$0xf0] }
 0x695   : > { %v18555_v23 = vld [vmem:[#allocation10 + $0xb14] sm:$0xf]  ;;  %v15050_v36 = vor.u32 %v18491_v9, %v15047_v33  ;;  %10574 = vmatpush.bf16.msra.mxu0 %v14538_v34 }
 0x696   : > { %v15303_v28 = vld [vmem:[#allocation10 + $0xb30] sm:$0xf0] }
 0x697   : > { %v18355_v10 = vld [vmem:[#allocation10 + $0x4d4] sm:$0xf]  ;;  %v15306_v20 = vor.u32 %v18555_v23, %v15303_v28  ;;  %10587 = vmatpush.bf16.msra.mxu1 %v14794_v27  ;;  %10600 = vmatpush.bf16.msra.mxu2 %v15050_v36 }
 0x698   : > { %v14503_v37 = vld [vmem:[#allocation10 + $0x4f0] sm:$0xf0] }
 0x699   : > { %v18419_v41 = vld [vmem:[#allocation10 + $0x6d4] sm:$0xf]  ;;  %v14506_v46 = vor.u32 %v18355_v10, %v14503_v37  ;;  %10613 = vmatpush.bf16.msra.mxu3 %v15306_v20 }
 0x69a   : > { %v14759_v38 = vld [vmem:[#allocation10 + $0x6f0] sm:$0xf0] }
 0x69b   : > { %v18483_v40 = vld [vmem:[#allocation10 + $0x8d4] sm:$0xf]  ;;  %v14762_v48 = vor.u32 %v18419_v41, %v14759_v38  ;;  %10575 = vmatpush.bf16.msra.mxu0 %v14506_v46  ;;  %v10348_v38 = vpop.f32.mrf.mxu2 }
 0x69c   : > { %v15015_v45 = vld [vmem:[#allocation10 + $0x8f0] sm:$0xf0] }
 0x69d   : > { %v18547_v42 = vld [vmem:[#allocation10 + $0xad4] sm:$0xf]  ;;  %v15018_v3 = vor.u32 %v18483_v40, %v15015_v45  ;;  %10588 = vmatpush.bf16.msra.mxu1 %v14762_v48 }
 0x69e   : > { %v15271_v43 = vld [vmem:[#allocation10 + $0xaf0] sm:$0xf0] }
 0x69f   : > { %v18347_v47 = vld [vmem:[#allocation10 + $0x494] sm:$0xf]  ;;  %v15274_v50 = vor.u32 %v18547_v42, %v15271_v43  ;;  %10601 = vmatpush.bf16.msra.mxu2 %v15018_v3  ;;  %v10361_v43 = vpop.f32.mrf.mxu3 }
 0x6a0   : > { %v14471_v49 = vld [vmem:[#allocation10 + $0x4b0] sm:$0xf0] }
 0x6a1   : > { %v18411_v57 = vld [vmem:[#allocation10 + $0x694] sm:$0xf]  ;;  %v14474_v0 = vor.u32 %v18347_v47, %v14471_v49  ;;  %10614 = vmatpush.bf16.msra.mxu3 %v15274_v50 }
 0x6a2   : > { %v14727_v53 = vld [vmem:[#allocation10 + $0x6b0] sm:$0xf0] }
 0x6a3   : > { %v18475_v54 = vld [vmem:[#allocation10 + $0x894] sm:$0xf]  ;;  %v14730_v2 = vor.u32 %v18411_v57, %v14727_v53  ;;  %10576 = vmatpush.bf16.msra.mxu0 %v14474_v0 }
 0x6a4   : > { %v14983_v55 = vld [vmem:[#allocation10 + $0x8b0] sm:$0xf0] }
 0x6a5   : > { %v18539_v59 = vld [vmem:[#allocation10 + $0xa94] sm:$0xf]  ;;  %v14986_v14 = vor.u32 %v18475_v54, %v14983_v55  ;;  %10589 = vmatpush.bf16.msra.mxu1 %v14730_v2 }
 0x6a6   : > { %v15239_v31 = vld [vmem:[#allocation10 + $0xab0] sm:$0xf0] }
 0x6a7   : > { %v18339_v5 = vld [vmem:[#allocation10 + $0x454] sm:$0xf]  ;;  %v15242_v8 = vor.u32 %v18539_v59, %v15239_v31  ;;  %10602 = vmatpush.bf16.msra.mxu2 %v14986_v14 }
 0x6a8   : > { %v14439_v6 = vld [vmem:[#allocation10 + $0x470] sm:$0xf0] }
 0x6a9   : > { %v18403_v18 = vld [vmem:[#allocation10 + $0x654] sm:$0xf]  ;;  %v14442_v23 = vor.u32 %v18339_v5, %v14439_v6  ;;  %10615 = vmatpush.bf16.msra.mxu3 %v15242_v8 }
 0x6aa   : > { %v14695_v7 = vld [vmem:[#allocation10 + $0x670] sm:$0xf0] }
 0x6ab   : > { %v18467_v4 = vld [vmem:[#allocation10 + $0x854] sm:$0xf]  ;;  %v14698_v34 = vor.u32 %v18403_v18, %v14695_v7  ;;  %10577 = vmatpush.bf16.msra.mxu0 %v14442_v23 }
 0x6ac   : > { %v14951_v9 = vld [vmem:[#allocation10 + $0x870] sm:$0xf0] }
 0x6ad   : > { %v18531_v33 = vld [vmem:[#allocation10 + $0xa54] sm:$0xf]  ;;  %v14954_v35 = vor.u32 %v18467_v4, %v14951_v9  ;;  %10590 = vmatpush.bf16.msra.mxu1 %v14698_v34 }
 0x6ae   : > { %v15207_v15 = vld [vmem:[#allocation10 + $0xa70] sm:$0xf0] }
 0x6af   : > { %v18331_v28 = vld [vmem:[#allocation10 + $0x414] sm:$0xf]  ;;  %v15210_v37 = vor.u32 %v18531_v33, %v15207_v15  ;;  %10603 = vmatpush.bf16.msra.mxu2 %v14954_v35 }
 0x6b0   : > { %v14407_v29 = vld [vmem:[#allocation10 + $0x430] sm:$0xf0] }
 0x6b1   : > { %v18395_v27 = vld [vmem:[#allocation10 + $0x614] sm:$0xf]  ;;  %v14410_v46 = vor.u32 %v18331_v28, %v14407_v29  ;;  %10616 = vmatpush.bf16.msra.mxu3 %v15210_v37 }
 0x6b2   : > { %v14663_v36 = vld [vmem:[#allocation10 + $0x630] sm:$0xf0] }
 0x6b3   : > { %v18459_v10 = vld [vmem:[#allocation10 + $0x814] sm:$0xf]  ;;  %v14666_v49 = vor.u32 %v18395_v27, %v14663_v36  ;;  %10578 = vmatpush.bf16.msra.mxu0 %v14410_v46 }
 0x6b4   : > { %v14919_v41 = vld [vmem:[#allocation10 + $0x830] sm:$0xf0] }
 0x6b5   : > { %v18523_v20 = vld [vmem:[#allocation10 + $0xa14] sm:$0xf]  ;;  %v14922_v57 = vor.u32 %v18459_v10, %v14919_v41  ;;  %10591 = vmatpush.bf16.msra.mxu1 %v14666_v49 }
 0x6b6   : > { %v15175_v11 = vld [vmem:[#allocation10 + $0xa30] sm:$0xf0]  ;;  %10579 = vmatmul.bf16.vlgmr.msra.gmra.mxu0 %v20975_v60 }
 0x6b7   : > { %v18643_v40 = vld [vmem:[#allocation10 + $0xdd4] sm:$0xf]  ;;  %v15178_v53 = vor.u32 %v18523_v20, %v15175_v11  ;;  %10604 = vmatpush.bf16.msra.mxu2 %v14922_v57  ;;  %v21140_v20 = vld [vmem:[#allocation12] sm:$0xff] }
 0x6b8   : > { %v15655_v45 = vld [vmem:[#allocation10 + $0xdf0] sm:$0xf0]  ;;  %10592 = vmatmul.bf16.vlgmr.msra.gmra.mxu1 %v20979_v62  ;;  %v5143_v11 = vperm.slane %v21140_v20, 4 }
 0x6b9   : > { %v18707_v42 = vld [vmem:[#allocation10 + $0xfd4] sm:$0xf]  ;;  %v15658_v54 = vor.u32 %v18643_v40, %v15655_v45  ;;  %10617 = vmatpush.bf16.msra.mxu3 %v15178_v53 }
 0x6ba   : > { %v15911_v48 = vld [vmem:[#allocation10 + $0xff0] sm:$0xf0]  ;;  %10605 = vmatmul.bf16.vlgmr.msra.gmra.mxu2 %v20993_v21 }
 0x6bb   : > { %v18771_v3 = vld [vmem:[#allocation10 + $0x11d4] sm:$0xf]  ;;  %v15914_v55 = vor.u32 %v18707_v42, %v15911_v48  ;;  %10623 = vmatpush.bf16.msrb.mxu0 %v15658_v54  ;;  %v10385_v54 = vpop.f32.mrf.mxu1 }
 0x6bc   : > { %v16167_v47 = vld [vmem:[#allocation10 + $0x11f0] sm:$0xf0]  ;;  %10618 = vmatmul.bf16.vlgmr.msra.gmra.mxu3 %v20997_v24 }
 0x6bd   : > { %v18835_v50 = vld [vmem:[#allocation10 + $0x13d4] sm:$0xf]  ;;  %v16170_v56 = vor.u32 %v18771_v3, %v16167_v47  ;;  %10636 = vmatpush.bf16.msrb.mxu1 %v15914_v55  ;;  %v10372_v3 = vpop.f32.mrf.mxu0 }
 0x6be   : > { %v16423_v51 = vld [vmem:[#allocation10 + $0x13f0] sm:$0xf0]  ;;  %v10373_v53 = vadd.f32 %v10372_v3, %v5143_v11 }
 0x6bf   : > { %v18635_v58 = vld [vmem:[#allocation10 + $0xd94] sm:$0xf]  ;;  %v16426_v63 = vor.u32 %v18835_v50, %v16423_v51  ;;  %10649 = vmatpush.bf16.msrb.mxu2 %v16170_v56 }
 0x6c0   : > { %v15623_v59 = vld [vmem:[#allocation10 + $0xdb0] sm:$0xf0] }
 0x6c1   : > { %v18699_v31 = vld [vmem:[#allocation10 + $0xf94] sm:$0xf]  ;;  %v15626_v6 = vor.u32 %v18635_v58, %v15623_v59  ;;  %10662 = vmatpush.bf16.msrb.mxu3 %v16426_v63 }
 0x6c2   : > { %v15879_v0 = vld [vmem:[#allocation10 + $0xfb0] sm:$0xf0] }
 0x6c3   : > { %v18763_v13 = vld [vmem:[#allocation10 + $0x1194] sm:$0xf]  ;;  %v15882_v18 = vor.u32 %v18699_v31, %v15879_v0  ;;  %10624 = vmatpush.bf16.msrb.mxu0 %v15626_v6  ;;  %v10386_v0 = vadd.f32 %v10385_v54, %v10373_v53 }
 0x6c4   : > { %v16135_v2 = vld [vmem:[#allocation10 + $0x11b0] sm:$0xf0] }
 0x6c5   : > { %v18827_v14 = vld [vmem:[#allocation10 + $0x1394] sm:$0xf]  ;;  %v16138_v8 = vor.u32 %v18763_v13, %v16135_v2  ;;  %10637 = vmatpush.bf16.msrb.mxu1 %v15882_v18 }
 0x6c6   : > { %v16391_v5 = vld [vmem:[#allocation10 + $0x13b0] sm:$0xf0] }
 0x6c7   : > { %v18627_v7 = vld [vmem:[#allocation10 + $0xd54] sm:$0xf]  ;;  %v16394_v33 = vor.u32 %v18827_v14, %v16391_v5  ;;  %10650 = vmatpush.bf16.msrb.mxu2 %v16138_v8  ;;  %v10398_v8 = vpop.f32.mrf.mxu2 }
 0x6c8   : > { %v15591_v4 = vld [vmem:[#allocation10 + $0xd70] sm:$0xf0] }
 0x6c9   : > { %v18691_v9 = vld [vmem:[#allocation10 + $0xf54] sm:$0xf]  ;;  %v15594_v35 = vor.u32 %v18627_v7, %v15591_v4  ;;  %10663 = vmatpush.bf16.msrb.mxu3 %v16394_v33 }
 0x6ca   : > { %v15847_v15 = vld [vmem:[#allocation10 + $0xf70] sm:$0xf0] }
 0x6cb   : > { %v18755_v23 = vld [vmem:[#allocation10 + $0x1154] sm:$0xf]  ;;  %v15850_v36 = vor.u32 %v18691_v9, %v15847_v15  ;;  %10625 = vmatpush.bf16.msrb.mxu0 %v15594_v35  ;;  %v10399_v15 = vadd.f32 %v10398_v8, %v10386_v0 }
 0x6cc   : > { %v16103_v28 = vld [vmem:[#allocation10 + $0x1170] sm:$0xf0] }
 0x6cd   : > { %v18819_v29 = vld [vmem:[#allocation10 + $0x1354] sm:$0xf]  ;;  %v16106_v10 = vor.u32 %v18755_v23, %v16103_v28  ;;  %10638 = vmatpush.bf16.msrb.mxu1 %v15850_v36  ;;  %v10411_v23 = vpop.f32.mrf.mxu3 }
 0x6ce   : > { %v16359_v34 = vld [vmem:[#allocation10 + $0x1370] sm:$0xf0]  ;;  %v21143_v35 = vadd.f32 %v10411_v23, %v10399_v15 }
 0x6cf   : > { %v18619_v27 = vld [vmem:[#allocation10 + $0xd14] sm:$0xf]  ;;  %v16362_v38 = vor.u32 %v18819_v29, %v16359_v34  ;;  %10651 = vmatpush.bf16.msrb.mxu2 %v16106_v10 }
 0x6d0   : > { %v15559_v37 = vld [vmem:[#allocation10 + $0xd30] sm:$0xf0] }
 0x6d1   : > { %v18683_v41 = vld [vmem:[#allocation10 + $0xf14] sm:$0xf]  ;;  %v15562_v48 = vor.u32 %v18619_v27, %v15559_v37  ;;  %10664 = vmatpush.bf16.msrb.mxu3 %v16362_v38  ;;  %v10374_v27 = vpop.f32.mrf.mxu0  ;;  %v10387_v38 = vpop.f32.mrf.mxu1 }
 0x6d2   : > { %v15815_v40 = vld [vmem:[#allocation10 + $0xf30] sm:$0xf0] }
 0x6d3   : > { %v18747_v45 = vld [vmem:[#allocation10 + $0x1114] sm:$0xf]  ;;  %v15818_v47 = vor.u32 %v18683_v41, %v15815_v40  ;;  %10626 = vmatpush.bf16.msrb.mxu0 %v15562_v48 }
 0x6d4   : > { %v16071_v42 = vld [vmem:[#allocation10 + $0x1130] sm:$0xf0] }
 0x6d5   : > { %v18811_v43 = vld [vmem:[#allocation10 + $0x1314] sm:$0xf]  ;;  %v16074_v49 = vor.u32 %v18747_v45, %v16071_v42  ;;  %10639 = vmatpush.bf16.msrb.mxu1 %v15818_v47 }
 0x6d6   : > { %v16327_v46 = vld [vmem:[#allocation10 + $0x1330] sm:$0xf0] }
 0x6d7   : > { %v18611_v57 = vld [vmem:[#allocation10 + $0xcd4] sm:$0xf]  ;;  %v16330_v55 = vor.u32 %v18811_v43, %v16327_v46  ;;  %10652 = vmatpush.bf16.msrb.mxu2 %v16074_v49 }
 0x6d8   : > { %v15527_v50 = vld [vmem:[#allocation10 + $0xcf0] sm:$0xf0] }
 0x6d9   : > { %v18675_v51 = vld [vmem:[#allocation10 + $0xed4] sm:$0xf]  ;;  %v15530_v13 = vor.u32 %v18611_v57, %v15527_v50  ;;  %10665 = vmatpush.bf16.msrb.mxu3 %v16330_v55  ;;  %v10400_v55 = vpop.f32.mrf.mxu2 }
 0x6da   : > { %v15783_v56 = vld [vmem:[#allocation10 + $0xef0] sm:$0xf0] }
 0x6db   : > { %v18739_v58 = vld [vmem:[#allocation10 + $0x10d4] sm:$0xf]  ;;  %v15786_v2 = vor.u32 %v18675_v51, %v15783_v56  ;;  %10627 = vmatpush.bf16.msrb.mxu0 %v15530_v13 }
 0x6dc   : > { %v16039_v59 = vld [vmem:[#allocation10 + $0x10f0] sm:$0xf0] }
 0x6dd   : > { %v18803_v31 = vld [vmem:[#allocation10 + $0x12d4] sm:$0xf]  ;;  %v16042_v14 = vor.u32 %v18739_v58, %v16039_v59  ;;  %10640 = vmatpush.bf16.msrb.mxu1 %v15786_v2 }
 0x6de   : > { %v16295_v63 = vld [vmem:[#allocation10 + $0x12f0] sm:$0xf0] }
 0x6df   : > { %v18603_v5 = vld [vmem:[#allocation10 + $0xc94] sm:$0xf]  ;;  %v16298_v7 = vor.u32 %v18803_v31, %v16295_v63  ;;  %10653 = vmatpush.bf16.msrb.mxu2 %v16042_v14  ;;  %v10413_v63 = vpop.f32.mrf.mxu3 }
 0x6e0   : > { %v15495_v6 = vld [vmem:[#allocation10 + $0xcb0] sm:$0xf0] }
 0x6e1   : > { %v18667_v18 = vld [vmem:[#allocation10 + $0xe94] sm:$0xf]  ;;  %v15498_v34 = vor.u32 %v18603_v5, %v15495_v6  ;;  %10666 = vmatpush.bf16.msrb.mxu3 %v16298_v7 }
 0x6e2   : > { %v15751_v4 = vld [vmem:[#allocation10 + $0xeb0] sm:$0xf0] }
 0x6e3   : > { %v18731_v9 = vld [vmem:[#allocation10 + $0x1094] sm:$0xf]  ;;  %v15754_v36 = vor.u32 %v18667_v18, %v15751_v4  ;;  %10628 = vmatpush.bf16.msrb.mxu0 %v15498_v34 }
 0x6e4   : > { %v16007_v33 = vld [vmem:[#allocation10 + $0x10b0] sm:$0xf0] }
 0x6e5   : > { %v18795_v28 = vld [vmem:[#allocation10 + $0x1294] sm:$0xf]  ;;  %v16010_v10 = vor.u32 %v18731_v9, %v16007_v33  ;;  %10641 = vmatpush.bf16.msrb.mxu1 %v15754_v36 }
 0x6e6   : > { %v16263_v29 = vld [vmem:[#allocation10 + $0x12b0] sm:$0xf0] }
 0x6e7   : > { %v18595_v37 = vld [vmem:[#allocation10 + $0xc54] sm:$0xf]  ;;  %v16266_v40 = vor.u32 %v18795_v28, %v16263_v29  ;;  %10654 = vmatpush.bf16.msrb.mxu2 %v16010_v10 }
 0x6e8   : > { %v15463_v41 = vld [vmem:[#allocation10 + $0xc70] sm:$0xf0] }
 0x6e9   : > { %v18659_v11 = vld [vmem:[#allocation10 + $0xe54] sm:$0xf]  ;;  %v15466_v3 = vor.u32 %v18595_v37, %v15463_v41  ;;  %10667 = vmatpush.bf16.msrb.mxu3 %v16266_v40 }
 0x6ea   : > { %v15719_v45 = vld [vmem:[#allocation10 + $0xe70] sm:$0xf0] }
 0x6eb   : > { %v18723_v42 = vld [vmem:[#allocation10 + $0x1054] sm:$0xf]  ;;  %v15722_v57 = vor.u32 %v18659_v11, %v15719_v45  ;;  %10629 = vmatpush.bf16.msrb.mxu0 %v15466_v3 }
 0x6ec   : > { %v15975_v43 = vld [vmem:[#allocation10 + $0x1070] sm:$0xf0] }
 0x6ed   : > { %v18787_v46 = vld [vmem:[#allocation10 + $0x1254] sm:$0xf]  ;;  %v15978_v50 = vor.u32 %v18723_v42, %v15975_v43  ;;  %10642 = vmatpush.bf16.msrb.mxu1 %v15722_v57 }
 0x6ee   : > { %v16231_v48 = vld [vmem:[#allocation10 + $0x1270] sm:$0xf0] }
 0x6ef   : > { %v18587_v47 = vld [vmem:[#allocation10 + $0xc14] sm:$0xf]  ;;  %v16234_v56 = vor.u32 %v18787_v46, %v16231_v48  ;;  %10655 = vmatpush.bf16.msrb.mxu2 %v15978_v50 }
 0x6f0   : > { %v15431_v49 = vld [vmem:[#allocation10 + $0xc30] sm:$0xf0] }
 0x6f1   : > { %v18651_v51 = vld [vmem:[#allocation10 + $0xe14] sm:$0xf]  ;;  %v15434_v14 = vor.u32 %v18587_v47, %v15431_v49  ;;  %10668 = vmatpush.bf16.msrb.mxu3 %v16234_v56 }
 0x6f2   : > { %v15687_v53 = vld [vmem:[#allocation10 + $0xe30] sm:$0xf0] }
 0x6f3   : > { %v18715_v54 = vld [vmem:[#allocation10 + $0x1014] sm:$0xf]  ;;  %v15690_v8 = vor.u32 %v18651_v51, %v15687_v53  ;;  %10630 = vmatpush.bf16.msrb.mxu0 %v15434_v14 }
 0x6f4   : > { %v15943_v58 = vld [vmem:[#allocation10 + $0x1030] sm:$0xf0] }
 0x6f5   : > { %v18779_v59 = vld [vmem:[#allocation10 + $0x1214] sm:$0xf]  ;;  %v15946_v7 = vor.u32 %v18715_v54, %v15943_v58  ;;  %10643 = vmatpush.bf16.msrb.mxu1 %v15690_v8 }
 0x6f6   : > { %v16199_v31 = vld [vmem:[#allocation10 + $0x1230] sm:$0xf0]  ;;  %10631 = vmatmul.bf16.vlgmr.msrb.gmra.mxu0 %v20991_v17 }
 0x6f7   : > { %v18899_v0 = vld [vmem:[#allocation10 + $0x15d4] sm:$0xf]  ;;  %v16202_v33 = vor.u32 %v18779_v59, %v16199_v31  ;;  %10656 = vmatpush.bf16.msrb.mxu2 %v15946_v7 }
 0x6f8   : > { %v16679_v13 = vld [vmem:[#allocation10 + $0x15f0] sm:$0xf0]  ;;  %10644 = vmatmul.bf16.vlgmr.msrb.gmra.mxu1 %v20995_v22 }
 0x6f9   : > { %v18963_v2 = vld [vmem:[#allocation10 + $0x17d4] sm:$0xf]  ;;  %v16682_v15 = vor.u32 %v18899_v0, %v16679_v13  ;;  %10669 = vmatpush.bf16.msrb.mxu3 %v16202_v33 }
 0x6fa   : > { %v16935_v5 = vld [vmem:[#allocation10 + $0x17f0] sm:$0xf0]  ;;  %10657 = vmatmul.bf16.vlgmr.msrb.gmra.mxu2 %v21009_v16 }
 0x6fb   : > { %v19027_v6 = vld [vmem:[#allocation10 + $0x19d4] sm:$0xf]  ;;  %v16938_v23 = vor.u32 %v18963_v2, %v16935_v5  ;;  %10675 = vmatpush.bf16.msra.mxu0 %v16682_v15  ;;  %v10437_v15 = vpop.f32.mrf.mxu1 }
 0x6fc   : > { %v17191_v18 = vld [vmem:[#allocation10 + $0x19f0] sm:$0xf0]  ;;  %10670 = vmatmul.bf16.vlgmr.msrb.gmra.mxu3 %v21013_v26 }
 0x6fd   : > { %v19091_v4 = vld [vmem:[#allocation10 + $0x1bd4] sm:$0xf]  ;;  %v17194_v28 = vor.u32 %v19027_v6, %v17191_v18  ;;  %10688 = vmatpush.bf16.msra.mxu1 %v16938_v23  ;;  %v10424_v6 = vpop.f32.mrf.mxu0 }
 0x6fe   : > { %v17447_v9 = vld [vmem:[#allocation10 + $0x1bf0] sm:$0xf0]  ;;  %v10425_v33 = vadd.f32 %v10424_v6, %v21143_v35 }
 0x6ff   : > { %v18891_v29 = vld [vmem:[#allocation10 + $0x1594] sm:$0xf]  ;;  %v17450_v36 = vor.u32 %v19091_v4, %v17447_v9  ;;  %10701 = vmatpush.bf16.msra.mxu2 %v17194_v28 }
 0x700   : > { %v16647_v34 = vld [vmem:[#allocation10 + $0x15b0] sm:$0xf0] }
 0x701   : > { %v18955_v27 = vld [vmem:[#allocation10 + $0x1794] sm:$0xf]  ;;  %v16650_v40 = vor.u32 %v18891_v29, %v16647_v34  ;;  %10714 = vmatpush.bf16.msra.mxu3 %v17450_v36 }
 0x702   : > { %v16903_v10 = vld [vmem:[#allocation10 + $0x17b0] sm:$0xf0] }
 0x703   : > { %v19019_v37 = vld [vmem:[#allocation10 + $0x1994] sm:$0xf]  ;;  %v16906_v45 = vor.u32 %v18955_v27, %v16903_v10  ;;  %10676 = vmatpush.bf16.msra.mxu0 %v16650_v40  ;;  %v10438_v10 = vadd.f32 %v10437_v15, %v10425_v33 }
 0x704   : > { %v17159_v41 = vld [vmem:[#allocation10 + $0x19b0] sm:$0xf0] }
 0x705   : > { %v19083_v11 = vld [vmem:[#allocation10 + $0x1b94] sm:$0xf]  ;;  %v17162_v42 = vor.u32 %v19019_v37, %v17159_v41  ;;  %10689 = vmatpush.bf16.msra.mxu1 %v16906_v45 }
 0x706   : > { %v17415_v38 = vld [vmem:[#allocation10 + $0x1bb0] sm:$0xf0] }
 0x707   : > { %v18883_v43 = vld [vmem:[#allocation10 + $0x1554] sm:$0xf]  ;;  %v17418_v3 = vor.u32 %v19083_v11, %v17415_v38  ;;  %10702 = vmatpush.bf16.msra.mxu2 %v17162_v42  ;;  %v10450_v42 = vpop.f32.mrf.mxu2 }
 0x708   : > { %v16615_v46 = vld [vmem:[#allocation10 + $0x1570] sm:$0xf0] }
 0x709   : > { %v18947_v48 = vld [vmem:[#allocation10 + $0x1754] sm:$0xf]  ;;  %v16618_v53 = vor.u32 %v18883_v43, %v16615_v46  ;;  %10715 = vmatpush.bf16.msra.mxu3 %v17418_v3  ;;  %v10451_v3 = vadd.f32 %v10450_v42, %v10438_v10  ;;  %v14125_v10 = vld [vmem:[#allocation10 + $0x1d8] sm:$0xf] }
 0x70a   : > { %v16871_v47 = vld [vmem:[#allocation10 + $0x1770] sm:$0xf0] }
 0x70b   : > { %v19011_v49 = vld [vmem:[#allocation10 + $0x1954] sm:$0xf]  ;;  %v16874_v54 = vor.u32 %v18947_v48, %v16871_v47  ;;  %10677 = vmatpush.bf16.msra.mxu0 %v16618_v53  ;;  %v10463_v47 = vpop.f32.mrf.mxu3  ;;  %v10426_v53 = vpop.f32.mrf.mxu0 }
 0x70c   : > { %v17127_v57 = vld [vmem:[#allocation10 + $0x1970] sm:$0xf0]  ;;  %v14349_v53 = vld [vmem:[#allocation10 + $0x398] sm:$0xf] }
 0x70d   : > { %v19075_v50 = vld [vmem:[#allocation10 + $0x1b54] sm:$0xf]  ;;  %v17130_v55 = vor.u32 %v19011_v49, %v17127_v57  ;;  %10690 = vmatpush.bf16.msra.mxu1 %v16874_v54 }
 0x70e   : > { %v17383_v51 = vld [vmem:[#allocation10 + $0x1b70] sm:$0xf0] }
 0x70f   : > { %v18875_v56 = vld [vmem:[#allocation10 + $0x1514] sm:$0xf]  ;;  %v17386_v31 = vor.u32 %v19075_v50, %v17383_v51  ;;  %10703 = vmatpush.bf16.msra.mxu2 %v17130_v55  ;;  %v21150_v51 = vadd.f32 %v10463_v47, %v10451_v3 }
 0x710   : > { %v16583_v58 = vld [vmem:[#allocation10 + $0x1530] sm:$0xf0] }
 0x711   : > { %v18939_v59 = vld [vmem:[#allocation10 + $0x1714] sm:$0xf]  ;;  %v16586_v5 = vor.u32 %v18875_v56, %v16583_v58  ;;  %10716 = vmatpush.bf16.msra.mxu3 %v17386_v31  ;;  %v10439_v31 = vpop.f32.mrf.mxu1 }
 0x712   : > { %v16839_v63 = vld [vmem:[#allocation10 + $0x1730] sm:$0xf0]  ;;  %v18448_v31 = vld [vmem:[#allocation10 + $0x7b4] sm:$0xf0] }
 0x713   : > { %v19003_v0 = vld [vmem:[#allocation10 + $0x1914] sm:$0xf]  ;;  %v16842_v18 = vor.u32 %v18939_v59, %v16839_v63  ;;  %10678 = vmatpush.bf16.msra.mxu0 %v16586_v5 }
 0x714   : > { %v17095_v13 = vld [vmem:[#allocation10 + $0x1930] sm:$0xf0] }
 0x715   : > { %v19067_v2 = vld [vmem:[#allocation10 + $0x1b14] sm:$0xf]  ;;  %v17098_v8 = vor.u32 %v19003_v0, %v17095_v13  ;;  %10691 = vmatpush.bf16.msra.mxu1 %v16842_v18 }
 0x716   : > { %v17351_v14 = vld [vmem:[#allocation10 + $0x1b30] sm:$0xf0] }
 0x717   : > { %v18867_v7 = vld [vmem:[#allocation10 + $0x14d4] sm:$0xf]  ;;  %v17354_v23 = vor.u32 %v19067_v2, %v17351_v14  ;;  %10704 = vmatpush.bf16.msra.mxu2 %v17098_v8 }
 0x718   : > { %v16551_v4 = vld [vmem:[#allocation10 + $0x14f0] sm:$0xf0] }
 0x719   : > { %v18931_v9 = vld [vmem:[#allocation10 + $0x16d4] sm:$0xf]  ;;  %v16554_v37 = vor.u32 %v18867_v7, %v16551_v4  ;;  %10717 = vmatpush.bf16.msra.mxu3 %v17354_v23  ;;  %v10452_v23 = vpop.f32.mrf.mxu2 }
 0x71a   : > { %v16807_v28 = vld [vmem:[#allocation10 + $0x16f0] sm:$0xf0] }
 0x71b   : > { %v18995_v29 = vld [vmem:[#allocation10 + $0x18d4] sm:$0xf]  ;;  %v16810_v41 = vor.u32 %v18931_v9, %v16807_v28  ;;  %10679 = vmatpush.bf16.msra.mxu0 %v16554_v37  ;;  %v18264_v37 = vld [vmem:[#allocation10 + $0x1f4] sm:$0xf0] }
 0x71c   : > { %v17063_v34 = vld [vmem:[#allocation10 + $0x18f0] sm:$0xf0]  ;;  %v14126_v3 = vor.u32 %v18264_v37, %v14125_v10  ;;  %v14541_v10 = vld [vmem:[#allocation10 + $0x518] sm:$0xf] }
 0x71d   : > { %v19059_v27 = vld [vmem:[#allocation10 + $0x1ad4] sm:$0xf]  ;;  %v17066_v11 = vor.u32 %v18995_v29, %v17063_v34  ;;  %10692 = vmatpush.bf16.msra.mxu1 %v16810_v41  ;;  %v14381_v41 = vld [vmem:[#allocation10 + $0x3d8] sm:$0xf] }
 0x71e   : > { %v17319_v36 = vld [vmem:[#allocation10 + $0x1af0] sm:$0xf0]  ;;  %v18368_v37 = vld [vmem:[#allocation10 + $0x534] sm:$0xf0] }
 0x71f   : > { %v18859_v38 = vld [vmem:[#allocation10 + $0x1494] sm:$0xf]  ;;  %v17322_v35 = vor.u32 %v19059_v27, %v17319_v36  ;;  %10705 = vmatpush.bf16.msra.mxu2 %v17066_v11  ;;  %v10465_v36 = vpop.f32.mrf.mxu3 }
 0x720   : > { %v16519_v40 = vld [vmem:[#allocation10 + $0x14b0] sm:$0xf0]  ;;  %v18304_v36 = vld [vmem:[#allocation10 + $0x334] sm:$0xf0] }
 0x721   : > { %v18923_v45 = vld [vmem:[#allocation10 + $0x1694] sm:$0xf]  ;;  %v16522_v50 = vor.u32 %v18859_v38, %v16519_v40  ;;  %10718 = vmatpush.bf16.msra.mxu3 %v17322_v35  ;;  %v18328_v38 = vld [vmem:[#allocation10 + $0x3f4] sm:$0xf0] }
 0x722   : > { %v16775_v43 = vld [vmem:[#allocation10 + $0x16b0] sm:$0xf0]  ;;  %v14637_v40 = vld [vmem:[#allocation10 + $0x5d8] sm:$0xf]  ;;  %v14382_v47 = vor.u32 %v18328_v38, %v14381_v41  ;;  %v10476_v41 = vpop.f32.mrf.mxu0 }
 0x723   : > { %v18987_v46 = vld [vmem:[#allocation10 + $0x1894] sm:$0xf]  ;;  %v16778_v54 = vor.u32 %v18923_v45, %v16775_v43  ;;  %10680 = vmatpush.bf16.msra.mxu0 %v16522_v50  ;;  %v18392_v45 = vld [vmem:[#allocation10 + $0x5f4] sm:$0xf0] }
 0x724   : > { %v17031_v48 = vld [vmem:[#allocation10 + $0x18b0] sm:$0xf0]  ;;  %v14893_v43 = vld [vmem:[#allocation10 + $0x7d8] sm:$0xf] }
 0x725   : > { %v19051_v49 = vld [vmem:[#allocation10 + $0x1a94] sm:$0xf]  ;;  %v17034_v55 = vor.u32 %v18987_v46, %v17031_v48  ;;  %10693 = vmatpush.bf16.msra.mxu1 %v16778_v54  ;;  %v18456_v46 = vld [vmem:[#allocation10 + $0x7f4] sm:$0xf0] }
 0x726   : > { %v17287_v57 = vld [vmem:[#allocation10 + $0x1ab0] sm:$0xf0]  ;;  %v18256_v50 = vld [vmem:[#allocation10 + $0x1b4] sm:$0xf0]  ;;  %v14894_v54 = vor.u32 %v18456_v46, %v14893_v43  ;;  %v14542_v43 = vor.u32 %v18368_v37, %v14541_v10 }
 0x727   : > { %v18851_v56 = vld [vmem:[#allocation10 + $0x1454] sm:$0xf]  ;;  %v17290_v63 = vor.u32 %v19051_v49, %v17287_v57  ;;  %10706 = vmatpush.bf16.msra.mxu2 %v17034_v55  ;;  %v14638_v49 = vor.u32 %v18392_v45, %v14637_v40  ;;  %v14093_v57 = vld [vmem:[#allocation10 + $0x198] sm:$0xf]  ;;  %v10477_v40 = vadd.f32 %v10476_v41, %v21150_v51 }
 0x728   : > { %v16487_v58 = vld [vmem:[#allocation10 + $0x1470] sm:$0xf0]  ;;  %v18320_v55 = vld [vmem:[#allocation10 + $0x3b4] sm:$0xf0] }
 0x729   : > { %v18915_v59 = vld [vmem:[#allocation10 + $0x1654] sm:$0xf]  ;;  %v16490_v6 = vor.u32 %v18851_v56, %v16487_v58  ;;  %10719 = vmatpush.bf16.msra.mxu3 %v17290_v63  ;;  %v14605_v56 = vld [vmem:[#allocation10 + $0x598] sm:$0xf]  ;;  %v14094_v63 = vor.u32 %v18256_v50, %v14093_v57 }
 0x72a   : > { %v16743_v0 = vld [vmem:[#allocation10 + $0x1670] sm:$0xf0]  ;;  %v18384_v58 = vld [vmem:[#allocation10 + $0x5b4] sm:$0xf0] }
 0x72b   : > { %v18979_v13 = vld [vmem:[#allocation10 + $0x1854] sm:$0xf]  ;;  %v16746_v7 = vor.u32 %v18915_v59, %v16743_v0  ;;  %10681 = vmatpush.bf16.msra.mxu0 %v16490_v6  ;;  %v14861_v59 = vld [vmem:[#allocation10 + $0x798] sm:$0xf]  ;;  %v14350_v0 = vor.u32 %v18320_v55, %v14349_v53 }
 0x72c   : > { %v16999_v2 = vld [vmem:[#allocation10 + $0x1870] sm:$0xf0]  ;;  %v14862_v6 = vor.u32 %v18448_v31, %v14861_v59  ;;  %v18432_v38 = vld [vmem:[#allocation10 + $0x734] sm:$0xf0] }
 0x72d   : > { %v19043_v14 = vld [vmem:[#allocation10 + $0x1a54] sm:$0xf]  ;;  %v17002_v4 = vor.u32 %v18979_v13, %v16999_v2  ;;  %10694 = vmatpush.bf16.msra.mxu1 %v16746_v7  ;;  %v14606_v13 = vor.u32 %v18384_v58, %v14605_v56  ;;  %v14061_v2 = vld [vmem:[#allocation10 + $0x158] sm:$0xf] }
 0x72e   : > { %v17255_v5 = vld [vmem:[#allocation10 + $0x1a70] sm:$0xf0]  ;;  %v18376_v7 = vld [vmem:[#allocation10 + $0x574] sm:$0xf0] }
 0x72f   : > { %v18843_v18 = vld [vmem:[#allocation10 + $0x1414] sm:$0xf]  ;;  %v17258_v28 = vor.u32 %v19043_v14, %v17255_v5  ;;  %10707 = vmatpush.bf16.msra.mxu2 %v17002_v4  ;;  %v18248_v14 = vld [vmem:[#allocation10 + $0x174] sm:$0xf0] }
 0x730   : > { %v16455_v8 = vld [vmem:[#allocation10 + $0x1430] sm:$0xf0]  ;;  %v14317_v5 = vld [vmem:[#allocation10 + $0x358] sm:$0xf] }
 0x731   : > { %v18907_v9 = vld [vmem:[#allocation10 + $0x1614] sm:$0xf]  ;;  %v16458_v11 = vor.u32 %v18843_v18, %v16455_v8  ;;  %10720 = vmatpush.bf16.msra.mxu3 %v17258_v28  ;;  %v18312_v18 = vld [vmem:[#allocation10 + $0x374] sm:$0xf0] }
 0x732   : > { %v16711_v33 = vld [vmem:[#allocation10 + $0x1630] sm:$0xf0]  ;;  %v14573_v8 = vld [vmem:[#allocation10 + $0x558] sm:$0xf] }
 0x733   : > { %v18971_v15 = vld [vmem:[#allocation10 + $0x1814] sm:$0xf]  ;;  %v16714_v42 = vor.u32 %v18907_v9, %v16711_v33  ;;  %10682 = vmatpush.bf16.msra.mxu0 %v16458_v11  ;;  %v14829_v4 = vld [vmem:[#allocation10 + $0x758] sm:$0xf]  ;;  %v14062_v33 = vor.u32 %v18248_v14, %v14061_v2  ;;  %v14574_v23 = vor.u32 %v18376_v7, %v14573_v8 }
 0x734   : > { %v16967_v29 = vld [vmem:[#allocation10 + $0x1830] sm:$0xf0]  ;;  %v18440_v9 = vld [vmem:[#allocation10 + $0x774] sm:$0xf0] }
 0x735   : > { %v19035_v34 = vld [vmem:[#allocation10 + $0x1a14] sm:$0xf]  ;;  %v16970_v35 = vor.u32 %v18971_v15, %v16967_v29  ;;  %10695 = vmatpush.bf16.msra.mxu1 %v16714_v42  ;;  %v14318_v15 = vor.u32 %v18312_v18, %v14317_v5  ;;  %v14029_v28 = vld [vmem:[#allocation10 + $0x118] sm:$0xf]  ;;  %v10489_v42 = vpop.f32.mrf.mxu1  ;;  %v10515_v18 = vpop.f32.mrf.mxu3 }
 0x736   : > { %v17223_v27 = vld [vmem:[#allocation10 + $0x1a30] sm:$0xf0]  ;;  %10683 = vmatmul.bf16.vlgmr.msra.gmra.mxu0 %v21011_v25  ;;  %v18240_v29 = vld [vmem:[#allocation10 + $0x134] sm:$0xf0] }
 0x737   : > { %v17226_v48 = vor.u32 %v19035_v34, %v17223_v27  ;;  %10708 = vmatpush.bf16.msra.mxu2 %v16970_v35  ;;  %10727 = vmatpush.bf16.msrb.mxu0 %v14126_v3  ;;  %v14285_v34 = vld [vmem:[#allocation10 + $0x318] sm:$0xf]  ;;  %v14830_v27 = vor.u32 %v18440_v9, %v14829_v4  ;;  %v14030_v45 = vor.u32 %v18240_v29, %v14029_v28  ;;  %v10478_v4 = vpop.f32.mrf.mxu0 }
 0x738   : > { %10696 = vmatmul.bf16.vlgmr.msra.gmra.mxu1 %v21015_v30  ;;  %v14797_v11 = vld [vmem:[#allocation10 + $0x718] sm:$0xf]  ;;  %v14286_v35 = vor.u32 %v18304_v36, %v14285_v34 }
 0x739   : > { %10721 = vmatpush.bf16.msra.mxu3 %v17226_v48  ;;  %10740 = vmatpush.bf16.msrb.mxu1 %v14382_v47  ;;  %v13997_v46 = vld [vmem:[#allocation10 + $0xd8] sm:$0xf]  ;;  %v14798_v47 = vor.u32 %v18432_v38, %v14797_v11 }
 0x73a   : > { %10709 = vmatmul.bf16.vlgmr.msra.gmra.mxu2 %v21023_v19  ;;  %v18232_v48 = vld [vmem:[#allocation10 + $0xf4] sm:$0xf0] }
 0x73b   : > { %10753 = vmatpush.bf16.msrb.mxu2 %v14638_v49  ;;  %10728 = vmatpush.bf16.msrb.mxu0 %v14094_v63  ;;  %v14253_v3 = vld [vmem:[#allocation10 + $0x2d8] sm:$0xf]  ;;  %v10490_v49 = vadd.f32 %v10489_v42, %v10477_v40  ;;  %v13998_v56 = vor.u32 %v18232_v48, %v13997_v46 }
 0x73c   : > { %10722 = vmatmul.bf16.vlgmr.msra.gmra.mxu3 %v21025_v32  ;;  %v18296_v57 = vld [vmem:[#allocation10 + $0x2f4] sm:$0xf0] }
 0x73d   : > { %10766 = vmatpush.bf16.msrb.mxu3 %v14894_v54  ;;  %10741 = vmatpush.bf16.msrb.mxu1 %v14350_v0  ;;  %v14509_v50 = vld [vmem:[#allocation10 + $0x4d8] sm:$0xf]  ;;  %v14254_v51 = vor.u32 %v18296_v57, %v14253_v3 }
 0x73e   : > { %v18360_v53 = vld [vmem:[#allocation10 + $0x4f4] sm:$0xf0] }
 0x73f   : > { %10754 = vmatpush.bf16.msrb.mxu2 %v14606_v13  ;;  %10729 = vmatpush.bf16.msrb.mxu0 %v14062_v33  ;;  %v14765_v54 = vld [vmem:[#allocation10 + $0x6d8] sm:$0xf]  ;;  %v14510_v58 = vor.u32 %v18360_v53, %v14509_v50  ;;  %v10502_v13 = vpop.f32.mrf.mxu2  ;;  %v10491_v33 = vpop.f32.mrf.mxu1 }
 0x740   : > { %v18424_v55 = vld [vmem:[#allocation10 + $0x6f4] sm:$0xf0] }
 0x741   : > { %10767 = vmatpush.bf16.msrb.mxu3 %v14862_v6  ;;  %10742 = vmatpush.bf16.msrb.mxu1 %v14318_v15  ;;  %v13965_v59 = vld [vmem:[#allocation10 + $0x98] sm:$0xf]  ;;  %v14766_v0 = vor.u32 %v18424_v55, %v14765_v54  ;;  %v10503_v6 = vadd.f32 %v10502_v13, %v10490_v49 }
 0x742   : > { %v18224_v31 = vld [vmem:[#allocation10 + $0xb4] sm:$0xf0] }
 0x743   : > { %10755 = vmatpush.bf16.msrb.mxu2 %v14574_v23  ;;  %10730 = vmatpush.bf16.msrb.mxu0 %v14030_v45  ;;  %v14221_v63 = vld [vmem:[#allocation10 + $0x298] sm:$0xf]  ;;  %v13966_v9 = vor.u32 %v18224_v31, %v13965_v59  ;;  %v21157_v15 = vadd.f32 %v10515_v18, %v10503_v6 }
 0x744   : > { %v18288_v2 = vld [vmem:[#allocation10 + $0x2b4] sm:$0xf0] }
 0x745   : > { %10768 = vmatpush.bf16.msrb.mxu3 %v14830_v27  ;;  %10743 = vmatpush.bf16.msrb.mxu1 %v14286_v35  ;;  %v14477_v14 = vld [vmem:[#allocation10 + $0x498] sm:$0xf]  ;;  %v14222_v23 = vor.u32 %v18288_v2, %v14221_v63 }
 0x746   : > { %v18352_v5 = vld [vmem:[#allocation10 + $0x4b4] sm:$0xf0] }
 0x747   : > { %10756 = vmatpush.bf16.msrb.mxu2 %v14542_v43  ;;  %v14733_v8 = vld [vmem:[#allocation10 + $0x698] sm:$0xf]  ;;  %10731 = vmatpush.bf16.msrb.mxu0 %v13998_v56  ;;  %v14478_v28 = vor.u32 %v18352_v5, %v14477_v14  ;;  %v10504_v53 = vpop.f32.mrf.mxu2 }
 0x748   : > { %v18416_v7 = vld [vmem:[#allocation10 + $0x6b4] sm:$0xf0] }
 0x749   : > { %10769 = vmatpush.bf16.msrb.mxu3 %v14798_v47  ;;  %10744 = vmatpush.bf16.msrb.mxu1 %v14254_v51  ;;  %v13933_v29 = vld [vmem:[#allocation10 + $0x58] sm:$0xf]  ;;  %v14734_v36 = vor.u32 %v18416_v7, %v14733_v8  ;;  %v10517_v51 = vpop.f32.mrf.mxu3 }
 0x74a   : > { %v18216_v34 = vld [vmem:[#allocation10 + $0x74] sm:$0xf0]  ;;  %v10528_v51 = vpop.f32.mrf.mxu0 }
 0x74b   : > { %10757 = vmatpush.bf16.msrb.mxu2 %v14510_v58  ;;  %v14189_v27 = vld [vmem:[#allocation10 + $0x258] sm:$0xf]  ;;  %10732 = vmatpush.bf16.msrb.mxu0 %v13966_v9  ;;  %v13934_v40 = vor.u32 %v18216_v34, %v13933_v29 }
 0x74c   : > { %v18280_v10 = vld [vmem:[#allocation10 + $0x274] sm:$0xf0] }
 0x74d   : > { %10770 = vmatpush.bf16.msrb.mxu3 %v14766_v0  ;;  %v14445_v37 = vld [vmem:[#allocation10 + $0x458] sm:$0xf]  ;;  %10745 = vmatpush.bf16.msrb.mxu1 %v14222_v23  ;;  %v14190_v35 = vor.u32 %v18280_v10, %v14189_v27 }
 0x74e   : > { %v18344_v41 = vld [vmem:[#allocation10 + $0x474] sm:$0xf0] }
 0x74f   : > { %v14701_v11 = vld [vmem:[#allocation10 + $0x658] sm:$0xf]  ;;  %10758 = vmatpush.bf16.msrb.mxu2 %v14478_v28  ;;  %v14446_v43 = vor.u32 %v18344_v41, %v14445_v37  ;;  %10733 = vmatpush.bf16.msrb.mxu0 %v13934_v40 }
 0x750   : > { %v18408_v38 = vld [vmem:[#allocation10 + $0x674] sm:$0xf0] }
 0x751   : > { %v13901_v45 = vld [vmem:[#allocation10 + $0x18] sm:$0xf]  ;;  %10771 = vmatpush.bf16.msrb.mxu3 %v14734_v36  ;;  %v14702_v47 = vor.u32 %v18408_v38, %v14701_v11  ;;  %10746 = vmatpush.bf16.msrb.mxu1 %v14190_v35 }
 0x752   : > { %v18208_v42 = vld [vmem:[#allocation10 + $0x34] sm:$0xf0] }
 0x753   : > { %v14157_v46 = vld [vmem:[#allocation10 + $0x218] sm:$0xf]  ;;  %v13902_v58 = vor.u32 %v18208_v42, %v13901_v45  ;;  %10759 = vmatpush.bf16.msrb.mxu2 %v14446_v43 }
 0x754   : > { %v18272_v48 = vld [vmem:[#allocation10 + $0x234] sm:$0xf0] }
 0x755   : > { %v14413_v3 = vld [vmem:[#allocation10 + $0x418] sm:$0xf]  ;;  %v14158_v0 = vor.u32 %v18272_v48, %v14157_v46  ;;  %10772 = vmatpush.bf16.msrb.mxu3 %v14702_v47  ;;  %10734 = vmatpush.bf16.msrb.mxu0 %v13902_v58 }
 0x756   : > { %v18336_v49 = vld [vmem:[#allocation10 + $0x434] sm:$0xf0] }
 0x757   : > { %v14669_v57 = vld [vmem:[#allocation10 + $0x618] sm:$0xf]  ;;  %v14414_v13 = vor.u32 %v18336_v49, %v14413_v3  ;;  %10747 = vmatpush.bf16.msrb.mxu1 %v14158_v0  ;;  %v10541_v0 = vpop.f32.mrf.mxu1 }
 0x758   : > { %v18400_v50 = vld [vmem:[#allocation10 + $0x634] sm:$0xf0]  ;;  %10735 = vmatmul.bf16.vlgmr.msrb.gmra.mxu0 %v20977_v61 }
 0x759   : > { %v15149_v54 = vld [vmem:[#allocation10 + $0x9d8] sm:$0xf]  ;;  %v14670_v5 = vor.u32 %v18400_v50, %v14669_v57  ;;  %10760 = vmatpush.bf16.msrb.mxu2 %v14414_v13 }
 0x75a   : > { %v18520_v55 = vld [vmem:[#allocation10 + $0x9f4] sm:$0xf0]  ;;  %10748 = vmatmul.bf16.vlgmr.msrb.gmra.mxu1 %v20982_v12 }
 0x75b   : > { %v15405_v56 = vld [vmem:[#allocation10 + $0xbd8] sm:$0xf]  ;;  %v15150_v6 = vor.u32 %v18520_v55, %v15149_v54  ;;  %10773 = vmatpush.bf16.msrb.mxu3 %v14670_v5 }
 0x75c   : > { %v18584_v59 = vld [vmem:[#allocation10 + $0xbf4] sm:$0xf0]  ;;  %10761 = vmatmul.bf16.vlgmr.msrb.gmra.mxu2 %v20975_v60 }
 0x75d   : > { %v15661_v31 = vld [vmem:[#allocation10 + $0xdd8] sm:$0xf]  ;;  %v15406_v18 = vor.u32 %v18584_v59, %v15405_v56  ;;  %10779 = vmatpush.bf16.msra.mxu0 %v15150_v6 }
 0x75e   : > { %v18648_v63 = vld [vmem:[#allocation10 + $0xdf4] sm:$0xf0]  ;;  %10774 = vmatmul.bf16.vlgmr.msrb.gmra.mxu3 %v20979_v62 }
 0x75f   : > { %v15917_v2 = vld [vmem:[#allocation10 + $0xfd8] sm:$0xf]  ;;  %v15662_v8 = vor.u32 %v18648_v63, %v15661_v31  ;;  %10792 = vmatpush.bf16.msra.mxu1 %v15406_v18  ;;  %v10529_v31 = vadd.f32 %v10528_v51, %v21157_v15  ;;  %v5144_v15 = vperm.slane %v21140_v20, 5  ;;  %v10530_v20 = vpop.f32.mrf.mxu0 }
 0x760   : > { %v18712_v14 = vld [vmem:[#allocation10 + $0xff4] sm:$0xf0] }
 0x761   : > { %v15117_v7 = vld [vmem:[#allocation10 + $0x998] sm:$0xf]  ;;  %v15918_v33 = vor.u32 %v18712_v14, %v15917_v2  ;;  %10805 = vmatpush.bf16.msra.mxu2 %v15662_v8  ;;  %v21164_v8 = vadd.f32 %v10541_v0, %v10529_v31 }
 0x762   : > { %v18512_v4 = vld [vmem:[#allocation10 + $0x9b4] sm:$0xf0] }
 0x763   : > { %v15373_v9 = vld [vmem:[#allocation10 + $0xb98] sm:$0xf]  ;;  %v15118_v36 = vor.u32 %v18512_v4, %v15117_v7  ;;  %10818 = vmatpush.bf16.msra.mxu3 %v15918_v33 }
 0x764   : > { %v18576_v23 = vld [vmem:[#allocation10 + $0xbb4] sm:$0xf0] }
 0x765   : > { %v15629_v28 = vld [vmem:[#allocation10 + $0xd98] sm:$0xf]  ;;  %v15374_v10 = vor.u32 %v18576_v23, %v15373_v9  ;;  %10780 = vmatpush.bf16.msra.mxu0 %v15118_v36 }
 0x766   : > { %v18640_v29 = vld [vmem:[#allocation10 + $0xdb4] sm:$0xf0] }
 0x767   : > { %v15885_v34 = vld [vmem:[#allocation10 + $0xf98] sm:$0xf]  ;;  %v15630_v37 = vor.u32 %v18640_v29, %v15629_v28  ;;  %10793 = vmatpush.bf16.msra.mxu1 %v15374_v10 }
 0x768   : > { %v18704_v27 = vld [vmem:[#allocation10 + $0xfb4] sm:$0xf0] }
 0x769   : > { %v15085_v41 = vld [vmem:[#allocation10 + $0x958] sm:$0xf]  ;;  %v15886_v40 = vor.u32 %v18704_v27, %v15885_v34  ;;  %10806 = vmatpush.bf16.msra.mxu2 %v15630_v37 }
 0x76a   : > { %v18504_v11 = vld [vmem:[#allocation10 + $0x974] sm:$0xf0] }
 0x76b   : > { %v15341_v38 = vld [vmem:[#allocation10 + $0xb58] sm:$0xf]  ;;  %v15086_v48 = vor.u32 %v18504_v11, %v15085_v41  ;;  %10819 = vmatpush.bf16.msra.mxu3 %v15886_v40  ;;  %v10554_v40 = vpop.f32.mrf.mxu2 }
 0x76c   : > { %v18568_v45 = vld [vmem:[#allocation10 + $0xb74] sm:$0xf0] }
 0x76d   : > { %v15597_v42 = vld [vmem:[#allocation10 + $0xd58] sm:$0xf]  ;;  %v15342_v3 = vor.u32 %v18568_v45, %v15341_v38  ;;  %10781 = vmatpush.bf16.msra.mxu0 %v15086_v48  ;;  %v10543_v48 = vpop.f32.mrf.mxu1 }
 0x76e   : > { %v18632_v35 = vld [vmem:[#allocation10 + $0xd74] sm:$0xf0] }
 0x76f   : > { %v15853_v43 = vld [vmem:[#allocation10 + $0xf58] sm:$0xf]  ;;  %v15598_v47 = vor.u32 %v18632_v35, %v15597_v42  ;;  %10794 = vmatpush.bf16.msra.mxu1 %v15342_v3  ;;  %v10555_v35 = vadd.f32 %v10554_v40, %v5144_v15 }
 0x770   : > { %v18696_v46 = vld [vmem:[#allocation10 + $0xf74] sm:$0xf0] }
 0x771   : > { %v15053_v49 = vld [vmem:[#allocation10 + $0x918] sm:$0xf]  ;;  %v15854_v53 = vor.u32 %v18696_v46, %v15853_v43  ;;  %10807 = vmatpush.bf16.msra.mxu2 %v15598_v47  ;;  %v10567_v43 = vpop.f32.mrf.mxu3 }
 0x772   : > { %v18496_v57 = vld [vmem:[#allocation10 + $0x934] sm:$0xf0] }
 0x773   : > { %v15309_v50 = vld [vmem:[#allocation10 + $0xb18] sm:$0xf]  ;;  %v15054_v63 = vor.u32 %v18496_v57, %v15053_v49  ;;  %10820 = vmatpush.bf16.msra.mxu3 %v15854_v53  ;;  %v21167_v53 = vadd.f32 %v10567_v43, %v10555_v35 }
 0x774   : > { %v18560_v54 = vld [vmem:[#allocation10 + $0xb34] sm:$0xf0] }
 0x775   : > { %v15565_v55 = vld [vmem:[#allocation10 + $0xd18] sm:$0xf]  ;;  %v15310_v13 = vor.u32 %v18560_v54, %v15309_v50  ;;  %10782 = vmatpush.bf16.msra.mxu0 %v15054_v63 }
 0x776   : > { %v18624_v56 = vld [vmem:[#allocation10 + $0xd34] sm:$0xf0] }
 0x777   : > { %v15821_v58 = vld [vmem:[#allocation10 + $0xf18] sm:$0xf]  ;;  %v15566_v2 = vor.u32 %v18624_v56, %v15565_v55  ;;  %10795 = vmatpush.bf16.msra.mxu1 %v15310_v13 }
 0x778   : > { %v18688_v59 = vld [vmem:[#allocation10 + $0xf34] sm:$0xf0] }
 0x779   : > { %v15021_v14 = vld [vmem:[#allocation10 + $0x8d8] sm:$0xf]  ;;  %v15822_v18 = vor.u32 %v18688_v59, %v15821_v58  ;;  %10808 = vmatpush.bf16.msra.mxu2 %v15566_v2 }
 0x77a   : > { %v18488_v5 = vld [vmem:[#allocation10 + $0x8f4] sm:$0xf0] }
 0x77b   : > { %v15277_v6 = vld [vmem:[#allocation10 + $0xad8] sm:$0xf]  ;;  %v15022_v28 = vor.u32 %v18488_v5, %v15021_v14  ;;  %10821 = vmatpush.bf16.msra.mxu3 %v15822_v18 }
 0x77c   : > { %v18552_v7 = vld [vmem:[#allocation10 + $0xaf4] sm:$0xf0] }
 0x77d   : > { %v15533_v4 = vld [vmem:[#allocation10 + $0xcd8] sm:$0xf]  ;;  %v15278_v29 = vor.u32 %v18552_v7, %v15277_v6  ;;  %10783 = vmatpush.bf16.msra.mxu0 %v15022_v28 }
 0x77e   : > { %v18616_v9 = vld [vmem:[#allocation10 + $0xcf4] sm:$0xf0] }
 0x77f   : > { %v15789_v33 = vld [vmem:[#allocation10 + $0xed8] sm:$0xf]  ;;  %v15534_v34 = vor.u32 %v18616_v9, %v15533_v4  ;;  %10796 = vmatpush.bf16.msra.mxu1 %v15278_v29  ;;  %v10569_v29 = vpop.f32.mrf.mxu3 }
 0x780   : > { %v18680_v23 = vld [vmem:[#allocation10 + $0xef4] sm:$0xf0] }
 0x781   : > { %v14989_v27 = vld [vmem:[#allocation10 + $0x898] sm:$0xf]  ;;  %v15790_v37 = vor.u32 %v18680_v23, %v15789_v33  ;;  %10809 = vmatpush.bf16.msra.mxu2 %v15534_v34  ;;  %v10556_v33 = vpop.f32.mrf.mxu2 }
 0x782   : > { %v18480_v36 = vld [vmem:[#allocation10 + $0x8b4] sm:$0xf0] }
 0x783   : > { %v15245_v10 = vld [vmem:[#allocation10 + $0xa98] sm:$0xf]  ;;  %v14990_v46 = vor.u32 %v18480_v36, %v14989_v27  ;;  %10822 = vmatpush.bf16.msra.mxu3 %v15790_v37 }
 0x784   : > { %v18544_v41 = vld [vmem:[#allocation10 + $0xab4] sm:$0xf0] }
 0x785   : > { %v15501_v11 = vld [vmem:[#allocation10 + $0xc98] sm:$0xf]  ;;  %v15246_v3 = vor.u32 %v18544_v41, %v15245_v10  ;;  %10784 = vmatpush.bf16.msra.mxu0 %v14990_v46 }
 0x786   : > { %v18608_v38 = vld [vmem:[#allocation10 + $0xcb4] sm:$0xf0] }
 0x787   : > { %v15757_v45 = vld [vmem:[#allocation10 + $0xe98] sm:$0xf]  ;;  %v15502_v47 = vor.u32 %v18608_v38, %v15501_v11  ;;  %10797 = vmatpush.bf16.msra.mxu1 %v15246_v3 }
 0x788   : > { %v18672_v42 = vld [vmem:[#allocation10 + $0xeb4] sm:$0xf0] }
 0x789   : > { %v14957_v49 = vld [vmem:[#allocation10 + $0x858] sm:$0xf]  ;;  %v15758_v54 = vor.u32 %v18672_v42, %v15757_v45  ;;  %10810 = vmatpush.bf16.msra.mxu2 %v15502_v47 }
 0x78a   : > { %v18472_v57 = vld [vmem:[#allocation10 + $0x874] sm:$0xf0] }
 0x78b   : > { %v15213_v50 = vld [vmem:[#allocation10 + $0xa58] sm:$0xf]  ;;  %v14958_v31 = vor.u32 %v18472_v57, %v14957_v49  ;;  %10823 = vmatpush.bf16.msra.mxu3 %v15758_v54 }
 0x78c   : > { %v18536_v55 = vld [vmem:[#allocation10 + $0xa74] sm:$0xf0] }
 0x78d   : > { %v15469_v56 = vld [vmem:[#allocation10 + $0xc58] sm:$0xf]  ;;  %v15214_v13 = vor.u32 %v18536_v55, %v15213_v50  ;;  %10785 = vmatpush.bf16.msra.mxu0 %v14958_v31 }
 0x78e   : > { %v18600_v51 = vld [vmem:[#allocation10 + $0xc74] sm:$0xf0] }
 0x78f   : > { %v15725_v58 = vld [vmem:[#allocation10 + $0xe58] sm:$0xf]  ;;  %v15470_v2 = vor.u32 %v18600_v51, %v15469_v56  ;;  %10798 = vmatpush.bf16.msra.mxu1 %v15214_v13 }
 0x790   : > { %v18664_v59 = vld [vmem:[#allocation10 + $0xe74] sm:$0xf0] }
 0x791   : > { %v14925_v63 = vld [vmem:[#allocation10 + $0x818] sm:$0xf]  ;;  %v15726_v18 = vor.u32 %v18664_v59, %v15725_v58  ;;  %10811 = vmatpush.bf16.msra.mxu2 %v15470_v2 }
 0x792   : > { %v18464_v0 = vld [vmem:[#allocation10 + $0x834] sm:$0xf0] }
 0x793   : > { %v15181_v14 = vld [vmem:[#allocation10 + $0xa18] sm:$0xf]  ;;  %v14926_v34 = vor.u32 %v18464_v0, %v14925_v63  ;;  %10824 = vmatpush.bf16.msra.mxu3 %v15726_v18 }
 0x794   : > { %v18528_v5 = vld [vmem:[#allocation10 + $0xa34] sm:$0xf0] }
 0x795   : > { %v15437_v6 = vld [vmem:[#allocation10 + $0xc18] sm:$0xf]  ;;  %v15182_v37 = vor.u32 %v18528_v5, %v15181_v14  ;;  %10786 = vmatpush.bf16.msra.mxu0 %v14926_v34 }
 0x796   : > { %v18592_v7 = vld [vmem:[#allocation10 + $0xc34] sm:$0xf0] }
 0x797   : > { %v15693_v4 = vld [vmem:[#allocation10 + $0xe18] sm:$0xf]  ;;  %v15438_v41 = vor.u32 %v18592_v7, %v15437_v6  ;;  %10799 = vmatpush.bf16.msra.mxu1 %v15182_v37 }
 0x798   : > { %v18656_v9 = vld [vmem:[#allocation10 + $0xe34] sm:$0xf0]  ;;  %10787 = vmatmul.bf16.vlgmr.msra.gmra.mxu0 %v20993_v21 }
 0x799   : > { %v16173_v23 = vld [vmem:[#allocation10 + $0x11d8] sm:$0xf]  ;;  %v15694_v40 = vor.u32 %v18656_v9, %v15693_v4  ;;  %10812 = vmatpush.bf16.msra.mxu2 %v15438_v41 }
 0x79a   : > { %v18776_v15 = vld [vmem:[#allocation10 + $0x11f4] sm:$0xf0]  ;;  %10800 = vmatmul.bf16.vlgmr.msra.gmra.mxu1 %v20997_v24 }
 0x79b   : > { %v16429_v28 = vld [vmem:[#allocation10 + $0x13d8] sm:$0xf]  ;;  %v16174_v45 = vor.u32 %v18776_v15, %v16173_v23  ;;  %10825 = vmatpush.bf16.msra.mxu3 %v15694_v40 }
 0x79c   : > { %v18840_v27 = vld [vmem:[#allocation10 + $0x13f4] sm:$0xf0]  ;;  %10813 = vmatmul.bf16.vlgmr.msra.gmra.mxu2 %v20991_v17 }
 0x79d   : > { %v16685_v36 = vld [vmem:[#allocation10 + $0x15d8] sm:$0xf]  ;;  %v16430_v42 = vor.u32 %v18840_v27, %v16429_v28  ;;  %10831 = vmatpush.bf16.msrb.mxu0 %v16174_v45  ;;  %v10593_v45 = vpop.f32.mrf.mxu1 }
 0x79e   : > { %v18904_v10 = vld [vmem:[#allocation10 + $0x15f4] sm:$0xf0]  ;;  %10826 = vmatmul.bf16.vlgmr.msra.gmra.mxu3 %v20995_v22 }
 0x79f   : > { %v16941_v11 = vld [vmem:[#allocation10 + $0x17d8] sm:$0xf]  ;;  %v16686_v35 = vor.u32 %v18904_v10, %v16685_v36  ;;  %10844 = vmatpush.bf16.msrb.mxu1 %v16430_v42  ;;  %v10580_v36 = vpop.f32.mrf.mxu0 }
 0x7a0   : > { %v18968_v38 = vld [vmem:[#allocation10 + $0x17f4] sm:$0xf0]  ;;  %v10581_v40 = vadd.f32 %v10580_v36, %v21167_v53 }
 0x7a1   : > { %v16141_v43 = vld [vmem:[#allocation10 + $0x1198] sm:$0xf]  ;;  %v16942_v48 = vor.u32 %v18968_v38, %v16941_v11  ;;  %10857 = vmatpush.bf16.msrb.mxu2 %v16686_v35 }
 0x7a2   : > { %v18768_v20 = vld [vmem:[#allocation10 + $0x11b4] sm:$0xf0] }
 0x7a3   : > { %v16397_v46 = vld [vmem:[#allocation10 + $0x1398] sm:$0xf]  ;;  %v16142_v54 = vor.u32 %v18768_v20, %v16141_v43  ;;  %10870 = vmatpush.bf16.msrb.mxu3 %v16942_v48 }
 0x7a4   : > { %v18832_v3 = vld [vmem:[#allocation10 + $0x13b4] sm:$0xf0] }
 0x7a5   : > { %v16653_v47 = vld [vmem:[#allocation10 + $0x1598] sm:$0xf]  ;;  %v16398_v55 = vor.u32 %v18832_v3, %v16397_v46  ;;  %10832 = vmatpush.bf16.msrb.mxu0 %v16142_v54  ;;  %v10594_v3 = vadd.f32 %v10593_v45, %v10581_v40 }
 0x7a6   : > { %v18896_v49 = vld [vmem:[#allocation10 + $0x15b4] sm:$0xf0] }
 0x7a7   : > { %v16909_v57 = vld [vmem:[#allocation10 + $0x1798] sm:$0xf]  ;;  %v16654_v56 = vor.u32 %v18896_v49, %v16653_v47  ;;  %10845 = vmatpush.bf16.msrb.mxu1 %v16398_v55 }
 0x7a8   : > { %v18960_v50 = vld [vmem:[#allocation10 + $0x17b4] sm:$0xf0] }
 0x7a9   : > { %v16109_v51 = vld [vmem:[#allocation10 + $0x1158] sm:$0xf]  ;;  %v16910_v31 = vor.u32 %v18960_v50, %v16909_v57  ;;  %10858 = vmatpush.bf16.msrb.mxu2 %v16654_v56  ;;  %v10606_v56 = vpop.f32.mrf.mxu2 }
 0x7aa   : > { %v18760_v58 = vld [vmem:[#allocation10 + $0x1174] sm:$0xf0] }
 0x7ab   : > { %v16365_v59 = vld [vmem:[#allocation10 + $0x1358] sm:$0xf]  ;;  %v16110_v5 = vor.u32 %v18760_v58, %v16109_v51  ;;  %10871 = vmatpush.bf16.msrb.mxu3 %v16910_v31  ;;  %v10607_v31 = vadd.f32 %v10606_v56, %v10594_v3 }
 0x7ac   : > { %v18824_v63 = vld [vmem:[#allocation10 + $0x1374] sm:$0xf0] }
 0x7ad   : > { %v16621_v0 = vld [vmem:[#allocation10 + $0x1558] sm:$0xf]  ;;  %v16366_v6 = vor.u32 %v18824_v63, %v16365_v59  ;;  %10833 = vmatpush.bf16.msrb.mxu0 %v16110_v5  ;;  %v10619_v63 = vpop.f32.mrf.mxu3  ;;  %v10582_v5 = vpop.f32.mrf.mxu0 }
 0x7ae   : > { %v18888_v13 = vld [vmem:[#allocation10 + $0x1574] sm:$0xf0] }
 0x7af   : > { %v16877_v2 = vld [vmem:[#allocation10 + $0x1758] sm:$0xf]  ;;  %v16622_v18 = vor.u32 %v18888_v13, %v16621_v0  ;;  %10846 = vmatpush.bf16.msrb.mxu1 %v16366_v6 }
 0x7b0   : > { %v18952_v14 = vld [vmem:[#allocation10 + $0x1774] sm:$0xf0] }
 0x7b1   : > { %v16077_v7 = vld [vmem:[#allocation10 + $0x1118] sm:$0xf]  ;;  %v16878_v33 = vor.u32 %v18952_v14, %v16877_v2  ;;  %10859 = vmatpush.bf16.msrb.mxu2 %v16622_v18  ;;  %v21174_v14 = vadd.f32 %v10619_v63, %v10607_v31 }
 0x7b2   : > { %v18752_v4 = vld [vmem:[#allocation10 + $0x1134] sm:$0xf0] }
 0x7b3   : > { %v16333_v9 = vld [vmem:[#allocation10 + $0x1318] sm:$0xf]  ;;  %v16078_v27 = vor.u32 %v18752_v4, %v16077_v7  ;;  %10872 = vmatpush.bf16.msrb.mxu3 %v16878_v33  ;;  %v10595_v33 = vpop.f32.mrf.mxu1 }
 0x7b4   : > { %v18816_v23 = vld [vmem:[#allocation10 + $0x1334] sm:$0xf0]  ;;  %v14351_v33 = vld [vmem:[#allocation10 + $0x3b8] sm:$0xf0] }
 0x7b5   : > { %v16589_v15 = vld [vmem:[#allocation10 + $0x1518] sm:$0xf]  ;;  %v16334_v10 = vor.u32 %v18816_v23, %v16333_v9  ;;  %10834 = vmatpush.bf16.msrb.mxu0 %v16078_v27 }
 0x7b6   : > { %v18880_v28 = vld [vmem:[#allocation10 + $0x1534] sm:$0xf0] }
 0x7b7   : > { %v16845_v29 = vld [vmem:[#allocation10 + $0x1718] sm:$0xf]  ;;  %v16590_v37 = vor.u32 %v18880_v28, %v16589_v15  ;;  %10847 = vmatpush.bf16.msrb.mxu1 %v16334_v10 }
 0x7b8   : > { %v18944_v34 = vld [vmem:[#allocation10 + $0x1734] sm:$0xf0] }
 0x7b9   : > { %v16045_v41 = vld [vmem:[#allocation10 + $0x10d8] sm:$0xf]  ;;  %v16846_v42 = vor.u32 %v18944_v34, %v16845_v29  ;;  %10860 = vmatpush.bf16.msrb.mxu2 %v16590_v37 }
 0x7ba   : > { %v18744_v11 = vld [vmem:[#allocation10 + $0x10f4] sm:$0xf0] }
 0x7bb   : > { %v16301_v38 = vld [vmem:[#allocation10 + $0x12d8] sm:$0xf]  ;;  %v16046_v47 = vor.u32 %v18744_v11, %v16045_v41  ;;  %10873 = vmatpush.bf16.msrb.mxu3 %v16846_v42  ;;  %v10608_v42 = vpop.f32.mrf.mxu2 }
 0x7bc   : > { %v18808_v35 = vld [vmem:[#allocation10 + $0x12f4] sm:$0xf0] }
 0x7bd   : > { %v16557_v43 = vld [vmem:[#allocation10 + $0x14d8] sm:$0xf]  ;;  %v16302_v49 = vor.u32 %v18808_v35, %v16301_v38  ;;  %10835 = vmatpush.bf16.msrb.mxu0 %v16046_v47 }
 0x7be   : > { %v18872_v20 = vld [vmem:[#allocation10 + $0x14f4] sm:$0xf0] }
 0x7bf   : > { %v16813_v46 = vld [vmem:[#allocation10 + $0x16d8] sm:$0xf]  ;;  %v16558_v57 = vor.u32 %v18872_v20, %v16557_v43  ;;  %10848 = vmatpush.bf16.msrb.mxu1 %v16302_v49 }
 0x7c0   : > { %v18936_v48 = vld [vmem:[#allocation10 + $0x16f4] sm:$0xf0] }
 0x7c1   : > { %v16013_v50 = vld [vmem:[#allocation10 + $0x1098] sm:$0xf]  ;;  %v16814_v53 = vor.u32 %v18936_v48, %v16813_v46  ;;  %10861 = vmatpush.bf16.msrb.mxu2 %v16558_v57  ;;  %v10621_v48 = vpop.f32.mrf.mxu3 }
 0x7c2   : > { %v18736_v54 = vld [vmem:[#allocation10 + $0x10b4] sm:$0xf0] }
 0x7c3   : > { %v16269_v55 = vld [vmem:[#allocation10 + $0x1298] sm:$0xf]  ;;  %v16014_v2 = vor.u32 %v18736_v54, %v16013_v50  ;;  %10874 = vmatpush.bf16.msrb.mxu3 %v16814_v53  ;;  %v18260_v54 = vld [vmem:[#allocation10 + $0x1dc] sm:$0xf] }
 0x7c4   : > { %v18800_v51 = vld [vmem:[#allocation10 + $0x12b4] sm:$0xf0] }
 0x7c5   : > { %v16525_v58 = vld [vmem:[#allocation10 + $0x1498] sm:$0xf]  ;;  %v16270_v6 = vor.u32 %v18800_v51, %v16269_v55  ;;  %10836 = vmatpush.bf16.msrb.mxu0 %v16014_v2  ;;  %v14127_v55 = vld [vmem:[#allocation10 + $0x1f8] sm:$0xf0] }
 0x7c6   : > { %v18864_v59 = vld [vmem:[#allocation10 + $0x14b4] sm:$0xf0]  ;;  %v18324_v51 = vld [vmem:[#allocation10 + $0x3dc] sm:$0xf] }
 0x7c7   : > { %v16781_v0 = vld [vmem:[#allocation10 + $0x1698] sm:$0xf]  ;;  %v16526_v18 = vor.u32 %v18864_v59, %v16525_v58  ;;  %10849 = vmatpush.bf16.msrb.mxu1 %v16270_v6  ;;  %v14383_v58 = vld [vmem:[#allocation10 + $0x3f8] sm:$0xf0] }
 0x7c8   : > { %v18928_v13 = vld [vmem:[#allocation10 + $0x16b4] sm:$0xf0]  ;;  %v14386_v6 = vor.u32 %v18324_v51, %v14383_v58 }
 0x7c9   : > { %v15981_v7 = vld [vmem:[#allocation10 + $0x1058] sm:$0xf]  ;;  %v16782_v23 = vor.u32 %v18928_v13, %v16781_v0  ;;  %10862 = vmatpush.bf16.msrb.mxu2 %v16526_v18  ;;  %v14130_v0 = vor.u32 %v18260_v54, %v14127_v55 }
 0x7ca   : > { %v18728_v4 = vld [vmem:[#allocation10 + $0x1074] sm:$0xf0] }
 0x7cb   : > { %v16237_v9 = vld [vmem:[#allocation10 + $0x1258] sm:$0xf]  ;;  %v15982_v36 = vor.u32 %v18728_v4, %v15981_v7  ;;  %10875 = vmatpush.bf16.msrb.mxu3 %v16782_v23  ;;  %v18252_v7 = vld [vmem:[#allocation10 + $0x19c] sm:$0xf] }
 0x7cc   : > { %v18792_v15 = vld [vmem:[#allocation10 + $0x1274] sm:$0xf0]  ;;  %v14095_v4 = vld [vmem:[#allocation10 + $0x1b8] sm:$0xf0] }
 0x7cd   : > { %v16493_v28 = vld [vmem:[#allocation10 + $0x1458] sm:$0xf]  ;;  %v16238_v41 = vor.u32 %v18792_v15, %v16237_v9  ;;  %10837 = vmatpush.bf16.msrb.mxu0 %v15982_v36  ;;  %v18316_v9 = vld [vmem:[#allocation10 + $0x39c] sm:$0xf] }
 0x7ce   : > { %v18856_v29 = vld [vmem:[#allocation10 + $0x1474] sm:$0xf0]  ;;  %v14354_v36 = vor.u32 %v18316_v9, %v14351_v33 }
 0x7cf   : > { %v16749_v34 = vld [vmem:[#allocation10 + $0x1658] sm:$0xf]  ;;  %v16494_v11 = vor.u32 %v18856_v29, %v16493_v28  ;;  %10850 = vmatpush.bf16.msrb.mxu1 %v16238_v41  ;;  %v14098_v28 = vor.u32 %v18252_v7, %v14095_v4  ;;  %v14063_v41 = vld [vmem:[#allocation10 + $0x178] sm:$0xf0] }
 0x7d0   : > { %v18920_v27 = vld [vmem:[#allocation10 + $0x1674] sm:$0xf0] }
 0x7d1   : > { %v15949_v10 = vld [vmem:[#allocation10 + $0x1018] sm:$0xf]  ;;  %v16750_v35 = vor.u32 %v18920_v27, %v16749_v34  ;;  %10863 = vmatpush.bf16.msrb.mxu2 %v16494_v11  ;;  %v18308_v11 = vld [vmem:[#allocation10 + $0x35c] sm:$0xf] }
 0x7d2   : > { %v18720_v37 = vld [vmem:[#allocation10 + $0x1034] sm:$0xf0] }
 0x7d3   : > { %v16205_v38 = vld [vmem:[#allocation10 + $0x1218] sm:$0xf]  ;;  %v15950_v57 = vor.u32 %v18720_v37, %v15949_v10  ;;  %10876 = vmatpush.bf16.msrb.mxu3 %v16750_v35  ;;  %v18244_v37 = vld [vmem:[#allocation10 + $0x15c] sm:$0xf] }
 0x7d4   : > { %v18784_v40 = vld [vmem:[#allocation10 + $0x1234] sm:$0xf0]  ;;  %v14066_v42 = vor.u32 %v18244_v37, %v14063_v41  ;;  %v18284_v37 = vld [vmem:[#allocation10 + $0x29c] sm:$0xf] }
 0x7d5   : > { %v16461_v45 = vld [vmem:[#allocation10 + $0x1418] sm:$0xf]  ;;  %v16206_v56 = vor.u32 %v18784_v40, %v16205_v38  ;;  %10838 = vmatpush.bf16.msrb.mxu0 %v15950_v57  ;;  %v14319_v38 = vld [vmem:[#allocation10 + $0x378] sm:$0xf0] }
 0x7d6   : > { %v18848_v43 = vld [vmem:[#allocation10 + $0x1434] sm:$0xf0]  ;;  %v18300_v57 = vld [vmem:[#allocation10 + $0x31c] sm:$0xf] }
 0x7d7   : > { %v16717_v20 = vld [vmem:[#allocation10 + $0x1618] sm:$0xf]  ;;  %v16462_v53 = vor.u32 %v18848_v43, %v16461_v45  ;;  %10851 = vmatpush.bf16.msrb.mxu1 %v16206_v56  ;;  %v10645_v56 = vpop.f32.mrf.mxu1  ;;  %v14223_v41 = vld [vmem:[#allocation10 + $0x2b8] sm:$0xf0] }
 0x7d8   : > { %v18912_v46 = vld [vmem:[#allocation10 + $0x1634] sm:$0xf0]  ;;  %10839 = vmatmul.bf16.vlgmr.msrb.gmra.mxu0 %v21009_v16 }
 0x7d9   : > { %v17197_v3 = vld [vmem:[#allocation10 + $0x19d8] sm:$0xf]  ;;  %v16718_v59 = vor.u32 %v18912_v46, %v16717_v20  ;;  %10864 = vmatpush.bf16.msrb.mxu2 %v16462_v53  ;;  %v14322_v46 = vor.u32 %v18308_v11, %v14319_v38 }
 0x7da   : > { %v19032_v47 = vld [vmem:[#allocation10 + $0x19f4] sm:$0xf0]  ;;  %10852 = vmatmul.bf16.vlgmr.msrb.gmra.mxu1 %v21013_v26 }
 0x7db   : > { %v17453_v49 = vld [vmem:[#allocation10 + $0x1bd8] sm:$0xf]  ;;  %v17198_v31 = vor.u32 %v19032_v47, %v17197_v3  ;;  %10877 = vmatpush.bf16.msrb.mxu3 %v16718_v59  ;;  %v18236_v3 = vld [vmem:[#allocation10 + $0x11c] sm:$0xf] }
 0x7dc   : > { %v19096_v50 = vld [vmem:[#allocation10 + $0x1bf4] sm:$0xf0]  ;;  %10865 = vmatmul.bf16.vlgmr.msrb.gmra.mxu2 %v21011_v25  ;;  %v14031_v47 = vld [vmem:[#allocation10 + $0x138] sm:$0xf0] }
 0x7dd   : > { %v17454_v63 = vor.u32 %v19096_v50, %v17453_v49  ;;  %v17165_v13 = vld [vmem:[#allocation10 + $0x1998] sm:$0xf]  ;;  %10883 = vmatpush.bf16.msra.mxu0 %v17198_v31  ;;  %10909 = vmatpush.bf16.msra.mxu2 %v14130_v0  ;;  %v10632_v49 = vpop.f32.mrf.mxu0  ;;  %v14287_v50 = vld [vmem:[#allocation10 + $0x338] sm:$0xf0]  ;;  %v14034_v51 = vor.u32 %v18236_v3, %v14031_v47 }
 0x7de   : > { %v19024_v2 = vld [vmem:[#allocation10 + $0x19b4] sm:$0xf0]  ;;  %10878 = vmatmul.bf16.vlgmr.msrb.gmra.mxu3 %v21015_v30  ;;  %v10633_v54 = vadd.f32 %v10632_v49, %v21174_v14  ;;  %v18212_v47 = vld [vmem:[#allocation10 + $0x5c] sm:$0xf] }
 0x7df   : > { %v17421_v5 = vld [vmem:[#allocation10 + $0x1b98] sm:$0xf]  ;;  %v17166_v23 = vor.u32 %v19024_v2, %v17165_v13  ;;  %10896 = vmatpush.bf16.msra.mxu1 %v17454_v63  ;;  %10922 = vmatpush.bf16.msra.mxu3 %v14386_v6  ;;  %v14290_v63 = vor.u32 %v18300_v57, %v14287_v50  ;;  %v18228_v2 = vld [vmem:[#allocation10 + $0xdc] sm:$0xf] }
 0x7e0   : > { %v19088_v18 = vld [vmem:[#allocation10 + $0x1bb4] sm:$0xf0]  ;;  %v10646_v0 = vadd.f32 %v10645_v56, %v10633_v54  ;;  %v18292_v6 = vld [vmem:[#allocation10 + $0x2dc] sm:$0xf] }
 0x7e1   : > { %v17422_v15 = vor.u32 %v19088_v18, %v17421_v5  ;;  %v17133_v29 = vld [vmem:[#allocation10 + $0x1958] sm:$0xf]  ;;  %10884 = vmatpush.bf16.msra.mxu0 %v17166_v23  ;;  %10910 = vmatpush.bf16.msra.mxu2 %v14098_v28  ;;  %v13999_v5 = vld [vmem:[#allocation10 + $0xf8] sm:$0xf0]  ;;  %v10658_v28 = vpop.f32.mrf.mxu2 }
 0x7e2   : > { %v19016_v34 = vld [vmem:[#allocation10 + $0x1974] sm:$0xf0]  ;;  %v14255_v18 = vld [vmem:[#allocation10 + $0x2f8] sm:$0xf0]  ;;  %v14002_v4 = vor.u32 %v18228_v2, %v13999_v5 }
 0x7e3   : > { %v17389_v27 = vld [vmem:[#allocation10 + $0x1b58] sm:$0xf]  ;;  %v17134_v40 = vor.u32 %v19016_v34, %v17133_v29  ;;  %10897 = vmatpush.bf16.msra.mxu1 %v17422_v15  ;;  %10923 = vmatpush.bf16.msra.mxu3 %v14354_v36  ;;  %v14258_v15 = vor.u32 %v18292_v6, %v14255_v18  ;;  %v18220_v34 = vld [vmem:[#allocation10 + $0x9c] sm:$0xf]  ;;  %v10659_v36 = vadd.f32 %v10658_v28, %v10646_v0 }
 0x7e4   : > { %v19080_v10 = vld [vmem:[#allocation10 + $0x1b74] sm:$0xf0]  ;;  %v13935_v49 = vld [vmem:[#allocation10 + $0x78] sm:$0xf0] }
 0x7e5   : > { %v17390_v45 = vor.u32 %v19080_v10, %v17389_v27  ;;  %v17101_v35 = vld [vmem:[#allocation10 + $0x1918] sm:$0xf]  ;;  %10885 = vmatpush.bf16.msra.mxu0 %v17134_v40  ;;  %10911 = vmatpush.bf16.msra.mxu2 %v14066_v42  ;;  %v13967_v27 = vld [vmem:[#allocation10 + $0xb8] sm:$0xf0]  ;;  %v10671_v10 = vpop.f32.mrf.mxu3  ;;  %v10634_v11 = vpop.f32.mrf.mxu0 }
 0x7e6   : > { %v19008_v43 = vld [vmem:[#allocation10 + $0x1934] sm:$0xf0]  ;;  %v10647_v40 = vpop.f32.mrf.mxu1  ;;  %v18276_v57 = vld [vmem:[#allocation10 + $0x25c] sm:$0xf] }
 0x7e7   : > { %v17357_v20 = vld [vmem:[#allocation10 + $0x1b18] sm:$0xf]  ;;  %v17102_v55 = vor.u32 %v19008_v43, %v17101_v35  ;;  %10898 = vmatpush.bf16.msra.mxu1 %v17390_v45  ;;  %10924 = vmatpush.bf16.msra.mxu3 %v14322_v46  ;;  %v21181_v45 = vadd.f32 %v10671_v10, %v10659_v36  ;;  %v13970_v35 = vor.u32 %v18220_v34, %v13967_v27  ;;  %v14191_v50 = vld [vmem:[#allocation10 + $0x278] sm:$0xf0] }
 0x7e8   : > { %v19072_v48 = vld [vmem:[#allocation10 + $0x1b34] sm:$0xf0]  ;;  %v13903_v0 = vld [vmem:[#allocation10 + $0x38] sm:$0xf0] }
 0x7e9   : > { %v17358_v53 = vor.u32 %v19072_v48, %v17357_v20  ;;  %v17069_v58 = vld [vmem:[#allocation10 + $0x18d8] sm:$0xf]  ;;  %10886 = vmatpush.bf16.msra.mxu0 %v17102_v55  ;;  %10912 = vmatpush.bf16.msra.mxu2 %v14034_v51  ;;  %v14226_v48 = vor.u32 %v18284_v37, %v14223_v41  ;;  %v13938_v51 = vor.u32 %v18212_v47, %v13935_v49  ;;  %v14159_v2 = vld [vmem:[#allocation10 + $0x238] sm:$0xf0]  ;;  %v10660_v5 = vpop.f32.mrf.mxu2 }
 0x7ea   : > { %v19000_v59 = vld [vmem:[#allocation10 + $0x18f4] sm:$0xf0]  ;;  %v18388_v6 = vld [vmem:[#allocation10 + $0x5dc] sm:$0xf] }
 0x7eb   : > { %v17325_v31 = vld [vmem:[#allocation10 + $0x1ad8] sm:$0xf]  ;;  %v17070_v7 = vor.u32 %v19000_v59, %v17069_v58  ;;  %10899 = vmatpush.bf16.msra.mxu1 %v17358_v53  ;;  %10925 = vmatpush.bf16.msra.mxu3 %v14290_v63  ;;  %v14194_v63 = vor.u32 %v18276_v57, %v14191_v50  ;;  %v14639_v18 = vld [vmem:[#allocation10 + $0x5f8] sm:$0xf0] }
 0x7ec   : > { %v19064_v13 = vld [vmem:[#allocation10 + $0x1af4] sm:$0xf0]  ;;  %v15407_v34 = vld [vmem:[#allocation10 + $0xbf8] sm:$0xf0]  ;;  %v14642_v36 = vor.u32 %v18388_v6, %v14639_v18 }
 0x7ed   : > { %v17326_v14 = vor.u32 %v19064_v13, %v17325_v31  ;;  %v17037_v9 = vld [vmem:[#allocation10 + $0x1898] sm:$0xf]  ;;  %10887 = vmatpush.bf16.msra.mxu0 %v17070_v7  ;;  %10913 = vmatpush.bf16.msra.mxu2 %v14002_v4  ;;  %v18204_v31 = vld [vmem:[#allocation10 + $0x1c] sm:$0xf] }
 0x7ee   : > { %v18992_v33 = vld [vmem:[#allocation10 + $0x18b4] sm:$0xf0]  ;;  %v18268_v13 = vld [vmem:[#allocation10 + $0x21c] sm:$0xf]  ;;  %v13906_v28 = vor.u32 %v18204_v31, %v13903_v0 }
 0x7ef   : > { %v17293_v23 = vld [vmem:[#allocation10 + $0x1a98] sm:$0xf]  ;;  %v17038_v38 = vor.u32 %v18992_v33, %v17037_v9  ;;  %10900 = vmatpush.bf16.msra.mxu1 %v17326_v14  ;;  %10926 = vmatpush.bf16.msra.mxu3 %v14258_v15  ;;  %v18452_v7 = vld [vmem:[#allocation10 + $0x7dc] sm:$0xf]  ;;  %v10673_v14 = vpop.f32.mrf.mxu3  ;;  %v14162_v27 = vor.u32 %v18268_v13, %v14159_v2 }
 0x7f0   : > { %v19056_v29 = vld [vmem:[#allocation10 + $0x1ab4] sm:$0xf0]  ;;  %v14895_v9 = vld [vmem:[#allocation10 + $0x7f8] sm:$0xf0]  ;;  %v10684_v14 = vpop.f32.mrf.mxu0 }
 0x7f1   : > { %v17294_v42 = vor.u32 %v19056_v29, %v17293_v23  ;;  %v17005_v43 = vld [vmem:[#allocation10 + $0x1858] sm:$0xf]  ;;  %10888 = vmatpush.bf16.msra.mxu0 %v17038_v38  ;;  %10914 = vmatpush.bf16.msra.mxu2 %v13970_v35  ;;  %v18516_v33 = vld [vmem:[#allocation10 + $0x9dc] sm:$0xf]  ;;  %v14898_v10 = vor.u32 %v18452_v7, %v14895_v9 }
 0x7f2   : > { %v18984_v20 = vld [vmem:[#allocation10 + $0x1874] sm:$0xf0]  ;;  %v15151_v23 = vld [vmem:[#allocation10 + $0x9f8] sm:$0xf0] }
 0x7f3   : > { %v17261_v46 = vld [vmem:[#allocation10 + $0x1a58] sm:$0xf]  ;;  %v17006_v54 = vor.u32 %v18984_v20, %v17005_v43  ;;  %10901 = vmatpush.bf16.msra.mxu1 %v17294_v42  ;;  %10927 = vmatpush.bf16.msra.mxu3 %v14226_v48  ;;  %v18580_v29 = vld [vmem:[#allocation10 + $0xbdc] sm:$0xf]  ;;  %v15154_v37 = vor.u32 %v18516_v33, %v15151_v23 }
 0x7f4   : > { %v19048_v3 = vld [vmem:[#allocation10 + $0x1a74] sm:$0xf0]  ;;  %v18380_v41 = vld [vmem:[#allocation10 + $0x59c] sm:$0xf]  ;;  %v15410_v40 = vor.u32 %v18580_v29, %v15407_v34 }
 0x7f5   : > { %v16973_v55 = vld [vmem:[#allocation10 + $0x1818] sm:$0xf]  ;;  %v17262_v53 = vor.u32 %v19048_v3, %v17261_v46  ;;  %10889 = vmatpush.bf16.msra.mxu0 %v17006_v54  ;;  %10915 = vmatpush.bf16.msra.mxu2 %v13938_v51  ;;  %v14607_v11 = vld [vmem:[#allocation10 + $0x5b8] sm:$0xf0] }
 0x7f6   : > { %v18976_v56 = vld [vmem:[#allocation10 + $0x1834] sm:$0xf0]  ;;  %v18444_v38 = vld [vmem:[#allocation10 + $0x79c] sm:$0xf]  ;;  %v14610_v48 = vor.u32 %v18380_v41, %v14607_v11 }
 0x7f7   : > { %v17229_v58 = vld [vmem:[#allocation10 + $0x1a18] sm:$0xf]  ;;  %v16974_v4 = vor.u32 %v18976_v56, %v16973_v55  ;;  %10902 = vmatpush.bf16.msra.mxu1 %v17262_v53  ;;  %10928 = vmatpush.bf16.msra.mxu3 %v14194_v63  ;;  %v14863_v42 = vld [vmem:[#allocation10 + $0x7b8] sm:$0xf0] }
 0x7f8   : > { %v19040_v59 = vld [vmem:[#allocation10 + $0x1a34] sm:$0xf0]  ;;  %v18508_v35 = vld [vmem:[#allocation10 + $0x99c] sm:$0xf]  ;;  %v14866_v3 = vor.u32 %v18444_v38, %v14863_v42 }
 0x7f9   : > { %v17230_v15 = vor.u32 %v19040_v59, %v17229_v58  ;;  %10890 = vmatpush.bf16.msra.mxu0 %v16974_v4  ;;  %v15119_v43 = vld [vmem:[#allocation10 + $0x9b8] sm:$0xf0]  ;;  %10916 = vmatpush.bf16.msra.mxu2 %v13906_v28 }
 0x7fa   : > { %v18572_v20 = vld [vmem:[#allocation10 + $0xb9c] sm:$0xf]  ;;  %v15122_v47 = vor.u32 %v18508_v35, %v15119_v43 }
 0x7fb   : > { %10903 = vmatpush.bf16.msra.mxu1 %v17230_v15  ;;  %v15375_v46 = vld [vmem:[#allocation10 + $0xbb8] sm:$0xf0]  ;;  %10929 = vmatpush.bf16.msra.mxu3 %v14162_v27 }
 0x7fc   : > { %v18372_v49 = vld [vmem:[#allocation10 + $0x55c] sm:$0xf]  ;;  %10891 = vmatmul.bf16.vlgmr.msra.gmra.mxu0 %v21023_v19  ;;  %v15378_v54 = vor.u32 %v18572_v20, %v15375_v46  ;;  %10917 = vmatmul.bf16.vlgmr.msra.gmra.mxu2 %v20977_v61  ;;  %v10685_v61 = vadd.f32 %v10684_v14, %v21181_v45 }
 0x7fd   : > { %10935 = vmatpush.bf16.msrb.mxu0 %v14642_v36  ;;  %10961 = vmatpush.bf16.msrb.mxu2 %v15154_v37  ;;  %v14575_v57 = vld [vmem:[#allocation10 + $0x578] sm:$0xf0] }
 0x7fe   : > { %v18436_v50 = vld [vmem:[#allocation10 + $0x75c] sm:$0xf]  ;;  %10904 = vmatmul.bf16.vlgmr.msra.gmra.mxu1 %v21025_v32  ;;  %v14578_v59 = vor.u32 %v18372_v49, %v14575_v57  ;;  %10930 = vmatmul.bf16.vlgmr.msra.gmra.mxu3 %v20982_v12  ;;  %v10697_v12 = vpop.f32.mrf.mxu1 }
 0x7ff   : > { %10948 = vmatpush.bf16.msrb.mxu1 %v14898_v10  ;;  %10974 = vmatpush.bf16.msrb.mxu3 %v15410_v40  ;;  %v14831_v55 = vld [vmem:[#allocation10 + $0x778] sm:$0xf0]  ;;  %v10698_v36 = vadd.f32 %v10697_v12, %v10685_v61 }
 0x800   : > { %v18500_v56 = vld [vmem:[#allocation10 + $0x95c] sm:$0xf]  ;;  %v14834_v31 = vor.u32 %v18436_v50, %v14831_v55  ;;  %v10723_v50 = vpop.f32.mrf.mxu3 }
 0x801   : > { %v15087_v53 = vld [vmem:[#allocation10 + $0x978] sm:$0xf0]  ;;  %10936 = vmatpush.bf16.msrb.mxu0 %v14610_v48  ;;  %10962 = vmatpush.bf16.msrb.mxu2 %v15122_v47  ;;  %v10710_v48 = vpop.f32.mrf.mxu2 }
 0x802   : > { %v18564_v51 = vld [vmem:[#allocation10 + $0xb5c] sm:$0xf]  ;;  %v15090_v63 = vor.u32 %v18500_v56, %v15087_v53  ;;  %v10711_v57 = vadd.f32 %v10710_v48, %v10698_v36  ;;  %v10686_v56 = vpop.f32.mrf.mxu0 }
 0x803   : > { %v15343_v58 = vld [vmem:[#allocation10 + $0xb78] sm:$0xf0]  ;;  %10949 = vmatpush.bf16.msrb.mxu1 %v14866_v3  ;;  %10975 = vmatpush.bf16.msrb.mxu3 %v15378_v54 }
 0x804   : > { %v18364_v0 = vld [vmem:[#allocation10 + $0x51c] sm:$0xf]  ;;  %v15346_v5 = vor.u32 %v18564_v51, %v15343_v58  ;;  %v21188_v58 = vadd.f32 %v10723_v50, %v10711_v57 }
 0x805   : > { %v14543_v13 = vld [vmem:[#allocation10 + $0x538] sm:$0xf0]  ;;  %10937 = vmatpush.bf16.msrb.mxu0 %v14578_v59  ;;  %10963 = vmatpush.bf16.msrb.mxu2 %v15090_v63 }
 0x806   : > { %v18428_v2 = vld [vmem:[#allocation10 + $0x71c] sm:$0xf]  ;;  %v14546_v33 = vor.u32 %v18364_v0, %v14543_v13  ;;  %v10699_v51 = vpop.f32.mrf.mxu1 }
 0x807   : > { %v14799_v6 = vld [vmem:[#allocation10 + $0x738] sm:$0xf0]  ;;  %10950 = vmatpush.bf16.msrb.mxu1 %v14834_v31  ;;  %10976 = vmatpush.bf16.msrb.mxu3 %v15346_v5 }
 0x808   : > { %v18492_v18 = vld [vmem:[#allocation10 + $0x91c] sm:$0xf]  ;;  %v14802_v23 = vor.u32 %v18428_v2, %v14799_v6 }
 0x809   : > { %v15055_v7 = vld [vmem:[#allocation10 + $0x938] sm:$0xf0]  ;;  %10938 = vmatpush.bf16.msrb.mxu0 %v14546_v33 }
 0x80a   : > { %v18556_v4 = vld [vmem:[#allocation10 + $0xb1c] sm:$0xf]  ;;  %v15058_v15 = vor.u32 %v18492_v18, %v15055_v7 }
 0x80b   : > { %v15311_v9 = vld [vmem:[#allocation10 + $0xb38] sm:$0xf0]  ;;  %10951 = vmatpush.bf16.msrb.mxu1 %v14802_v23 }
 0x80c   : > { %v18356_v28 = vld [vmem:[#allocation10 + $0x4dc] sm:$0xf]  ;;  %v15314_v27 = vor.u32 %v18556_v4, %v15311_v9  ;;  %10964 = vmatpush.bf16.msrb.mxu2 %v15058_v15 }
 0x80d   : > { %v14511_v29 = vld [vmem:[#allocation10 + $0x4f8] sm:$0xf0] }
 0x80e   : > { %v18420_v34 = vld [vmem:[#allocation10 + $0x6dc] sm:$0xf]  ;;  %v14514_v40 = vor.u32 %v18356_v28, %v14511_v29  ;;  %10977 = vmatpush.bf16.msrb.mxu3 %v15314_v27 }
 0x80f   : > { %v14767_v10 = vld [vmem:[#allocation10 + $0x6f8] sm:$0xf0] }
 0x810   : > { %v18484_v37 = vld [vmem:[#allocation10 + $0x8dc] sm:$0xf]  ;;  %v14770_v45 = vor.u32 %v18420_v34, %v14767_v10  ;;  %10939 = vmatpush.bf16.msrb.mxu0 %v14514_v40  ;;  %v10712_v10 = vpop.f32.mrf.mxu2 }
 0x811   : > { %v15023_v41 = vld [vmem:[#allocation10 + $0x8f8] sm:$0xf0] }
 0x812   : > { %v18548_v11 = vld [vmem:[#allocation10 + $0xadc] sm:$0xf]  ;;  %v15026_v42 = vor.u32 %v18484_v37, %v15023_v41  ;;  %10952 = vmatpush.bf16.msrb.mxu1 %v14770_v45 }
 0x813   : > { %v15279_v38 = vld [vmem:[#allocation10 + $0xaf8] sm:$0xf0] }
 0x814   : > { %v18348_v35 = vld [vmem:[#allocation10 + $0x49c] sm:$0xf]  ;;  %v15282_v46 = vor.u32 %v18548_v11, %v15279_v38  ;;  %10965 = vmatpush.bf16.msrb.mxu2 %v15026_v42  ;;  %v10725_v38 = vpop.f32.mrf.mxu3 }
 0x815   : > { %v14479_v43 = vld [vmem:[#allocation10 + $0x4b8] sm:$0xf0] }
 0x816   : > { %v18412_v20 = vld [vmem:[#allocation10 + $0x69c] sm:$0xf]  ;;  %v14482_v53 = vor.u32 %v18348_v35, %v14479_v43  ;;  %10978 = vmatpush.bf16.msrb.mxu3 %v15282_v46 }
 0x817   : > { %v14735_v3 = vld [vmem:[#allocation10 + $0x6b8] sm:$0xf0] }
 0x818   : > { %v18476_v47 = vld [vmem:[#allocation10 + $0x89c] sm:$0xf]  ;;  %v14738_v59 = vor.u32 %v18412_v20, %v14735_v3  ;;  %10940 = vmatpush.bf16.msrb.mxu0 %v14482_v53 }
 0x819   : > { %v14991_v49 = vld [vmem:[#allocation10 + $0x8b8] sm:$0xf0] }
 0x81a   : > { %v18540_v54 = vld [vmem:[#allocation10 + $0xa9c] sm:$0xf]  ;;  %v14994_v31 = vor.u32 %v18476_v47, %v14991_v49  ;;  %10953 = vmatpush.bf16.msrb.mxu1 %v14738_v59 }
 0x81b   : > { %v15247_v55 = vld [vmem:[#allocation10 + $0xab8] sm:$0xf0] }
 0x81c   : > { %v18340_v63 = vld [vmem:[#allocation10 + $0x45c] sm:$0xf]  ;;  %v15250_v2 = vor.u32 %v18540_v54, %v15247_v55  ;;  %10966 = vmatpush.bf16.msrb.mxu2 %v14994_v31 }
 0x81d   : > { %v14447_v0 = vld [vmem:[#allocation10 + $0x478] sm:$0xf0] }
 0x81e   : > { %v18404_v13 = vld [vmem:[#allocation10 + $0x65c] sm:$0xf]  ;;  %v14450_v4 = vor.u32 %v18340_v63, %v14447_v0  ;;  %10979 = vmatpush.bf16.msrb.mxu3 %v15250_v2 }
 0x81f   : > { %v14703_v5 = vld [vmem:[#allocation10 + $0x678] sm:$0xf0] }
 0x820   : > { %v18468_v6 = vld [vmem:[#allocation10 + $0x85c] sm:$0xf]  ;;  %v14706_v33 = vor.u32 %v18404_v13, %v14703_v5  ;;  %10941 = vmatpush.bf16.msrb.mxu0 %v14450_v4 }
 0x821   : > { %v14959_v18 = vld [vmem:[#allocation10 + $0x878] sm:$0xf0] }
 0x822   : > { %v18532_v7 = vld [vmem:[#allocation10 + $0xa5c] sm:$0xf]  ;;  %v14962_v12 = vor.u32 %v18468_v6, %v14959_v18  ;;  %10954 = vmatpush.bf16.msrb.mxu1 %v14706_v33 }
 0x823   : > { %v15215_v14 = vld [vmem:[#allocation10 + $0xa78] sm:$0xf0] }
 0x824   : > { %v18332_v9 = vld [vmem:[#allocation10 + $0x41c] sm:$0xf]  ;;  %v15218_v29 = vor.u32 %v18532_v7, %v15215_v14  ;;  %10967 = vmatpush.bf16.msrb.mxu2 %v14962_v12 }
 0x825   : > { %v14415_v61 = vld [vmem:[#allocation10 + $0x438] sm:$0xf0] }
 0x826   : > { %v18396_v23 = vld [vmem:[#allocation10 + $0x61c] sm:$0xf]  ;;  %v14418_v40 = vor.u32 %v18332_v9, %v14415_v61  ;;  %10980 = vmatpush.bf16.msrb.mxu3 %v15218_v29 }
 0x827   : > { %v14671_v15 = vld [vmem:[#allocation10 + $0x638] sm:$0xf0] }
 0x828   : > { %v18460_v28 = vld [vmem:[#allocation10 + $0x81c] sm:$0xf]  ;;  %v14674_v43 = vor.u32 %v18396_v23, %v14671_v15  ;;  %10942 = vmatpush.bf16.msrb.mxu0 %v14418_v40 }
 0x829   : > { %v14927_v34 = vld [vmem:[#allocation10 + $0x838] sm:$0xf0] }
 0x82a   : > { %v18524_v27 = vld [vmem:[#allocation10 + $0xa1c] sm:$0xf]  ;;  %v14930_v20 = vor.u32 %v18460_v28, %v14927_v34  ;;  %10955 = vmatpush.bf16.msrb.mxu1 %v14674_v43  ;;  %v21194_v34 = vld [vmem:[#allocation12] sm:$0xff] }
 0x82b   : > { %v15183_v36 = vld [vmem:[#allocation10 + $0xa38] sm:$0xf0]  ;;  %10943 = vmatmul.bf16.vlgmr.msrb.gmra.mxu0 %v20975_v60 }
 0x82c   : > { %v18644_v37 = vld [vmem:[#allocation10 + $0xddc] sm:$0xf]  ;;  %v15186_v3 = vor.u32 %v18524_v27, %v15183_v36  ;;  %10968 = vmatpush.bf16.msrb.mxu2 %v14930_v20  ;;  %v5145_v27 = vperm.slane %v21194_v34, 6  ;;  %v10749_v20 = vpop.f32.mrf.mxu1 }
 0x82d   : > { %v15663_v41 = vld [vmem:[#allocation10 + $0xdf8] sm:$0xf0]  ;;  %10956 = vmatmul.bf16.vlgmr.msrb.gmra.mxu1 %v20979_v62 }
 0x82e   : > { %v18708_v11 = vld [vmem:[#allocation10 + $0xfdc] sm:$0xf]  ;;  %v15666_v47 = vor.u32 %v18644_v37, %v15663_v41  ;;  %10981 = vmatpush.bf16.msrb.mxu3 %v15186_v3 }
 0x82f   : > { %v15919_v45 = vld [vmem:[#allocation10 + $0xff8] sm:$0xf0]  ;;  %10969 = vmatmul.bf16.vlgmr.msrb.gmra.mxu2 %v20993_v21 }
 0x830   : > { %v18772_v42 = vld [vmem:[#allocation10 + $0x11dc] sm:$0xf]  ;;  %v15922_v49 = vor.u32 %v18708_v11, %v15919_v45  ;;  %10987 = vmatpush.bf16.msra.mxu0 %v15666_v47  ;;  %v10736_v11 = vpop.f32.mrf.mxu0 }
 0x831   : > { %v16175_v35 = vld [vmem:[#allocation10 + $0x11f8] sm:$0xf0]  ;;  %10982 = vmatmul.bf16.vlgmr.msrb.gmra.mxu3 %v20997_v24  ;;  %v10737_v43 = vadd.f32 %v10736_v11, %v5145_v27 }
 0x832   : > { %v18836_v46 = vld [vmem:[#allocation10 + $0x13dc] sm:$0xf]  ;;  %v16178_v57 = vor.u32 %v18772_v42, %v16175_v35  ;;  %11000 = vmatpush.bf16.msra.mxu1 %v15922_v49 }
 0x833   : > { %v16431_v48 = vld [vmem:[#allocation10 + $0x13f8] sm:$0xf0] }
 0x834   : > { %v18636_v50 = vld [vmem:[#allocation10 + $0xd9c] sm:$0xf]  ;;  %v16434_v56 = vor.u32 %v18836_v46, %v16431_v48  ;;  %11013 = vmatpush.bf16.msra.mxu2 %v16178_v57 }
 0x835   : > { %v15631_v54 = vld [vmem:[#allocation10 + $0xdb8] sm:$0xf0] }
 0x836   : > { %v18700_v55 = vld [vmem:[#allocation10 + $0xf9c] sm:$0xf]  ;;  %v15634_v0 = vor.u32 %v18636_v50, %v15631_v54  ;;  %11026 = vmatpush.bf16.msra.mxu3 %v16434_v56  ;;  %v10750_v50 = vadd.f32 %v10749_v20, %v10737_v43 }
 0x837   : > { %v15887_v53 = vld [vmem:[#allocation10 + $0xfb8] sm:$0xf0] }
 0x838   : > { %v18764_v51 = vld [vmem:[#allocation10 + $0x119c] sm:$0xf]  ;;  %v15890_v13 = vor.u32 %v18700_v55, %v15887_v53  ;;  %10988 = vmatpush.bf16.msra.mxu0 %v15634_v0 }
 0x839   : > { %v16143_v59 = vld [vmem:[#allocation10 + $0x11b8] sm:$0xf0] }
 0x83a   : > { %v18828_v31 = vld [vmem:[#allocation10 + $0x139c] sm:$0xf]  ;;  %v16146_v2 = vor.u32 %v18764_v51, %v16143_v59  ;;  %11001 = vmatpush.bf16.msra.mxu1 %v15890_v13 }
 0x83b   : > { %v16399_v63 = vld [vmem:[#allocation10 + $0x13b8] sm:$0xf0] }
 0x83c   : > { %v18628_v5 = vld [vmem:[#allocation10 + $0xd5c] sm:$0xf]  ;;  %v16402_v7 = vor.u32 %v18828_v31, %v16399_v63  ;;  %11014 = vmatpush.bf16.msra.mxu2 %v16146_v2  ;;  %v10762_v31 = vpop.f32.mrf.mxu2 }
 0x83d   : > { %v15599_v6 = vld [vmem:[#allocation10 + $0xd78] sm:$0xf0] }
 0x83e   : > { %v18692_v18 = vld [vmem:[#allocation10 + $0xf5c] sm:$0xf]  ;;  %v15602_v12 = vor.u32 %v18628_v5, %v15599_v6  ;;  %11027 = vmatpush.bf16.msra.mxu3 %v16402_v7  ;;  %v10763_v5 = vadd.f32 %v10762_v31, %v10750_v50  ;;  %v10775_v6 = vpop.f32.mrf.mxu3 }
 0x83f   : > { %v15855_v14 = vld [vmem:[#allocation10 + $0xf78] sm:$0xf0] }
 0x840   : > { %v18756_v4 = vld [vmem:[#allocation10 + $0x115c] sm:$0xf]  ;;  %v15858_v15 = vor.u32 %v18692_v18, %v15855_v14  ;;  %10989 = vmatpush.bf16.msra.mxu0 %v15602_v12 }
 0x841   : > { %v16111_v9 = vld [vmem:[#allocation10 + $0x1178] sm:$0xf0] }
 0x842   : > { %v18820_v61 = vld [vmem:[#allocation10 + $0x135c] sm:$0xf]  ;;  %v16114_v28 = vor.u32 %v18756_v4, %v16111_v9  ;;  %11002 = vmatpush.bf16.msra.mxu1 %v15858_v15  ;;  %v21197_v4 = vadd.f32 %v10775_v6, %v10763_v5  ;;  %v10738_v9 = vpop.f32.mrf.mxu0 }
 0x843   : > { %v16367_v33 = vld [vmem:[#allocation10 + $0x1378] sm:$0xf0] }
 0x844   : > { %v18620_v23 = vld [vmem:[#allocation10 + $0xd1c] sm:$0xf]  ;;  %v16370_v36 = vor.u32 %v18820_v61, %v16367_v33  ;;  %11015 = vmatpush.bf16.msra.mxu2 %v16114_v28  ;;  %v10751_v28 = vpop.f32.mrf.mxu1 }
 0x845   : > { %v15567_v29 = vld [vmem:[#allocation10 + $0xd38] sm:$0xf0] }
 0x846   : > { %v18684_v21 = vld [vmem:[#allocation10 + $0xf1c] sm:$0xf]  ;;  %v15570_v62 = vor.u32 %v18620_v23, %v15567_v29  ;;  %11028 = vmatpush.bf16.msra.mxu3 %v16370_v36 }
 0x847   : > { %v15823_v60 = vld [vmem:[#allocation10 + $0xf38] sm:$0xf0] }
 0x848   : > { %v18748_v10 = vld [vmem:[#allocation10 + $0x111c] sm:$0xf]  ;;  %v15826_v38 = vor.u32 %v18684_v21, %v15823_v60  ;;  %10990 = vmatpush.bf16.msra.mxu0 %v15570_v62 }
 0x849   : > { %v16079_v24 = vld [vmem:[#allocation10 + $0x1138] sm:$0xf0] }
 0x84a   : > { %v18812_v37 = vld [vmem:[#allocation10 + $0x131c] sm:$0xf]  ;;  %v16082_v40 = vor.u32 %v18748_v10, %v16079_v24  ;;  %11003 = vmatpush.bf16.msra.mxu1 %v15826_v38 }
 0x84b   : > { %v16335_v41 = vld [vmem:[#allocation10 + $0x1338] sm:$0xf0] }
 0x84c   : > { %v18612_v45 = vld [vmem:[#allocation10 + $0xcdc] sm:$0xf]  ;;  %v16338_v46 = vor.u32 %v18812_v37, %v16335_v41  ;;  %11016 = vmatpush.bf16.msra.mxu2 %v16082_v40 }
 0x84d   : > { %v15535_v42 = vld [vmem:[#allocation10 + $0xcf8] sm:$0xf0] }
 0x84e   : > { %v18676_v35 = vld [vmem:[#allocation10 + $0xedc] sm:$0xf]  ;;  %v15538_v54 = vor.u32 %v18612_v45, %v15535_v42  ;;  %11029 = vmatpush.bf16.msra.mxu3 %v16338_v46  ;;  %v10764_v42 = vpop.f32.mrf.mxu2 }
 0x84f   : > { %v15791_v48 = vld [vmem:[#allocation10 + $0xef8] sm:$0xf0] }
 0x850   : > { %v18740_v3 = vld [vmem:[#allocation10 + $0x10dc] sm:$0xf]  ;;  %v15794_v55 = vor.u32 %v18676_v35, %v15791_v48  ;;  %10991 = vmatpush.bf16.msra.mxu0 %v15538_v54  ;;  %v10777_v48 = vpop.f32.mrf.mxu3 }
 0x851   : > { %v16047_v47 = vld [vmem:[#allocation10 + $0x10f8] sm:$0xf0] }
 0x852   : > { %v18804_v49 = vld [vmem:[#allocation10 + $0x12dc] sm:$0xf]  ;;  %v16050_v56 = vor.u32 %v18740_v3, %v16047_v47  ;;  %11004 = vmatpush.bf16.msra.mxu1 %v15794_v55 }
 0x853   : > { %v16303_v57 = vld [vmem:[#allocation10 + $0x12f8] sm:$0xf0] }
 0x854   : > { %v18604_v53 = vld [vmem:[#allocation10 + $0xc9c] sm:$0xf]  ;;  %v16306_v63 = vor.u32 %v18804_v49, %v16303_v57  ;;  %11017 = vmatpush.bf16.msra.mxu2 %v16050_v56 }
 0x855   : > { %v15503_v51 = vld [vmem:[#allocation10 + $0xcb8] sm:$0xf0] }
 0x856   : > { %v18668_v59 = vld [vmem:[#allocation10 + $0xe9c] sm:$0xf]  ;;  %v15506_v14 = vor.u32 %v18604_v53, %v15503_v51  ;;  %11030 = vmatpush.bf16.msra.mxu3 %v16306_v63 }
 0x857   : > { %v15759_v0 = vld [vmem:[#allocation10 + $0xeb8] sm:$0xf0] }
 0x858   : > { %v18732_v13 = vld [vmem:[#allocation10 + $0x109c] sm:$0xf]  ;;  %v15762_v61 = vor.u32 %v18668_v59, %v15759_v0  ;;  %10992 = vmatpush.bf16.msra.mxu0 %v15506_v14 }
 0x859   : > { %v16015_v2 = vld [vmem:[#allocation10 + $0x10b8] sm:$0xf0] }
 0x85a   : > { %v18796_v18 = vld [vmem:[#allocation10 + $0x129c] sm:$0xf]  ;;  %v16018_v33 = vor.u32 %v18732_v13, %v16015_v2  ;;  %11005 = vmatpush.bf16.msra.mxu1 %v15762_v61 }
 0x85b   : > { %v16271_v7 = vld [vmem:[#allocation10 + $0x12b8] sm:$0xf0] }
 0x85c   : > { %v18596_v12 = vld [vmem:[#allocation10 + $0xc5c] sm:$0xf]  ;;  %v16274_v29 = vor.u32 %v18796_v18, %v16271_v7  ;;  %11018 = vmatpush.bf16.msra.mxu2 %v16018_v33 }
 0x85d   : > { %v15471_v23 = vld [vmem:[#allocation10 + $0xc78] sm:$0xf0] }
 0x85e   : > { %v18660_v15 = vld [vmem:[#allocation10 + $0xe5c] sm:$0xf]  ;;  %v15474_v24 = vor.u32 %v18596_v12, %v15471_v23  ;;  %11031 = vmatpush.bf16.msra.mxu3 %v16274_v29 }
 0x85f   : > { %v15727_v21 = vld [vmem:[#allocation10 + $0xe78] sm:$0xf0] }
 0x860   : > { %v18724_v27 = vld [vmem:[#allocation10 + $0x105c] sm:$0xf]  ;;  %v15730_v62 = vor.u32 %v18660_v15, %v15727_v21  ;;  %10993 = vmatpush.bf16.msra.mxu0 %v15474_v24 }
 0x861   : > { %v15983_v36 = vld [vmem:[#allocation10 + $0x1078] sm:$0xf0] }
 0x862   : > { %v18788_v60 = vld [vmem:[#allocation10 + $0x125c] sm:$0xf]  ;;  %v15986_v11 = vor.u32 %v18724_v27, %v15983_v36  ;;  %11006 = vmatpush.bf16.msra.mxu1 %v15730_v62 }
 0x863   : > { %v16239_v10 = vld [vmem:[#allocation10 + $0x1278] sm:$0xf0] }
 0x864   : > { %v18588_v37 = vld [vmem:[#allocation10 + $0xc1c] sm:$0xf]  ;;  %v16242_v35 = vor.u32 %v18788_v60, %v16239_v10  ;;  %11019 = vmatpush.bf16.msra.mxu2 %v15986_v11 }
 0x865   : > { %v15439_v41 = vld [vmem:[#allocation10 + $0xc38] sm:$0xf0] }
 0x866   : > { %v18652_v38 = vld [vmem:[#allocation10 + $0xe1c] sm:$0xf]  ;;  %v15442_v57 = vor.u32 %v18588_v37, %v15439_v41  ;;  %11032 = vmatpush.bf16.msra.mxu3 %v16242_v35 }
 0x867   : > { %v15695_v40 = vld [vmem:[#allocation10 + $0xe38] sm:$0xf0] }
 0x868   : > { %v18716_v45 = vld [vmem:[#allocation10 + $0x101c] sm:$0xf]  ;;  %v15698_v56 = vor.u32 %v18652_v38, %v15695_v40  ;;  %10994 = vmatpush.bf16.msra.mxu0 %v15442_v57  ;;  %v21205_v57 = vpop.f32.mrf.mxu1 }
 0x869   : > { %v15951_v43 = vld [vmem:[#allocation10 + $0x1038] sm:$0xf0] }
 0x86a   : > { %v18780_v20 = vld [vmem:[#allocation10 + $0x121c] sm:$0xf]  ;;  %v15954_v53 = vor.u32 %v18716_v45, %v15951_v43  ;;  %11007 = vmatpush.bf16.msra.mxu1 %v15698_v56 }
 0x86b   : > { %v16207_v46 = vld [vmem:[#allocation10 + $0x1238] sm:$0xf0]  ;;  %10995 = vmatmul.bf16.vlgmr.msra.gmra.mxu0 %v20991_v17 }
 0x86c   : > { %v18900_v3 = vld [vmem:[#allocation10 + $0x15dc] sm:$0xf]  ;;  %v16210_v31 = vor.u32 %v18780_v20, %v16207_v46  ;;  %11020 = vmatpush.bf16.msra.mxu2 %v15954_v53  ;;  %v21203_v46 = vpop.f32.mrf.mxu0 }
 0x86d   : > { %v16687_v47 = vld [vmem:[#allocation10 + $0x15f8] sm:$0xf0]  ;;  %11008 = vmatmul.bf16.vlgmr.msra.gmra.mxu1 %v20995_v22 }
 0x86e   : > { %v18964_v49 = vld [vmem:[#allocation10 + $0x17dc] sm:$0xf]  ;;  %v16690_v63 = vor.u32 %v18900_v3, %v16687_v47  ;;  %11033 = vmatpush.bf16.msra.mxu3 %v16210_v31 }
 0x86f   : > { %v16943_v50 = vld [vmem:[#allocation10 + $0x17f8] sm:$0xf0]  ;;  %11021 = vmatmul.bf16.vlgmr.msra.gmra.mxu2 %v21009_v16 }
 0x870   : > { %v19028_v54 = vld [vmem:[#allocation10 + $0x19dc] sm:$0xf]  ;;  %v16946_v0 = vor.u32 %v18964_v49, %v16943_v50  ;;  %11039 = vmatpush.bf16.msrb.mxu0 %v16690_v63 }
 0x871   : > { %v17199_v55 = vld [vmem:[#allocation10 + $0x19f8] sm:$0xf0]  ;;  %11034 = vmatmul.bf16.vlgmr.msra.gmra.mxu3 %v21013_v26 }
 0x872   : > { %v19092_v51 = vld [vmem:[#allocation10 + $0x1bdc] sm:$0xf]  ;;  %v17202_v13 = vor.u32 %v19028_v54, %v17199_v55  ;;  %11052 = vmatpush.bf16.msrb.mxu1 %v16946_v0 }
 0x873   : > { %v17455_v59 = vld [vmem:[#allocation10 + $0x1bf8] sm:$0xf0] }
 0x874   : > { %v18892_v2 = vld [vmem:[#allocation10 + $0x159c] sm:$0xf]  ;;  %v17458_v18 = vor.u32 %v19092_v51, %v17455_v59  ;;  %11065 = vmatpush.bf16.msrb.mxu2 %v17202_v13 }
 0x875   : > { %v16655_v5 = vld [vmem:[#allocation10 + $0x15b8] sm:$0xf0] }
 0x876   : > { %v18956_v6 = vld [vmem:[#allocation10 + $0x179c] sm:$0xf]  ;;  %v16658_v12 = vor.u32 %v18892_v2, %v16655_v5  ;;  %11078 = vmatpush.bf16.msrb.mxu3 %v17458_v18  ;;  %v21207_v5 = vpop.f32.mrf.mxu2 }
 0x877   : > { %v16911_v7 = vld [vmem:[#allocation10 + $0x17b8] sm:$0xf0] }
 0x878   : > { %v19020_v14 = vld [vmem:[#allocation10 + $0x199c] sm:$0xf]  ;;  %v16914_v23 = vor.u32 %v18956_v6, %v16911_v7  ;;  %11040 = vmatpush.bf16.msrb.mxu0 %v16658_v12 }
 0x879   : > { %v17167_v9 = vld [vmem:[#allocation10 + $0x19b8] sm:$0xf0] }
 0x87a   : > { %v19084_v61 = vld [vmem:[#allocation10 + $0x1b9c] sm:$0xf]  ;;  %v17170_v15 = vor.u32 %v19020_v14, %v17167_v9  ;;  %11053 = vmatpush.bf16.msrb.mxu1 %v16914_v23  ;;  %v21209_v9 = vpop.f32.mrf.mxu3  ;;  %v10790_v23 = vpop.f32.mrf.mxu0 }
 0x87b   : > { %v17423_v33 = vld [vmem:[#allocation10 + $0x1bb8] sm:$0xf0]  ;;  %v19124_v23 = vld [vmem:[#allocation13 + $0xd8] sm:$0xff] }
 0x87c   : > { %v18884_v28 = vld [vmem:[#allocation10 + $0x155c] sm:$0xf]  ;;  %v17426_v27 = vor.u32 %v19084_v61, %v17423_v33  ;;  %11066 = vmatpush.bf16.msrb.mxu2 %v17170_v15 }
 0x87d   : > { %v16623_v29 = vld [vmem:[#allocation10 + $0x1578] sm:$0xf0] }
 0x87e   : > { %v18948_v21 = vld [vmem:[#allocation10 + $0x175c] sm:$0xf]  ;;  %v16626_v41 = vor.u32 %v18884_v28, %v16623_v29  ;;  %11079 = vmatpush.bf16.msrb.mxu3 %v17426_v27 }
 0x87f   : > { %v16879_v36 = vld [vmem:[#allocation10 + $0x1778] sm:$0xf0] }
 0x880   : > { %v19012_v60 = vld [vmem:[#allocation10 + $0x195c] sm:$0xf]  ;;  %v16882_v62 = vor.u32 %v18948_v21, %v16879_v36  ;;  %11041 = vmatpush.bf16.msrb.mxu0 %v16626_v41  ;;  %v10803_v36 = vpop.f32.mrf.mxu1 }
 0x881   : > { %v17135_v10 = vld [vmem:[#allocation10 + $0x1978] sm:$0xf0] }
 0x882   : > { %v19076_v24 = vld [vmem:[#allocation10 + $0x1b5c] sm:$0xf]  ;;  %v17138_v11 = vor.u32 %v19012_v60, %v17135_v10  ;;  %11054 = vmatpush.bf16.msrb.mxu1 %v16882_v62 }
 0x883   : > { %v17391_v37 = vld [vmem:[#allocation10 + $0x1b78] sm:$0xf0] }
 0x884   : > { %v18876_v38 = vld [vmem:[#allocation10 + $0x151c] sm:$0xf]  ;;  %v17394_v45 = vor.u32 %v19076_v24, %v17391_v37  ;;  %11067 = vmatpush.bf16.msrb.mxu2 %v17138_v11 }
 0x885   : > { %v16591_v17 = vld [vmem:[#allocation10 + $0x1538] sm:$0xf0] }
 0x886   : > { %v18940_v40 = vld [vmem:[#allocation10 + $0x171c] sm:$0xf]  ;;  %v16594_v20 = vor.u32 %v18876_v38, %v16591_v17  ;;  %11080 = vmatpush.bf16.msrb.mxu3 %v17394_v45 }
 0x887   : > { %v16847_v42 = vld [vmem:[#allocation10 + $0x1738] sm:$0xf0] }
 0x888   : > { %v19004_v35 = vld [vmem:[#allocation10 + $0x191c] sm:$0xf]  ;;  %v16850_v26 = vor.u32 %v18940_v40, %v16847_v42  ;;  %11042 = vmatpush.bf16.msrb.mxu0 %v16594_v20 }
 0x889   : > { %v17103_v16 = vld [vmem:[#allocation10 + $0x1938] sm:$0xf0] }
 0x88a   : > { %v19068_v43 = vld [vmem:[#allocation10 + $0x1b1c] sm:$0xf]  ;;  %v17106_v48 = vor.u32 %v19004_v35, %v17103_v16  ;;  %11055 = vmatpush.bf16.msrb.mxu1 %v16850_v26  ;;  %v10816_v35 = vpop.f32.mrf.mxu2  ;;  %v10829_v26 = vpop.f32.mrf.mxu3 }
 0x88b   : > { %v17359_v22 = vld [vmem:[#allocation10 + $0x1b38] sm:$0xf0]  ;;  %v11091_v35 = vmax.f32 %v21056_v44, 0.0  ;;  %v19144_v26 = vld [vmem:[#allocation13 + $0x178] sm:$0xff] }
 0x88c   : > { %v18868_v3 = vld [vmem:[#allocation10 + $0x14dc] sm:$0xf]  ;;  %v17362_v50 = vor.u32 %v19068_v43, %v17359_v22  ;;  %11068 = vmatpush.bf16.msrb.mxu2 %v17106_v48 }
 0x88d   : > { %v16559_v47 = vld [vmem:[#allocation10 + $0x14f8] sm:$0xf0] }
 0x88e   : > { %v18932_v49 = vld [vmem:[#allocation10 + $0x16dc] sm:$0xf]  ;;  %v16562_v59 = vor.u32 %v18868_v3, %v16559_v47  ;;  %11081 = vmatpush.bf16.msrb.mxu3 %v17362_v50 }
 0x88f   : > { %v16815_v54 = vld [vmem:[#allocation10 + $0x16f8] sm:$0xf0] }
 0x890   : > { %v18996_v55 = vld [vmem:[#allocation10 + $0x18dc] sm:$0xf]  ;;  %v16818_v31 = vor.u32 %v18932_v49, %v16815_v54  ;;  %11043 = vmatpush.bf16.msrb.mxu0 %v16562_v59 }
 0x891   : > { %v17071_v56 = vld [vmem:[#allocation10 + $0x18f8] sm:$0xf0] }
 0x892   : > { %v19060_v53 = vld [vmem:[#allocation10 + $0x1adc] sm:$0xf]  ;;  %v17074_v63 = vor.u32 %v18996_v55, %v17071_v56  ;;  %11056 = vmatpush.bf16.msrb.mxu1 %v16818_v31  ;;  %v19104_v55 = vld [vmem:[#allocation13 + $0x38] sm:$0xff] }
 0x893   : > { %v17327_v51 = vld [vmem:[#allocation10 + $0x1af8] sm:$0xf0]  ;;  %v19112_v56 = vld [vmem:[#allocation13 + $0x78] sm:$0xff] }
 0x894   : > { %v18860_v0 = vld [vmem:[#allocation10 + $0x149c] sm:$0xf]  ;;  %v17330_v6 = vor.u32 %v19060_v53, %v17327_v51  ;;  %11069 = vmatpush.bf16.msrb.mxu2 %v17074_v63  ;;  %v19120_v53 = vld [vmem:[#allocation13 + $0xb8] sm:$0xff] }
 0x895   : > { %v16527_v13 = vld [vmem:[#allocation10 + $0x14b8] sm:$0xf0]  ;;  %v19128_v51 = vld [vmem:[#allocation13 + $0xf8] sm:$0xff] }
 0x896   : > { %v18924_v2 = vld [vmem:[#allocation10 + $0x169c] sm:$0xf]  ;;  %v16530_v12 = vor.u32 %v18860_v0, %v16527_v13  ;;  %11082 = vmatpush.bf16.msrb.mxu3 %v17330_v6  ;;  %v19102_v13 = vld [vmem:[#allocation13 + $0x28] sm:$0xff] }
 0x897   : > { %v16783_v18 = vld [vmem:[#allocation10 + $0x16b8] sm:$0xf0]  ;;  %v19118_v6 = vld [vmem:[#allocation13 + $0xa8] sm:$0xff] }
 0x898   : > { %v18988_v7 = vld [vmem:[#allocation10 + $0x189c] sm:$0xf]  ;;  %v16786_v15 = vor.u32 %v18924_v2, %v16783_v18  ;;  %11044 = vmatpush.bf16.msrb.mxu0 %v16530_v12  ;;  %v19110_v2 = vld [vmem:[#allocation13 + $0x68] sm:$0xff]  ;;  %v19116_v12 = vld [vmem:[#allocation13 + $0x98] sm:$0xff] }
 0x899   : > { %v17039_v14 = vld [vmem:[#allocation10 + $0x18b8] sm:$0xf0]  ;;  %v19126_v18 = vld [vmem:[#allocation13 + $0xe8] sm:$0xff] }
 0x89a   : > { %v19052_v61 = vld [vmem:[#allocation10 + $0x1a9c] sm:$0xf]  ;;  %v17042_v28 = vor.u32 %v18988_v7, %v17039_v14  ;;  %11057 = vmatpush.bf16.msrb.mxu1 %v16786_v15  ;;  %v21215_v7 = vpop.f32.mrf.mxu0  ;;  %v19101_v14 = vld [vmem:[#allocation13 + $0x20] sm:$0xff]  ;;  %v21219_v15 = vpop.f32.mrf.mxu2 }
 0x89b   : > { %v17295_v33 = vld [vmem:[#allocation10 + $0x1ab8] sm:$0xf0] }
 0x89c   : > { %v18852_v29 = vld [vmem:[#allocation10 + $0x145c] sm:$0xf]  ;;  %v17298_v60 = vor.u32 %v19052_v61, %v17295_v33  ;;  %11070 = vmatpush.bf16.msrb.mxu2 %v17042_v28  ;;  %v19100_v61 = vld [vmem:[#allocation13 + $0x18] sm:$0xff]  ;;  %v21221_v28 = vpop.f32.mrf.mxu3 }
 0x89d   : > { %v16495_v21 = vld [vmem:[#allocation10 + $0x1478] sm:$0xf0]  ;;  %v19108_v33 = vld [vmem:[#allocation13 + $0x58] sm:$0xff] }
 0x89e   : > { %v18916_v27 = vld [vmem:[#allocation10 + $0x165c] sm:$0xf]  ;;  %v16498_v11 = vor.u32 %v18852_v29, %v16495_v21  ;;  %11083 = vmatpush.bf16.msrb.mxu3 %v17298_v60 }
 0x89f   : > { %v16751_v10 = vld [vmem:[#allocation10 + $0x1678] sm:$0xf0] }
 0x8a0   : > { %v18980_v24 = vld [vmem:[#allocation10 + $0x185c] sm:$0xf]  ;;  %v16754_v38 = vor.u32 %v18916_v27, %v16751_v10  ;;  %11045 = vmatpush.bf16.msrb.mxu0 %v16498_v11  ;;  %v19122_v11 = vld [vmem:[#allocation13 + $0xc8] sm:$0xff] }
 0x8a1   : > { %v17007_v37 = vld [vmem:[#allocation10 + $0x1878] sm:$0xf0] }
 0x8a2   : > { %v19044_v41 = vld [vmem:[#allocation10 + $0x1a5c] sm:$0xf]  ;;  %v17010_v17 = vor.u32 %v18980_v24, %v17007_v37  ;;  %11058 = vmatpush.bf16.msrb.mxu1 %v16754_v38  ;;  %v10842_v29 = vpop.f32.mrf.mxu0  ;;  %v19098_v24 = vld [vmem:[#allocation13 + $0x8] sm:$0xff]  ;;  %v10868_v38 = vpop.f32.mrf.mxu2 }
 0x8a3   : > { %v17263_v62 = vld [vmem:[#allocation10 + $0x1a78] sm:$0xf0]  ;;  %v19106_v37 = vld [vmem:[#allocation13 + $0x48] sm:$0xff] }
 0x8a4   : > { %v18844_v40 = vld [vmem:[#allocation10 + $0x141c] sm:$0xf]  ;;  %v17266_v16 = vor.u32 %v19044_v41, %v17263_v62  ;;  %11071 = vmatpush.bf16.msrb.mxu2 %v17010_v17  ;;  %v19114_v41 = vld [vmem:[#allocation13 + $0x88] sm:$0xff]  ;;  %v10789_v62 = vadd.f32 %v21203_v46, %v21197_v4  ;;  %v10881_v17 = vpop.f32.mrf.mxu3  ;;  %v11093_v4 = vmax.f32 %v21110_v39, 0.0  ;;  %v11094_v46 = vmax.f32 %v21134_v1, 0.0 }
 0x8a5   : > { %v16463_v45 = vld [vmem:[#allocation10 + $0x1438] sm:$0xf0]  ;;  %v19138_v29 = vld [vmem:[#allocation13 + $0x148] sm:$0xff] }
 0x8a6   : > { %v18908_v42 = vld [vmem:[#allocation10 + $0x161c] sm:$0xf]  ;;  %v16466_v47 = vor.u32 %v18844_v40, %v16463_v45  ;;  %11084 = vmatpush.bf16.msrb.mxu3 %v17266_v16  ;;  %v19097_v40 = vld [vmem:[#allocation13] sm:$0xff]  ;;  %v11092_v16 = vmax.f32 %v21080_v52, 0.0 }
 0x8a7   : > { %v16719_v43 = vld [vmem:[#allocation10 + $0x1638] sm:$0xf0]  ;;  %v19105_v45 = vld [vmem:[#allocation13 + $0x40] sm:$0xff] }
 0x8a8   : > { %v18972_v22 = vld [vmem:[#allocation10 + $0x181c] sm:$0xf]  ;;  %v16722_v49 = vor.u32 %v18908_v42, %v16719_v43  ;;  %11046 = vmatpush.bf16.msrb.mxu0 %v16466_v47  ;;  %v19113_v42 = vld [vmem:[#allocation13 + $0x80] sm:$0xff]  ;;  %v10802_v43 = vadd.f32 %v21205_v57, %v10789_v62  ;;  %v11100_v47 = vpack.c.bf16 %v11092_v16, %v11092_v16  ;;  %v11101_v57 = vpack.c.bf16 %v11093_v4, %v11093_v4 }
 0x8a9   : > { %v16975_v20 = vld [vmem:[#allocation10 + $0x1838] sm:$0xf0] }
 0x8aa   : > { %v19036_v48 = vld [vmem:[#allocation10 + $0x1a1c] sm:$0xf]  ;;  %v16978_v50 = vor.u32 %v18972_v22, %v16975_v20  ;;  %11059 = vmatpush.bf16.msrb.mxu1 %v16722_v49  ;;  %v19121_v22 = vld [vmem:[#allocation13 + $0xc0] sm:$0xff]  ;;  %v19136_v20 = vld [vmem:[#allocation13 + $0x138] sm:$0xff]  ;;  %v10815_v44 = vadd.f32 %v21207_v5, %v10802_v43  ;;  %v11102_v49 = vpack.c.bf16 %v11094_v46, %v11094_v46 }
 0x8ab   : > { %v17231_v3 = vld [vmem:[#allocation10 + $0x1a38] sm:$0xf0]  ;;  %11047 = vmatmul.bf16.vlgmr.msrb.gmra.mxu0 %v21011_v25  ;;  %v21217_v25 = vpop.f32.mrf.mxu1  ;;  %v19142_v5 = vld [vmem:[#allocation13 + $0x168] sm:$0xff]  ;;  %v19157_v46 = vld [vmem:[#allocation13 + $0x1e0] sm:$0xff] }
 0x8ac   : > { %v17234_v54 = vor.u32 %v19036_v48, %v17231_v3  ;;  %11072 = vmatpush.bf16.msrb.mxu2 %v16978_v50  ;;  %11623 = vmatpush.bf16.msra.mxu0 %v19104_v55  ;;  %v19103_v59 = vld [vmem:[#allocation13 + $0x30] sm:$0xff]  ;;  %v19152_v48 = vld [vmem:[#allocation13 + $0x1b8] sm:$0xff]  ;;  %v11099_v3 = vpack.c.bf16 %v11091_v35, %v11091_v35  ;;  %v10828_v1 = vadd.f32 %v21209_v9, %v10815_v44  ;;  %v19150_v55 = vld [vmem:[#allocation13 + $0x1a8] sm:$0xff]  ;;  %v5146_v9 = vperm.slane %v21194_v34, 7 }
 0x8ad   : > { %v19111_v31 = vld [vmem:[#allocation13 + $0x70] sm:$0xff]  ;;  %11060 = vmatmul.bf16.vlgmr.msrb.gmra.mxu1 %v21015_v30  ;;  %v19109_v30 = vld [vmem:[#allocation13 + $0x60] sm:$0xff]  ;;  %v19160_v35 = vld [vmem:[#allocation13 + $0x1f8] sm:$0xff] }
 0x8ae   : > { %11085 = vmatpush.bf16.msrb.mxu3 %v17234_v54  ;;  %11636 = vmatpush.bf16.msra.mxu1 %v19112_v56  ;;  %v19119_v63 = vld [vmem:[#allocation13 + $0xb0] sm:$0xff]  ;;  %v19134_v54 = vld [vmem:[#allocation13 + $0x128] sm:$0xff]  ;;  %v10841_v56 = vadd.f32 %v21215_v7, %v10828_v1  ;;  %v10918_v7 = vpop.f32.mrf.mxu2 }
 0x8af   : > { %v19127_v0 = vld [vmem:[#allocation13 + $0xf0] sm:$0xff]  ;;  %11073 = vmatmul.bf16.vlgmr.msrb.gmra.mxu2 %v21023_v19  ;;  %v19117_v19 = vld [vmem:[#allocation13 + $0xa0] sm:$0xff] }
 0x8b0   : > { %11649 = vmatpush.bf16.msra.mxu2 %v19120_v53  ;;  %11624 = vmatpush.bf16.msra.mxu0 %v19103_v59  ;;  %v19099_v21 = vld [vmem:[#allocation13 + $0x10] sm:$0xff]  ;;  %v10892_v53 = vpop.f32.mrf.mxu0 }
 0x8b1   : > { %11086 = vmatmul.bf16.vlgmr.msrb.gmra.mxu3 %v21025_v32  ;;  %v19125_v32 = vld [vmem:[#allocation13 + $0xe0] sm:$0xff]  ;;  %v19107_v36 = vld [vmem:[#allocation13 + $0x50] sm:$0xff] }
 0x8b2   : > { %11662 = vmatpush.bf16.msra.mxu3 %v19128_v51  ;;  %11637 = vmatpush.bf16.msra.mxu1 %v19111_v31  ;;  %v19115_v60 = vld [vmem:[#allocation13 + $0x90] sm:$0xff]  ;;  %v19133_v51 = vld [vmem:[#allocation13 + $0x120] sm:$0xff] }
 0x8b3   : > { %v10855_v27 = vpop.f32.mrf.mxu1  ;;  %v19123_v10 = vld [vmem:[#allocation13 + $0xd0] sm:$0xff]  ;;  %v19141_v31 = vld [vmem:[#allocation13 + $0x160] sm:$0xff] }
 0x8b4   : > { %11650 = vmatpush.bf16.msra.mxu2 %v19119_v63  ;;  %11625 = vmatpush.bf16.msra.mxu0 %v19102_v13  ;;  %v19135_v52 = vld [vmem:[#allocation13 + $0x130] sm:$0xff]  ;;  %v19149_v63 = vld [vmem:[#allocation13 + $0x1a0] sm:$0xff] }
 0x8b5   : > { %v19143_v50 = vld [vmem:[#allocation13 + $0x170] sm:$0xff] }
 0x8b6   : > { %11663 = vmatpush.bf16.msra.mxu3 %v19127_v0  ;;  %11638 = vmatpush.bf16.msra.mxu1 %v19110_v2  ;;  %v19151_v39 = vld [vmem:[#allocation13 + $0x1b0] sm:$0xff]  ;;  %v10854_v0 = vadd.f32 %v21217_v25, %v10841_v56  ;;  %v19132_v2 = vld [vmem:[#allocation13 + $0x118] sm:$0xff] }
 0x8b7   : > { %v19139_v34 = vld [vmem:[#allocation13 + $0x150] sm:$0xff] }
 0x8b8   : > { %11651 = vmatpush.bf16.msra.mxu2 %v19118_v6  ;;  %11626 = vmatpush.bf16.msra.mxu0 %v19101_v14  ;;  %v10867_v13 = vadd.f32 %v21219_v15, %v10854_v0  ;;  %v19140_v6 = vld [vmem:[#allocation13 + $0x158] sm:$0xff]  ;;  %v10919_v14 = vadd.f32 %v10918_v7, %v5146_v9  ;;  %v19147_v25 = vld [vmem:[#allocation13 + $0x190] sm:$0xff]  ;;  %v19130_v15 = vld [vmem:[#allocation13 + $0x108] sm:$0xff] }
 0x8ba   : > { %11664 = vmatpush.bf16.msra.mxu3 %v19126_v18  ;;  %11639 = vmatpush.bf16.msra.mxu1 %v19109_v30  ;;  %v19148_v18 = vld [vmem:[#allocation13 + $0x198] sm:$0xff]  ;;  %v10931_v30 = vpop.f32.mrf.mxu3 }
 0x8bb   : > { %v10905_v59 = vpop.f32.mrf.mxu1 }
 0x8bc   : > { %11652 = vmatpush.bf16.msra.mxu2 %v19117_v19  ;;  %11627 = vmatpush.bf16.msra.mxu0 %v19100_v61  ;;  %v10894_v19 = vpop.f32.mrf.mxu0  ;;  %v19131_v61 = vld [vmem:[#allocation13 + $0x110] sm:$0xff] }
 0x8be   : > { %11665 = vmatpush.bf16.msra.mxu3 %v19125_v32  ;;  %11640 = vmatpush.bf16.msra.mxu1 %v19108_v33  ;;  %v10880_v32 = vadd.f32 %v21221_v28, %v10867_v13  ;;  %v19129_v28 = vld [vmem:[#allocation13 + $0x100] sm:$0xff] }
 0x8c0   : > { %11653 = vmatpush.bf16.msra.mxu2 %v19116_v12  ;;  %11628 = vmatpush.bf16.msra.mxu0 %v19099_v21  ;;  %v10932_v12 = vadd.f32 %v10931_v30, %v10919_v14  ;;  %v19146_v21 = vld [vmem:[#allocation13 + $0x188] sm:$0xff] }
 0x8c2   : > { %11666 = vmatpush.bf16.msra.mxu3 %v19124_v23  ;;  %11641 = vmatpush.bf16.msra.mxu1 %v19107_v36  ;;  %v10893_v23 = vadd.f32 %v10892_v53, %v10880_v32  ;;  %v10920_v36 = vpop.f32.mrf.mxu2 }
 0x8c3   : > { %v10907_v33 = vpop.f32.mrf.mxu1 }
 0x8c4   : > { %11654 = vmatpush.bf16.msra.mxu2 %v19115_v60  ;;  %11629 = vmatpush.bf16.msra.mxu0 %v19098_v24  ;;  %v10906_v27 = vadd.f32 %v10905_v59, %v10893_v23  ;;  %v10933_v60 = vpop.f32.mrf.mxu3  ;;  %v19137_v24 = vld [vmem:[#allocation13 + $0x140] sm:$0xff] }
 0x8c6   : > { %11667 = vmatpush.bf16.msra.mxu3 %v19123_v10  ;;  %11642 = vmatpush.bf16.msra.mxu1 %v19106_v37  ;;  %v11095_v10 = vmax.f32 %v21164_v8, 0.0  ;;  %v19145_v37 = vld [vmem:[#allocation13 + $0x180] sm:$0xff]  ;;  %v11097_v62 = vmax.f32 %v10906_v27, 0.0 }
 0x8c8   : > { %11655 = vmatpush.bf16.msra.mxu2 %v19114_v41  ;;  %11630 = vmatpush.bf16.msra.mxu0 %v19097_v40  ;;  %v11096_v41 = vmax.f32 %v21188_v58, 0.0  ;;  %v11105_v17 = vpack.c.bf16 %v11097_v62, %v11097_v62  ;;  %v10944_v40 = vpop.f32.mrf.mxu0 }
 0x8c9   : > { %v10945_v44 = vadd.f32 %v10944_v40, %v10932_v12 }
 0x8ca   : > { %11668 = vmatpush.bf16.msra.mxu3 %v19122_v11  ;;  %11643 = vmatpush.bf16.msra.mxu1 %v19105_v45  ;;  %v11103_v11 = vpack.c.bf16 %v11095_v10, %v11095_v10  ;;  %v11104_v38 = vpack.c.bf16 %v11096_v41, %v11096_v41 }
 0x8cb   : > { %11631 = vmatmul.bf16.vlgmr.msra.gmra.mxu0 %v11099_v3  ;;  %v10957_v45 = vpop.f32.mrf.mxu1 }
 0x8cc   : > { %11656 = vmatpush.bf16.msra.mxu2 %v19113_v42  ;;  %11675 = vmatpush.bf16.msrb.mxu0 %v19136_v20  ;;  %v10970_v42 = vpop.f32.mrf.mxu2  ;;  %v10983_v8 = vpop.f32.mrf.mxu3  ;;  %v19158_v20 = vld [vmem:[#allocation13 + $0x1e8] sm:$0xff]  ;;  %v10958_v1 = vadd.f32 %v10957_v45, %v10945_v44 }
 0x8cd   : > { %11644 = vmatmul.bf16.vlgmr.msra.gmra.mxu1 %v11100_v47  ;;  %v19155_v47 = vld [vmem:[#allocation13 + $0x1d0] sm:$0xff] }
 0x8ce   : > { %11669 = vmatpush.bf16.msra.mxu3 %v19121_v22  ;;  %11688 = vmatpush.bf16.msrb.mxu1 %v19144_v26  ;;  %v19159_v22 = vld [vmem:[#allocation13 + $0x1f0] sm:$0xff]  ;;  %v19156_v26 = vld [vmem:[#allocation13 + $0x1d8] sm:$0xff] }
 0x8cf   : > { %11657 = vmatmul.bf16.vlgmr.msra.gmra.mxu2 %v11101_v57 }
 0x8d0   : > { %11701 = vmatpush.bf16.msrb.mxu2 %v19152_v48  ;;  %11676 = vmatpush.bf16.msrb.mxu0 %v19135_v52  ;;  %v10946_v16 = vpop.f32.mrf.mxu0  ;;  %v19154_v52 = vld [vmem:[#allocation13 + $0x1c8] sm:$0xff] }
 0x8d1   : > { %11670 = vmatmul.bf16.vlgmr.msra.gmra.mxu3 %v11102_v49 }
 0x8d2   : > { %11689 = vmatpush.bf16.msrb.mxu1 %v19143_v50  ;;  %11714 = vmatpush.bf16.msrb.mxu3 %v19160_v35 }
 0x8d3   : > { %v10959_v43 = vpop.f32.mrf.mxu1 }
 0x8d4   : > { %11702 = vmatpush.bf16.msrb.mxu2 %v19151_v39  ;;  %11677 = vmatpush.bf16.msrb.mxu0 %v19134_v54  ;;  %v10972_v58 = vpop.f32.mrf.mxu2  ;;  %v10985_v4 = vpop.f32.mrf.mxu3  ;;  %v19153_v54 = vld [vmem:[#allocation13 + $0x1c0] sm:$0xff] }
 0x8d5   : > { %v19162_v4 = vld [vmem:[#allocation16 + $0x8] sm:$0xff] }
 0x8d6   : > { %11690 = vmatpush.bf16.msrb.mxu1 %v19142_v5  ;;  %11715 = vmatpush.bf16.msrb.mxu3 %v19159_v22  ;;  %v10971_v5 = vadd.f32 %v10970_v42, %v10958_v1 }
 0x8d8   : > { %11703 = vmatpush.bf16.msrb.mxu2 %v19150_v55  ;;  %11678 = vmatpush.bf16.msrb.mxu0 %v19133_v51  ;;  %v10984_v53 = vadd.f32 %v10983_v8, %v10971_v5  ;;  %v19163_v8 = vld [vmem:[#allocation16 + $0x10] sm:$0xff] }
 0x8da   : > { %11691 = vmatpush.bf16.msrb.mxu1 %v19141_v31  ;;  %11716 = vmatpush.bf16.msrb.mxu3 %v19158_v20 }
 0x8dc   : > { %11704 = vmatpush.bf16.msrb.mxu2 %v19149_v63  ;;  %11679 = vmatpush.bf16.msrb.mxu0 %v19132_v2 }
 0x8de   : > { %11692 = vmatpush.bf16.msrb.mxu1 %v19140_v6  ;;  %11717 = vmatpush.bf16.msrb.mxu3 %v19157_v46  ;;  %v19161_v46 = vld [vmem:[#allocation16] sm:$0xff] }
 0x8e0   : > { %11705 = vmatpush.bf16.msrb.mxu2 %v19148_v18  ;;  %11680 = vmatpush.bf16.msrb.mxu0 %v19131_v61 }
 0x8e2   : > { %11693 = vmatpush.bf16.msrb.mxu1 %v19139_v34  ;;  %11718 = vmatpush.bf16.msrb.mxu3 %v19156_v26  ;;  %v11811_v26 = vld [vmem:[%s21301_s25] sm:$0xff] }
 0x8e4   : > { %11706 = vmatpush.bf16.msrb.mxu2 %v19147_v25  ;;  %11681 = vmatpush.bf16.msrb.mxu0 %v19130_v15  ;;  %v19329_v25 = vld [vmem:[#allocation15] ss:$0 sm:$0xff] }
 0x8e6   : > { %11694 = vmatpush.bf16.msrb.mxu1 %v19138_v29  ;;  %11719 = vmatpush.bf16.msrb.mxu3 %v19155_v47 }
 0x8e8   : > { %11707 = vmatpush.bf16.msrb.mxu2 %v19146_v21  ;;  %11682 = vmatpush.bf16.msrb.mxu0 %v19129_v28  ;;  %v10996_v48 = vpop.f32.mrf.mxu0 }
 0x8e9   : > { %v10997_v51 = vadd.f32 %v10996_v48, %v10984_v53  ;;  %v19759_v48 = vmov 0  }
 0x8ea   : > { %11695 = vmatpush.bf16.msrb.mxu1 %v19137_v24  ;;  %v11009_v3 = vpop.f32.mrf.mxu1  ;;  %11720 = vmatpush.bf16.msrb.mxu3 %v19154_v52  ;;  %v19168_v24 = vld [vmem:[#allocation16 + $0x38] sm:$0xff] }
 0x8eb   : > { %11683 = vmatmul.bf16.vlgmr.msrb.gmra.mxu0 %v11103_v11  ;;  %v11010_v59 = vadd.f32 %v11009_v3, %v10997_v51  ;;  %v19166_v11 = vld [vmem:[#allocation16 + $0x28] sm:$0xff]  ;;  %19328 = vset.pattern.permute.xlu0 %v19759_v48 }
 0x8ec   : > { %11708 = vmatpush.bf16.msrb.mxu2 %v19145_v37  ;;  %11797 = vmatpush.bf16.msra.mxu0 %v19168_v24  ;;  %v19167_v37 = vld [vmem:[#allocation16 + $0x30] sm:$0xff] }
 0x8ed   : > { %11696 = vmatmul.bf16.vlgmr.msrb.gmra.mxu1 %v11104_v38  ;;  %v19165_v38 = vld [vmem:[#allocation16 + $0x20] sm:$0xff]  ;;  %11817 = vperm.xlu0 %19328, %v11811_v26  }
 0x8ee   : > { %11721 = vmatpush.bf16.msrb.mxu3 %v19153_v54 }
 0x8ef   : > { %11709 = vmatmul.bf16.vlgmr.msrb.gmra.mxu2 %v11105_v17  ;;  %v19164_v17 = vld [vmem:[#allocation16 + $0x18] sm:$0xff] }
 0x8f0   : > { %v10998_v50 = vpop.f32.mrf.mxu0  ;;  %11798 = vmatpush.bf16.msra.mxu0 %v19167_v37 }
 0x8f1   : > { %v19330_v50 = vld [vmem:[#allocation18] ss:$0 sm:$0xff] }
 0x8f2   : > { %v11022_v57 = vpop.f32.mrf.mxu2  ;;  %v11011_v39 = vpop.f32.mrf.mxu1 }
 0x8f3   : > { %v11023_v31 = vadd.f32 %v11022_v57, %v11010_v59 }
 0x8f4   : > { %v11035_v49 = vpop.f32.mrf.mxu3  ;;  %11799 = vmatpush.bf16.msra.mxu0 %v19166_v11 }
 0x8f5   : > { %v11036_v63 = vadd.f32 %v11035_v49, %v11023_v31  ;;  %v11812_v49 = vlaneseq  ;;  %v19332_v31 = vld [vmem:[#allocation3] ss:$0 sm:$0xff] }
 0x8f7   : > { %v11813_v39 = vand.u32 127, %v11812_v49 }
 0x8f8   : > { %11800 = vmatpush.bf16.msra.mxu0 %v19165_v38 }
 0x8f9   : > { %vm11814_vm0 = vcmp.eq.s32.totalorder %v11813_v39, 20 }
 0x8fa   : > { %v11024_v55 = vpop.f32.mrf.mxu2 }
 0x8fb   : > { %v19331_v55 = vld [vmem:[#allocation19] ss:$0 sm:$0xff] }
 0x8fc   : > { %v11037_v56 = vpop.f32.mrf.mxu3  ;;  %11801 = vmatpush.bf16.msra.mxu0 %v19164_v17 }
 0x900   : > { %11802 = vmatpush.bf16.msra.mxu0 %v19163_v8 }
 0x904   : > { %11803 = vmatpush.bf16.msra.mxu0 %v19162_v4 }
 0x908   : > { %11804 = vmatpush.bf16.msra.mxu0 %v19161_v46 }
 0x928   : > { %v11048_v0 = vpop.f32.mrf.mxu0 }
 0x929   : > { %v11049_v13 = vadd.f32 %v11048_v0, %v11036_v63 }
 0x92a   : > { %v11061_v9 = vpop.f32.mrf.mxu1 }
 0x92b   : > { %v11062_v2 = vadd.f32 %v11061_v9, %v11049_v13 }
 0x930   : > { %v11050_v14 = vpop.f32.mrf.mxu0 }
 0x932   : > { %v11074_v6 = vpop.f32.mrf.mxu2  ;;  %v11063_v30 = vpop.f32.mrf.mxu1 }
 0x933   : > { %v11075_v18 = vadd.f32 %v11074_v6, %v11062_v2 }
 0x934   : > { %v11087_v7 = vpop.f32.mrf.mxu3 }
 0x935   : > { %v11088_v19 = vadd.f32 %v11087_v7, %v11075_v18 }
 0x937   : > { %v11098_v32 = vmax.f32 %v11088_v19, 0.0 }
 0x939   : > { %v11106_v61 = vpack.c.bf16 %v11098_v32, %v11098_v32 }
 0x93a   : > { %v11076_v33 = vpop.f32.mrf.mxu2 }
 0x93b   : > { %11722 = vmatmul.bf16.vlgmr.msrb.gmra.mxu3 %v11106_v61 }
 0x93c   : > { %v11089_v34 = vpop.f32.mrf.mxu3 }
 0x948   : > { %v11632_v12 = vpop.f32.mrf.mxu0 }
 0x949   : > { %v11633_v15 = vadd.f32 %v19329_v25, %v11632_v12 }
 0x94a   : > { %v11645_v23 = vpop.f32.mrf.mxu1 }
 0x94b   : > { %v11646_v29 = vadd.f32 %v11645_v23, %v11633_v15 }
 0x950   : > { %v11634_v60 = vpop.f32.mrf.mxu0 }
 0x952   : > { %v11658_v21 = vpop.f32.mrf.mxu2  ;;  %v11647_v28 = vpop.f32.mrf.mxu1 }
 0x953   : > { %v11659_v36 = vadd.f32 %v11658_v21, %v11646_v29 }
 0x954   : > { %v11671_v27 = vpop.f32.mrf.mxu3 }
 0x955   : > { %v11672_v10 = vadd.f32 %v11671_v27, %v11659_v36 }
 0x95a   : > { %v11660_v41 = vpop.f32.mrf.mxu2 }
 0x95c   : > { %v11673_v62 = vpop.f32.mrf.mxu3 }
 0x95f   : > { %v11818_v5 = vpop.permute.xlu0 %11817 }
 0x968   : > { %v11684_v40 = vpop.f32.mrf.mxu0 }
 0x969   : > { %v11685_v45 = vadd.f32 %v11684_v40, %v11672_v10 }
 0x96a   : > { %v11697_v42 = vpop.f32.mrf.mxu1 }
 0x96b   : > { %v11698_v35 = vadd.f32 %v11697_v42, %v11685_v45 }
 0x970   : > { %v11686_v22 = vpop.f32.mrf.mxu0 }
 0x972   : > { %v11710_v16 = vpop.f32.mrf.mxu2  ;;  %v11699_v58 = vpop.f32.mrf.mxu1 }
 0x973   : > { %v11711_v43 = vadd.f32 %v11710_v16, %v11698_v35 }
 0x97a   : > { %v11712_v20 = vpop.f32.mrf.mxu2 }
 0x9be   : > { %v11723_v3 = vpop.f32.mrf.mxu3 }
 0x9bf   : > { %v11724_v47 = vadd.f32 %v11723_v3, %v11711_v43 }
 0x9c1   : > { %v11727_v44 = vmax.f32 %v11724_v47, 0.0 }
 0x9c3   : > { %v11728_v52 = vpack.c.bf16 %v11727_v44, %v11727_v44 }
 0x9c5   : > { %11805 = vmatmul.bf16.vlgmr.msra.gmra.mxu0 %v11728_v52 }
 0x9c6   : > { %v11725_v57 = vpop.f32.mrf.mxu3 }
 0xa42   : > { %v11806_v1 = vpop.f32.mrf.mxu0 }
 0xa43   : > { %v11807_v54 = vadd.f32 %v19330_v50, %v11806_v1 }
 0xa45   : > { %v11810_v56 = vmax.f32 %v11807_v54, 0.0 }
 0xa47   : > { %v11820_v53 = vsel %vm11814_vm0, %v11818_v5, %v11810_v56 }
 0xa48   : > { %11821 = vst [vmem:[#allocation21] sm:$0xff] %v11820_v53  ;;  %v11826_v51 = vmul.f32 %v19331_v55, %v11820_v53 }
 0xa4a   : > { %v11808_v59 = vpop.f32.mrf.mxu0  ;;  %11827 = vadd.xlane.f32.xlu0 %v11826_v51 }
 0xabd   : > { %v11828_v63 = vpop.xlane.xlu0 %11827 }
 0xabe   : > { %v11833_v0 = vadd.f32 %v19332_v31, %v11828_v63 }
 0xac0   : > { %11835 = vst.msk [vmem:[%s21302_s26] sm:$0xff] %vm11834_vm1, %v11833_v0 }
 0xac1 PF: > { %p19261_p3 = scmp.eq.s32.totalorder %s19865_s15, 4  ;;  %s21303_s18 = sld [smem:[#allocation38_spill]] }
 0xac2   : > { %s19760_s23 = smov [#allocation21]  }
 0xac3   : > { %s11851_s6 = sshll.u32 %s19760_s23, 4  ;;  %s11852_s6 = int_to_ptr.vmem [resolvable:$true] %s11851_s6 }
 0xac7   : > { %s11853_s21 = sshll.u32 %s21303_s18, 4  ;;  %s11854_s21 = int_to_ptr.hbm [resolvable:$true] %s11853_s21 }
 0xac8   : > { %19209 = dma.vmem_to_hbm [thread:$0]  (%p19261_p3), %s11852_s6, 128, %s11854_s21, [#allocation6]  }
 0xac9   : > { %19717 = dma.done.wait (%p19261_p3), [#allocation6], 128  }
 0xaca   : > { %19719 = vsyncadd (%p19261_p3), [#allocation6], 4294967168 }
 0xacb PF: > { %s37_s11 = sadd.s32 1, %s19742_s11   ;;  %s21304_s27 = smov %s19726_s28 }
 0xacc   : > { %p34_p4 = scmp.ge.s32.totalorder %s37_s11, 7   ;;  %s21305_s28 = smov %s19730_s29 }
 0xacd   : > { %s21306_s29 = smov %s19946_s24  ;;  %s21307_s30 = smov %s19738_s14 }
 0xace   : > { %s21308_s14 = smov %s21310_s1  ;;  %36 = sbr.rel (!%p34_p4) target bundleno = 21 (0x15), region = 174 }
 0xad3   :  { %11874 = vsyncpa [#allocation5], 1 }
 0xad4   :  { %11876 = vsyncpa [#allocation5 + $0x1], 1 }
 0xad5   :  { %11877 = vsyncpa [#allocation8], 1 }
 0xad6   :  { %11879 = vsyncpa [#allocation8 + $0x1], 1 }
 0xad7   :  { %11880 = vsyncpa [#allocation11], 1 }
 0xad8   :  { %11881 = vsyncpa [#allocation14], 1 }
 0xad9   :  { %11882 = vsyncpa [#allocation17], 1 }
 0xada   :  { %11883 = vsyncpa [#allocation20], 1 }
 0xadb   :  { %11884 = vsyncpa [#allocation6], 1 }
 0xadc   :  { %11886 = vsyncpa [#allocation6 + $0x1], 1 }

</bundles_post_ra>
